<compile_context>
chip_gen: v6e
topology: v6e:2x2x1
jax: 0.10.0
libtpu: 0.0.40
codegen_flags: <defaults>
</compile_context>

<pallas_src>
import functools

import jax
import jax.numpy as jnp
from jax.experimental import pallas as pl
from jax.experimental.pallas import tpu as pltpu

LANE = 128
SUBLANE = 8
# Budgeted against v7x: 64 MiB physical / 32 MiB default scoped VMEM.
_VMEM_LIMIT = 32 * 1024 * 1024


def _round_up(x, m):
    return (x + m - 1) // m * m


# ---------------------------------------------------------------------------
# Fused Conv2d(valid, stride 1) + bias + ReLU + MaxPool2d(2,2) kernel
# ---------------------------------------------------------------------------
def _conv_relu_pool_kernel(cols_ref, w_ref, b_ref, o_ref):
    # cols_ref: (4, tile_m, Kp) -- the 4 pooling quadrants stacked along M.
    q, tm, kp = cols_ref.shape
    y = jnp.dot(cols_ref[...].reshape(q * tm, kp), w_ref[...],
                preferred_element_type=jnp.float32)          # one MXU matmul
    # 4-way max over sublane-aligned row blocks == 2x2 max-pool of the conv.
    m = jnp.maximum(jnp.maximum(y[0 * tm:1 * tm], y[1 * tm:2 * tm]),
                    jnp.maximum(y[2 * tm:3 * tm], y[3 * tm:4 * tm]))
    # max(relu(x_i + b)) == relu(max(x_i) + b): add bias / ReLU once.
    o_ref[...] = jnp.maximum(m + b_ref[...], 0.0).astype(o_ref.dtype)


def conv_relu_pool(x, w2d, b2d, *, kh, kw, cout):
    """x: (N,H,W,Cin) NHWC.  w2d: (Kp,128) pre-padded (ki,kj,ci)-major.  b2d: (1,128)."""
    N, H, W, cin = x.shape
    Ho, Wo = H - kh + 1, W - kw + 1
    H2, W2 = Ho // 2, Wo // 2                    # floor, matching PyTorch MaxPool2d
    K = kh * kw * cin
    Kp, Cp = w2d.shape
    M = N * H2 * W2
    tile_m = _round_up((M + 1) // 2, SUBLANE)    # 2-way parallel grid (v7x: 2 TCs)
    Mp = 2 * tile_m

    # im2col patches once per stage, (ki,kj,cin)-major to match w_hwio.reshape(K,cout).
    patches = jnp.concatenate(
        [x[:, ki:ki + Ho, kj:kj + Wo, :] for ki in range(kh) for kj in range(kw)],
        axis=-1)                                                 # (N, Ho, Wo, K)
    # 4 pooling quadrants as strided views of the single patches array.
    quads = jnp.stack(
        [patches[:, di::2, dj::2, :][:, :H2, :W2, :]
         for di in range(2) for dj in range(2)], axis=0)         # (4, N, H2, W2, K)
    cols = jnp.pad(quads.reshape(4, M, K), ((0, 0), (0, Mp - M), (0, Kp - K)))

    out = pl.pallas_call(
        _conv_relu_pool_kernel,
        out_shape=jax.ShapeDtypeStruct((Mp, Cp), jnp.float32),
        grid=(2,),
        in_specs=[
            pl.BlockSpec((4, tile_m, Kp), lambda i: (0, i, 0)),
            pl.BlockSpec((Kp, Cp), lambda i: (0, 0)),
            pl.BlockSpec((1, Cp), lambda i: (0, 0)),
        ],
        out_specs=pl.BlockSpec((tile_m, Cp), lambda i: (i, 0)),
        compiler_params=pltpu.CompilerParams(
            dimension_semantics=("parallel",),
            vmem_limit_bytes=_VMEM_LIMIT),
    )(cols, w2d, b2d)
    return out[:M, :cout].reshape(N, H2, W2, cout)


# ---------------------------------------------------------------------------
# Fused head kernel: (folded fc1@fc2) -> LSTM recurrence -> final Linear
# ---------------------------------------------------------------------------
def _sigmoid(x):
    # EUP-approx reciprocal rides the otherwise-idle EUP slot on the serial path.
    return pl.reciprocal(1.0 + jnp.exp(-x), approx=True)


def _head_kernel(x_ref, w12_ref, b12_ref, wih_ref, whh_ref, bl_ref,
                 h0_ref, c0_ref, wlin_ref, blin_ref,
                 cout_ref, rout_ref, hlin_ref, cn_ref, *, hp, seq_len):
    # fc1 -> fc2 (pre-folded weight), produces c_out for both output and LSTM input.
    c_out = (jnp.dot(x_ref[...], w12_ref[...], preferred_element_type=jnp.float32)
             + b12_ref[...])                                       # (Mp, 512)
    cout_ref[...] = c_out
    # Hoisted LSTM input projection: one matmul for all time steps.
    gates_x = (jnp.dot(c_out, wih_ref[...], preferred_element_type=jnp.float32)
               + bl_ref[...])                                      # (Mp, 4*hp)
    rout_ref[...] = jnp.zeros_like(rout_ref)
    h = h0_ref[...]                                                # (1, hp)
    c = c0_ref[...]
    # seq_len is static & small -> fully unrolled recurrence.
    for t in range(seq_len):
        gates = gates_x[t:t + 1, :] + jnp.dot(
            h, whh_ref[...], preferred_element_type=jnp.float32)   # (1, 4*hp)
        i_g = _sigmoid(gates[:, 0 * hp:1 * hp])   # gate slices at 128-lane bounds
        f_g = _sigmoid(gates[:, 1 * hp:2 * hp])
        g_g = jnp.tanh(gates[:, 2 * hp:3 * hp])
        o_g = _sigmoid(gates[:, 3 * hp:4 * hp])
        c = f_g * c + i_g * g_g
        h = o_g * jnp.tanh(c)
        rout_ref[t:t + 1, :] = h
    cn_ref[...] = c
    # Final Linear(64 -> 11) folded into the same kernel (zero-cost epilogue).
    hlin_ref[...] = (jnp.dot(h, wlin_ref[...], preferred_element_type=jnp.float32)
                     + blin_ref[...])


def head_forward(flat, p, h0, c0, *, hidden=64, hp=128, fc_out=500):
    T, _ = flat.shape                         # seq_len = number of images
    Mp = _round_up(max(T, SUBLANE), SUBLANE)
    x = jnp.pad(flat, ((0, Mp - T), (0, 0)))
    h0p = jnp.pad(h0, ((0, 0), (0, hp - hidden)))
    c0p = jnp.pad(c0, ((0, 0), (0, hp - hidden)))
    nfc = p["fc12_w"].shape[1]                # 512 (500 padded to lane multiple)
    vmem = pl.BlockSpec(memory_space=pltpu.MemorySpace.VMEM)
    cout_p, rout_p, hlin_p, cn_p = pl.pallas_call(
        functools.partial(_head_kernel, hp=hp, seq_len=T),
        out_shape=(
            jax.ShapeDtypeStruct((Mp, nfc), jnp.float32),   # c_out
            jax.ShapeDtypeStruct((Mp, hp), jnp.float32),    # r_out
            jax.ShapeDtypeStruct((1, LANE), jnp.float32),   # linear(h_n)
            jax.ShapeDtypeStruct((1, hp), jnp.float32),     # c_n
        ),
        in_specs=[vmem] * 10,
        out_specs=(vmem, vmem, vmem, vmem),
        compiler_params=pltpu.CompilerParams(vmem_limit_bytes=_VMEM_LIMIT),
    )(x, p["fc12_w"], p["fc12_b"], p["lstm_wih"], p["lstm_whh"], p["lstm_b"],
      h0p, c0p, p["lin_w"], p["lin_b"])
    return (cout_p[:T, :fc_out], rout_p[:T, :hidden],
            hlin_p[:1, :11], cn_p[:1, :hidden])


# ---------------------------------------------------------------------------
# Parameter init (weights pre-padded / pre-folded into kernel-ready layouts)
# ---------------------------------------------------------------------------
def init_params(key):
    ks = jax.random.split(key, 16)

    def u(k, shape, fan_in):
        bound = 1.0 / jnp.sqrt(jnp.float32(fan_in))
        return jax.random.uniform(k, shape, jnp.float32, -bound, bound)

    H, HP = 64, 128          # LSTM hidden, padded hidden (per gate)
    NFC = 512                # fc output 500 padded to lane multiple

    def conv_pack(wk, bk, kh, kw, cin, cout):
        K = kh * kw * cin
        Kp = _round_up(K, LANE)       # pad contraction dim to 128 (unmasked MXU feed)
        w = u(wk, (kh, kw, cin, cout), K)     # HWIO
        b = u(bk, (cout,), K)
        w2d = jnp.pad(w.reshape(K, cout), ((0, Kp - K), (0, LANE - cout)))
        b2d = jnp.pad(b, (0, LANE - cout)).reshape(1, LANE)
        return w2d, b2d

    c1w, c1b = conv_pack(ks[0], ks[1], 5, 5, 1, 20)
    c2w, c2b = conv_pack(ks[2], ks[3], 5, 5, 20, 50)
    c3w, c3b = conv_pack(ks[4], ks[5], 2, 2, 50, 50)

    # fc1 / fc2, then algebraic fold (legal: no nonlinearity between fc1 and fc2,
    # dropout is before fc1 and is eval-mode identity here).
    fc1_w = u(ks[6], (1200, 1000), 1200)
    fc1_b = u(ks[7], (1000,), 1200)
    fc2_w = u(ks[8], (1000, 500), 1000)
    fc2_b = u(ks[9], (500,), 1000)
    fc12_w = jnp.pad(fc1_w @ fc2_w, ((0, 0), (0, NFC - 500)))          # (1200, 512)
    fc12_b = jnp.pad(fc1_b @ fc2_w + fc2_b, (0, NFC - 500)).reshape(1, NFC)

    # LSTM weights (stored transposed vs PyTorch), each gate padded to its own
    # 128-lane block; extra rows/cols are zero so padded lanes stay exactly zero.
    w_ih = u(ks[10], (500, 4 * H), H)
    w_hh = u(ks[11], (H, 4 * H), H)
    b_lstm = u(ks[12], (4 * H,), H) + u(ks[13], (4 * H,), H)   # b_ih + b_hh

    def pad_gate_cols(a):
        return jnp.concatenate(
            [jnp.pad(a[:, g * H:(g + 1) * H], ((0, 0), (0, HP - H)))
             for g in range(4)], axis=1)

    w_ih_p = jnp.pad(pad_gate_cols(w_ih), ((0, NFC - 500), (0, 0)))    # (512, 512)
    w_hh_p = jnp.pad(pad_gate_cols(w_hh), ((0, HP - H), (0, 0)))       # (128, 512)
    b_p = pad_gate_cols(b_lstm.reshape(1, 4 * H))                      # (1, 512)

    lin_w = jnp.pad(u(ks[14], (H, 11), H), ((0, HP - H), (0, LANE - 11)))   # (128,128)
    lin_b = jnp.pad(u(ks[15], (11,), H), (0, LANE - 11)).reshape(1, LANE)

    return {
        "conv1_w2d": c1w, "conv1_b2d": c1b,
        "conv2_w2d": c2w, "conv2_b2d": c2b,
        "conv3_w2d": c3w, "conv3_b2d": c3b,
        "fc12_w": fc12_w, "fc12_b": fc12_b,
        "lstm_wih": w_ih_p, "lstm_whh": w_hh_p, "lstm_b": b_p,
        "lin_w": lin_w, "lin_b": lin_b,
    }


# ---------------------------------------------------------------------------
# Model wiring
# ---------------------------------------------------------------------------
def cnn_lstm_forward(p, x_nchw, h0, c0):
    x = jnp.transpose(x_nchw, (0, 2, 3, 1))                   # NCHW -> NHWC
    out = conv_relu_pool(x, p["conv1_w2d"], p["conv1_b2d"], kh=5, kw=5, cout=20)
    out = conv_relu_pool(out, p["conv2_w2d"], p["conv2_b2d"], kh=5, kw=5, cout=50)
    out = conv_relu_pool(out, p["conv3_w2d"], p["conv3_b2d"], kh=2, kw=2, cout=50)
    N = out.shape[0]
    flat = out.reshape(N, -1)   # (N, 1200); NHWC flatten order (weights are ours)
    # TODO(synk): Dropout(0.5) is applied as identity (eval-mode semantics); the
    # training-mode random mask of the PyTorch reference is not reproduced.
    # torch.unsqueeze(c_out, 1) + batch_first=False  =>  seq_len = N, batch = 1
    c_out, r_out, h_lin, c_n = head_forward(flat, p, h0, c0, hidden=64, hp=128)
    # Match PyTorch output shapes exactly: (r_out, h, c, c_out)
    return (r_out.reshape(N, 1, 64),       # r_out : (N, 1, 64)
            h_lin.reshape(1, 1, 11),       # h     : (1, 1, 11)
            c_n.reshape(1, 1, 64),         # c     : (1, 1, 64)
            c_out.reshape(N, 1, 500))      # c_out : (N, 1, 500)


if __name__ == "__main__":
    key = jax.random.PRNGKey(0)
    kp, kx, kh, kc = jax.random.split(key, 4)
    params = init_params(kp)
    x = jax.random.normal(kx, (2, 1, 64, 48), jnp.float32)  # NCHW, spatial fixed by fc1
    # The PyTorch forward draws fresh randn h0/c0; here drawn deterministically.
    h0 = jax.random.normal(kh, (1, 64), jnp.float32)
    c0 = jax.random.normal(kc, (1, 64), jnp.float32)

    fwd = jax.jit(cnn_lstm_forward)
    r_out, h, c, c_out = fwd(params, x, h0, c0)
    jax.block_until_ready((r_out, h, c, c_out))

    assert r_out.shape == (2, 1, 64) and r_out.dtype == jnp.float32
    assert h.shape == (1, 1, 11) and h.dtype == jnp.float32
    assert c.shape == (1, 1, 64) and c.dtype == jnp.float32
    assert c_out.shape == (2, 1, 500) and c_out.dtype == jnp.float32
    print("KERNEL_OK")
</pallas_src>

<mosaic_0001>
module attributes {stable_mosaic.version = 11 : i64} {
  func.func @_conv_relu_pool_kernel(%arg0: i32, %arg1: memref<4x664x128xf32, #tpu.memory_space<vmem>>, %arg2: memref<128x128xf32, #tpu.memory_space<vmem>>, %arg3: memref<1x128xf32, #tpu.memory_space<vmem>>, %arg4: memref<664x128xf32, #tpu.memory_space<vmem>>) attributes {dimension_semantics = [#tpu.dimension_semantics<parallel>], iteration_bounds = array<i64: 2>, scalar_prefetch = 0 : i64, scratch_operands = 0 : i64, tpu.core_type = #tpu.core_type<tc>, window_params = [{transform_indices = @transform_0, window_bounds = array<i64: 4, 664, 128>}, {pipeline_mode = #tpu.pipeline_mode<synchronous>, transform_indices = @transform_1, window_bounds = array<i64: 128, 128>}, {pipeline_mode = #tpu.pipeline_mode<synchronous>, transform_indices = @transform_2, window_bounds = array<i64: 1, 128>}, {transform_indices = @transform_3, window_bounds = array<i64: 664, 128>}]} {
    %c0 = arith.constant 0 : index
    %c0_0 = arith.constant 0 : index
    %c0_1 = arith.constant 0 : index
    %0 = vector.load %arg1[%c0, %c0_0, %c0_1] : memref<4x664x128xf32, #tpu.memory_space<vmem>>, vector<4x664x128xf32>
    %1 = vector.shape_cast %0 : vector<4x664x128xf32> to vector<2656x128xf32>
    %c0_2 = arith.constant 0 : index
    %c0_3 = arith.constant 0 : index
    %2 = vector.load %arg2[%c0_2, %c0_3] : memref<128x128xf32, #tpu.memory_space<vmem>>, vector<128x128xf32>
    %cst = arith.constant dense<0.000000e+00> : vector<2656x128xf32>
    %3 = tpu.matmul %1, %2, %cst {dimension_numbers = #tpu.dot_dimension_numbers<[1], [0], [0], [1], [0, 0, 1, 1], [], []>} : vector<2656x128xf32>, vector<128x128xf32>, vector<2656x128xf32> -> vector<2656x128xf32>
    %4 = vector.extract_strided_slice %3 {offsets = [0, 0], sizes = [664, 128], strides = [1, 1]} : vector<2656x128xf32> to vector<664x128xf32>
    %5 = vector.extract_strided_slice %3 {offsets = [664, 0], sizes = [664, 128], strides = [1, 1]} : vector<2656x128xf32> to vector<664x128xf32>
    %6 = arith.maximumf %4, %5 : vector<664x128xf32>
    %7 = vector.extract_strided_slice %3 {offsets = [1328, 0], sizes = [664, 128], strides = [1, 1]} : vector<2656x128xf32> to vector<664x128xf32>
    %8 = vector.extract_strided_slice %3 {offsets = [1992, 0], sizes = [664, 128], strides = [1, 1]} : vector<2656x128xf32> to vector<664x128xf32>
    %9 = arith.maximumf %7, %8 : vector<664x128xf32>
    %10 = arith.maximumf %6, %9 : vector<664x128xf32>
    %c0_4 = arith.constant 0 : index
    %c0_5 = arith.constant 0 : index
    %11 = vector.load %arg3[%c0_4, %c0_5] : memref<1x128xf32, #tpu.memory_space<vmem>>, vector<1x128xf32>
    %12 = vector.broadcast %11 : vector<1x128xf32> to vector<664x128xf32>
    %13 = arith.addf %10, %12 : vector<664x128xf32>
    %cst_6 = arith.constant 0.000000e+00 : f32
    %14 = vector.broadcast %cst_6 : f32 to vector<664x128xf32>
    %15 = arith.maximumf %13, %14 : vector<664x128xf32>
    %c0_7 = arith.constant 0 : index
    %c0_8 = arith.constant 0 : index
    %16 = vector.load %arg4[%c0_7, %c0_8] : memref<664x128xf32, #tpu.memory_space<vmem>>, vector<664x128xf32>
    tpu.vector_store %arg4[%c0_7, %c0_8], %15 {strides = array<i32>} : memref<664x128xf32, #tpu.memory_space<vmem>>, vector<664x128xf32>,
    return
  }
  func.func @transform_0(%arg0: i32) -> (i32, i32, i32) {
    %c0_i32 = arith.constant 0 : i32
    %c0_i32_0 = arith.constant 0 : i32
    %c0_i32_1 = arith.constant 0 : i32
    return %c0_i32, %arg0, %c0_i32_0 : i32, i32, i32
  }
  func.func @transform_1(%arg0: i32) -> (i32, i32) {
    %c0_i32 = arith.constant 0 : i32
    %c0_i32_0 = arith.constant 0 : i32
    %c0_i32_1 = arith.constant 0 : i32
    return %c0_i32, %c0_i32_0 : i32, i32
  }
  func.func @transform_2(%arg0: i32) -> (i32, i32) {
    %c0_i32 = arith.constant 0 : i32
    %c0_i32_0 = arith.constant 0 : i32
    %c0_i32_1 = arith.constant 0 : i32
    return %c0_i32, %c0_i32_0 : i32, i32
  }
  func.func @transform_3(%arg0: i32) -> (i32, i32) {
    %c0_i32 = arith.constant 0 : i32
    %c0_i32_0 = arith.constant 0 : i32
    return %arg0, %c0_i32 : i32, i32
  }
}

module attributes {stable_mosaic.version = 11 : i64} {
  func.func @_conv_relu_pool_kernel(%arg0: i32, %arg1: memref<4x120x512xf32, #tpu.memory_space<vmem>>, %arg2: memref<512x128xf32, #tpu.memory_space<vmem>>, %arg3: memref<1x128xf32, #tpu.memory_space<vmem>>, %arg4: memref<120x128xf32, #tpu.memory_space<vmem>>) attributes {dimension_semantics = [#tpu.dimension_semantics<parallel>], iteration_bounds = array<i64: 2>, scalar_prefetch = 0 : i64, scratch_operands = 0 : i64, tpu.core_type = #tpu.core_type<tc>, window_params = [{transform_indices = @transform_0, window_bounds = array<i64: 4, 120, 512>}, {pipeline_mode = #tpu.pipeline_mode<synchronous>, transform_indices = @transform_1, window_bounds = array<i64: 512, 128>}, {pipeline_mode = #tpu.pipeline_mode<synchronous>, transform_indices = @transform_2, window_bounds = array<i64: 1, 128>}, {transform_indices = @transform_3, window_bounds = array<i64: 120, 128>}]} {
    %c0 = arith.constant 0 : index
    %c0_0 = arith.constant 0 : index
    %c0_1 = arith.constant 0 : index
    %0 = vector.load %arg1[%c0, %c0_0, %c0_1] : memref<4x120x512xf32, #tpu.memory_space<vmem>>, vector<4x120x512xf32>
    %1 = vector.shape_cast %0 : vector<4x120x512xf32> to vector<480x512xf32>
    %c0_2 = arith.constant 0 : index
    %c0_3 = arith.constant 0 : index
    %2 = vector.load %arg2[%c0_2, %c0_3] : memref<512x128xf32, #tpu.memory_space<vmem>>, vector<512x128xf32>
    %cst = arith.constant dense<0.000000e+00> : vector<480x128xf32>
    %3 = tpu.matmul %1, %2, %cst {dimension_numbers = #tpu.dot_dimension_numbers<[1], [0], [0], [1], [0, 0, 1, 1], [], []>} : vector<480x512xf32>, vector<512x128xf32>, vector<480x128xf32> -> vector<480x128xf32>
    %4 = vector.extract_strided_slice %3 {offsets = [0, 0], sizes = [120, 128], strides = [1, 1]} : vector<480x128xf32> to vector<120x128xf32>
    %5 = vector.extract_strided_slice %3 {offsets = [120, 0], sizes = [120, 128], strides = [1, 1]} : vector<480x128xf32> to vector<120x128xf32>
    %6 = arith.maximumf %4, %5 : vector<120x128xf32>
    %7 = vector.extract_strided_slice %3 {offsets = [240, 0], sizes = [120, 128], strides = [1, 1]} : vector<480x128xf32> to vector<120x128xf32>
    %8 = vector.extract_strided_slice %3 {offsets = [360, 0], sizes = [120, 128], strides = [1, 1]} : vector<480x128xf32> to vector<120x128xf32>
    %9 = arith.maximumf %7, %8 : vector<120x128xf32>
    %10 = arith.maximumf %6, %9 : vector<120x128xf32>
    %c0_4 = arith.constant 0 : index
    %c0_5 = arith.constant 0 : index
    %11 = vector.load %arg3[%c0_4, %c0_5] : memref<1x128xf32, #tpu.memory_space<vmem>>, vector<1x128xf32>
    %12 = vector.broadcast %11 : vector<1x128xf32> to vector<120x128xf32>
    %13 = arith.addf %10, %12 : vector<120x128xf32>
    %cst_6 = arith.constant 0.000000e+00 : f32
    %14 = vector.broadcast %cst_6 : f32 to vector<120x128xf32>
    %15 = arith.maximumf %13, %14 : vector<120x128xf32>
    %c0_7 = arith.constant 0 : index
    %c0_8 = arith.constant 0 : index
    %16 = vector.load %arg4[%c0_7, %c0_8] : memref<120x128xf32, #tpu.memory_space<vmem>>, vector<120x128xf32>
    tpu.vector_store %arg4[%c0_7, %c0_8], %15 {strides = array<i32>} : memref<120x128xf32, #tpu.memory_space<vmem>>, vector<120x128xf32>,
    return
  }
  func.func @transform_0(%arg0: i32) -> (i32, i32, i32) {
    %c0_i32 = arith.constant 0 : i32
    %c0_i32_0 = arith.constant 0 : i32
    %c0_i32_1 = arith.constant 0 : i32
    return %c0_i32, %arg0, %c0_i32_0 : i32, i32, i32
  }
  func.func @transform_1(%arg0: i32) -> (i32, i32) {
    %c0_i32 = arith.constant 0 : i32
    %c0_i32_0 = arith.constant 0 : i32
    %c0_i32_1 = arith.constant 0 : i32
    return %c0_i32, %c0_i32_0 : i32, i32
  }
  func.func @transform_2(%arg0: i32) -> (i32, i32) {
    %c0_i32 = arith.constant 0 : i32
    %c0_i32_0 = arith.constant 0 : i32
    %c0_i32_1 = arith.constant 0 : i32
    return %c0_i32, %c0_i32_0 : i32, i32
  }
  func.func @transform_3(%arg0: i32) -> (i32, i32) {
    %c0_i32 = arith.constant 0 : i32
    %c0_i32_0 = arith.constant 0 : i32
    return %arg0, %c0_i32 : i32, i32
  }
}

module attributes {stable_mosaic.version = 11 : i64} {
  func.func @_conv_relu_pool_kernel(%arg0: i32, %arg1: memref<4x24x256xf32, #tpu.memory_space<vmem>>, %arg2: memref<256x128xf32, #tpu.memory_space<vmem>>, %arg3: memref<1x128xf32, #tpu.memory_space<vmem>>, %arg4: memref<24x128xf32, #tpu.memory_space<vmem>>) attributes {dimension_semantics = [#tpu.dimension_semantics<parallel>], iteration_bounds = array<i64: 2>, scalar_prefetch = 0 : i64, scratch_operands = 0 : i64, tpu.core_type = #tpu.core_type<tc>, window_params = [{transform_indices = @transform_0, window_bounds = array<i64: 4, 24, 256>}, {pipeline_mode = #tpu.pipeline_mode<synchronous>, transform_indices = @transform_1, window_bounds = array<i64: 256, 128>}, {pipeline_mode = #tpu.pipeline_mode<synchronous>, transform_indices = @transform_2, window_bounds = array<i64: 1, 128>}, {transform_indices = @transform_3, window_bounds = array<i64: 24, 128>}]} {
    %c0 = arith.constant 0 : index
    %c0_0 = arith.constant 0 : index
    %c0_1 = arith.constant 0 : index
    %0 = vector.load %arg1[%c0, %c0_0, %c0_1] : memref<4x24x256xf32, #tpu.memory_space<vmem>>, vector<4x24x256xf32>
    %1 = vector.shape_cast %0 : vector<4x24x256xf32> to vector<96x256xf32>
    %c0_2 = arith.constant 0 : index
    %c0_3 = arith.constant 0 : index
    %2 = vector.load %arg2[%c0_2, %c0_3] : memref<256x128xf32, #tpu.memory_space<vmem>>, vector<256x128xf32>
    %cst = arith.constant dense<0.000000e+00> : vector<96x128xf32>
    %3 = tpu.matmul %1, %2, %cst {dimension_numbers = #tpu.dot_dimension_numbers<[1], [0], [0], [1], [0, 0, 1, 1], [], []>} : vector<96x256xf32>, vector<256x128xf32>, vector<96x128xf32> -> vector<96x128xf32>
    %4 = vector.extract_strided_slice %3 {offsets = [0, 0], sizes = [24, 128], strides = [1, 1]} : vector<96x128xf32> to vector<24x128xf32>
    %5 = vector.extract_strided_slice %3 {offsets = [24, 0], sizes = [24, 128], strides = [1, 1]} : vector<96x128xf32> to vector<24x128xf32>
    %6 = arith.maximumf %4, %5 : vector<24x128xf32>
    %7 = vector.extract_strided_slice %3 {offsets = [48, 0], sizes = [24, 128], strides = [1, 1]} : vector<96x128xf32> to vector<24x128xf32>
    %8 = vector.extract_strided_slice %3 {offsets = [72, 0], sizes = [24, 128], strides = [1, 1]} : vector<96x128xf32> to vector<24x128xf32>
    %9 = arith.maximumf %7, %8 : vector<24x128xf32>
    %10 = arith.maximumf %6, %9 : vector<24x128xf32>
    %c0_4 = arith.constant 0 : index
    %c0_5 = arith.constant 0 : index
    %11 = vector.load %arg3[%c0_4, %c0_5] : memref<1x128xf32, #tpu.memory_space<vmem>>, vector<1x128xf32>
    %12 = vector.broadcast %11 : vector<1x128xf32> to vector<24x128xf32>
    %13 = arith.addf %10, %12 : vector<24x128xf32>
    %cst_6 = arith.constant 0.000000e+00 : f32
    %14 = vector.broadcast %cst_6 : f32 to vector<24x128xf32>
    %15 = arith.maximumf %13, %14 : vector<24x128xf32>
    %c0_7 = arith.constant 0 : index
    %c0_8 = arith.constant 0 : index
    %16 = vector.load %arg4[%c0_7, %c0_8] : memref<24x128xf32, #tpu.memory_space<vmem>>, vector<24x128xf32>
    tpu.vector_store %arg4[%c0_7, %c0_8], %15 {strides = array<i32>} : memref<24x128xf32, #tpu.memory_space<vmem>>, vector<24x128xf32>,
    return
  }
  func.func @transform_0(%arg0: i32) -> (i32, i32, i32) {
    %c0_i32 = arith.constant 0 : i32
    %c0_i32_0 = arith.constant 0 : i32
    %c0_i32_1 = arith.constant 0 : i32
    return %c0_i32, %arg0, %c0_i32_0 : i32, i32, i32
  }
  func.func @transform_1(%arg0: i32) -> (i32, i32) {
    %c0_i32 = arith.constant 0 : i32
    %c0_i32_0 = arith.constant 0 : i32
    %c0_i32_1 = arith.constant 0 : i32
    return %c0_i32, %c0_i32_0 : i32, i32
  }
  func.func @transform_2(%arg0: i32) -> (i32, i32) {
    %c0_i32 = arith.constant 0 : i32
    %c0_i32_0 = arith.constant 0 : i32
    %c0_i32_1 = arith.constant 0 : i32
    return %c0_i32, %c0_i32_0 : i32, i32
  }
  func.func @transform_3(%arg0: i32) -> (i32, i32) {
    %c0_i32 = arith.constant 0 : i32
    %c0_i32_0 = arith.constant 0 : i32
    return %arg0, %c0_i32 : i32, i32
  }
}

module attributes {stable_mosaic.version = 11 : i64} {
  func.func @_head_kernel(%arg0: memref<8x1200xf32, #tpu.memory_space<vmem>>, %arg1: memref<1200x512xf32, #tpu.memory_space<vmem>>, %arg2: memref<1x512xf32, #tpu.memory_space<vmem>>, %arg3: memref<512x512xf32, #tpu.memory_space<vmem>>, %arg4: memref<128x512xf32, #tpu.memory_space<vmem>>, %arg5: memref<1x512xf32, #tpu.memory_space<vmem>>, %arg6: memref<1x128xf32, #tpu.memory_space<vmem>>, %arg7: memref<1x128xf32, #tpu.memory_space<vmem>>, %arg8: memref<128x128xf32, #tpu.memory_space<vmem>>, %arg9: memref<1x128xf32, #tpu.memory_space<vmem>>, %arg10: memref<8x512xf32, #tpu.memory_space<vmem>>, %arg11: memref<8x128xf32, #tpu.memory_space<vmem>>, %arg12: memref<1x128xf32, #tpu.memory_space<vmem>>, %arg13: memref<1x128xf32, #tpu.memory_space<vmem>>) attributes {dimension_semantics = [], scalar_prefetch = 0 : i64, scratch_operands = 0 : i64, tpu.core_type = #tpu.core_type<tc>} {
    %c0 = arith.constant 0 : index
    %c0_0 = arith.constant 0 : index
    %0 = vector.load %arg0[%c0, %c0_0] : memref<8x1200xf32, #tpu.memory_space<vmem>>, vector<8x1200xf32>
    %c0_1 = arith.constant 0 : index
    %c0_2 = arith.constant 0 : index
    %1 = vector.load %arg1[%c0_1, %c0_2] : memref<1200x512xf32, #tpu.memory_space<vmem>>, vector<1200x512xf32>
    %cst = arith.constant dense<0.000000e+00> : vector<8x512xf32>
    %2 = tpu.matmul %0, %1, %cst {dimension_numbers = #tpu.dot_dimension_numbers<[1], [0], [0], [1], [0, 0, 1, 1], [], []>} : vector<8x1200xf32>, vector<1200x512xf32>, vector<8x512xf32> -> vector<8x512xf32>
    %c0_3 = arith.constant 0 : index
    %c0_4 = arith.constant 0 : index
    %3 = vector.load %arg2[%c0_3, %c0_4] : memref<1x512xf32, #tpu.memory_space<vmem>>, vector<1x512xf32>
    %4 = vector.broadcast %3 : vector<1x512xf32> to vector<8x512xf32>
    %5 = arith.addf %2, %4 : vector<8x512xf32>
    %c0_5 = arith.constant 0 : index
    %c0_6 = arith.constant 0 : index
    %6 = vector.load %arg10[%c0_5, %c0_6] : memref<8x512xf32, #tpu.memory_space<vmem>>, vector<8x512xf32>
    tpu.vector_store %arg10[%c0_5, %c0_6], %5 {strides = array<i32>} : memref<8x512xf32, #tpu.memory_space<vmem>>, vector<8x512xf32>,
    %c0_7 = arith.constant 0 : index
    %c0_8 = arith.constant 0 : index
    %7 = vector.load %arg3[%c0_7, %c0_8] : memref<512x512xf32, #tpu.memory_space<vmem>>, vector<512x512xf32>
    %cst_9 = arith.constant dense<0.000000e+00> : vector<8x512xf32>
    %8 = tpu.matmul %5, %7, %cst_9 {dimension_numbers = #tpu.dot_dimension_numbers<[1], [0], [0], [1], [0, 0, 1, 1], [], []>} : vector<8x512xf32>, vector<512x512xf32>, vector<8x512xf32> -> vector<8x512xf32>
    %c0_10 = arith.constant 0 : index
    %c0_11 = arith.constant 0 : index
    %9 = vector.load %arg5[%c0_10, %c0_11] : memref<1x512xf32, #tpu.memory_space<vmem>>, vector<1x512xf32>
    %10 = vector.broadcast %9 : vector<1x512xf32> to vector<8x512xf32>
    %11 = arith.addf %8, %10 : vector<8x512xf32>
    %cst_12 = arith.constant 0.000000e+00 : f32
    %12 = vector.broadcast %cst_12 : f32 to vector<8x128xf32>
    %c0_13 = arith.constant 0 : index
    %c0_14 = arith.constant 0 : index
    %13 = vector.load %arg11[%c0_13, %c0_14] : memref<8x128xf32, #tpu.memory_space<vmem>>, vector<8x128xf32>
    tpu.vector_store %arg11[%c0_13, %c0_14], %12 {strides = array<i32>} : memref<8x128xf32, #tpu.memory_space<vmem>>, vector<8x128xf32>,
    %c0_15 = arith.constant 0 : index
    %c0_16 = arith.constant 0 : index
    %14 = vector.load %arg6[%c0_15, %c0_16] : memref<1x128xf32, #tpu.memory_space<vmem>>, vector<1x128xf32>
    %c0_17 = arith.constant 0 : index
    %c0_18 = arith.constant 0 : index
    %15 = vector.load %arg7[%c0_17, %c0_18] : memref<1x128xf32, #tpu.memory_space<vmem>>, vector<1x128xf32>
    %16 = vector.extract_strided_slice %11 {offsets = [0, 0], sizes = [1, 512], strides = [1, 1]} : vector<8x512xf32> to vector<1x512xf32>
    %c0_19 = arith.constant 0 : index
    %c0_20 = arith.constant 0 : index
    %17 = vector.load %arg4[%c0_19, %c0_20] : memref<128x512xf32, #tpu.memory_space<vmem>>, vector<128x512xf32>
    %cst_21 = arith.constant dense<0.000000e+00> : vector<1x512xf32>
    %18 = tpu.matmul %14, %17, %cst_21 {dimension_numbers = #tpu.dot_dimension_numbers<[1], [0], [0], [1], [0, 0, 1, 1], [], []>} : vector<1x128xf32>, vector<128x512xf32>, vector<1x512xf32> -> vector<1x512xf32>
    %19 = arith.addf %16, %18 : vector<1x512xf32>
    %20 = vector.extract_strided_slice %19 {offsets = [0, 0], sizes = [1, 128], strides = [1, 1]} : vector<1x512xf32> to vector<1x128xf32>
    %cst_22 = arith.constant 0.000000e+00 : f32
    %21 = vector.broadcast %cst_22 : f32 to vector<1x128xf32>
    %22 = arith.subf %21, %20 : vector<1x128xf32>
    %23 = math.exp %22 : vector<1x128xf32>
    %cst_23 = arith.constant 1.000000e+00 : f32
    %24 = vector.broadcast %cst_23 : f32 to vector<1x128xf32>
    %25 = arith.addf %24, %23 : vector<1x128xf32>
    %26 = tpu.reciprocal %25 {approx = true} : vector<1x128xf32> -> vector<1x128xf32>
    %27 = vector.extract_strided_slice %19 {offsets = [0, 128], sizes = [1, 128], strides = [1, 1]} : vector<1x512xf32> to vector<1x128xf32>
    %cst_24 = arith.constant 0.000000e+00 : f32
    %28 = vector.broadcast %cst_24 : f32 to vector<1x128xf32>
    %29 = arith.subf %28, %27 : vector<1x128xf32>
    %30 = math.exp %29 : vector<1x128xf32>
    %cst_25 = arith.constant 1.000000e+00 : f32
    %31 = vector.broadcast %cst_25 : f32 to vector<1x128xf32>
    %32 = arith.addf %31, %30 : vector<1x128xf32>
    %33 = tpu.reciprocal %32 {approx = true} : vector<1x128xf32> -> vector<1x128xf32>
    %34 = vector.extract_strided_slice %19 {offsets = [0, 256], sizes = [1, 128], strides = [1, 1]} : vector<1x512xf32> to vector<1x128xf32>
    %35 = math.tanh %34 : vector<1x128xf32>
    %36 = vector.extract_strided_slice %19 {offsets = [0, 384], sizes = [1, 128], strides = [1, 1]} : vector<1x512xf32> to vector<1x128xf32>
    %cst_26 = arith.constant 0.000000e+00 : f32
    %37 = vector.broadcast %cst_26 : f32 to vector<1x128xf32>
    %38 = arith.subf %37, %36 : vector<1x128xf32>
    %39 = math.exp %38 : vector<1x128xf32>
    %cst_27 = arith.constant 1.000000e+00 : f32
    %40 = vector.broadcast %cst_27 : f32 to vector<1x128xf32>
    %41 = arith.addf %40, %39 : vector<1x128xf32>
    %42 = tpu.reciprocal %41 {approx = true} : vector<1x128xf32> -> vector<1x128xf32>
    %43 = arith.mulf %33, %15 : vector<1x128xf32>
    %44 = arith.mulf %26, %35 : vector<1x128xf32>
    %45 = arith.addf %43, %44 : vector<1x128xf32>
    %46 = math.tanh %45 : vector<1x128xf32>
    %47 = arith.mulf %42, %46 : vector<1x128xf32>
    %c0_28 = arith.constant 0 : index
    %c0_29 = arith.constant 0 : index
    %48 = vector.load %arg11[%c0_28, %c0_29] : memref<8x128xf32, #tpu.memory_space<vmem>>, vector<1x128xf32>
    tpu.vector_store %arg11[%c0_28, %c0_29], %47 {strides = array<i32>} : memref<8x128xf32, #tpu.memory_space<vmem>>, vector<1x128xf32>,
    %49 = vector.extract_strided_slice %11 {offsets = [1, 0], sizes = [1, 512], strides = [1, 1]} : vector<8x512xf32> to vector<1x512xf32>
    %c0_30 = arith.constant 0 : index
    %c0_31 = arith.constant 0 : index
    %50 = vector.load %arg4[%c0_30, %c0_31] : memref<128x512xf32, #tpu.memory_space<vmem>>, vector<128x512xf32>
    %cst_32 = arith.constant dense<0.000000e+00> : vector<1x512xf32>
    %51 = tpu.matmul %47, %50, %cst_32 {dimension_numbers = #tpu.dot_dimension_numbers<[1], [0], [0], [1], [0, 0, 1, 1], [], []>} : vector<1x128xf32>, vector<128x512xf32>, vector<1x512xf32> -> vector<1x512xf32>
    %52 = arith.addf %49, %51 : vector<1x512xf32>
    %53 = vector.extract_strided_slice %52 {offsets = [0, 0], sizes = [1, 128], strides = [1, 1]} : vector<1x512xf32> to vector<1x128xf32>
    %cst_33 = arith.constant 0.000000e+00 : f32
    %54 = vector.broadcast %cst_33 : f32 to vector<1x128xf32>
    %55 = arith.subf %54, %53 : vector<1x128xf32>
    %56 = math.exp %55 : vector<1x128xf32>
    %cst_34 = arith.constant 1.000000e+00 : f32
    %57 = vector.broadcast %cst_34 : f32 to vector<1x128xf32>
    %58 = arith.addf %57, %56 : vector<1x128xf32>
    %59 = tpu.reciprocal %58 {approx = true} : vector<1x128xf32> -> vector<1x128xf32>
    %60 = vector.extract_strided_slice %52 {offsets = [0, 128], sizes = [1, 128], strides = [1, 1]} : vector<1x512xf32> to vector<1x128xf32>
    %cst_35 = arith.constant 0.000000e+00 : f32
    %61 = vector.broadcast %cst_35 : f32 to vector<1x128xf32>
    %62 = arith.subf %61, %60 : vector<1x128xf32>
    %63 = math.exp %62 : vector<1x128xf32>
    %cst_36 = arith.constant 1.000000e+00 : f32
    %64 = vector.broadcast %cst_36 : f32 to vector<1x128xf32>
    %65 = arith.addf %64, %63 : vector<1x128xf32>
    %66 = tpu.reciprocal %65 {approx = true} : vector<1x128xf32> -> vector<1x128xf32>
    %67 = vector.extract_strided_slice %52 {offsets = [0, 256], sizes = [1, 128], strides = [1, 1]} : vector<1x512xf32> to vector<1x128xf32>
    %68 = math.tanh %67 : vector<1x128xf32>
    %69 = vector.extract_strided_slice %52 {offsets = [0, 384], sizes = [1, 128], strides = [1, 1]} : vector<1x512xf32> to vector<1x128xf32>
    %cst_37 = arith.constant 0.000000e+00 : f32
    %70 = vector.broadcast %cst_37 : f32 to vector<1x128xf32>
    %71 = arith.subf %70, %69 : vector<1x128xf32>
    %72 = math.exp %71 : vector<1x128xf32>
    %cst_38 = arith.constant 1.000000e+00 : f32
    %73 = vector.broadcast %cst_38 : f32 to vector<1x128xf32>
    %74 = arith.addf %73, %72 : vector<1x128xf32>
    %75 = tpu.reciprocal %74 {approx = true} : vector<1x128xf32> -> vector<1x128xf32>
    %76 = arith.mulf %66, %45 : vector<1x128xf32>
    %77 = arith.mulf %59, %68 : vector<1x128xf32>
    %78 = arith.addf %76, %77 : vector<1x128xf32>
    %79 = math.tanh %78 : vector<1x128xf32>
    %80 = arith.mulf %75, %79 : vector<1x128xf32>
    %c1 = arith.constant 1 : index
    %c0_39 = arith.constant 0 : index
    %81 = vector.load %arg11[%c1, %c0_39] : memref<8x128xf32, #tpu.memory_space<vmem>>, vector<1x128xf32>
    tpu.vector_store %arg11[%c1, %c0_39], %80 {strides = array<i32>} : memref<8x128xf32, #tpu.memory_space<vmem>>, vector<1x128xf32>,
    %c0_40 = arith.constant 0 : index
    %c0_41 = arith.constant 0 : index
    %82 = vector.load %arg13[%c0_40, %c0_41] : memref<1x128xf32, #tpu.memory_space<vmem>>, vector<1x128xf32>
    tpu.vector_store %arg13[%c0_40, %c0_41], %78 {strides = array<i32>} : memref<1x128xf32, #tpu.memory_space<vmem>>, vector<1x128xf32>,
    %c0_42 = arith.constant 0 : index
    %c0_43 = arith.constant 0 : index
    %83 = vector.load %arg8[%c0_42, %c0_43] : memref<128x128xf32, #tpu.memory_space<vmem>>, vector<128x128xf32>
    %cst_44 = arith.constant dense<0.000000e+00> : vector<1x128xf32>
    %84 = tpu.matmul %80, %83, %cst_44 {dimension_numbers = #tpu.dot_dimension_numbers<[1], [0], [0], [1], [0, 0, 1, 1], [], []>} : vector<1x128xf32>, vector<128x128xf32>, vector<1x128xf32> -> vector<1x128xf32>
    %c0_45 = arith.constant 0 : index
    %c0_46 = arith.constant 0 : index
    %85 = vector.load %arg9[%c0_45, %c0_46] : memref<1x128xf32, #tpu.memory_space<vmem>>, vector<1x128xf32>
    %86 = arith.addf %84, %85 : vector<1x128xf32>
    %c0_47 = arith.constant 0 : index
    %c0_48 = arith.constant 0 : index
    %87 = vector.load %arg12[%c0_47, %c0_48] : memref<1x128xf32, #tpu.memory_space<vmem>>, vector<1x128xf32>
    tpu.vector_store %arg12[%c0_47, %c0_48], %86 {strides = array<i32>} : memref<1x128xf32, #tpu.memory_space<vmem>>, vector<1x128xf32>,
    return
  }
}

</mosaic_0001>

<bundles_post_ra>
// kernel: cnn_lstm_forward.4
= control target key start
LH: loop header
LB: loop body
LE: loop exit
PB: predicated region body
PF: predicated region fallthrough
CT: control target
= control target key end

     0   :  { %s5165_s12 = smov 0   ;;  %s5167_s13 = smov 0   ;;  %s6943_s0 = inlined_call_operand.vmem [shape: f32[4,1328,128], index: 0, kind: input, shape index: {}]   ;;  %s6944_s1 = inlined_call_operand.vmem [shape: f32[128,128], index: 1, kind: input, shape index: {}]   ;;  %s6945_s2 = inlined_call_operand.vmem [shape: f32[1,128], index: 2, kind: input, shape index: {}]   ;;  %s6946_s3 = inlined_call_operand.vmem [shape: f32[1328,128], index: 3, kind: output, shape index: {}]  }
   0x1   :  { %s5169_s14 = smov 0  }
   0x2 LB: > { %s4173_s15 = sadd.s32 4294967295, %s5143_s14   ;;  %s5182_s16 = sadd.s32 1, %s5143_s14   ;;  %s5143_s14 = sphi %s5169_s14, %s7181_s14   ;;  %s5139_s13 = sphi %s5167_s13, %s7180_s13   ;;  %s5135_s12 = sphi %s5165_s12, %s7179_s12  }
   0x3   : > { %s17_s17 = ssub.s32 %s5143_s14, %s5182_s16  ;;  %s20_s18 = sadd.s32 1, %s5139_s13 }
   0x4   : > { %p18_p0 = scmp.eq.s32.totalorder %s17_s17, 0  ;;  %p27_p1 = scmp.ne.s32.totalorder %s5139_s13, %s5135_s12 }
   0x5   : > { %p28_p2 = scmp.eq.s32.totalorder %s5143_s14, 0  ;;  %p4176_p4 = scmp.ge.s32.totalorder %s5143_s14, 2 }
   0x6   : > { %s5191_s19 = scalar_select %p18_p0, %s5139_s13, %s20_s18  }
   0x7   : > { %p29_p3 = por %p28_p2, %p27_p1  ;;  %127 = sbr.rel (%p4176_p4) target bundleno = 183 (0xb7), region = 24 }
   0xc   : > { %130 = sbr.rel (!%p29_p3) target bundleno = 183 (0xb7), region = 28  ;;  %s132_s20 = sand.u32 (%p29_p3), 1, %s5139_s13  }
   0xd   : > { %s4183_s21 = smul.u32 (%p29_p3), 664, %s5143_s14 }
   0xe   : > { %s5094_s22 = smul.u32 (%p29_p3), 2656, %s132_s20 }
   0xf   : > { %s5199_s25 = scalar_lea.vmem (%p29_p3), %s6943_s0, %s4183_s21 }
  0x10   : > { %v828_v0 = vld [vmem:[%s5199_s25] sm:$0xff] (%p29_p3)  ;;  %v830_v1 = vld [vmem:[%s5199_s25 + $0x8] sm:$0xff] (%p29_p3)  ;;  %v832_v2 = vld [vmem:[%s5199_s25 + $0x10] sm:$0xff] (%p29_p3)  ;;  %s5204_s26 = scalar_lea.vmem (%p29_p3), [#allocation2], %s5094_s22 }
  0x11   : > { %829 = vst [vmem:[%s5204_s26] sm:$0xff] %v828_v0  ;;  %831 = vst [vmem:[%s5204_s26 + $0x8] sm:$0xff] %v830_v1  ;;  %v834_v3 = vld [vmem:[%s5199_s25 + $0x18] sm:$0xff]  ;;  %v836_v4 = vld [vmem:[%s5199_s25 + $0x20] sm:$0xff] }
  0x12   : > { %833 = vst [vmem:[%s5204_s26 + $0x10] sm:$0xff] %v832_v2  ;;  %v838_v5 = vld [vmem:[%s5199_s25 + $0x28] sm:$0xff]  ;;  %835 = vst [vmem:[%s5204_s26 + $0x18] sm:$0xff] %v834_v3  ;;  %v840_v6 = vld [vmem:[%s5199_s25 + $0x30] sm:$0xff] }
  0x13   : > { %837 = vst [vmem:[%s5204_s26 + $0x20] sm:$0xff] %v836_v4  ;;  %839 = vst [vmem:[%s5204_s26 + $0x28] sm:$0xff] %v838_v5  ;;  %v842_v7 = vld [vmem:[%s5199_s25 + $0x38] sm:$0xff]  ;;  %v844_v8 = vld [vmem:[%s5199_s25 + $0x40] sm:$0xff] }
  0x14   : > { %841 = vst [vmem:[%s5204_s26 + $0x30] sm:$0xff] %v840_v6  ;;  %843 = vst [vmem:[%s5204_s26 + $0x38] sm:$0xff] %v842_v7  ;;  %v846_v9 = vld [vmem:[%s5199_s25 + $0x48] sm:$0xff]  ;;  %v848_v10 = vld [vmem:[%s5199_s25 + $0x50] sm:$0xff] }
  0x15   : > { %845 = vst [vmem:[%s5204_s26 + $0x40] sm:$0xff] %v844_v8  ;;  %v850_v11 = vld [vmem:[%s5199_s25 + $0x58] sm:$0xff]  ;;  %847 = vst [vmem:[%s5204_s26 + $0x48] sm:$0xff] %v846_v9  ;;  %v852_v12 = vld [vmem:[%s5199_s25 + $0x60] sm:$0xff] }
  0x16   : > { %849 = vst [vmem:[%s5204_s26 + $0x50] sm:$0xff] %v848_v10  ;;  %851 = vst [vmem:[%s5204_s26 + $0x58] sm:$0xff] %v850_v11  ;;  %v854_v13 = vld [vmem:[%s5199_s25 + $0x68] sm:$0xff]  ;;  %v856_v14 = vld [vmem:[%s5199_s25 + $0x70] sm:$0xff] }
  0x17   : > { %853 = vst [vmem:[%s5204_s26 + $0x60] sm:$0xff] %v852_v12  ;;  %855 = vst [vmem:[%s5204_s26 + $0x68] sm:$0xff] %v854_v13  ;;  %v858_v15 = vld [vmem:[%s5199_s25 + $0x78] sm:$0xff]  ;;  %v860_v16 = vld [vmem:[%s5199_s25 + $0x80] sm:$0xff] }
  0x18   : > { %857 = vst [vmem:[%s5204_s26 + $0x70] sm:$0xff] %v856_v14  ;;  %v862_v17 = vld [vmem:[%s5199_s25 + $0x88] sm:$0xff]  ;;  %859 = vst [vmem:[%s5204_s26 + $0x78] sm:$0xff] %v858_v15  ;;  %v864_v18 = vld [vmem:[%s5199_s25 + $0x90] sm:$0xff] }
  0x19   : > { %861 = vst [vmem:[%s5204_s26 + $0x80] sm:$0xff] %v860_v16  ;;  %863 = vst [vmem:[%s5204_s26 + $0x88] sm:$0xff] %v862_v17  ;;  %v866_v19 = vld [vmem:[%s5199_s25 + $0x98] sm:$0xff]  ;;  %v868_v20 = vld [vmem:[%s5199_s25 + $0xa0] sm:$0xff] }
  0x1a   : > { %865 = vst [vmem:[%s5204_s26 + $0x90] sm:$0xff] %v864_v18  ;;  %867 = vst [vmem:[%s5204_s26 + $0x98] sm:$0xff] %v866_v19  ;;  %v870_v21 = vld [vmem:[%s5199_s25 + $0xa8] sm:$0xff]  ;;  %v872_v22 = vld [vmem:[%s5199_s25 + $0xb0] sm:$0xff] }
  0x1b   : > { %869 = vst [vmem:[%s5204_s26 + $0xa0] sm:$0xff] %v868_v20  ;;  %v874_v23 = vld [vmem:[%s5199_s25 + $0xb8] sm:$0xff]  ;;  %871 = vst [vmem:[%s5204_s26 + $0xa8] sm:$0xff] %v870_v21  ;;  %v876_v24 = vld [vmem:[%s5199_s25 + $0xc0] sm:$0xff] }
  0x1c   : > { %873 = vst [vmem:[%s5204_s26 + $0xb0] sm:$0xff] %v872_v22  ;;  %875 = vst [vmem:[%s5204_s26 + $0xb8] sm:$0xff] %v874_v23  ;;  %v878_v25 = vld [vmem:[%s5199_s25 + $0xc8] sm:$0xff]  ;;  %v880_v26 = vld [vmem:[%s5199_s25 + $0xd0] sm:$0xff] }
  0x1d   : > { %877 = vst [vmem:[%s5204_s26 + $0xc0] sm:$0xff] %v876_v24  ;;  %879 = vst [vmem:[%s5204_s26 + $0xc8] sm:$0xff] %v878_v25  ;;  %v882_v27 = vld [vmem:[%s5199_s25 + $0xd8] sm:$0xff]  ;;  %v884_v28 = vld [vmem:[%s5199_s25 + $0xe0] sm:$0xff] }
  0x1e   : > { %881 = vst [vmem:[%s5204_s26 + $0xd0] sm:$0xff] %v880_v26  ;;  %v886_v29 = vld [vmem:[%s5199_s25 + $0xe8] sm:$0xff]  ;;  %883 = vst [vmem:[%s5204_s26 + $0xd8] sm:$0xff] %v882_v27  ;;  %v888_v30 = vld [vmem:[%s5199_s25 + $0xf0] sm:$0xff] }
  0x1f   : > { %885 = vst [vmem:[%s5204_s26 + $0xe0] sm:$0xff] %v884_v28  ;;  %887 = vst [vmem:[%s5204_s26 + $0xe8] sm:$0xff] %v886_v29  ;;  %v890_v31 = vld [vmem:[%s5199_s25 + $0xf8] sm:$0xff]  ;;  %v892_v32 = vld [vmem:[%s5199_s25 + $0x100] sm:$0xff] }
  0x20   : > { %889 = vst [vmem:[%s5204_s26 + $0xf0] sm:$0xff] %v888_v30  ;;  %891 = vst [vmem:[%s5204_s26 + $0xf8] sm:$0xff] %v890_v31  ;;  %v894_v33 = vld [vmem:[%s5199_s25 + $0x108] sm:$0xff]  ;;  %v896_v34 = vld [vmem:[%s5199_s25 + $0x110] sm:$0xff] }
  0x21   : > { %893 = vst [vmem:[%s5204_s26 + $0x100] sm:$0xff] %v892_v32  ;;  %v898_v35 = vld [vmem:[%s5199_s25 + $0x118] sm:$0xff]  ;;  %895 = vst [vmem:[%s5204_s26 + $0x108] sm:$0xff] %v894_v33  ;;  %v900_v36 = vld [vmem:[%s5199_s25 + $0x120] sm:$0xff] }
  0x22   : > { %897 = vst [vmem:[%s5204_s26 + $0x110] sm:$0xff] %v896_v34  ;;  %899 = vst [vmem:[%s5204_s26 + $0x118] sm:$0xff] %v898_v35  ;;  %v902_v37 = vld [vmem:[%s5199_s25 + $0x128] sm:$0xff]  ;;  %v904_v38 = vld [vmem:[%s5199_s25 + $0x130] sm:$0xff] }
  0x23   : > { %901 = vst [vmem:[%s5204_s26 + $0x120] sm:$0xff] %v900_v36  ;;  %903 = vst [vmem:[%s5204_s26 + $0x128] sm:$0xff] %v902_v37  ;;  %v906_v39 = vld [vmem:[%s5199_s25 + $0x138] sm:$0xff]  ;;  %v908_v40 = vld [vmem:[%s5199_s25 + $0x140] sm:$0xff] }
  0x24   : > { %905 = vst [vmem:[%s5204_s26 + $0x130] sm:$0xff] %v904_v38  ;;  %v910_v41 = vld [vmem:[%s5199_s25 + $0x148] sm:$0xff]  ;;  %907 = vst [vmem:[%s5204_s26 + $0x138] sm:$0xff] %v906_v39  ;;  %v912_v42 = vld [vmem:[%s5199_s25 + $0x150] sm:$0xff] }
  0x25   : > { %909 = vst [vmem:[%s5204_s26 + $0x140] sm:$0xff] %v908_v40  ;;  %911 = vst [vmem:[%s5204_s26 + $0x148] sm:$0xff] %v910_v41  ;;  %v914_v43 = vld [vmem:[%s5199_s25 + $0x158] sm:$0xff]  ;;  %v916_v44 = vld [vmem:[%s5199_s25 + $0x160] sm:$0xff] }
  0x26   : > { %913 = vst [vmem:[%s5204_s26 + $0x150] sm:$0xff] %v912_v42  ;;  %915 = vst [vmem:[%s5204_s26 + $0x158] sm:$0xff] %v914_v43  ;;  %v918_v45 = vld [vmem:[%s5199_s25 + $0x168] sm:$0xff]  ;;  %v920_v46 = vld [vmem:[%s5199_s25 + $0x170] sm:$0xff] }
  0x27   : > { %917 = vst [vmem:[%s5204_s26 + $0x160] sm:$0xff] %v916_v44  ;;  %v922_v47 = vld [vmem:[%s5199_s25 + $0x178] sm:$0xff]  ;;  %919 = vst [vmem:[%s5204_s26 + $0x168] sm:$0xff] %v918_v45  ;;  %v924_v48 = vld [vmem:[%s5199_s25 + $0x180] sm:$0xff] }
  0x28   : > { %921 = vst [vmem:[%s5204_s26 + $0x170] sm:$0xff] %v920_v46  ;;  %923 = vst [vmem:[%s5204_s26 + $0x178] sm:$0xff] %v922_v47  ;;  %v926_v49 = vld [vmem:[%s5199_s25 + $0x188] sm:$0xff]  ;;  %v928_v50 = vld [vmem:[%s5199_s25 + $0x190] sm:$0xff] }
  0x29   : > { %925 = vst [vmem:[%s5204_s26 + $0x180] sm:$0xff] %v924_v48  ;;  %927 = vst [vmem:[%s5204_s26 + $0x188] sm:$0xff] %v926_v49  ;;  %v930_v51 = vld [vmem:[%s5199_s25 + $0x198] sm:$0xff]  ;;  %v932_v52 = vld [vmem:[%s5199_s25 + $0x1a0] sm:$0xff] }
  0x2a   : > { %929 = vst [vmem:[%s5204_s26 + $0x190] sm:$0xff] %v928_v50  ;;  %v934_v53 = vld [vmem:[%s5199_s25 + $0x1a8] sm:$0xff]  ;;  %931 = vst [vmem:[%s5204_s26 + $0x198] sm:$0xff] %v930_v51  ;;  %v936_v54 = vld [vmem:[%s5199_s25 + $0x1b0] sm:$0xff] }
  0x2b   : > { %933 = vst [vmem:[%s5204_s26 + $0x1a0] sm:$0xff] %v932_v52  ;;  %935 = vst [vmem:[%s5204_s26 + $0x1a8] sm:$0xff] %v934_v53  ;;  %v938_v55 = vld [vmem:[%s5199_s25 + $0x1b8] sm:$0xff]  ;;  %v940_v56 = vld [vmem:[%s5199_s25 + $0x1c0] sm:$0xff] }
  0x2c   : > { %937 = vst [vmem:[%s5204_s26 + $0x1b0] sm:$0xff] %v936_v54  ;;  %939 = vst [vmem:[%s5204_s26 + $0x1b8] sm:$0xff] %v938_v55  ;;  %v942_v57 = vld [vmem:[%s5199_s25 + $0x1c8] sm:$0xff]  ;;  %v944_v58 = vld [vmem:[%s5199_s25 + $0x1d0] sm:$0xff] }
  0x2d   : > { %941 = vst [vmem:[%s5204_s26 + $0x1c0] sm:$0xff] %v940_v56  ;;  %v946_v59 = vld [vmem:[%s5199_s25 + $0x1d8] sm:$0xff]  ;;  %943 = vst [vmem:[%s5204_s26 + $0x1c8] sm:$0xff] %v942_v57  ;;  %v948_v60 = vld [vmem:[%s5199_s25 + $0x1e0] sm:$0xff] }
  0x2e   : > { %945 = vst [vmem:[%s5204_s26 + $0x1d0] sm:$0xff] %v944_v58  ;;  %947 = vst [vmem:[%s5204_s26 + $0x1d8] sm:$0xff] %v946_v59  ;;  %v950_v61 = vld [vmem:[%s5199_s25 + $0x1e8] sm:$0xff]  ;;  %v952_v62 = vld [vmem:[%s5199_s25 + $0x1f0] sm:$0xff] }
  0x2f   : > { %949 = vst [vmem:[%s5204_s26 + $0x1e0] sm:$0xff] %v948_v60  ;;  %951 = vst [vmem:[%s5204_s26 + $0x1e8] sm:$0xff] %v950_v61  ;;  %v954_v63 = vld [vmem:[%s5199_s25 + $0x1f8] sm:$0xff]  ;;  %v956_v0 = vld [vmem:[%s5199_s25 + $0x200] sm:$0xff] }
  0x30   : > { %953 = vst [vmem:[%s5204_s26 + $0x1f0] sm:$0xff] %v952_v62  ;;  %v958_v1 = vld [vmem:[%s5199_s25 + $0x208] sm:$0xff]  ;;  %955 = vst [vmem:[%s5204_s26 + $0x1f8] sm:$0xff] %v954_v63  ;;  %v960_v2 = vld [vmem:[%s5199_s25 + $0x210] sm:$0xff] }
  0x31   : > { %957 = vst [vmem:[%s5204_s26 + $0x200] sm:$0xff] %v956_v0  ;;  %959 = vst [vmem:[%s5204_s26 + $0x208] sm:$0xff] %v958_v1  ;;  %v962_v3 = vld [vmem:[%s5199_s25 + $0x218] sm:$0xff]  ;;  %v964_v4 = vld [vmem:[%s5199_s25 + $0x220] sm:$0xff] }
  0x32   : > { %961 = vst [vmem:[%s5204_s26 + $0x210] sm:$0xff] %v960_v2  ;;  %963 = vst [vmem:[%s5204_s26 + $0x218] sm:$0xff] %v962_v3  ;;  %v966_v5 = vld [vmem:[%s5199_s25 + $0x228] sm:$0xff]  ;;  %v968_v6 = vld [vmem:[%s5199_s25 + $0x230] sm:$0xff] }
  0x33   : > { %965 = vst [vmem:[%s5204_s26 + $0x220] sm:$0xff] %v964_v4  ;;  %v970_v7 = vld [vmem:[%s5199_s25 + $0x238] sm:$0xff]  ;;  %967 = vst [vmem:[%s5204_s26 + $0x228] sm:$0xff] %v966_v5  ;;  %v972_v8 = vld [vmem:[%s5199_s25 + $0x240] sm:$0xff] }
  0x34   : > { %969 = vst [vmem:[%s5204_s26 + $0x230] sm:$0xff] %v968_v6  ;;  %971 = vst [vmem:[%s5204_s26 + $0x238] sm:$0xff] %v970_v7  ;;  %v974_v9 = vld [vmem:[%s5199_s25 + $0x248] sm:$0xff]  ;;  %v976_v10 = vld [vmem:[%s5199_s25 + $0x250] sm:$0xff] }
  0x35   : > { %973 = vst [vmem:[%s5204_s26 + $0x240] sm:$0xff] %v972_v8  ;;  %975 = vst [vmem:[%s5204_s26 + $0x248] sm:$0xff] %v974_v9  ;;  %v978_v11 = vld [vmem:[%s5199_s25 + $0x258] sm:$0xff]  ;;  %v980_v12 = vld [vmem:[%s5199_s25 + $0x260] sm:$0xff] }
  0x36   : > { %977 = vst [vmem:[%s5204_s26 + $0x250] sm:$0xff] %v976_v10  ;;  %v982_v13 = vld [vmem:[%s5199_s25 + $0x268] sm:$0xff]  ;;  %979 = vst [vmem:[%s5204_s26 + $0x258] sm:$0xff] %v978_v11  ;;  %v984_v14 = vld [vmem:[%s5199_s25 + $0x270] sm:$0xff] }
  0x37   : > { %981 = vst [vmem:[%s5204_s26 + $0x260] sm:$0xff] %v980_v12  ;;  %983 = vst [vmem:[%s5204_s26 + $0x268] sm:$0xff] %v982_v13  ;;  %v986_v15 = vld [vmem:[%s5199_s25 + $0x278] sm:$0xff]  ;;  %v988_v16 = vld [vmem:[%s5199_s25 + $0x280] sm:$0xff] }
  0x38   : > { %985 = vst [vmem:[%s5204_s26 + $0x270] sm:$0xff] %v984_v14  ;;  %987 = vst [vmem:[%s5204_s26 + $0x278] sm:$0xff] %v986_v15  ;;  %v990_v17 = vld [vmem:[%s5199_s25 + $0x288] sm:$0xff]  ;;  %v992_v18 = vld [vmem:[%s5199_s25 + $0x290] sm:$0xff] }
  0x39   : > { %989 = vst [vmem:[%s5204_s26 + $0x280] sm:$0xff] %v988_v16  ;;  %v994_v19 = vld [vmem:[%s5199_s25 + $0x530] sm:$0xff]  ;;  %991 = vst [vmem:[%s5204_s26 + $0x288] sm:$0xff] %v990_v17  ;;  %v996_v20 = vld [vmem:[%s5199_s25 + $0x538] sm:$0xff] }
  0x3a   : > { %993 = vst [vmem:[%s5204_s26 + $0x290] sm:$0xff] %v992_v18  ;;  %995 = vst [vmem:[%s5204_s26 + $0x298] sm:$0xff] %v994_v19  ;;  %v998_v21 = vld [vmem:[%s5199_s25 + $0x540] sm:$0xff]  ;;  %v1000_v22 = vld [vmem:[%s5199_s25 + $0x548] sm:$0xff] }
  0x3b   : > { %997 = vst [vmem:[%s5204_s26 + $0x2a0] sm:$0xff] %v996_v20  ;;  %999 = vst [vmem:[%s5204_s26 + $0x2a8] sm:$0xff] %v998_v21  ;;  %v1002_v23 = vld [vmem:[%s5199_s25 + $0x550] sm:$0xff]  ;;  %v1004_v24 = vld [vmem:[%s5199_s25 + $0x558] sm:$0xff] }
  0x3c   : > { %1001 = vst [vmem:[%s5204_s26 + $0x2b0] sm:$0xff] %v1000_v22  ;;  %v1006_v25 = vld [vmem:[%s5199_s25 + $0x560] sm:$0xff]  ;;  %1003 = vst [vmem:[%s5204_s26 + $0x2b8] sm:$0xff] %v1002_v23  ;;  %v1008_v26 = vld [vmem:[%s5199_s25 + $0x568] sm:$0xff] }
  0x3d   : > { %1005 = vst [vmem:[%s5204_s26 + $0x2c0] sm:$0xff] %v1004_v24  ;;  %1007 = vst [vmem:[%s5204_s26 + $0x2c8] sm:$0xff] %v1006_v25  ;;  %v1010_v27 = vld [vmem:[%s5199_s25 + $0x570] sm:$0xff]  ;;  %v1012_v28 = vld [vmem:[%s5199_s25 + $0x578] sm:$0xff] }
  0x3e   : > { %1009 = vst [vmem:[%s5204_s26 + $0x2d0] sm:$0xff] %v1008_v26  ;;  %1011 = vst [vmem:[%s5204_s26 + $0x2d8] sm:$0xff] %v1010_v27  ;;  %v1014_v29 = vld [vmem:[%s5199_s25 + $0x580] sm:$0xff]  ;;  %v1016_v30 = vld [vmem:[%s5199_s25 + $0x588] sm:$0xff] }
  0x3f   : > { %1013 = vst [vmem:[%s5204_s26 + $0x2e0] sm:$0xff] %v1012_v28  ;;  %v1018_v31 = vld [vmem:[%s5199_s25 + $0x590] sm:$0xff]  ;;  %1015 = vst [vmem:[%s5204_s26 + $0x2e8] sm:$0xff] %v1014_v29  ;;  %v1020_v32 = vld [vmem:[%s5199_s25 + $0x598] sm:$0xff] }
  0x40   : > { %1017 = vst [vmem:[%s5204_s26 + $0x2f0] sm:$0xff] %v1016_v30  ;;  %1019 = vst [vmem:[%s5204_s26 + $0x2f8] sm:$0xff] %v1018_v31  ;;  %v1022_v33 = vld [vmem:[%s5199_s25 + $0x5a0] sm:$0xff]  ;;  %v1024_v34 = vld [vmem:[%s5199_s25 + $0x5a8] sm:$0xff] }
  0x41   : > { %1021 = vst [vmem:[%s5204_s26 + $0x300] sm:$0xff] %v1020_v32  ;;  %1023 = vst [vmem:[%s5204_s26 + $0x308] sm:$0xff] %v1022_v33  ;;  %v1026_v35 = vld [vmem:[%s5199_s25 + $0x5b0] sm:$0xff]  ;;  %v1028_v36 = vld [vmem:[%s5199_s25 + $0x5b8] sm:$0xff] }
  0x42   : > { %1025 = vst [vmem:[%s5204_s26 + $0x310] sm:$0xff] %v1024_v34  ;;  %v1030_v37 = vld [vmem:[%s5199_s25 + $0x5c0] sm:$0xff]  ;;  %1027 = vst [vmem:[%s5204_s26 + $0x318] sm:$0xff] %v1026_v35  ;;  %v1032_v38 = vld [vmem:[%s5199_s25 + $0x5c8] sm:$0xff] }
  0x43   : > { %1029 = vst [vmem:[%s5204_s26 + $0x320] sm:$0xff] %v1028_v36  ;;  %1031 = vst [vmem:[%s5204_s26 + $0x328] sm:$0xff] %v1030_v37  ;;  %v1034_v39 = vld [vmem:[%s5199_s25 + $0x5d0] sm:$0xff]  ;;  %v1036_v40 = vld [vmem:[%s5199_s25 + $0x5d8] sm:$0xff] }
  0x44   : > { %1033 = vst [vmem:[%s5204_s26 + $0x330] sm:$0xff] %v1032_v38  ;;  %1035 = vst [vmem:[%s5204_s26 + $0x338] sm:$0xff] %v1034_v39  ;;  %v1038_v41 = vld [vmem:[%s5199_s25 + $0x5e0] sm:$0xff]  ;;  %v1040_v42 = vld [vmem:[%s5199_s25 + $0x5e8] sm:$0xff] }
  0x45   : > { %1037 = vst [vmem:[%s5204_s26 + $0x340] sm:$0xff] %v1036_v40  ;;  %v1042_v43 = vld [vmem:[%s5199_s25 + $0x5f0] sm:$0xff]  ;;  %1039 = vst [vmem:[%s5204_s26 + $0x348] sm:$0xff] %v1038_v41  ;;  %v1044_v44 = vld [vmem:[%s5199_s25 + $0x5f8] sm:$0xff] }
  0x46   : > { %1041 = vst [vmem:[%s5204_s26 + $0x350] sm:$0xff] %v1040_v42  ;;  %1043 = vst [vmem:[%s5204_s26 + $0x358] sm:$0xff] %v1042_v43  ;;  %v1046_v45 = vld [vmem:[%s5199_s25 + $0x600] sm:$0xff]  ;;  %v1048_v46 = vld [vmem:[%s5199_s25 + $0x608] sm:$0xff] }
  0x47   : > { %1045 = vst [vmem:[%s5204_s26 + $0x360] sm:$0xff] %v1044_v44  ;;  %1047 = vst [vmem:[%s5204_s26 + $0x368] sm:$0xff] %v1046_v45  ;;  %v1050_v47 = vld [vmem:[%s5199_s25 + $0x610] sm:$0xff]  ;;  %v1052_v48 = vld [vmem:[%s5199_s25 + $0x618] sm:$0xff] }
  0x48   : > { %1049 = vst [vmem:[%s5204_s26 + $0x370] sm:$0xff] %v1048_v46  ;;  %v1054_v49 = vld [vmem:[%s5199_s25 + $0x620] sm:$0xff]  ;;  %1051 = vst [vmem:[%s5204_s26 + $0x378] sm:$0xff] %v1050_v47  ;;  %v1056_v50 = vld [vmem:[%s5199_s25 + $0x628] sm:$0xff] }
  0x49   : > { %1053 = vst [vmem:[%s5204_s26 + $0x380] sm:$0xff] %v1052_v48  ;;  %1055 = vst [vmem:[%s5204_s26 + $0x388] sm:$0xff] %v1054_v49  ;;  %v1058_v51 = vld [vmem:[%s5199_s25 + $0x630] sm:$0xff]  ;;  %v1060_v52 = vld [vmem:[%s5199_s25 + $0x638] sm:$0xff] }
  0x4a   : > { %1057 = vst [vmem:[%s5204_s26 + $0x390] sm:$0xff] %v1056_v50  ;;  %1059 = vst [vmem:[%s5204_s26 + $0x398] sm:$0xff] %v1058_v51  ;;  %v1062_v53 = vld [vmem:[%s5199_s25 + $0x640] sm:$0xff]  ;;  %v1064_v54 = vld [vmem:[%s5199_s25 + $0x648] sm:$0xff] }
  0x4b   : > { %1061 = vst [vmem:[%s5204_s26 + $0x3a0] sm:$0xff] %v1060_v52  ;;  %v1066_v55 = vld [vmem:[%s5199_s25 + $0x650] sm:$0xff]  ;;  %1063 = vst [vmem:[%s5204_s26 + $0x3a8] sm:$0xff] %v1062_v53  ;;  %v1068_v56 = vld [vmem:[%s5199_s25 + $0x658] sm:$0xff] }
  0x4c   : > { %1065 = vst [vmem:[%s5204_s26 + $0x3b0] sm:$0xff] %v1064_v54  ;;  %1067 = vst [vmem:[%s5204_s26 + $0x3b8] sm:$0xff] %v1066_v55  ;;  %v1070_v57 = vld [vmem:[%s5199_s25 + $0x660] sm:$0xff]  ;;  %v1072_v58 = vld [vmem:[%s5199_s25 + $0x668] sm:$0xff] }
  0x4d   : > { %1069 = vst [vmem:[%s5204_s26 + $0x3c0] sm:$0xff] %v1068_v56  ;;  %1071 = vst [vmem:[%s5204_s26 + $0x3c8] sm:$0xff] %v1070_v57  ;;  %v1074_v59 = vld [vmem:[%s5199_s25 + $0x670] sm:$0xff]  ;;  %v1076_v60 = vld [vmem:[%s5199_s25 + $0x678] sm:$0xff] }
  0x4e   : > { %1073 = vst [vmem:[%s5204_s26 + $0x3d0] sm:$0xff] %v1072_v58  ;;  %v1078_v61 = vld [vmem:[%s5199_s25 + $0x680] sm:$0xff]  ;;  %1075 = vst [vmem:[%s5204_s26 + $0x3d8] sm:$0xff] %v1074_v59  ;;  %v1080_v62 = vld [vmem:[%s5199_s25 + $0x688] sm:$0xff] }
  0x4f   : > { %1077 = vst [vmem:[%s5204_s26 + $0x3e0] sm:$0xff] %v1076_v60  ;;  %1079 = vst [vmem:[%s5204_s26 + $0x3e8] sm:$0xff] %v1078_v61  ;;  %v1082_v63 = vld [vmem:[%s5199_s25 + $0x690] sm:$0xff]  ;;  %v1084_v0 = vld [vmem:[%s5199_s25 + $0x698] sm:$0xff] }
  0x50   : > { %1081 = vst [vmem:[%s5204_s26 + $0x3f0] sm:$0xff] %v1080_v62  ;;  %1083 = vst [vmem:[%s5204_s26 + $0x3f8] sm:$0xff] %v1082_v63  ;;  %v1086_v1 = vld [vmem:[%s5199_s25 + $0x6a0] sm:$0xff]  ;;  %v1088_v2 = vld [vmem:[%s5199_s25 + $0x6a8] sm:$0xff] }
  0x51   : > { %1085 = vst [vmem:[%s5204_s26 + $0x400] sm:$0xff] %v1084_v0  ;;  %v1090_v3 = vld [vmem:[%s5199_s25 + $0x6b0] sm:$0xff]  ;;  %1087 = vst [vmem:[%s5204_s26 + $0x408] sm:$0xff] %v1086_v1  ;;  %v1092_v4 = vld [vmem:[%s5199_s25 + $0x6b8] sm:$0xff] }
  0x52   : > { %1089 = vst [vmem:[%s5204_s26 + $0x410] sm:$0xff] %v1088_v2  ;;  %1091 = vst [vmem:[%s5204_s26 + $0x418] sm:$0xff] %v1090_v3  ;;  %v1094_v5 = vld [vmem:[%s5199_s25 + $0x6c0] sm:$0xff]  ;;  %v1096_v6 = vld [vmem:[%s5199_s25 + $0x6c8] sm:$0xff] }
  0x53   : > { %1093 = vst [vmem:[%s5204_s26 + $0x420] sm:$0xff] %v1092_v4  ;;  %1095 = vst [vmem:[%s5204_s26 + $0x428] sm:$0xff] %v1094_v5  ;;  %v1098_v7 = vld [vmem:[%s5199_s25 + $0x6d0] sm:$0xff]  ;;  %v1100_v8 = vld [vmem:[%s5199_s25 + $0x6d8] sm:$0xff] }
  0x54   : > { %1097 = vst [vmem:[%s5204_s26 + $0x430] sm:$0xff] %v1096_v6  ;;  %v1102_v9 = vld [vmem:[%s5199_s25 + $0x6e0] sm:$0xff]  ;;  %1099 = vst [vmem:[%s5204_s26 + $0x438] sm:$0xff] %v1098_v7  ;;  %v1104_v10 = vld [vmem:[%s5199_s25 + $0x6e8] sm:$0xff] }
  0x55   : > { %1101 = vst [vmem:[%s5204_s26 + $0x440] sm:$0xff] %v1100_v8  ;;  %1103 = vst [vmem:[%s5204_s26 + $0x448] sm:$0xff] %v1102_v9  ;;  %v1106_v11 = vld [vmem:[%s5199_s25 + $0x6f0] sm:$0xff]  ;;  %v1108_v12 = vld [vmem:[%s5199_s25 + $0x6f8] sm:$0xff] }
  0x56   : > { %1105 = vst [vmem:[%s5204_s26 + $0x450] sm:$0xff] %v1104_v10  ;;  %1107 = vst [vmem:[%s5204_s26 + $0x458] sm:$0xff] %v1106_v11  ;;  %v1110_v13 = vld [vmem:[%s5199_s25 + $0x700] sm:$0xff]  ;;  %v1112_v14 = vld [vmem:[%s5199_s25 + $0x708] sm:$0xff] }
  0x57   : > { %1109 = vst [vmem:[%s5204_s26 + $0x460] sm:$0xff] %v1108_v12  ;;  %v1114_v15 = vld [vmem:[%s5199_s25 + $0x710] sm:$0xff]  ;;  %1111 = vst [vmem:[%s5204_s26 + $0x468] sm:$0xff] %v1110_v13  ;;  %v1116_v16 = vld [vmem:[%s5199_s25 + $0x718] sm:$0xff] }
  0x58   : > { %1113 = vst [vmem:[%s5204_s26 + $0x470] sm:$0xff] %v1112_v14  ;;  %1115 = vst [vmem:[%s5204_s26 + $0x478] sm:$0xff] %v1114_v15  ;;  %v1118_v17 = vld [vmem:[%s5199_s25 + $0x720] sm:$0xff]  ;;  %v1120_v18 = vld [vmem:[%s5199_s25 + $0x728] sm:$0xff] }
  0x59   : > { %1117 = vst [vmem:[%s5204_s26 + $0x480] sm:$0xff] %v1116_v16  ;;  %1119 = vst [vmem:[%s5204_s26 + $0x488] sm:$0xff] %v1118_v17  ;;  %v1122_v19 = vld [vmem:[%s5199_s25 + $0x730] sm:$0xff]  ;;  %v1124_v20 = vld [vmem:[%s5199_s25 + $0x738] sm:$0xff] }
  0x5a   : > { %1121 = vst [vmem:[%s5204_s26 + $0x490] sm:$0xff] %v1120_v18  ;;  %v1126_v21 = vld [vmem:[%s5199_s25 + $0x740] sm:$0xff]  ;;  %1123 = vst [vmem:[%s5204_s26 + $0x498] sm:$0xff] %v1122_v19  ;;  %v1128_v22 = vld [vmem:[%s5199_s25 + $0x748] sm:$0xff] }
  0x5b   : > { %1125 = vst [vmem:[%s5204_s26 + $0x4a0] sm:$0xff] %v1124_v20  ;;  %1127 = vst [vmem:[%s5204_s26 + $0x4a8] sm:$0xff] %v1126_v21  ;;  %v1130_v23 = vld [vmem:[%s5199_s25 + $0x750] sm:$0xff]  ;;  %v1132_v24 = vld [vmem:[%s5199_s25 + $0x758] sm:$0xff] }
  0x5c   : > { %1129 = vst [vmem:[%s5204_s26 + $0x4b0] sm:$0xff] %v1128_v22  ;;  %1131 = vst [vmem:[%s5204_s26 + $0x4b8] sm:$0xff] %v1130_v23  ;;  %v1134_v25 = vld [vmem:[%s5199_s25 + $0x760] sm:$0xff]  ;;  %v1136_v26 = vld [vmem:[%s5199_s25 + $0x768] sm:$0xff] }
  0x5d   : > { %1133 = vst [vmem:[%s5204_s26 + $0x4c0] sm:$0xff] %v1132_v24  ;;  %v1138_v27 = vld [vmem:[%s5199_s25 + $0x770] sm:$0xff]  ;;  %1135 = vst [vmem:[%s5204_s26 + $0x4c8] sm:$0xff] %v1134_v25  ;;  %v1140_v28 = vld [vmem:[%s5199_s25 + $0x778] sm:$0xff] }
  0x5e   : > { %1137 = vst [vmem:[%s5204_s26 + $0x4d0] sm:$0xff] %v1136_v26  ;;  %1139 = vst [vmem:[%s5204_s26 + $0x4d8] sm:$0xff] %v1138_v27  ;;  %v1142_v29 = vld [vmem:[%s5199_s25 + $0x780] sm:$0xff]  ;;  %v1144_v30 = vld [vmem:[%s5199_s25 + $0x788] sm:$0xff] }
  0x5f   : > { %1141 = vst [vmem:[%s5204_s26 + $0x4e0] sm:$0xff] %v1140_v28  ;;  %1143 = vst [vmem:[%s5204_s26 + $0x4e8] sm:$0xff] %v1142_v29  ;;  %v1146_v31 = vld [vmem:[%s5199_s25 + $0x790] sm:$0xff]  ;;  %v1148_v32 = vld [vmem:[%s5199_s25 + $0x798] sm:$0xff] }
  0x60   : > { %1145 = vst [vmem:[%s5204_s26 + $0x4f0] sm:$0xff] %v1144_v30  ;;  %v1150_v33 = vld [vmem:[%s5199_s25 + $0x7a0] sm:$0xff]  ;;  %1147 = vst [vmem:[%s5204_s26 + $0x4f8] sm:$0xff] %v1146_v31  ;;  %v1152_v34 = vld [vmem:[%s5199_s25 + $0x7a8] sm:$0xff] }
  0x61   : > { %1149 = vst [vmem:[%s5204_s26 + $0x500] sm:$0xff] %v1148_v32  ;;  %1151 = vst [vmem:[%s5204_s26 + $0x508] sm:$0xff] %v1150_v33  ;;  %v1154_v35 = vld [vmem:[%s5199_s25 + $0x7b0] sm:$0xff]  ;;  %v1156_v36 = vld [vmem:[%s5199_s25 + $0x7b8] sm:$0xff] }
  0x62   : > { %1153 = vst [vmem:[%s5204_s26 + $0x510] sm:$0xff] %v1152_v34  ;;  %1155 = vst [vmem:[%s5204_s26 + $0x518] sm:$0xff] %v1154_v35  ;;  %v1158_v37 = vld [vmem:[%s5199_s25 + $0x7c0] sm:$0xff]  ;;  %v1162_v39 = vld [vmem:[%s5199_s25 + $0xa68] sm:$0xff] }
  0x63   : > { %1157 = vst [vmem:[%s5204_s26 + $0x520] sm:$0xff] %v1156_v36  ;;  %v1160_v38 = vld [vmem:[%s5199_s25 + $0xa60] sm:$0xff]  ;;  %1159 = vst [vmem:[%s5204_s26 + $0x528] sm:$0xff] %v1158_v37  ;;  %v1164_v40 = vld [vmem:[%s5199_s25 + $0xa70] sm:$0xff] }
  0x64   : > { %1161 = vst [vmem:[%s5204_s26 + $0x530] sm:$0xff] %v1160_v38  ;;  %1163 = vst [vmem:[%s5204_s26 + $0x538] sm:$0xff] %v1162_v39  ;;  %v1166_v41 = vld [vmem:[%s5199_s25 + $0xa78] sm:$0xff]  ;;  %v1168_v42 = vld [vmem:[%s5199_s25 + $0xa80] sm:$0xff] }
  0x65   : > { %1165 = vst [vmem:[%s5204_s26 + $0x540] sm:$0xff] %v1164_v40  ;;  %1167 = vst [vmem:[%s5204_s26 + $0x548] sm:$0xff] %v1166_v41  ;;  %v1170_v43 = vld [vmem:[%s5199_s25 + $0xa88] sm:$0xff]  ;;  %v1172_v44 = vld [vmem:[%s5199_s25 + $0xa90] sm:$0xff] }
  0x66   : > { %1169 = vst [vmem:[%s5204_s26 + $0x550] sm:$0xff] %v1168_v42  ;;  %v1174_v45 = vld [vmem:[%s5199_s25 + $0xa98] sm:$0xff]  ;;  %1171 = vst [vmem:[%s5204_s26 + $0x558] sm:$0xff] %v1170_v43  ;;  %v1176_v46 = vld [vmem:[%s5199_s25 + $0xaa0] sm:$0xff] }
  0x67   : > { %1173 = vst [vmem:[%s5204_s26 + $0x560] sm:$0xff] %v1172_v44  ;;  %1175 = vst [vmem:[%s5204_s26 + $0x568] sm:$0xff] %v1174_v45  ;;  %v1178_v47 = vld [vmem:[%s5199_s25 + $0xaa8] sm:$0xff]  ;;  %v1180_v48 = vld [vmem:[%s5199_s25 + $0xab0] sm:$0xff] }
  0x68   : > { %1177 = vst [vmem:[%s5204_s26 + $0x570] sm:$0xff] %v1176_v46  ;;  %1179 = vst [vmem:[%s5204_s26 + $0x578] sm:$0xff] %v1178_v47  ;;  %v1182_v49 = vld [vmem:[%s5199_s25 + $0xab8] sm:$0xff]  ;;  %v1184_v50 = vld [vmem:[%s5199_s25 + $0xac0] sm:$0xff] }
  0x69   : > { %1181 = vst [vmem:[%s5204_s26 + $0x580] sm:$0xff] %v1180_v48  ;;  %v1186_v51 = vld [vmem:[%s5199_s25 + $0xac8] sm:$0xff]  ;;  %1183 = vst [vmem:[%s5204_s26 + $0x588] sm:$0xff] %v1182_v49  ;;  %v1188_v52 = vld [vmem:[%s5199_s25 + $0xad0] sm:$0xff] }
  0x6a   : > { %1185 = vst [vmem:[%s5204_s26 + $0x590] sm:$0xff] %v1184_v50  ;;  %1187 = vst [vmem:[%s5204_s26 + $0x598] sm:$0xff] %v1186_v51  ;;  %v1190_v53 = vld [vmem:[%s5199_s25 + $0xad8] sm:$0xff]  ;;  %v1192_v54 = vld [vmem:[%s5199_s25 + $0xae0] sm:$0xff] }
  0x6b   : > { %1189 = vst [vmem:[%s5204_s26 + $0x5a0] sm:$0xff] %v1188_v52  ;;  %1191 = vst [vmem:[%s5204_s26 + $0x5a8] sm:$0xff] %v1190_v53  ;;  %v1194_v55 = vld [vmem:[%s5199_s25 + $0xae8] sm:$0xff]  ;;  %v1196_v56 = vld [vmem:[%s5199_s25 + $0xaf0] sm:$0xff] }
  0x6c   : > { %1193 = vst [vmem:[%s5204_s26 + $0x5b0] sm:$0xff] %v1192_v54  ;;  %v1198_v57 = vld [vmem:[%s5199_s25 + $0xaf8] sm:$0xff]  ;;  %1195 = vst [vmem:[%s5204_s26 + $0x5b8] sm:$0xff] %v1194_v55  ;;  %v1200_v58 = vld [vmem:[%s5199_s25 + $0xb00] sm:$0xff] }
  0x6d   : > { %1197 = vst [vmem:[%s5204_s26 + $0x5c0] sm:$0xff] %v1196_v56  ;;  %1199 = vst [vmem:[%s5204_s26 + $0x5c8] sm:$0xff] %v1198_v57  ;;  %v1202_v59 = vld [vmem:[%s5199_s25 + $0xb08] sm:$0xff]  ;;  %v1204_v60 = vld [vmem:[%s5199_s25 + $0xb10] sm:$0xff] }
  0x6e   : > { %1201 = vst [vmem:[%s5204_s26 + $0x5d0] sm:$0xff] %v1200_v58  ;;  %1203 = vst [vmem:[%s5204_s26 + $0x5d8] sm:$0xff] %v1202_v59  ;;  %v1206_v61 = vld [vmem:[%s5199_s25 + $0xb18] sm:$0xff]  ;;  %v1208_v62 = vld [vmem:[%s5199_s25 + $0xb20] sm:$0xff] }
  0x6f   : > { %1205 = vst [vmem:[%s5204_s26 + $0x5e0] sm:$0xff] %v1204_v60  ;;  %v1210_v63 = vld [vmem:[%s5199_s25 + $0xb28] sm:$0xff]  ;;  %1207 = vst [vmem:[%s5204_s26 + $0x5e8] sm:$0xff] %v1206_v61  ;;  %v1212_v0 = vld [vmem:[%s5199_s25 + $0xb30] sm:$0xff] }
  0x70   : > { %1209 = vst [vmem:[%s5204_s26 + $0x5f0] sm:$0xff] %v1208_v62  ;;  %1211 = vst [vmem:[%s5204_s26 + $0x5f8] sm:$0xff] %v1210_v63  ;;  %v1214_v1 = vld [vmem:[%s5199_s25 + $0xb38] sm:$0xff]  ;;  %v1216_v2 = vld [vmem:[%s5199_s25 + $0xb40] sm:$0xff] }
  0x71   : > { %1213 = vst [vmem:[%s5204_s26 + $0x600] sm:$0xff] %v1212_v0  ;;  %1215 = vst [vmem:[%s5204_s26 + $0x608] sm:$0xff] %v1214_v1  ;;  %v1218_v3 = vld [vmem:[%s5199_s25 + $0xb48] sm:$0xff]  ;;  %v1220_v4 = vld [vmem:[%s5199_s25 + $0xb50] sm:$0xff] }
  0x72   : > { %1217 = vst [vmem:[%s5204_s26 + $0x610] sm:$0xff] %v1216_v2  ;;  %v1222_v5 = vld [vmem:[%s5199_s25 + $0xb58] sm:$0xff]  ;;  %1219 = vst [vmem:[%s5204_s26 + $0x618] sm:$0xff] %v1218_v3  ;;  %v1224_v6 = vld [vmem:[%s5199_s25 + $0xb60] sm:$0xff] }
  0x73   : > { %1221 = vst [vmem:[%s5204_s26 + $0x620] sm:$0xff] %v1220_v4  ;;  %1223 = vst [vmem:[%s5204_s26 + $0x628] sm:$0xff] %v1222_v5  ;;  %v1226_v7 = vld [vmem:[%s5199_s25 + $0xb68] sm:$0xff]  ;;  %v1228_v8 = vld [vmem:[%s5199_s25 + $0xb70] sm:$0xff] }
  0x74   : > { %1225 = vst [vmem:[%s5204_s26 + $0x630] sm:$0xff] %v1224_v6  ;;  %1227 = vst [vmem:[%s5204_s26 + $0x638] sm:$0xff] %v1226_v7  ;;  %v1230_v9 = vld [vmem:[%s5199_s25 + $0xb78] sm:$0xff]  ;;  %v1232_v10 = vld [vmem:[%s5199_s25 + $0xb80] sm:$0xff] }
  0x75   : > { %1229 = vst [vmem:[%s5204_s26 + $0x640] sm:$0xff] %v1228_v8  ;;  %v1234_v11 = vld [vmem:[%s5199_s25 + $0xb88] sm:$0xff]  ;;  %1231 = vst [vmem:[%s5204_s26 + $0x648] sm:$0xff] %v1230_v9  ;;  %v1236_v12 = vld [vmem:[%s5199_s25 + $0xb90] sm:$0xff] }
  0x76   : > { %1233 = vst [vmem:[%s5204_s26 + $0x650] sm:$0xff] %v1232_v10  ;;  %1235 = vst [vmem:[%s5204_s26 + $0x658] sm:$0xff] %v1234_v11  ;;  %v1238_v13 = vld [vmem:[%s5199_s25 + $0xb98] sm:$0xff]  ;;  %v1240_v14 = vld [vmem:[%s5199_s25 + $0xba0] sm:$0xff] }
  0x77   : > { %1237 = vst [vmem:[%s5204_s26 + $0x660] sm:$0xff] %v1236_v12  ;;  %1239 = vst [vmem:[%s5204_s26 + $0x668] sm:$0xff] %v1238_v13  ;;  %v1242_v15 = vld [vmem:[%s5199_s25 + $0xba8] sm:$0xff]  ;;  %v1244_v16 = vld [vmem:[%s5199_s25 + $0xbb0] sm:$0xff] }
  0x78   : > { %1241 = vst [vmem:[%s5204_s26 + $0x670] sm:$0xff] %v1240_v14  ;;  %v1246_v17 = vld [vmem:[%s5199_s25 + $0xbb8] sm:$0xff]  ;;  %1243 = vst [vmem:[%s5204_s26 + $0x678] sm:$0xff] %v1242_v15  ;;  %v1248_v18 = vld [vmem:[%s5199_s25 + $0xbc0] sm:$0xff] }
  0x79   : > { %1245 = vst [vmem:[%s5204_s26 + $0x680] sm:$0xff] %v1244_v16  ;;  %1247 = vst [vmem:[%s5204_s26 + $0x688] sm:$0xff] %v1246_v17  ;;  %v1250_v19 = vld [vmem:[%s5199_s25 + $0xbc8] sm:$0xff]  ;;  %v1252_v20 = vld [vmem:[%s5199_s25 + $0xbd0] sm:$0xff] }
  0x7a   : > { %1249 = vst [vmem:[%s5204_s26 + $0x690] sm:$0xff] %v1248_v18  ;;  %1251 = vst [vmem:[%s5204_s26 + $0x698] sm:$0xff] %v1250_v19  ;;  %v1254_v21 = vld [vmem:[%s5199_s25 + $0xbd8] sm:$0xff]  ;;  %v1256_v22 = vld [vmem:[%s5199_s25 + $0xbe0] sm:$0xff] }
  0x7b   : > { %1253 = vst [vmem:[%s5204_s26 + $0x6a0] sm:$0xff] %v1252_v20  ;;  %v1258_v23 = vld [vmem:[%s5199_s25 + $0xbe8] sm:$0xff]  ;;  %1255 = vst [vmem:[%s5204_s26 + $0x6a8] sm:$0xff] %v1254_v21  ;;  %v1260_v24 = vld [vmem:[%s5199_s25 + $0xbf0] sm:$0xff] }
  0x7c   : > { %1257 = vst [vmem:[%s5204_s26 + $0x6b0] sm:$0xff] %v1256_v22  ;;  %1259 = vst [vmem:[%s5204_s26 + $0x6b8] sm:$0xff] %v1258_v23  ;;  %v1262_v25 = vld [vmem:[%s5199_s25 + $0xbf8] sm:$0xff]  ;;  %v1264_v26 = vld [vmem:[%s5199_s25 + $0xc00] sm:$0xff] }
  0x7d   : > { %1261 = vst [vmem:[%s5204_s26 + $0x6c0] sm:$0xff] %v1260_v24  ;;  %1263 = vst [vmem:[%s5204_s26 + $0x6c8] sm:$0xff] %v1262_v25  ;;  %v1266_v27 = vld [vmem:[%s5199_s25 + $0xc08] sm:$0xff]  ;;  %v1268_v28 = vld [vmem:[%s5199_s25 + $0xc10] sm:$0xff] }
  0x7e   : > { %1265 = vst [vmem:[%s5204_s26 + $0x6d0] sm:$0xff] %v1264_v26  ;;  %v1270_v29 = vld [vmem:[%s5199_s25 + $0xc18] sm:$0xff]  ;;  %1267 = vst [vmem:[%s5204_s26 + $0x6d8] sm:$0xff] %v1266_v27  ;;  %v1272_v30 = vld [vmem:[%s5199_s25 + $0xc20] sm:$0xff] }
  0x7f   : > { %1269 = vst [vmem:[%s5204_s26 + $0x6e0] sm:$0xff] %v1268_v28  ;;  %1271 = vst [vmem:[%s5204_s26 + $0x6e8] sm:$0xff] %v1270_v29  ;;  %v1274_v31 = vld [vmem:[%s5199_s25 + $0xc28] sm:$0xff]  ;;  %v1276_v32 = vld [vmem:[%s5199_s25 + $0xc30] sm:$0xff] }
  0x80   : > { %1273 = vst [vmem:[%s5204_s26 + $0x6f0] sm:$0xff] %v1272_v30  ;;  %1275 = vst [vmem:[%s5204_s26 + $0x6f8] sm:$0xff] %v1274_v31  ;;  %v1278_v33 = vld [vmem:[%s5199_s25 + $0xc38] sm:$0xff]  ;;  %v1280_v34 = vld [vmem:[%s5199_s25 + $0xc40] sm:$0xff] }
  0x81   : > { %1277 = vst [vmem:[%s5204_s26 + $0x700] sm:$0xff] %v1276_v32  ;;  %v1282_v35 = vld [vmem:[%s5199_s25 + $0xc48] sm:$0xff]  ;;  %1279 = vst [vmem:[%s5204_s26 + $0x708] sm:$0xff] %v1278_v33  ;;  %v1284_v36 = vld [vmem:[%s5199_s25 + $0xc50] sm:$0xff] }
  0x82   : > { %1281 = vst [vmem:[%s5204_s26 + $0x710] sm:$0xff] %v1280_v34  ;;  %1283 = vst [vmem:[%s5204_s26 + $0x718] sm:$0xff] %v1282_v35  ;;  %v1286_v37 = vld [vmem:[%s5199_s25 + $0xc58] sm:$0xff]  ;;  %v1288_v38 = vld [vmem:[%s5199_s25 + $0xc60] sm:$0xff] }
  0x83   : > { %1285 = vst [vmem:[%s5204_s26 + $0x720] sm:$0xff] %v1284_v36  ;;  %1287 = vst [vmem:[%s5204_s26 + $0x728] sm:$0xff] %v1286_v37  ;;  %v1290_v39 = vld [vmem:[%s5199_s25 + $0xc68] sm:$0xff]  ;;  %v1292_v40 = vld [vmem:[%s5199_s25 + $0xc70] sm:$0xff] }
  0x84   : > { %1289 = vst [vmem:[%s5204_s26 + $0x730] sm:$0xff] %v1288_v38  ;;  %v1294_v41 = vld [vmem:[%s5199_s25 + $0xc78] sm:$0xff]  ;;  %1291 = vst [vmem:[%s5204_s26 + $0x738] sm:$0xff] %v1290_v39  ;;  %v1296_v42 = vld [vmem:[%s5199_s25 + $0xc80] sm:$0xff] }
  0x85   : > { %1293 = vst [vmem:[%s5204_s26 + $0x740] sm:$0xff] %v1292_v40  ;;  %1295 = vst [vmem:[%s5204_s26 + $0x748] sm:$0xff] %v1294_v41  ;;  %v1298_v43 = vld [vmem:[%s5199_s25 + $0xc88] sm:$0xff]  ;;  %v1300_v44 = vld [vmem:[%s5199_s25 + $0xc90] sm:$0xff] }
  0x86   : > { %1297 = vst [vmem:[%s5204_s26 + $0x750] sm:$0xff] %v1296_v42  ;;  %1299 = vst [vmem:[%s5204_s26 + $0x758] sm:$0xff] %v1298_v43  ;;  %v1302_v45 = vld [vmem:[%s5199_s25 + $0xc98] sm:$0xff]  ;;  %v1304_v46 = vld [vmem:[%s5199_s25 + $0xca0] sm:$0xff] }
  0x87   : > { %1301 = vst [vmem:[%s5204_s26 + $0x760] sm:$0xff] %v1300_v44  ;;  %v1306_v47 = vld [vmem:[%s5199_s25 + $0xca8] sm:$0xff]  ;;  %1303 = vst [vmem:[%s5204_s26 + $0x768] sm:$0xff] %v1302_v45  ;;  %v1308_v48 = vld [vmem:[%s5199_s25 + $0xcb0] sm:$0xff] }
  0x88   : > { %1305 = vst [vmem:[%s5204_s26 + $0x770] sm:$0xff] %v1304_v46  ;;  %1307 = vst [vmem:[%s5204_s26 + $0x778] sm:$0xff] %v1306_v47  ;;  %v1310_v49 = vld [vmem:[%s5199_s25 + $0xcb8] sm:$0xff]  ;;  %v1312_v50 = vld [vmem:[%s5199_s25 + $0xcc0] sm:$0xff] }
  0x89   : > { %1309 = vst [vmem:[%s5204_s26 + $0x780] sm:$0xff] %v1308_v48  ;;  %1311 = vst [vmem:[%s5204_s26 + $0x788] sm:$0xff] %v1310_v49  ;;  %v1314_v51 = vld [vmem:[%s5199_s25 + $0xcc8] sm:$0xff]  ;;  %v1316_v52 = vld [vmem:[%s5199_s25 + $0xcd0] sm:$0xff] }
  0x8a   : > { %1313 = vst [vmem:[%s5204_s26 + $0x790] sm:$0xff] %v1312_v50  ;;  %v1318_v53 = vld [vmem:[%s5199_s25 + $0xcd8] sm:$0xff]  ;;  %1315 = vst [vmem:[%s5204_s26 + $0x798] sm:$0xff] %v1314_v51  ;;  %v1320_v54 = vld [vmem:[%s5199_s25 + $0xce0] sm:$0xff] }
  0x8b   : > { %1317 = vst [vmem:[%s5204_s26 + $0x7a0] sm:$0xff] %v1316_v52  ;;  %1319 = vst [vmem:[%s5204_s26 + $0x7a8] sm:$0xff] %v1318_v53  ;;  %v1322_v55 = vld [vmem:[%s5199_s25 + $0xce8] sm:$0xff]  ;;  %v1324_v56 = vld [vmem:[%s5199_s25 + $0xcf0] sm:$0xff] }
  0x8c   : > { %1321 = vst [vmem:[%s5204_s26 + $0x7b0] sm:$0xff] %v1320_v54  ;;  %1323 = vst [vmem:[%s5204_s26 + $0x7b8] sm:$0xff] %v1322_v55  ;;  %v1326_v57 = vld [vmem:[%s5199_s25 + $0xf90] sm:$0xff]  ;;  %v1328_v58 = vld [vmem:[%s5199_s25 + $0xf98] sm:$0xff] }
  0x8d   : > { %1325 = vst [vmem:[%s5204_s26 + $0x7c0] sm:$0xff] %v1324_v56  ;;  %v1330_v59 = vld [vmem:[%s5199_s25 + $0xfa0] sm:$0xff]  ;;  %1327 = vst [vmem:[%s5204_s26 + $0x7c8] sm:$0xff] %v1326_v57  ;;  %v1332_v60 = vld [vmem:[%s5199_s25 + $0xfa8] sm:$0xff] }
  0x8e   : > { %1329 = vst [vmem:[%s5204_s26 + $0x7d0] sm:$0xff] %v1328_v58  ;;  %1331 = vst [vmem:[%s5204_s26 + $0x7d8] sm:$0xff] %v1330_v59  ;;  %v1334_v61 = vld [vmem:[%s5199_s25 + $0xfb0] sm:$0xff]  ;;  %v1336_v62 = vld [vmem:[%s5199_s25 + $0xfb8] sm:$0xff] }
  0x8f   : > { %1333 = vst [vmem:[%s5204_s26 + $0x7e0] sm:$0xff] %v1332_v60  ;;  %1335 = vst [vmem:[%s5204_s26 + $0x7e8] sm:$0xff] %v1334_v61  ;;  %v1338_v63 = vld [vmem:[%s5199_s25 + $0xfc0] sm:$0xff]  ;;  %v1340_v0 = vld [vmem:[%s5199_s25 + $0xfc8] sm:$0xff] }
  0x90   : > { %1337 = vst [vmem:[%s5204_s26 + $0x7f0] sm:$0xff] %v1336_v62  ;;  %v1342_v1 = vld [vmem:[%s5199_s25 + $0xfd0] sm:$0xff]  ;;  %1339 = vst [vmem:[%s5204_s26 + $0x7f8] sm:$0xff] %v1338_v63  ;;  %v1344_v2 = vld [vmem:[%s5199_s25 + $0xfd8] sm:$0xff] }
  0x91   : > { %1341 = vst [vmem:[%s5204_s26 + $0x800] sm:$0xff] %v1340_v0  ;;  %1343 = vst [vmem:[%s5204_s26 + $0x808] sm:$0xff] %v1342_v1  ;;  %v1346_v3 = vld [vmem:[%s5199_s25 + $0xfe0] sm:$0xff]  ;;  %v1348_v4 = vld [vmem:[%s5199_s25 + $0xfe8] sm:$0xff] }
  0x92   : > { %1345 = vst [vmem:[%s5204_s26 + $0x810] sm:$0xff] %v1344_v2  ;;  %1347 = vst [vmem:[%s5204_s26 + $0x818] sm:$0xff] %v1346_v3  ;;  %v1350_v5 = vld [vmem:[%s5199_s25 + $0xff0] sm:$0xff]  ;;  %v1352_v6 = vld [vmem:[%s5199_s25 + $0xff8] sm:$0xff] }
  0x93   : > { %1349 = vst [vmem:[%s5204_s26 + $0x820] sm:$0xff] %v1348_v4  ;;  %v1354_v7 = vld [vmem:[%s5199_s25 + $0x1000] sm:$0xff]  ;;  %1351 = vst [vmem:[%s5204_s26 + $0x828] sm:$0xff] %v1350_v5  ;;  %v1356_v8 = vld [vmem:[%s5199_s25 + $0x1008] sm:$0xff] }
  0x94   : > { %1353 = vst [vmem:[%s5204_s26 + $0x830] sm:$0xff] %v1352_v6  ;;  %1355 = vst [vmem:[%s5204_s26 + $0x838] sm:$0xff] %v1354_v7  ;;  %v1358_v9 = vld [vmem:[%s5199_s25 + $0x1010] sm:$0xff]  ;;  %v1360_v10 = vld [vmem:[%s5199_s25 + $0x1018] sm:$0xff] }
  0x95   : > { %1357 = vst [vmem:[%s5204_s26 + $0x840] sm:$0xff] %v1356_v8  ;;  %1359 = vst [vmem:[%s5204_s26 + $0x848] sm:$0xff] %v1358_v9  ;;  %v1362_v11 = vld [vmem:[%s5199_s25 + $0x1020] sm:$0xff]  ;;  %v1364_v12 = vld [vmem:[%s5199_s25 + $0x1028] sm:$0xff] }
  0x96   : > { %1361 = vst [vmem:[%s5204_s26 + $0x850] sm:$0xff] %v1360_v10  ;;  %v1366_v13 = vld [vmem:[%s5199_s25 + $0x1030] sm:$0xff]  ;;  %1363 = vst [vmem:[%s5204_s26 + $0x858] sm:$0xff] %v1362_v11  ;;  %v1368_v14 = vld [vmem:[%s5199_s25 + $0x1038] sm:$0xff] }
  0x97   : > { %1365 = vst [vmem:[%s5204_s26 + $0x860] sm:$0xff] %v1364_v12  ;;  %1367 = vst [vmem:[%s5204_s26 + $0x868] sm:$0xff] %v1366_v13  ;;  %v1370_v15 = vld [vmem:[%s5199_s25 + $0x1040] sm:$0xff]  ;;  %v1372_v16 = vld [vmem:[%s5199_s25 + $0x1048] sm:$0xff] }
  0x98   : > { %1369 = vst [vmem:[%s5204_s26 + $0x870] sm:$0xff] %v1368_v14  ;;  %1371 = vst [vmem:[%s5204_s26 + $0x878] sm:$0xff] %v1370_v15  ;;  %v1374_v17 = vld [vmem:[%s5199_s25 + $0x1050] sm:$0xff]  ;;  %v1376_v18 = vld [vmem:[%s5199_s25 + $0x1058] sm:$0xff] }
  0x99   : > { %1373 = vst [vmem:[%s5204_s26 + $0x880] sm:$0xff] %v1372_v16  ;;  %v1378_v19 = vld [vmem:[%s5199_s25 + $0x1060] sm:$0xff]  ;;  %1375 = vst [vmem:[%s5204_s26 + $0x888] sm:$0xff] %v1374_v17  ;;  %v1380_v20 = vld [vmem:[%s5199_s25 + $0x1068] sm:$0xff] }
  0x9a   : > { %1377 = vst [vmem:[%s5204_s26 + $0x890] sm:$0xff] %v1376_v18  ;;  %1379 = vst [vmem:[%s5204_s26 + $0x898] sm:$0xff] %v1378_v19  ;;  %v1382_v21 = vld [vmem:[%s5199_s25 + $0x1070] sm:$0xff]  ;;  %v1384_v22 = vld [vmem:[%s5199_s25 + $0x1078] sm:$0xff] }
  0x9b   : > { %1381 = vst [vmem:[%s5204_s26 + $0x8a0] sm:$0xff] %v1380_v20  ;;  %1383 = vst [vmem:[%s5204_s26 + $0x8a8] sm:$0xff] %v1382_v21  ;;  %v1386_v23 = vld [vmem:[%s5199_s25 + $0x1080] sm:$0xff]  ;;  %v1388_v24 = vld [vmem:[%s5199_s25 + $0x1088] sm:$0xff] }
  0x9c   : > { %1385 = vst [vmem:[%s5204_s26 + $0x8b0] sm:$0xff] %v1384_v22  ;;  %v1390_v25 = vld [vmem:[%s5199_s25 + $0x1090] sm:$0xff]  ;;  %1387 = vst [vmem:[%s5204_s26 + $0x8b8] sm:$0xff] %v1386_v23  ;;  %v1392_v26 = vld [vmem:[%s5199_s25 + $0x1098] sm:$0xff] }
  0x9d   : > { %1389 = vst [vmem:[%s5204_s26 + $0x8c0] sm:$0xff] %v1388_v24  ;;  %1391 = vst [vmem:[%s5204_s26 + $0x8c8] sm:$0xff] %v1390_v25  ;;  %v1394_v27 = vld [vmem:[%s5199_s25 + $0x10a0] sm:$0xff]  ;;  %v1396_v28 = vld [vmem:[%s5199_s25 + $0x10a8] sm:$0xff] }
  0x9e   : > { %1393 = vst [vmem:[%s5204_s26 + $0x8d0] sm:$0xff] %v1392_v26  ;;  %1395 = vst [vmem:[%s5204_s26 + $0x8d8] sm:$0xff] %v1394_v27  ;;  %v1398_v29 = vld [vmem:[%s5199_s25 + $0x10b0] sm:$0xff]  ;;  %v1400_v30 = vld [vmem:[%s5199_s25 + $0x10b8] sm:$0xff] }
  0x9f   : > { %1397 = vst [vmem:[%s5204_s26 + $0x8e0] sm:$0xff] %v1396_v28  ;;  %v1402_v31 = vld [vmem:[%s5199_s25 + $0x10c0] sm:$0xff]  ;;  %1399 = vst [vmem:[%s5204_s26 + $0x8e8] sm:$0xff] %v1398_v29  ;;  %v1404_v32 = vld [vmem:[%s5199_s25 + $0x10c8] sm:$0xff] }
  0xa0   : > { %1401 = vst [vmem:[%s5204_s26 + $0x8f0] sm:$0xff] %v1400_v30  ;;  %1403 = vst [vmem:[%s5204_s26 + $0x8f8] sm:$0xff] %v1402_v31  ;;  %v1406_v33 = vld [vmem:[%s5199_s25 + $0x10d0] sm:$0xff]  ;;  %v1408_v34 = vld [vmem:[%s5199_s25 + $0x10d8] sm:$0xff] }
  0xa1   : > { %1405 = vst [vmem:[%s5204_s26 + $0x900] sm:$0xff] %v1404_v32  ;;  %1407 = vst [vmem:[%s5204_s26 + $0x908] sm:$0xff] %v1406_v33  ;;  %v1410_v35 = vld [vmem:[%s5199_s25 + $0x10e0] sm:$0xff]  ;;  %v1412_v36 = vld [vmem:[%s5199_s25 + $0x10e8] sm:$0xff] }
  0xa2   : > { %1409 = vst [vmem:[%s5204_s26 + $0x910] sm:$0xff] %v1408_v34  ;;  %v1414_v37 = vld [vmem:[%s5199_s25 + $0x10f0] sm:$0xff]  ;;  %1411 = vst [vmem:[%s5204_s26 + $0x918] sm:$0xff] %v1410_v35  ;;  %v1416_v38 = vld [vmem:[%s5199_s25 + $0x10f8] sm:$0xff] }
  0xa3   : > { %1413 = vst [vmem:[%s5204_s26 + $0x920] sm:$0xff] %v1412_v36  ;;  %1415 = vst [vmem:[%s5204_s26 + $0x928] sm:$0xff] %v1414_v37  ;;  %v1418_v39 = vld [vmem:[%s5199_s25 + $0x1100] sm:$0xff]  ;;  %v1420_v40 = vld [vmem:[%s5199_s25 + $0x1108] sm:$0xff] }
  0xa4   : > { %1417 = vst [vmem:[%s5204_s26 + $0x930] sm:$0xff] %v1416_v38  ;;  %1419 = vst [vmem:[%s5204_s26 + $0x938] sm:$0xff] %v1418_v39  ;;  %v1422_v41 = vld [vmem:[%s5199_s25 + $0x1110] sm:$0xff]  ;;  %v1424_v42 = vld [vmem:[%s5199_s25 + $0x1118] sm:$0xff] }
  0xa5   : > { %1421 = vst [vmem:[%s5204_s26 + $0x940] sm:$0xff] %v1420_v40  ;;  %v1426_v43 = vld [vmem:[%s5199_s25 + $0x1120] sm:$0xff]  ;;  %1423 = vst [vmem:[%s5204_s26 + $0x948] sm:$0xff] %v1422_v41  ;;  %v1428_v44 = vld [vmem:[%s5199_s25 + $0x1128] sm:$0xff] }
  0xa6   : > { %1425 = vst [vmem:[%s5204_s26 + $0x950] sm:$0xff] %v1424_v42  ;;  %1427 = vst [vmem:[%s5204_s26 + $0x958] sm:$0xff] %v1426_v43  ;;  %v1430_v45 = vld [vmem:[%s5199_s25 + $0x1130] sm:$0xff]  ;;  %v1432_v46 = vld [vmem:[%s5199_s25 + $0x1138] sm:$0xff] }
  0xa7   : > { %1429 = vst [vmem:[%s5204_s26 + $0x960] sm:$0xff] %v1428_v44  ;;  %1431 = vst [vmem:[%s5204_s26 + $0x968] sm:$0xff] %v1430_v45  ;;  %v1434_v47 = vld [vmem:[%s5199_s25 + $0x1140] sm:$0xff]  ;;  %v1436_v48 = vld [vmem:[%s5199_s25 + $0x1148] sm:$0xff] }
  0xa8   : > { %1433 = vst [vmem:[%s5204_s26 + $0x970] sm:$0xff] %v1432_v46  ;;  %v1438_v49 = vld [vmem:[%s5199_s25 + $0x1150] sm:$0xff]  ;;  %1435 = vst [vmem:[%s5204_s26 + $0x978] sm:$0xff] %v1434_v47  ;;  %v1440_v50 = vld [vmem:[%s5199_s25 + $0x1158] sm:$0xff] }
  0xa9   : > { %1437 = vst [vmem:[%s5204_s26 + $0x980] sm:$0xff] %v1436_v48  ;;  %1439 = vst [vmem:[%s5204_s26 + $0x988] sm:$0xff] %v1438_v49  ;;  %v1442_v51 = vld [vmem:[%s5199_s25 + $0x1160] sm:$0xff]  ;;  %v1444_v52 = vld [vmem:[%s5199_s25 + $0x1168] sm:$0xff] }
  0xaa   : > { %1441 = vst [vmem:[%s5204_s26 + $0x990] sm:$0xff] %v1440_v50  ;;  %1443 = vst [vmem:[%s5204_s26 + $0x998] sm:$0xff] %v1442_v51  ;;  %v1446_v53 = vld [vmem:[%s5199_s25 + $0x1170] sm:$0xff]  ;;  %v1448_v54 = vld [vmem:[%s5199_s25 + $0x1178] sm:$0xff] }
  0xab   : > { %1445 = vst [vmem:[%s5204_s26 + $0x9a0] sm:$0xff] %v1444_v52  ;;  %v1450_v55 = vld [vmem:[%s5199_s25 + $0x1180] sm:$0xff]  ;;  %1447 = vst [vmem:[%s5204_s26 + $0x9a8] sm:$0xff] %v1446_v53  ;;  %v1452_v56 = vld [vmem:[%s5199_s25 + $0x1188] sm:$0xff] }
  0xac   : > { %1449 = vst [vmem:[%s5204_s26 + $0x9b0] sm:$0xff] %v1448_v54  ;;  %1451 = vst [vmem:[%s5204_s26 + $0x9b8] sm:$0xff] %v1450_v55  ;;  %v1454_v57 = vld [vmem:[%s5199_s25 + $0x1190] sm:$0xff]  ;;  %v1456_v58 = vld [vmem:[%s5199_s25 + $0x1198] sm:$0xff] }
  0xad   : > { %1453 = vst [vmem:[%s5204_s26 + $0x9c0] sm:$0xff] %v1452_v56  ;;  %1455 = vst [vmem:[%s5204_s26 + $0x9c8] sm:$0xff] %v1454_v57  ;;  %v1458_v59 = vld [vmem:[%s5199_s25 + $0x11a0] sm:$0xff]  ;;  %v1460_v60 = vld [vmem:[%s5199_s25 + $0x11a8] sm:$0xff] }
  0xae   : > { %1457 = vst [vmem:[%s5204_s26 + $0x9d0] sm:$0xff] %v1456_v58  ;;  %v1462_v61 = vld [vmem:[%s5199_s25 + $0x11b0] sm:$0xff]  ;;  %1459 = vst [vmem:[%s5204_s26 + $0x9d8] sm:$0xff] %v1458_v59  ;;  %v1464_v62 = vld [vmem:[%s5199_s25 + $0x11b8] sm:$0xff] }
  0xaf   : > { %1461 = vst [vmem:[%s5204_s26 + $0x9e0] sm:$0xff] %v1460_v60  ;;  %1463 = vst [vmem:[%s5204_s26 + $0x9e8] sm:$0xff] %v1462_v61  ;;  %v1466_v63 = vld [vmem:[%s5199_s25 + $0x11c0] sm:$0xff]  ;;  %v1468_v0 = vld [vmem:[%s5199_s25 + $0x11c8] sm:$0xff] }
  0xb0   : > { %1465 = vst [vmem:[%s5204_s26 + $0x9f0] sm:$0xff] %v1464_v62  ;;  %1467 = vst [vmem:[%s5204_s26 + $0x9f8] sm:$0xff] %v1466_v63  ;;  %v1470_v1 = vld [vmem:[%s5199_s25 + $0x11d0] sm:$0xff]  ;;  %v1472_v2 = vld [vmem:[%s5199_s25 + $0x11d8] sm:$0xff] }
  0xb1   : > { %1469 = vst [vmem:[%s5204_s26 + $0xa00] sm:$0xff] %v1468_v0  ;;  %v1474_v3 = vld [vmem:[%s5199_s25 + $0x11e0] sm:$0xff]  ;;  %1471 = vst [vmem:[%s5204_s26 + $0xa08] sm:$0xff] %v1470_v1  ;;  %v1476_v4 = vld [vmem:[%s5199_s25 + $0x11e8] sm:$0xff] }
  0xb2   : > { %1473 = vst [vmem:[%s5204_s26 + $0xa10] sm:$0xff] %v1472_v2  ;;  %1475 = vst [vmem:[%s5204_s26 + $0xa18] sm:$0xff] %v1474_v3  ;;  %v1478_v5 = vld [vmem:[%s5199_s25 + $0x11f0] sm:$0xff]  ;;  %v1480_v6 = vld [vmem:[%s5199_s25 + $0x11f8] sm:$0xff] }
  0xb3   : > { %1477 = vst [vmem:[%s5204_s26 + $0xa20] sm:$0xff] %v1476_v4  ;;  %1479 = vst [vmem:[%s5204_s26 + $0xa28] sm:$0xff] %v1478_v5  ;;  %v1482_v7 = vld [vmem:[%s5199_s25 + $0x1200] sm:$0xff]  ;;  %v1484_v8 = vld [vmem:[%s5199_s25 + $0x1208] sm:$0xff] }
  0xb4   : > { %1481 = vst [vmem:[%s5204_s26 + $0xa30] sm:$0xff] %v1480_v6  ;;  %v1486_v9 = vld [vmem:[%s5199_s25 + $0x1210] sm:$0xff]  ;;  %1483 = vst [vmem:[%s5204_s26 + $0xa38] sm:$0xff] %v1482_v7  ;;  %v1488_v10 = vld [vmem:[%s5199_s25 + $0x1218] sm:$0xff] }
  0xb5   : > { %1485 = vst [vmem:[%s5204_s26 + $0xa40] sm:$0xff] %v1484_v8  ;;  %1487 = vst [vmem:[%s5204_s26 + $0xa48] sm:$0xff] %v1486_v9  ;;  %v1490_v11 = vld [vmem:[%s5199_s25 + $0x1220] sm:$0xff] }
  0xb6   : > { %1489 = vst [vmem:[%s5204_s26 + $0xa50] sm:$0xff] %v1488_v10  ;;  %1491 = vst [vmem:[%s5204_s26 + $0xa58] sm:$0xff] %v1490_v11 }
  0xb7 PF: > { %p4178_p5 = scmp.ge.s32.totalorder %s5143_s14, 1  ;;  %p1496_p6 = scmp.lt.s32.totalorder %s5143_s14, 3 }
  0xb9   : > { %p1497_p7 = pnand %p4178_p5, %p1496_p6 }
  0xbb   : > { %1500 = sbr.rel (%p1497_p7) target bundleno = 758 (0x2f6), region = 66 }
  0xc0   : > { %v1880_v12 = vld [vmem:[%s6944_s1 + $0x78] sm:$0xff]  ;;  %v1879_v13 = vld [vmem:[%s6944_s1 + $0x70] sm:$0xff]  ;;  %v1878_v14 = vld [vmem:[%s6944_s1 + $0x68] sm:$0xff]  ;;  %s1503_s30 = sand.u32 1, %s5135_s12   ;;  %s1527_s18 = smul.u32 83, %s4173_s15 }
  0xc1   : > { %4532 = vmatprep.subr.mxu0 %v1880_v12  ;;  %5062 = vmatprep.subr.mxu1 %v1880_v12  ;;  %v1877_v15 = vld [vmem:[%s6944_s1 + $0x60] sm:$0xff]  ;;  %v1876_v16 = vld [vmem:[%s6944_s1 + $0x58] sm:$0xff]  ;;  %v1875_v17 = vld [vmem:[%s6944_s1 + $0x50] sm:$0xff]  ;;  %s5095_s6 = smul.u32 2656, %s1503_s30 }
  0xc2   : > { %4533 = vmatpush3.msra.mxu0 %v1880_v12  ;;  %5078 = vmatpush3.msra.mxu1 %v1880_v12  ;;  %v1874_v18 = vld [vmem:[%s6944_s1 + $0x48] sm:$0xff]  ;;  %v1873_v19 = vld [vmem:[%s6944_s1 + $0x40] sm:$0xff]  ;;  %v1872_v20 = vld [vmem:[%s6944_s1 + $0x38] sm:$0xff]  ;;  %p1528_p8 = scmp.lt.s32.totalorder %s1527_s18, 165 }
  0xc3   : > { %4534 = vmatprep.subr.mxu0 %v1879_v13  ;;  %5063 = vmatprep.subr.mxu1 %v1879_v13  ;;  %v1871_v21 = vld [vmem:[%s6944_s1 + $0x30] sm:$0xff]  ;;  %v1870_v22 = vld [vmem:[%s6944_s1 + $0x28] sm:$0xff]  ;;  %v1869_v23 = vld [vmem:[%s6944_s1 + $0x20] sm:$0xff]  ;;  %s5918_s17 = scalar_lea.vmem [#allocation2], %s5095_s6 }
  0xc4   : > { %4535 = vmatpush3.msra.mxu0 %v1879_v13  ;;  %5079 = vmatpush3.msra.mxu1 %v1879_v13  ;;  %v1868_v24 = vld [vmem:[%s6944_s1 + $0x18] sm:$0xff]  ;;  %v1867_v25 = vld [vmem:[%s6944_s1 + $0x10] sm:$0xff]  ;;  %v1866_v26 = vld [vmem:[%s6944_s1 + $0x8] sm:$0xff]  ;;  %s7183_s18 = smov (!%p1528_p8, %s1527_s18), 165 }
  0xc5   : > { %4536 = vmatprep.subr.mxu0 %v1878_v14  ;;  %5064 = vmatprep.subr.mxu1 %v1878_v14  ;;  %v1865_v27 = vld [vmem:[%s6944_s1] sm:$0xff]  ;;  %v1699_v29 = vld [vmem:[%s5918_s17 + $0x530] sm:$0xff]  ;;  %v1534_v30 = vld [vmem:[%s5918_s17 + $0x8] sm:$0xff]  ;;  %s4179_s20 = sshll.u32 %s7183_s18, 3 }
  0xc6   : > { %4537 = vmatpush3.msra.mxu0 %v1878_v14  ;;  %5080 = vmatpush3.msra.mxu1 %v1878_v14  ;;  %v1533_v28 = vld [vmem:[%s5918_s17] sm:$0xff]  ;;  %v1700_v31 = vld [vmem:[%s5918_s17 + $0x538] sm:$0xff]  ;;  %v1535_v32 = vld [vmem:[%s5918_s17 + $0x10] sm:$0xff]  ;;  %s6599_s23 = scalar_lea.vmem %s6946_s3, %s4179_s20 }
  0xc7   : > { %4538 = vmatprep.subr.mxu0 %v1877_v15  ;;  %5065 = vmatprep.subr.mxu1 %v1877_v15  ;;  %v1701_v33 = vld [vmem:[%s5918_s17 + $0x540] sm:$0xff]  ;;  %v1536_v34 = vld [vmem:[%s5918_s17 + $0x18] sm:$0xff]  ;;  %v1702_v35 = vld [vmem:[%s5918_s17 + $0x548] sm:$0xff] }
  0xc8   : > { %4539 = vmatpush3.msra.mxu0 %v1877_v15  ;;  %5081 = vmatpush3.msra.mxu1 %v1877_v15  ;;  %v1537_v36 = vld [vmem:[%s5918_s17 + $0x20] sm:$0xff]  ;;  %v1703_v37 = vld [vmem:[%s5918_s17 + $0x550] sm:$0xff]  ;;  %v1538_v38 = vld [vmem:[%s5918_s17 + $0x28] sm:$0xff] }
  0xc9   : > { %4540 = vmatprep.subr.mxu0 %v1876_v16  ;;  %5066 = vmatprep.subr.mxu1 %v1876_v16  ;;  %v1704_v39 = vld [vmem:[%s5918_s17 + $0x558] sm:$0xff]  ;;  %v1539_v40 = vld [vmem:[%s5918_s17 + $0x30] sm:$0xff]  ;;  %v1705_v41 = vld [vmem:[%s5918_s17 + $0x560] sm:$0xff] }
  0xca   : > { %4541 = vmatpush3.msra.mxu0 %v1876_v16  ;;  %5082 = vmatpush3.msra.mxu1 %v1876_v16  ;;  %v1540_v42 = vld [vmem:[%s5918_s17 + $0x38] sm:$0xff]  ;;  %v1706_v43 = vld [vmem:[%s5918_s17 + $0x568] sm:$0xff]  ;;  %v1541_v44 = vld [vmem:[%s5918_s17 + $0x40] sm:$0xff] }
  0xcb   : > { %4542 = vmatprep.subr.mxu0 %v1875_v17  ;;  %5067 = vmatprep.subr.mxu1 %v1875_v17  ;;  %v1707_v45 = vld [vmem:[%s5918_s17 + $0x570] sm:$0xff]  ;;  %v1542_v46 = vld [vmem:[%s5918_s17 + $0x48] sm:$0xff]  ;;  %v1708_v47 = vld [vmem:[%s5918_s17 + $0x578] sm:$0xff] }
  0xcc   : > { %4543 = vmatpush3.msra.mxu0 %v1875_v17  ;;  %5083 = vmatpush3.msra.mxu1 %v1875_v17  ;;  %v1543_v48 = vld [vmem:[%s5918_s17 + $0x50] sm:$0xff]  ;;  %v1709_v49 = vld [vmem:[%s5918_s17 + $0x580] sm:$0xff]  ;;  %v1544_v50 = vld [vmem:[%s5918_s17 + $0x58] sm:$0xff] }
  0xcd   : > { %4544 = vmatprep.subr.mxu0 %v1874_v18  ;;  %5068 = vmatprep.subr.mxu1 %v1874_v18  ;;  %v1710_v51 = vld [vmem:[%s5918_s17 + $0x588] sm:$0xff]  ;;  %v1545_v52 = vld [vmem:[%s5918_s17 + $0x60] sm:$0xff]  ;;  %v1711_v53 = vld [vmem:[%s5918_s17 + $0x590] sm:$0xff] }
  0xce   : > { %4545 = vmatpush3.msra.mxu0 %v1874_v18  ;;  %5084 = vmatpush3.msra.mxu1 %v1874_v18  ;;  %v1546_v54 = vld [vmem:[%s5918_s17 + $0x68] sm:$0xff]  ;;  %v1712_v55 = vld [vmem:[%s5918_s17 + $0x598] sm:$0xff]  ;;  %v1547_v56 = vld [vmem:[%s5918_s17 + $0x70] sm:$0xff] }
  0xcf   : > { %4546 = vmatprep.subr.mxu0 %v1873_v19  ;;  %5069 = vmatprep.subr.mxu1 %v1873_v19  ;;  %v1713_v57 = vld [vmem:[%s5918_s17 + $0x5a0] sm:$0xff]  ;;  %v1548_v58 = vld [vmem:[%s5918_s17 + $0x78] sm:$0xff]  ;;  %v1714_v59 = vld [vmem:[%s5918_s17 + $0x5a8] sm:$0xff] }
  0xd0   : > { %4547 = vmatpush3.msra.mxu0 %v1873_v19  ;;  %5085 = vmatpush3.msra.mxu1 %v1873_v19  ;;  %v1549_v60 = vld [vmem:[%s5918_s17 + $0x80] sm:$0xff]  ;;  %v1715_v61 = vld [vmem:[%s5918_s17 + $0x5b0] sm:$0xff]  ;;  %v1550_v62 = vld [vmem:[%s5918_s17 + $0x88] sm:$0xff] }
  0xd1   : > { %4548 = vmatprep.subr.mxu0 %v1872_v20  ;;  %5070 = vmatprep.subr.mxu1 %v1872_v20  ;;  %v1716_v63 = vld [vmem:[%s5918_s17 + $0x5b8] sm:$0xff]  ;;  %v1551_v0 = vld [vmem:[%s5918_s17 + $0x90] sm:$0xff]  ;;  %v1717_v1 = vld [vmem:[%s5918_s17 + $0x5c0] sm:$0xff] }
  0xd2   : > { %4549 = vmatpush3.msra.mxu0 %v1872_v20  ;;  %5086 = vmatpush3.msra.mxu1 %v1872_v20  ;;  %v1552_v2 = vld [vmem:[%s5918_s17 + $0x98] sm:$0xff]  ;;  %v1718_v3 = vld [vmem:[%s5918_s17 + $0x5c8] sm:$0xff]  ;;  %v1553_v4 = vld [vmem:[%s5918_s17 + $0xa0] sm:$0xff] }
  0xd3   : > { %4550 = vmatprep.subr.mxu0 %v1871_v21  ;;  %5071 = vmatprep.subr.mxu1 %v1871_v21  ;;  %v1719_v5 = vld [vmem:[%s5918_s17 + $0x5d0] sm:$0xff]  ;;  %v1554_v6 = vld [vmem:[%s5918_s17 + $0xa8] sm:$0xff]  ;;  %v1720_v7 = vld [vmem:[%s5918_s17 + $0x5d8] sm:$0xff] }
  0xd4   : > { %4551 = vmatpush3.msra.mxu0 %v1871_v21  ;;  %5087 = vmatpush3.msra.mxu1 %v1871_v21  ;;  %v1555_v8 = vld [vmem:[%s5918_s17 + $0xb0] sm:$0xff]  ;;  %v1721_v9 = vld [vmem:[%s5918_s17 + $0x5e0] sm:$0xff]  ;;  %v1556_v10 = vld [vmem:[%s5918_s17 + $0xb8] sm:$0xff] }
  0xd5   : > { %4552 = vmatprep.subr.mxu0 %v1870_v22  ;;  %5072 = vmatprep.subr.mxu1 %v1870_v22  ;;  %v1722_v11 = vld [vmem:[%s5918_s17 + $0x5e8] sm:$0xff]  ;;  %v1557_v12 = vld [vmem:[%s5918_s17 + $0xc0] sm:$0xff]  ;;  %v1723_v13 = vld [vmem:[%s5918_s17 + $0x5f0] sm:$0xff] }
  0xd6   : > { %4553 = vmatpush3.msra.mxu0 %v1870_v22  ;;  %5088 = vmatpush3.msra.mxu1 %v1870_v22  ;;  %v1558_v14 = vld [vmem:[%s5918_s17 + $0xc8] sm:$0xff]  ;;  %v1724_v15 = vld [vmem:[%s5918_s17 + $0x5f8] sm:$0xff]  ;;  %v1559_v16 = vld [vmem:[%s5918_s17 + $0xd0] sm:$0xff] }
  0xd7   : > { %4554 = vmatprep.subr.mxu0 %v1869_v23  ;;  %5073 = vmatprep.subr.mxu1 %v1869_v23  ;;  %v1725_v17 = vld [vmem:[%s5918_s17 + $0x600] sm:$0xff]  ;;  %v1560_v18 = vld [vmem:[%s5918_s17 + $0xd8] sm:$0xff]  ;;  %v1726_v19 = vld [vmem:[%s5918_s17 + $0x608] sm:$0xff] }
  0xd8   : > { %4555 = vmatpush3.msra.mxu0 %v1869_v23  ;;  %5089 = vmatpush3.msra.mxu1 %v1869_v23  ;;  %v1561_v20 = vld [vmem:[%s5918_s17 + $0xe0] sm:$0xff]  ;;  %v1727_v21 = vld [vmem:[%s5918_s17 + $0x610] sm:$0xff]  ;;  %v1562_v22 = vld [vmem:[%s5918_s17 + $0xe8] sm:$0xff] }
  0xd9   : > { %4556 = vmatprep.subr.mxu0 %v1868_v24  ;;  %5074 = vmatprep.subr.mxu1 %v1868_v24  ;;  %v1728_v23 = vld [vmem:[%s5918_s17 + $0x618] sm:$0xff] }
  0xda   : > { %4557 = vmatpush3.msra.mxu0 %v1868_v24  ;;  %5090 = vmatpush3.msra.mxu1 %v1868_v24  ;;  %v1563_v24 = vld [vmem:[%s5918_s17 + $0xf0] sm:$0xff] }
  0xdb   : > { %4558 = vmatprep.subr.mxu0 %v1867_v25  ;;  %5075 = vmatprep.subr.mxu1 %v1867_v25 }
  0xdc   : > { %4559 = vmatpush3.msra.mxu0 %v1867_v25  ;;  %5091 = vmatpush3.msra.mxu1 %v1867_v25  ;;  %v1729_v25 = vld [vmem:[%s5918_s17 + $0x620] sm:$0xff] }
  0xdd   : > { %4560 = vmatprep.subr.mxu0 %v1866_v26  ;;  %5076 = vmatprep.subr.mxu1 %v1866_v26 }
  0xde   : > { %4561 = vmatpush3.msra.mxu0 %v1866_v26  ;;  %5092 = vmatpush3.msra.mxu1 %v1866_v26  ;;  %v1564_v26 = vld [vmem:[%s5918_s17 + $0xf8] sm:$0xff] }
  0xdf   : > { %4562 = vmatprep.subr.mxu0 %v1865_v27  ;;  %5077 = vmatprep.subr.mxu1 %v1865_v27 }
  0xe0   : > { %4563 = vmatpush3.msra.mxu0 %v1865_v27  ;;  %5093 = vmatpush3.msra.mxu1 %v1865_v27  ;;  %v1730_v27 = vld [vmem:[%s5918_s17 + $0x628] sm:$0xff] }
  0xe1   : > { %4564 = vmatprep.mubr.f32.mxu0 %v1533_v28  ;;  %4813 = vmatprep.mubr.f32.mxu1 %v1699_v29  ;;  %v1565_v28 = vld [vmem:[%s5918_s17 + $0x100] sm:$0xff]  ;;  %v1731_v29 = vld [vmem:[%s5918_s17 + $0x630] sm:$0xff] }
  0xe2   : > { %4565 = vmatmul.mubr.f32.vlgmr.msra.gmra.mxu0 %v1534_v30  ;;  %4814 = vmatmul.mubr.f32.vlgmr.msra.gmra.mxu1 %v1700_v31  ;;  %v1566_v30 = vld [vmem:[%s5918_s17 + $0x108] sm:$0xff]  ;;  %v1732_v31 = vld [vmem:[%s5918_s17 + $0x638] sm:$0xff] }
  0xe3   : > { %4567 = vmatprep.mubr.f32.mxu0 %v1535_v32  ;;  %4816 = vmatprep.mubr.f32.mxu1 %v1701_v33  ;;  %v1567_v32 = vld [vmem:[%s5918_s17 + $0x110] sm:$0xff]  ;;  %v1733_v33 = vld [vmem:[%s5918_s17 + $0x640] sm:$0xff] }
  0xe6   : > { %4568 = vmatmul.mubr.f32.gmra.mxu0 %v1536_v34  ;;  %4817 = vmatmul.mubr.f32.gmra.mxu1 %v1702_v35  ;;  %v1568_v34 = vld [vmem:[%s5918_s17 + $0x118] sm:$0xff]  ;;  %v1734_v35 = vld [vmem:[%s5918_s17 + $0x648] sm:$0xff] }
  0xe7   : > { %4570 = vmatprep.mubr.f32.mxu0 %v1537_v36  ;;  %4819 = vmatprep.mubr.f32.mxu1 %v1703_v37  ;;  %v1569_v36 = vld [vmem:[%s5918_s17 + $0x120] sm:$0xff]  ;;  %v1735_v37 = vld [vmem:[%s5918_s17 + $0x650] sm:$0xff] }
  0xea   : > { %4571 = vmatmul.mubr.f32.gmra.mxu0 %v1538_v38  ;;  %4820 = vmatmul.mubr.f32.gmra.mxu1 %v1704_v39  ;;  %v1570_v38 = vld [vmem:[%s5918_s17 + $0x128] sm:$0xff]  ;;  %v1736_v39 = vld [vmem:[%s5918_s17 + $0x658] sm:$0xff] }
  0xeb   : > { %4573 = vmatprep.mubr.f32.mxu0 %v1539_v40  ;;  %4822 = vmatprep.mubr.f32.mxu1 %v1705_v41  ;;  %v1571_v40 = vld [vmem:[%s5918_s17 + $0x130] sm:$0xff]  ;;  %v1737_v41 = vld [vmem:[%s5918_s17 + $0x660] sm:$0xff] }
  0xee   : > { %4574 = vmatmul.mubr.f32.gmra.mxu0 %v1540_v42  ;;  %4823 = vmatmul.mubr.f32.gmra.mxu1 %v1706_v43  ;;  %v1572_v42 = vld [vmem:[%s5918_s17 + $0x138] sm:$0xff]  ;;  %v1738_v43 = vld [vmem:[%s5918_s17 + $0x668] sm:$0xff] }
  0xef   : > { %4576 = vmatprep.mubr.f32.mxu0 %v1541_v44  ;;  %4825 = vmatprep.mubr.f32.mxu1 %v1707_v45  ;;  %v1573_v44 = vld [vmem:[%s5918_s17 + $0x140] sm:$0xff]  ;;  %v1739_v45 = vld [vmem:[%s5918_s17 + $0x670] sm:$0xff] }
  0xf2   : > { %4577 = vmatmul.mubr.f32.gmra.mxu0 %v1542_v46  ;;  %4826 = vmatmul.mubr.f32.gmra.mxu1 %v1708_v47  ;;  %v1574_v46 = vld [vmem:[%s5918_s17 + $0x148] sm:$0xff]  ;;  %v1740_v47 = vld [vmem:[%s5918_s17 + $0x678] sm:$0xff] }
  0xf3   : > { %4579 = vmatprep.mubr.f32.mxu0 %v1543_v48  ;;  %4828 = vmatprep.mubr.f32.mxu1 %v1709_v49  ;;  %v1575_v48 = vld [vmem:[%s5918_s17 + $0x150] sm:$0xff]  ;;  %v1741_v49 = vld [vmem:[%s5918_s17 + $0x680] sm:$0xff] }
  0xf6   : > { %4580 = vmatmul.mubr.f32.gmra.mxu0 %v1544_v50  ;;  %4829 = vmatmul.mubr.f32.gmra.mxu1 %v1710_v51  ;;  %v1576_v50 = vld [vmem:[%s5918_s17 + $0x158] sm:$0xff]  ;;  %v1742_v51 = vld [vmem:[%s5918_s17 + $0x688] sm:$0xff] }
  0xf7   : > { %4582 = vmatprep.mubr.f32.mxu0 %v1545_v52  ;;  %4831 = vmatprep.mubr.f32.mxu1 %v1711_v53  ;;  %v1577_v52 = vld [vmem:[%s5918_s17 + $0x160] sm:$0xff]  ;;  %v1743_v53 = vld [vmem:[%s5918_s17 + $0x690] sm:$0xff] }
  0xfa   : > { %4583 = vmatmul.mubr.f32.gmra.mxu0 %v1546_v54  ;;  %4832 = vmatmul.mubr.f32.gmra.mxu1 %v1712_v55  ;;  %v1578_v54 = vld [vmem:[%s5918_s17 + $0x168] sm:$0xff]  ;;  %v1744_v55 = vld [vmem:[%s5918_s17 + $0x698] sm:$0xff] }
  0xfb   : > { %4585 = vmatprep.mubr.f32.mxu0 %v1547_v56  ;;  %4834 = vmatprep.mubr.f32.mxu1 %v1713_v57  ;;  %v1579_v56 = vld [vmem:[%s5918_s17 + $0x170] sm:$0xff]  ;;  %v1745_v57 = vld [vmem:[%s5918_s17 + $0x6a0] sm:$0xff] }
  0xfe   : > { %4586 = vmatmul.mubr.f32.gmra.mxu0 %v1548_v58  ;;  %4835 = vmatmul.mubr.f32.gmra.mxu1 %v1714_v59  ;;  %v1580_v58 = vld [vmem:[%s5918_s17 + $0x178] sm:$0xff]  ;;  %v1746_v59 = vld [vmem:[%s5918_s17 + $0x6a8] sm:$0xff] }
  0xff   : > { %4588 = vmatprep.mubr.f32.mxu0 %v1549_v60  ;;  %4837 = vmatprep.mubr.f32.mxu1 %v1715_v61  ;;  %v1581_v60 = vld [vmem:[%s5918_s17 + $0x180] sm:$0xff]  ;;  %v1747_v61 = vld [vmem:[%s5918_s17 + $0x6b0] sm:$0xff] }
 0x102   : > { %4589 = vmatmul.mubr.f32.gmra.mxu0 %v1550_v62  ;;  %4838 = vmatmul.mubr.f32.gmra.mxu1 %v1716_v63  ;;  %v1582_v62 = vld [vmem:[%s5918_s17 + $0x188] sm:$0xff]  ;;  %v1748_v63 = vld [vmem:[%s5918_s17 + $0x6b8] sm:$0xff] }
 0x103   : > { %4591 = vmatprep.mubr.f32.mxu0 %v1551_v0  ;;  %4840 = vmatprep.mubr.f32.mxu1 %v1717_v1  ;;  %v1583_v0 = vld [vmem:[%s5918_s17 + $0x190] sm:$0xff]  ;;  %v1749_v1 = vld [vmem:[%s5918_s17 + $0x6c0] sm:$0xff] }
 0x106   : > { %4592 = vmatmul.mubr.f32.gmra.mxu0 %v1552_v2  ;;  %4841 = vmatmul.mubr.f32.gmra.mxu1 %v1718_v3  ;;  %v1584_v2 = vld [vmem:[%s5918_s17 + $0x198] sm:$0xff]  ;;  %v1750_v3 = vld [vmem:[%s5918_s17 + $0x6c8] sm:$0xff] }
 0x107   : > { %4594 = vmatprep.mubr.f32.mxu0 %v1553_v4  ;;  %4843 = vmatprep.mubr.f32.mxu1 %v1719_v5  ;;  %v1585_v4 = vld [vmem:[%s5918_s17 + $0x1a0] sm:$0xff]  ;;  %v1751_v5 = vld [vmem:[%s5918_s17 + $0x6d0] sm:$0xff] }
 0x10a   : > { %4595 = vmatmul.mubr.f32.gmra.mxu0 %v1554_v6  ;;  %4844 = vmatmul.mubr.f32.gmra.mxu1 %v1720_v7  ;;  %v1586_v6 = vld [vmem:[%s5918_s17 + $0x1a8] sm:$0xff]  ;;  %v1752_v7 = vld [vmem:[%s5918_s17 + $0x6d8] sm:$0xff] }
 0x10b   : > { %4597 = vmatprep.mubr.f32.mxu0 %v1555_v8  ;;  %4846 = vmatprep.mubr.f32.mxu1 %v1721_v9  ;;  %v1587_v8 = vld [vmem:[%s5918_s17 + $0x1b0] sm:$0xff]  ;;  %v1753_v9 = vld [vmem:[%s5918_s17 + $0x6e0] sm:$0xff] }
 0x10e   : > { %4598 = vmatmul.mubr.f32.gmra.mxu0 %v1556_v10  ;;  %4847 = vmatmul.mubr.f32.gmra.mxu1 %v1722_v11  ;;  %v1588_v10 = vld [vmem:[%s5918_s17 + $0x1b8] sm:$0xff]  ;;  %v1754_v11 = vld [vmem:[%s5918_s17 + $0x6e8] sm:$0xff] }
 0x10f   : > { %4600 = vmatprep.mubr.f32.mxu0 %v1557_v12  ;;  %4849 = vmatprep.mubr.f32.mxu1 %v1723_v13  ;;  %v1589_v12 = vld [vmem:[%s5918_s17 + $0x1c0] sm:$0xff]  ;;  %v1755_v13 = vld [vmem:[%s5918_s17 + $0x6f0] sm:$0xff] }
 0x112   : > { %4601 = vmatmul.mubr.f32.gmra.mxu0 %v1558_v14  ;;  %4850 = vmatmul.mubr.f32.gmra.mxu1 %v1724_v15  ;;  %v1590_v14 = vld [vmem:[%s5918_s17 + $0x1c8] sm:$0xff]  ;;  %v1756_v15 = vld [vmem:[%s5918_s17 + $0x6f8] sm:$0xff] }
 0x113   : > { %4603 = vmatprep.mubr.f32.mxu0 %v1559_v16  ;;  %4852 = vmatprep.mubr.f32.mxu1 %v1725_v17  ;;  %v1591_v16 = vld [vmem:[%s5918_s17 + $0x1d0] sm:$0xff]  ;;  %v1757_v17 = vld [vmem:[%s5918_s17 + $0x700] sm:$0xff] }
 0x116   : > { %4604 = vmatmul.mubr.f32.gmra.mxu0 %v1560_v18  ;;  %4853 = vmatmul.mubr.f32.gmra.mxu1 %v1726_v19  ;;  %v1592_v18 = vld [vmem:[%s5918_s17 + $0x1d8] sm:$0xff]  ;;  %v1758_v19 = vld [vmem:[%s5918_s17 + $0x708] sm:$0xff] }
 0x117   : > { %4606 = vmatprep.mubr.f32.mxu0 %v1561_v20  ;;  %4855 = vmatprep.mubr.f32.mxu1 %v1727_v21  ;;  %v1593_v20 = vld [vmem:[%s5918_s17 + $0x1e0] sm:$0xff]  ;;  %v1759_v21 = vld [vmem:[%s5918_s17 + $0x710] sm:$0xff] }
 0x11a   : > { %4607 = vmatmul.mubr.f32.gmra.mxu0 %v1562_v22  ;;  %4856 = vmatmul.mubr.f32.gmra.mxu1 %v1728_v23  ;;  %v1594_v22 = vld [vmem:[%s5918_s17 + $0x1e8] sm:$0xff]  ;;  %v1760_v23 = vld [vmem:[%s5918_s17 + $0x718] sm:$0xff] }
 0x11b   : > { %4609 = vmatprep.mubr.f32.mxu0 %v1563_v24  ;;  %4858 = vmatprep.mubr.f32.mxu1 %v1729_v25  ;;  %v1595_v24 = vld [vmem:[%s5918_s17 + $0x1f0] sm:$0xff]  ;;  %v1761_v25 = vld [vmem:[%s5918_s17 + $0x720] sm:$0xff] }
 0x11e   : > { %4610 = vmatmul.mubr.f32.gmra.mxu0 %v1564_v26  ;;  %4859 = vmatmul.mubr.f32.gmra.mxu1 %v1730_v27  ;;  %v1596_v26 = vld [vmem:[%s5918_s17 + $0x1f8] sm:$0xff]  ;;  %v1762_v27 = vld [vmem:[%s5918_s17 + $0x728] sm:$0xff] }
 0x11f   : > { %4612 = vmatprep.mubr.f32.mxu0 %v1565_v28  ;;  %4861 = vmatprep.mubr.f32.mxu1 %v1731_v29  ;;  %v1597_v28 = vld [vmem:[%s5918_s17 + $0x200] sm:$0xff]  ;;  %v1763_v29 = vld [vmem:[%s5918_s17 + $0x730] sm:$0xff] }
 0x122   : > { %4613 = vmatmul.mubr.f32.gmra.mxu0 %v1566_v30  ;;  %4862 = vmatmul.mubr.f32.gmra.mxu1 %v1732_v31  ;;  %v1598_v30 = vld [vmem:[%s5918_s17 + $0x208] sm:$0xff]  ;;  %v1764_v31 = vld [vmem:[%s5918_s17 + $0x738] sm:$0xff] }
 0x123   : > { %4615 = vmatprep.mubr.f32.mxu0 %v1567_v32  ;;  %4864 = vmatprep.mubr.f32.mxu1 %v1733_v33  ;;  %v1599_v32 = vld [vmem:[%s5918_s17 + $0x210] sm:$0xff]  ;;  %v1765_v33 = vld [vmem:[%s5918_s17 + $0x740] sm:$0xff] }
 0x126   : > { %4616 = vmatmul.mubr.f32.gmra.mxu0 %v1568_v34  ;;  %4865 = vmatmul.mubr.f32.gmra.mxu1 %v1734_v35  ;;  %v1600_v34 = vld [vmem:[%s5918_s17 + $0x218] sm:$0xff]  ;;  %v1766_v35 = vld [vmem:[%s5918_s17 + $0x748] sm:$0xff] }
 0x127   : > { %4618 = vmatprep.mubr.f32.mxu0 %v1569_v36  ;;  %4867 = vmatprep.mubr.f32.mxu1 %v1735_v37  ;;  %v1601_v36 = vld [vmem:[%s5918_s17 + $0x220] sm:$0xff]  ;;  %v1767_v37 = vld [vmem:[%s5918_s17 + $0x750] sm:$0xff] }
 0x12a   : > { %4619 = vmatmul.mubr.f32.gmra.mxu0 %v1570_v38  ;;  %4868 = vmatmul.mubr.f32.gmra.mxu1 %v1736_v39  ;;  %v1602_v38 = vld [vmem:[%s5918_s17 + $0x228] sm:$0xff]  ;;  %v1768_v39 = vld [vmem:[%s5918_s17 + $0x758] sm:$0xff] }
 0x12b   : > { %4621 = vmatprep.mubr.f32.mxu0 %v1571_v40  ;;  %4870 = vmatprep.mubr.f32.mxu1 %v1737_v41  ;;  %v1603_v40 = vld [vmem:[%s5918_s17 + $0x230] sm:$0xff]  ;;  %v1769_v41 = vld [vmem:[%s5918_s17 + $0x760] sm:$0xff] }
 0x12e   : > { %4622 = vmatmul.mubr.f32.gmra.mxu0 %v1572_v42  ;;  %4871 = vmatmul.mubr.f32.gmra.mxu1 %v1738_v43  ;;  %v1604_v42 = vld [vmem:[%s5918_s17 + $0x238] sm:$0xff]  ;;  %v1770_v43 = vld [vmem:[%s5918_s17 + $0x768] sm:$0xff] }
 0x12f   : > { %4624 = vmatprep.mubr.f32.mxu0 %v1573_v44  ;;  %4873 = vmatprep.mubr.f32.mxu1 %v1739_v45  ;;  %v1605_v44 = vld [vmem:[%s5918_s17 + $0x240] sm:$0xff]  ;;  %v1771_v45 = vld [vmem:[%s5918_s17 + $0x770] sm:$0xff] }
 0x132   : > { %4625 = vmatmul.mubr.f32.gmra.mxu0 %v1574_v46  ;;  %4874 = vmatmul.mubr.f32.gmra.mxu1 %v1740_v47  ;;  %v1606_v46 = vld [vmem:[%s5918_s17 + $0x248] sm:$0xff]  ;;  %v1772_v47 = vld [vmem:[%s5918_s17 + $0x778] sm:$0xff] }
 0x133   : > { %4627 = vmatprep.mubr.f32.mxu0 %v1575_v48  ;;  %4876 = vmatprep.mubr.f32.mxu1 %v1741_v49  ;;  %v1607_v48 = vld [vmem:[%s5918_s17 + $0x250] sm:$0xff]  ;;  %v1773_v49 = vld [vmem:[%s5918_s17 + $0x780] sm:$0xff] }
 0x136   : > { %4628 = vmatmul.mubr.f32.gmra.mxu0 %v1576_v50  ;;  %4877 = vmatmul.mubr.f32.gmra.mxu1 %v1742_v51  ;;  %v1608_v50 = vld [vmem:[%s5918_s17 + $0x258] sm:$0xff]  ;;  %v1774_v51 = vld [vmem:[%s5918_s17 + $0x788] sm:$0xff] }
 0x137   : > { %4630 = vmatprep.mubr.f32.mxu0 %v1577_v52  ;;  %4879 = vmatprep.mubr.f32.mxu1 %v1743_v53  ;;  %v1609_v52 = vld [vmem:[%s5918_s17 + $0x260] sm:$0xff]  ;;  %v1775_v53 = vld [vmem:[%s5918_s17 + $0x790] sm:$0xff] }
 0x13a   : > { %4631 = vmatmul.mubr.f32.gmra.mxu0 %v1578_v54  ;;  %4880 = vmatmul.mubr.f32.gmra.mxu1 %v1744_v55  ;;  %v1610_v54 = vld [vmem:[%s5918_s17 + $0x268] sm:$0xff]  ;;  %v1776_v55 = vld [vmem:[%s5918_s17 + $0x798] sm:$0xff] }
 0x13b   : > { %4633 = vmatprep.mubr.f32.mxu0 %v1579_v56  ;;  %4882 = vmatprep.mubr.f32.mxu1 %v1745_v57  ;;  %v1611_v56 = vld [vmem:[%s5918_s17 + $0x270] sm:$0xff]  ;;  %v1777_v57 = vld [vmem:[%s5918_s17 + $0x7a0] sm:$0xff] }
 0x13e   : > { %4634 = vmatmul.mubr.f32.gmra.mxu0 %v1580_v58  ;;  %4883 = vmatmul.mubr.f32.gmra.mxu1 %v1746_v59  ;;  %v1612_v58 = vld [vmem:[%s5918_s17 + $0x278] sm:$0xff]  ;;  %v1778_v59 = vld [vmem:[%s5918_s17 + $0x7a8] sm:$0xff] }
 0x13f   : > { %4636 = vmatprep.mubr.f32.mxu0 %v1581_v60  ;;  %4885 = vmatprep.mubr.f32.mxu1 %v1747_v61  ;;  %v1613_v60 = vld [vmem:[%s5918_s17 + $0x280] sm:$0xff]  ;;  %v1779_v61 = vld [vmem:[%s5918_s17 + $0x7b0] sm:$0xff] }
 0x142   : > { %4637 = vmatmul.mubr.f32.gmra.mxu0 %v1582_v62  ;;  %4886 = vmatmul.mubr.f32.gmra.mxu1 %v1748_v63  ;;  %v1614_v62 = vld [vmem:[%s5918_s17 + $0x288] sm:$0xff]  ;;  %v1780_v63 = vld [vmem:[%s5918_s17 + $0x7b8] sm:$0xff] }
 0x143   : > { %4639 = vmatprep.mubr.f32.mxu0 %v1583_v0  ;;  %4888 = vmatprep.mubr.f32.mxu1 %v1749_v1  ;;  %v1615_v0 = vld [vmem:[%s5918_s17 + $0x290] sm:$0xff]  ;;  %v1781_v1 = vld [vmem:[%s5918_s17 + $0x7c0] sm:$0xff] }
 0x146   : > { %4640 = vmatmul.mubr.f32.gmra.mxu0 %v1584_v2  ;;  %4889 = vmatmul.mubr.f32.gmra.mxu1 %v1750_v3  ;;  %v1616_v2 = vld [vmem:[%s5918_s17 + $0x298] sm:$0xff]  ;;  %v1782_v3 = vld [vmem:[%s5918_s17 + $0x7c8] sm:$0xff] }
 0x147   : > { %4642 = vmatprep.mubr.f32.mxu0 %v1585_v4  ;;  %4891 = vmatprep.mubr.f32.mxu1 %v1751_v5  ;;  %v1617_v4 = vld [vmem:[%s5918_s17 + $0x2a0] sm:$0xff]  ;;  %v1783_v5 = vld [vmem:[%s5918_s17 + $0x7d0] sm:$0xff] }
 0x14a   : > { %4643 = vmatmul.mubr.f32.gmra.mxu0 %v1586_v6  ;;  %4892 = vmatmul.mubr.f32.gmra.mxu1 %v1752_v7  ;;  %v1618_v6 = vld [vmem:[%s5918_s17 + $0x2a8] sm:$0xff]  ;;  %v1784_v7 = vld [vmem:[%s5918_s17 + $0x7d8] sm:$0xff] }
 0x14b   : > { %4645 = vmatprep.mubr.f32.mxu0 %v1587_v8  ;;  %4894 = vmatprep.mubr.f32.mxu1 %v1753_v9  ;;  %v1619_v8 = vld [vmem:[%s5918_s17 + $0x2b0] sm:$0xff]  ;;  %v1785_v9 = vld [vmem:[%s5918_s17 + $0x7e0] sm:$0xff] }
 0x14e   : > { %4646 = vmatmul.mubr.f32.gmra.mxu0 %v1588_v10  ;;  %4895 = vmatmul.mubr.f32.gmra.mxu1 %v1754_v11  ;;  %v1620_v10 = vld [vmem:[%s5918_s17 + $0x2b8] sm:$0xff]  ;;  %v1786_v11 = vld [vmem:[%s5918_s17 + $0x7e8] sm:$0xff] }
 0x14f   : > { %4648 = vmatprep.mubr.f32.mxu0 %v1589_v12  ;;  %4897 = vmatprep.mubr.f32.mxu1 %v1755_v13  ;;  %v1621_v12 = vld [vmem:[%s5918_s17 + $0x2c0] sm:$0xff]  ;;  %v1787_v13 = vld [vmem:[%s5918_s17 + $0x7f0] sm:$0xff] }
 0x152   : > { %4649 = vmatmul.mubr.f32.gmra.mxu0 %v1590_v14  ;;  %4898 = vmatmul.mubr.f32.gmra.mxu1 %v1756_v15  ;;  %v1622_v14 = vld [vmem:[%s5918_s17 + $0x2c8] sm:$0xff]  ;;  %v1788_v15 = vld [vmem:[%s5918_s17 + $0x7f8] sm:$0xff] }
 0x153   : > { %4651 = vmatprep.mubr.f32.mxu0 %v1591_v16  ;;  %4900 = vmatprep.mubr.f32.mxu1 %v1757_v17  ;;  %v1623_v16 = vld [vmem:[%s5918_s17 + $0x2d0] sm:$0xff]  ;;  %v1789_v17 = vld [vmem:[%s5918_s17 + $0x800] sm:$0xff] }
 0x156   : > { %4652 = vmatmul.mubr.f32.gmra.mxu0 %v1592_v18  ;;  %4901 = vmatmul.mubr.f32.gmra.mxu1 %v1758_v19  ;;  %v1624_v18 = vld [vmem:[%s5918_s17 + $0x2d8] sm:$0xff]  ;;  %v1790_v19 = vld [vmem:[%s5918_s17 + $0x808] sm:$0xff] }
 0x157   : > { %4654 = vmatprep.mubr.f32.mxu0 %v1593_v20  ;;  %4903 = vmatprep.mubr.f32.mxu1 %v1759_v21  ;;  %v1625_v20 = vld [vmem:[%s5918_s17 + $0x2e0] sm:$0xff]  ;;  %v1791_v21 = vld [vmem:[%s5918_s17 + $0x810] sm:$0xff] }
 0x15a   : > { %4655 = vmatmul.mubr.f32.gmra.mxu0 %v1594_v22  ;;  %4904 = vmatmul.mubr.f32.gmra.mxu1 %v1760_v23  ;;  %v1626_v22 = vld [vmem:[%s5918_s17 + $0x2e8] sm:$0xff]  ;;  %v1792_v23 = vld [vmem:[%s5918_s17 + $0x818] sm:$0xff] }
 0x15b   : > { %4657 = vmatprep.mubr.f32.mxu0 %v1595_v24  ;;  %4906 = vmatprep.mubr.f32.mxu1 %v1761_v25  ;;  %v1627_v24 = vld [vmem:[%s5918_s17 + $0x2f0] sm:$0xff]  ;;  %v1793_v25 = vld [vmem:[%s5918_s17 + $0x820] sm:$0xff] }
 0x15e   : > { %4658 = vmatmul.mubr.f32.gmra.mxu0 %v1596_v26  ;;  %4907 = vmatmul.mubr.f32.gmra.mxu1 %v1762_v27  ;;  %v1628_v26 = vld [vmem:[%s5918_s17 + $0x2f8] sm:$0xff]  ;;  %v1794_v27 = vld [vmem:[%s5918_s17 + $0x828] sm:$0xff] }
 0x15f   : > { %4660 = vmatprep.mubr.f32.mxu0 %v1597_v28  ;;  %4909 = vmatprep.mubr.f32.mxu1 %v1763_v29  ;;  %v1629_v28 = vld [vmem:[%s5918_s17 + $0x300] sm:$0xff]  ;;  %v1795_v29 = vld [vmem:[%s5918_s17 + $0x830] sm:$0xff] }
 0x162   : > { %4661 = vmatmul.mubr.f32.gmra.mxu0 %v1598_v30  ;;  %4910 = vmatmul.mubr.f32.gmra.mxu1 %v1764_v31  ;;  %v1630_v30 = vld [vmem:[%s5918_s17 + $0x308] sm:$0xff]  ;;  %v1796_v31 = vld [vmem:[%s5918_s17 + $0x838] sm:$0xff] }
 0x163   : > { %4663 = vmatprep.mubr.f32.mxu0 %v1599_v32  ;;  %4912 = vmatprep.mubr.f32.mxu1 %v1765_v33  ;;  %v1631_v32 = vld [vmem:[%s5918_s17 + $0x310] sm:$0xff]  ;;  %v1797_v33 = vld [vmem:[%s5918_s17 + $0x840] sm:$0xff] }
 0x166   : > { %4664 = vmatmul.mubr.f32.gmra.mxu0 %v1600_v34  ;;  %4913 = vmatmul.mubr.f32.gmra.mxu1 %v1766_v35 }
 0x167   : > { %4666 = vmatprep.mubr.f32.mxu0 %v1601_v36  ;;  %4915 = vmatprep.mubr.f32.mxu1 %v1767_v37  ;;  %v1632_v36 = vld [vmem:[%s5918_s17 + $0x318] sm:$0xff]  ;;  %v1798_v37 = vld [vmem:[%s5918_s17 + $0x848] sm:$0xff] }
 0x16a   : > { %4667 = vmatmul.mubr.f32.gmra.mxu0 %v1602_v38  ;;  %4916 = vmatmul.mubr.f32.gmra.mxu1 %v1768_v39 }
 0x16b   : > { %4669 = vmatprep.mubr.f32.mxu0 %v1603_v40  ;;  %4918 = vmatprep.mubr.f32.mxu1 %v1769_v41  ;;  %v1633_v40 = vld [vmem:[%s5918_s17 + $0x320] sm:$0xff]  ;;  %v1799_v41 = vld [vmem:[%s5918_s17 + $0x850] sm:$0xff] }
 0x16e   : > { %4670 = vmatmul.mubr.f32.gmra.mxu0 %v1604_v42  ;;  %4919 = vmatmul.mubr.f32.gmra.mxu1 %v1770_v43 }
 0x16f   : > { %4672 = vmatprep.mubr.f32.mxu0 %v1605_v44  ;;  %4921 = vmatprep.mubr.f32.mxu1 %v1771_v45  ;;  %v1634_v44 = vld [vmem:[%s5918_s17 + $0x328] sm:$0xff]  ;;  %v1800_v45 = vld [vmem:[%s5918_s17 + $0x858] sm:$0xff] }
 0x172   : > { %4673 = vmatmul.mubr.f32.gmra.mxu0 %v1606_v46  ;;  %4922 = vmatmul.mubr.f32.gmra.mxu1 %v1772_v47 }
 0x173   : > { %4675 = vmatprep.mubr.f32.mxu0 %v1607_v48  ;;  %4924 = vmatprep.mubr.f32.mxu1 %v1773_v49  ;;  %v1635_v48 = vld [vmem:[%s5918_s17 + $0x330] sm:$0xff]  ;;  %v1801_v49 = vld [vmem:[%s5918_s17 + $0x860] sm:$0xff] }
 0x176   : > { %4676 = vmatmul.mubr.f32.gmra.mxu0 %v1608_v50  ;;  %4925 = vmatmul.mubr.f32.gmra.mxu1 %v1774_v51 }
 0x177   : > { %4678 = vmatprep.mubr.f32.mxu0 %v1609_v52  ;;  %4927 = vmatprep.mubr.f32.mxu1 %v1775_v53  ;;  %v1636_v52 = vld [vmem:[%s5918_s17 + $0x338] sm:$0xff]  ;;  %v1802_v53 = vld [vmem:[%s5918_s17 + $0x868] sm:$0xff] }
 0x17a   : > { %4679 = vmatmul.mubr.f32.gmra.mxu0 %v1610_v54  ;;  %4928 = vmatmul.mubr.f32.gmra.mxu1 %v1776_v55 }
 0x17b   : > { %4681 = vmatprep.mubr.f32.mxu0 %v1611_v56  ;;  %4930 = vmatprep.mubr.f32.mxu1 %v1777_v57  ;;  %v1637_v56 = vld [vmem:[%s5918_s17 + $0x340] sm:$0xff]  ;;  %v1803_v57 = vld [vmem:[%s5918_s17 + $0x870] sm:$0xff] }
 0x17e   : > { %4682 = vmatmul.mubr.f32.gmra.mxu0 %v1612_v58  ;;  %4931 = vmatmul.mubr.f32.gmra.mxu1 %v1778_v59 }
 0x17f   : > { %4684 = vmatprep.mubr.f32.mxu0 %v1613_v60  ;;  %4933 = vmatprep.mubr.f32.mxu1 %v1779_v61  ;;  %v1638_v60 = vld [vmem:[%s5918_s17 + $0x348] sm:$0xff]  ;;  %v1804_v61 = vld [vmem:[%s5918_s17 + $0x878] sm:$0xff] }
 0x182   : > { %4685 = vmatmul.mubr.f32.gmra.mxu0 %v1614_v62  ;;  %4934 = vmatmul.mubr.f32.gmra.mxu1 %v1780_v63 }
 0x183   : > { %4687 = vmatprep.mubr.f32.mxu0 %v1615_v0  ;;  %4936 = vmatprep.mubr.f32.mxu1 %v1781_v1  ;;  %v1639_v0 = vld [vmem:[%s5918_s17 + $0x350] sm:$0xff]  ;;  %v1805_v1 = vld [vmem:[%s5918_s17 + $0x880] sm:$0xff] }
 0x186   : > { %4688 = vmatmul.mubr.f32.gmra.mxu0 %v1616_v2  ;;  %4937 = vmatmul.mubr.f32.gmra.mxu1 %v1782_v3 }
 0x187   : > { %4690 = vmatprep.mubr.f32.mxu0 %v1617_v4  ;;  %4939 = vmatprep.mubr.f32.mxu1 %v1783_v5  ;;  %v1640_v4 = vld [vmem:[%s5918_s17 + $0x358] sm:$0xff]  ;;  %v1806_v5 = vld [vmem:[%s5918_s17 + $0x888] sm:$0xff] }
 0x18a   : > { %4691 = vmatmul.mubr.f32.gmra.mxu0 %v1618_v6  ;;  %4940 = vmatmul.mubr.f32.gmra.mxu1 %v1784_v7 }
 0x18b   : > { %4693 = vmatprep.mubr.f32.mxu0 %v1619_v8  ;;  %4942 = vmatprep.mubr.f32.mxu1 %v1785_v9  ;;  %v1641_v8 = vld [vmem:[%s5918_s17 + $0x360] sm:$0xff]  ;;  %v1807_v9 = vld [vmem:[%s5918_s17 + $0x890] sm:$0xff] }
 0x18e   : > { %4694 = vmatmul.mubr.f32.gmra.mxu0 %v1620_v10  ;;  %4943 = vmatmul.mubr.f32.gmra.mxu1 %v1786_v11 }
 0x18f   : > { %4696 = vmatprep.mubr.f32.mxu0 %v1621_v12  ;;  %4945 = vmatprep.mubr.f32.mxu1 %v1787_v13  ;;  %v1642_v12 = vld [vmem:[%s5918_s17 + $0x368] sm:$0xff]  ;;  %v1808_v13 = vld [vmem:[%s5918_s17 + $0x898] sm:$0xff] }
 0x192   : > { %4697 = vmatmul.mubr.f32.gmra.mxu0 %v1622_v14  ;;  %4946 = vmatmul.mubr.f32.gmra.mxu1 %v1788_v15 }
 0x193   : > { %4699 = vmatprep.mubr.f32.mxu0 %v1623_v16  ;;  %4948 = vmatprep.mubr.f32.mxu1 %v1789_v17  ;;  %v1643_v16 = vld [vmem:[%s5918_s17 + $0x370] sm:$0xff]  ;;  %v1809_v17 = vld [vmem:[%s5918_s17 + $0x8a0] sm:$0xff] }
 0x196   : > { %4700 = vmatmul.mubr.f32.gmra.mxu0 %v1624_v18  ;;  %4949 = vmatmul.mubr.f32.gmra.mxu1 %v1790_v19 }
 0x197   : > { %4702 = vmatprep.mubr.f32.mxu0 %v1625_v20  ;;  %4951 = vmatprep.mubr.f32.mxu1 %v1791_v21  ;;  %v1644_v20 = vld [vmem:[%s5918_s17 + $0x378] sm:$0xff]  ;;  %v1810_v21 = vld [vmem:[%s5918_s17 + $0x8a8] sm:$0xff] }
 0x19a   : > { %4703 = vmatmul.mubr.f32.gmra.mxu0 %v1626_v22  ;;  %4952 = vmatmul.mubr.f32.gmra.mxu1 %v1792_v23 }
 0x19b   : > { %4705 = vmatprep.mubr.f32.mxu0 %v1627_v24  ;;  %4954 = vmatprep.mubr.f32.mxu1 %v1793_v25  ;;  %v1645_v24 = vld [vmem:[%s5918_s17 + $0x380] sm:$0xff]  ;;  %v1811_v25 = vld [vmem:[%s5918_s17 + $0x8b0] sm:$0xff] }
 0x19e   : > { %4706 = vmatmul.mubr.f32.gmra.mxu0 %v1628_v26  ;;  %4955 = vmatmul.mubr.f32.gmra.mxu1 %v1794_v27 }
 0x19f   : > { %4708 = vmatprep.mubr.f32.mxu0 %v1629_v28  ;;  %4957 = vmatprep.mubr.f32.mxu1 %v1795_v29  ;;  %v1646_v28 = vld [vmem:[%s5918_s17 + $0x388] sm:$0xff]  ;;  %v1812_v29 = vld [vmem:[%s5918_s17 + $0x8b8] sm:$0xff] }
 0x1a2   : > { %v6118_v34 = vpop.f32.mrf.mxu0  ;;  %4709 = vmatmul.mubr.f32.gmra.mxu0 %v1630_v30  ;;  %v6120_v35 = vpop.f32.mrf.mxu1  ;;  %4958 = vmatmul.mubr.f32.gmra.mxu1 %v1796_v31 }
 0x1a3   : > { %4711 = vmatprep.mubr.f32.mxu0 %v1631_v32  ;;  %4960 = vmatprep.mubr.f32.mxu1 %v1797_v33  ;;  %v1647_v32 = vld [vmem:[%s5918_s17 + $0x390] sm:$0xff]  ;;  %v1813_v33 = vld [vmem:[%s5918_s17 + $0x8c0] sm:$0xff] }
 0x1a4   : > { %v6124_v38 = vpop.f32.mrf.mxu0  ;;  %v6126_v39 = vpop.f32.mrf.mxu1 }
 0x1a6   : > { %v6130_v42 = vpop.f32.mrf.mxu0  ;;  %4712 = vmatmul.mubr.f32.gmra.mxu0 %v1632_v36  ;;  %v6132_v43 = vpop.f32.mrf.mxu1  ;;  %4961 = vmatmul.mubr.f32.gmra.mxu1 %v1798_v37 }
 0x1a7   : > { %4714 = vmatprep.mubr.f32.mxu0 %v1633_v40  ;;  %4963 = vmatprep.mubr.f32.mxu1 %v1799_v41  ;;  %v1648_v40 = vld [vmem:[%s5918_s17 + $0x398] sm:$0xff]  ;;  %v1814_v41 = vld [vmem:[%s5918_s17 + $0x8c8] sm:$0xff] }
 0x1a8   : > { %v6136_v46 = vpop.f32.mrf.mxu0  ;;  %v6138_v47 = vpop.f32.mrf.mxu1 }
 0x1aa   : > { %v6142_v50 = vpop.f32.mrf.mxu0  ;;  %4715 = vmatmul.mubr.f32.gmra.mxu0 %v1634_v44  ;;  %v6144_v51 = vpop.f32.mrf.mxu1  ;;  %4964 = vmatmul.mubr.f32.gmra.mxu1 %v1800_v45 }
 0x1ab   : > { %4717 = vmatprep.mubr.f32.mxu0 %v1635_v48  ;;  %4966 = vmatprep.mubr.f32.mxu1 %v1801_v49  ;;  %v1649_v48 = vld [vmem:[%s5918_s17 + $0x3a0] sm:$0xff]  ;;  %v1815_v49 = vld [vmem:[%s5918_s17 + $0x8d0] sm:$0xff] }
 0x1ac   : > { %v6148_v54 = vpop.f32.mrf.mxu0  ;;  %v6150_v55 = vpop.f32.mrf.mxu1 }
 0x1ae   : > { %v6154_v58 = vpop.f32.mrf.mxu0  ;;  %4718 = vmatmul.mubr.f32.gmra.mxu0 %v1636_v52  ;;  %v6156_v59 = vpop.f32.mrf.mxu1  ;;  %4967 = vmatmul.mubr.f32.gmra.mxu1 %v1802_v53 }
 0x1af   : > { %4720 = vmatprep.mubr.f32.mxu0 %v1637_v56  ;;  %4969 = vmatprep.mubr.f32.mxu1 %v1803_v57  ;;  %v1650_v56 = vld [vmem:[%s5918_s17 + $0x3a8] sm:$0xff]  ;;  %v1816_v57 = vld [vmem:[%s5918_s17 + $0x8d8] sm:$0xff] }
 0x1b0   : > { %v6160_v62 = vpop.f32.mrf.mxu0  ;;  %v6162_v63 = vpop.f32.mrf.mxu1 }
 0x1b2   : > { %v6166_v2 = vpop.f32.mrf.mxu0  ;;  %4721 = vmatmul.mubr.f32.gmra.mxu0 %v1638_v60  ;;  %v6168_v3 = vpop.f32.mrf.mxu1  ;;  %4970 = vmatmul.mubr.f32.gmra.mxu1 %v1804_v61 }
 0x1b3   : > { %4723 = vmatprep.mubr.f32.mxu0 %v1639_v0  ;;  %4972 = vmatprep.mubr.f32.mxu1 %v1805_v1  ;;  %v1651_v0 = vld [vmem:[%s5918_s17 + $0x3b0] sm:$0xff]  ;;  %v1817_v1 = vld [vmem:[%s5918_s17 + $0x8e0] sm:$0xff] }
 0x1b4   : > { %v6172_v6 = vpop.f32.mrf.mxu0  ;;  %v6174_v7 = vpop.f32.mrf.mxu1 }
 0x1b6   : > { %v6178_v10 = vpop.f32.mrf.mxu0  ;;  %4724 = vmatmul.mubr.f32.gmra.mxu0 %v1640_v4  ;;  %v6180_v11 = vpop.f32.mrf.mxu1  ;;  %4973 = vmatmul.mubr.f32.gmra.mxu1 %v1806_v5 }
 0x1b7   : > { %4726 = vmatprep.mubr.f32.mxu0 %v1641_v8  ;;  %4975 = vmatprep.mubr.f32.mxu1 %v1807_v9  ;;  %v1652_v8 = vld [vmem:[%s5918_s17 + $0x3b8] sm:$0xff]  ;;  %v1818_v9 = vld [vmem:[%s5918_s17 + $0x8e8] sm:$0xff] }
 0x1b8   : > { %v6184_v14 = vpop.f32.mrf.mxu0  ;;  %v6186_v15 = vpop.f32.mrf.mxu1 }
 0x1ba   : > { %v6190_v18 = vpop.f32.mrf.mxu0  ;;  %4727 = vmatmul.mubr.f32.gmra.mxu0 %v1642_v12  ;;  %v6192_v19 = vpop.f32.mrf.mxu1  ;;  %4976 = vmatmul.mubr.f32.gmra.mxu1 %v1808_v13 }
 0x1bb   : > { %4729 = vmatprep.mubr.f32.mxu0 %v1643_v16  ;;  %4978 = vmatprep.mubr.f32.mxu1 %v1809_v17  ;;  %v1653_v16 = vld [vmem:[%s5918_s17 + $0x3c0] sm:$0xff]  ;;  %v1819_v17 = vld [vmem:[%s5918_s17 + $0x8f0] sm:$0xff] }
 0x1bc   : > { %v6196_v22 = vpop.f32.mrf.mxu0  ;;  %v6198_v23 = vpop.f32.mrf.mxu1 }
 0x1be   : > { %v6202_v26 = vpop.f32.mrf.mxu0  ;;  %4730 = vmatmul.mubr.f32.gmra.mxu0 %v1644_v20  ;;  %v6204_v27 = vpop.f32.mrf.mxu1  ;;  %4979 = vmatmul.mubr.f32.gmra.mxu1 %v1810_v21 }
 0x1bf   : > { %4732 = vmatprep.mubr.f32.mxu0 %v1645_v24  ;;  %4981 = vmatprep.mubr.f32.mxu1 %v1811_v25  ;;  %v1654_v24 = vld [vmem:[%s5918_s17 + $0x3c8] sm:$0xff]  ;;  %v1820_v25 = vld [vmem:[%s5918_s17 + $0x8f8] sm:$0xff] }
 0x1c0   : > { %v6208_v30 = vpop.f32.mrf.mxu0  ;;  %v6210_v31 = vpop.f32.mrf.mxu1 }
 0x1c2   : > { %v6214_v36 = vpop.f32.mrf.mxu0  ;;  %4733 = vmatmul.mubr.f32.gmra.mxu0 %v1646_v28  ;;  %v6216_v37 = vpop.f32.mrf.mxu1  ;;  %4982 = vmatmul.mubr.f32.gmra.mxu1 %v1812_v29 }
 0x1c3   : > { %4735 = vmatprep.mubr.f32.mxu0 %v1647_v32  ;;  %4984 = vmatprep.mubr.f32.mxu1 %v1813_v33  ;;  %v1655_v32 = vld [vmem:[%s5918_s17 + $0x3d0] sm:$0xff]  ;;  %v1821_v33 = vld [vmem:[%s5918_s17 + $0x900] sm:$0xff] }
 0x1c4   : > { %v6220_v44 = vpop.f32.mrf.mxu0  ;;  %v6222_v45 = vpop.f32.mrf.mxu1 }
 0x1c6   : > { %v6226_v52 = vpop.f32.mrf.mxu0  ;;  %4736 = vmatmul.mubr.f32.gmra.mxu0 %v1648_v40  ;;  %v6228_v53 = vpop.f32.mrf.mxu1  ;;  %4985 = vmatmul.mubr.f32.gmra.mxu1 %v1814_v41 }
 0x1c7   : > { %4738 = vmatprep.mubr.f32.mxu0 %v1649_v48  ;;  %4987 = vmatprep.mubr.f32.mxu1 %v1815_v49  ;;  %v1656_v48 = vld [vmem:[%s5918_s17 + $0x3d8] sm:$0xff]  ;;  %v1822_v49 = vld [vmem:[%s5918_s17 + $0x908] sm:$0xff] }
 0x1c8   : > { %v6232_v60 = vpop.f32.mrf.mxu0  ;;  %v6234_v61 = vpop.f32.mrf.mxu1 }
 0x1ca   : > { %v6238_v4 = vpop.f32.mrf.mxu0  ;;  %4739 = vmatmul.mubr.f32.gmra.mxu0 %v1650_v56  ;;  %v6240_v5 = vpop.f32.mrf.mxu1  ;;  %4988 = vmatmul.mubr.f32.gmra.mxu1 %v1816_v57 }
 0x1cb   : > { %4741 = vmatprep.mubr.f32.mxu0 %v1651_v0  ;;  %4990 = vmatprep.mubr.f32.mxu1 %v1817_v1  ;;  %v1657_v0 = vld [vmem:[%s5918_s17 + $0x3e0] sm:$0xff]  ;;  %v1823_v1 = vld [vmem:[%s5918_s17 + $0x910] sm:$0xff] }
 0x1cc   : > { %v6244_v12 = vpop.f32.mrf.mxu0  ;;  %v6246_v13 = vpop.f32.mrf.mxu1 }
 0x1ce   : > { %v6250_v20 = vpop.f32.mrf.mxu0  ;;  %4742 = vmatmul.mubr.f32.gmra.mxu0 %v1652_v8  ;;  %v6252_v21 = vpop.f32.mrf.mxu1  ;;  %4991 = vmatmul.mubr.f32.gmra.mxu1 %v1818_v9 }
 0x1cf   : > { %4744 = vmatprep.mubr.f32.mxu0 %v1653_v16  ;;  %4993 = vmatprep.mubr.f32.mxu1 %v1819_v17  ;;  %v1658_v16 = vld [vmem:[%s5918_s17 + $0x3e8] sm:$0xff]  ;;  %v1824_v17 = vld [vmem:[%s5918_s17 + $0x918] sm:$0xff] }
 0x1d0   : > { %v6256_v28 = vpop.f32.mrf.mxu0  ;;  %v6258_v29 = vpop.f32.mrf.mxu1 }
 0x1d2   : > { %v6262_v40 = vpop.f32.mrf.mxu0  ;;  %4745 = vmatmul.mubr.f32.gmra.mxu0 %v1654_v24  ;;  %v6264_v41 = vpop.f32.mrf.mxu1  ;;  %4994 = vmatmul.mubr.f32.gmra.mxu1 %v1820_v25 }
 0x1d3   : > { %6947 = vst [vmem:[#allocation3_spill] sm:$0xff] %v6262_v40  ;;  %6948 = vst [vmem:[#allocation4_spill] sm:$0xff] %v6264_v41  ;;  %4747 = vmatprep.mubr.f32.mxu0 %v1655_v32  ;;  %4996 = vmatprep.mubr.f32.mxu1 %v1821_v33  ;;  %v1659_v32 = vld [vmem:[%s5918_s17 + $0x3f0] sm:$0xff]  ;;  %v1825_v33 = vld [vmem:[%s5918_s17 + $0x920] sm:$0xff] }
 0x1d4   : > { %v6268_v56 = vpop.f32.mrf.mxu0  ;;  %v6270_v57 = vpop.f32.mrf.mxu1  ;;  %v1827_v40 = vld [vmem:[%s5918_s17 + $0x930] sm:$0xff] }
 0x1d6   : > { %v6274_v8 = vpop.f32.mrf.mxu0  ;;  %4748 = vmatmul.mubr.f32.gmra.mxu0 %v1656_v48  ;;  %v6276_v9 = vpop.f32.mrf.mxu1  ;;  %4997 = vmatmul.mubr.f32.gmra.mxu1 %v1822_v49  ;;  %v1660_v49 = vld [vmem:[%s5918_s17 + $0x3f8] sm:$0xff] }
 0x1d7   : > { %6949 = vst [vmem:[#allocation5_spill] sm:$0xff] %v6274_v8  ;;  %6950 = vst [vmem:[#allocation6_spill] sm:$0xff] %v6276_v9  ;;  %4750 = vmatprep.mubr.f32.mxu0 %v1657_v0  ;;  %4999 = vmatprep.mubr.f32.mxu1 %v1823_v1  ;;  %v1826_v0 = vld [vmem:[%s5918_s17 + $0x928] sm:$0xff]  ;;  %v1661_v8 = vld [vmem:[%s5918_s17 + $0x400] sm:$0xff] }
 0x1d8   : > { %v6280_v24 = vpop.f32.mrf.mxu0  ;;  %v6282_v25 = vpop.f32.mrf.mxu1 }
 0x1d9   : > { %6951 = vst [vmem:[#allocation7_spill] sm:$0xff] %v6280_v24  ;;  %6952 = vst [vmem:[#allocation8_spill] sm:$0xff] %v6282_v25 }
 0x1da   : > { %v6286_v41 = vpop.f32.mrf.mxu0  ;;  %4751 = vmatmul.mubr.f32.gmra.mxu0 %v1658_v16  ;;  %v6288_v48 = vpop.f32.mrf.mxu1  ;;  %5000 = vmatmul.mubr.f32.gmra.mxu1 %v1824_v17  ;;  %v1662_v17 = vld [vmem:[%s5918_s17 + $0x408] sm:$0xff] }
 0x1db   : > { %6953 = vst [vmem:[#allocation9_spill] sm:$0xff] %v6286_v41  ;;  %6954 = vst [vmem:[#allocation10_spill] sm:$0xff] %v6288_v48  ;;  %4753 = vmatprep.mubr.f32.mxu0 %v1659_v32  ;;  %5002 = vmatprep.mubr.f32.mxu1 %v1825_v33  ;;  %v1828_v32 = vld [vmem:[%s5918_s17 + $0x938] sm:$0xff]  ;;  %v1663_v41 = vld [vmem:[%s5918_s17 + $0x410] sm:$0xff] }
 0x1dc   : > { %v6292_v1 = vpop.f32.mrf.mxu0  ;;  %v6294_v9 = vpop.f32.mrf.mxu1 }
 0x1dd   : > { %6955 = vst [vmem:[#allocation11_spill] sm:$0xff] %v6292_v1  ;;  %6956 = vst [vmem:[#allocation12_spill] sm:$0xff] %v6294_v9  ;;  %v1829_v9 = vld [vmem:[%s5918_s17 + $0x940] sm:$0xff] }
 0x1de   : > { %v6298_v25 = vpop.f32.mrf.mxu0  ;;  %4754 = vmatmul.mubr.f32.gmra.mxu0 %v1660_v49  ;;  %v6300_v16 = vpop.f32.mrf.mxu1  ;;  %5003 = vmatmul.mubr.f32.gmra.mxu1 %v1826_v0 }
 0x1df   : > { %6957 = vst [vmem:[#allocation13_spill] sm:$0xff] %v6298_v25  ;;  %6958 = vst [vmem:[#allocation14_spill] sm:$0xff] %v6300_v16  ;;  %4756 = vmatprep.mubr.f32.mxu0 %v1661_v8  ;;  %5005 = vmatprep.mubr.f32.mxu1 %v1827_v40  ;;  %v1664_v40 = vld [vmem:[%s5918_s17 + $0x418] sm:$0xff]  ;;  %v1830_v8 = vld [vmem:[%s5918_s17 + $0x948] sm:$0xff] }
 0x1e0   : > { %v6304_v33 = vpop.f32.mrf.mxu0  ;;  %v6306_v48 = vpop.f32.mrf.mxu1  ;;  %v1665_v25 = vld [vmem:[%s5918_s17 + $0x420] sm:$0xff] }
 0x1e1   : > { %6959 = vst [vmem:[#allocation15_spill] sm:$0xff] %v6304_v33  ;;  %6960 = vst [vmem:[#allocation16_spill] sm:$0xff] %v6306_v48  ;;  %v1831_v48 = vld [vmem:[%s5918_s17 + $0x950] sm:$0xff] }
 0x1e2   : > { %v6310_v1 = vpop.f32.mrf.mxu0  ;;  %4757 = vmatmul.mubr.f32.gmra.mxu0 %v1662_v17  ;;  %v6312_v49 = vpop.f32.mrf.mxu1  ;;  %5006 = vmatmul.mubr.f32.gmra.mxu1 %v1828_v32 }
 0x1e3   : > { %6961 = vst [vmem:[#allocation17_spill] sm:$0xff] %v6310_v1  ;;  %6962 = vst [vmem:[#allocation18_spill] sm:$0xff] %v6312_v49  ;;  %4759 = vmatprep.mubr.f32.mxu0 %v1663_v41  ;;  %5008 = vmatprep.mubr.f32.mxu1 %v1829_v9  ;;  %v1666_v41 = vld [vmem:[%s5918_s17 + $0x428] sm:$0xff]  ;;  %v1832_v9 = vld [vmem:[%s5918_s17 + $0x958] sm:$0xff] }
 0x1e4   : > { %v6316_v0 = vpop.f32.mrf.mxu0  ;;  %v6318_v16 = vpop.f32.mrf.mxu1  ;;  %v1667_v1 = vld [vmem:[%s5918_s17 + $0x430] sm:$0xff] }
 0x1e5   : > { %6963 = vst [vmem:[#allocation19_spill] sm:$0xff] %v6316_v0  ;;  %6964 = vst [vmem:[#allocation20_spill] sm:$0xff] %v6318_v16  ;;  %v1833_v16 = vld [vmem:[%s5918_s17 + $0x960] sm:$0xff] }
 0x1e6   : > { %v6322_v33 = vpop.f32.mrf.mxu0  ;;  %4760 = vmatmul.mubr.f32.gmra.mxu0 %v1664_v40  ;;  %v6324_v17 = vpop.f32.mrf.mxu1  ;;  %5009 = vmatmul.mubr.f32.gmra.mxu1 %v1830_v8 }
 0x1e7   : > { %6965 = vst [vmem:[#allocation21_spill] sm:$0xff] %v6322_v33  ;;  %6966 = vst [vmem:[#allocation22_spill] sm:$0xff] %v6324_v17  ;;  %4762 = vmatprep.mubr.f32.mxu0 %v1665_v25  ;;  %5011 = vmatprep.mubr.f32.mxu1 %v1831_v48  ;;  %v1668_v25 = vld [vmem:[%s5918_s17 + $0x438] sm:$0xff]  ;;  %v1834_v48 = vld [vmem:[%s5918_s17 + $0x968] sm:$0xff] }
 0x1e8   : > { %v6328_v32 = vpop.f32.mrf.mxu0  ;;  %v6330_v49 = vpop.f32.mrf.mxu1  ;;  %v1669_v33 = vld [vmem:[%s5918_s17 + $0x440] sm:$0xff] }
 0x1e9   : > { %6967 = vst [vmem:[#allocation23_spill] sm:$0xff] %v6328_v32  ;;  %6968 = vst [vmem:[#allocation24_spill] sm:$0xff] %v6330_v49  ;;  %v1835_v49 = vld [vmem:[%s5918_s17 + $0x970] sm:$0xff] }
 0x1ea   : > { %v6334_v0 = vpop.f32.mrf.mxu0  ;;  %4763 = vmatmul.mubr.f32.gmra.mxu0 %v1666_v41  ;;  %v6336_v40 = vpop.f32.mrf.mxu1  ;;  %5012 = vmatmul.mubr.f32.gmra.mxu1 %v1832_v9 }
 0x1eb   : > { %6969 = vst [vmem:[#allocation25_spill] sm:$0xff] %v6334_v0  ;;  %6970 = vst [vmem:[#allocation26_spill] sm:$0xff] %v6336_v40  ;;  %4765 = vmatprep.mubr.f32.mxu0 %v1667_v1  ;;  %5014 = vmatprep.mubr.f32.mxu1 %v1833_v16  ;;  %v1670_v1 = vld [vmem:[%s5918_s17 + $0x448] sm:$0xff]  ;;  %v1836_v16 = vld [vmem:[%s5918_s17 + $0x978] sm:$0xff] }
 0x1ec   : > { %v6340_v8 = vpop.f32.mrf.mxu0  ;;  %v6342_v17 = vpop.f32.mrf.mxu1  ;;  %v1671_v0 = vld [vmem:[%s5918_s17 + $0x450] sm:$0xff] }
 0x1ed   : > { %6971 = vst [vmem:[#allocation27_spill] sm:$0xff] %v6340_v8  ;;  %6972 = vst [vmem:[#allocation28_spill] sm:$0xff] %v6342_v17  ;;  %v1837_v17 = vld [vmem:[%s5918_s17 + $0x980] sm:$0xff] }
 0x1ee   : > { %v6346_v32 = vpop.f32.mrf.mxu0  ;;  %4766 = vmatmul.mubr.f32.gmra.mxu0 %v1668_v25  ;;  %v6348_v41 = vpop.f32.mrf.mxu1  ;;  %5015 = vmatmul.mubr.f32.gmra.mxu1 %v1834_v48 }
 0x1ef   : > { %6973 = vst [vmem:[#allocation29_spill] sm:$0xff] %v6346_v32  ;;  %6974 = vst [vmem:[#allocation30_spill] sm:$0xff] %v6348_v41  ;;  %4768 = vmatprep.mubr.f32.mxu0 %v1669_v33  ;;  %5017 = vmatprep.mubr.f32.mxu1 %v1835_v49  ;;  %v1672_v33 = vld [vmem:[%s5918_s17 + $0x458] sm:$0xff]  ;;  %v1838_v49 = vld [vmem:[%s5918_s17 + $0x988] sm:$0xff] }
 0x1f0   : > { %v6352_v9 = vpop.f32.mrf.mxu0  ;;  %v6354_v40 = vpop.f32.mrf.mxu1  ;;  %v1673_v32 = vld [vmem:[%s5918_s17 + $0x460] sm:$0xff] }
 0x1f1   : > { %6975 = vst [vmem:[#allocation31_spill] sm:$0xff] %v6352_v9  ;;  %6976 = vst [vmem:[#allocation32_spill] sm:$0xff] %v6354_v40  ;;  %v1839_v40 = vld [vmem:[%s5918_s17 + $0x990] sm:$0xff] }
 0x1f2   : > { %v6358_v8 = vpop.f32.mrf.mxu0  ;;  %4769 = vmatmul.mubr.f32.gmra.mxu0 %v1670_v1  ;;  %v6360_v25 = vpop.f32.mrf.mxu1  ;;  %5018 = vmatmul.mubr.f32.gmra.mxu1 %v1836_v16 }
 0x1f3   : > { %6977 = vst [vmem:[#allocation33_spill] sm:$0xff] %v6358_v8  ;;  %6978 = vst [vmem:[#allocation34_spill] sm:$0xff] %v6360_v25  ;;  %4771 = vmatprep.mubr.f32.mxu0 %v1671_v0  ;;  %5020 = vmatprep.mubr.f32.mxu1 %v1837_v17  ;;  %v1674_v0 = vld [vmem:[%s5918_s17 + $0x468] sm:$0xff]  ;;  %v1840_v17 = vld [vmem:[%s5918_s17 + $0x998] sm:$0xff] }
 0x1f4   : > { %v6364_v48 = vpop.f32.mrf.mxu0  ;;  %v6366_v41 = vpop.f32.mrf.mxu1  ;;  %v1675_v8 = vld [vmem:[%s5918_s17 + $0x470] sm:$0xff] }
 0x1f5   : > { %6979 = vst [vmem:[#allocation35_spill] sm:$0xff] %v6364_v48  ;;  %6980 = vst [vmem:[#allocation36_spill] sm:$0xff] %v6366_v41  ;;  %v1841_v41 = vld [vmem:[%s5918_s17 + $0x9a0] sm:$0xff] }
 0x1f6   : > { %v6370_v9 = vpop.f32.mrf.mxu0  ;;  %4772 = vmatmul.mubr.f32.gmra.mxu0 %v1672_v33  ;;  %v6372_v1 = vpop.f32.mrf.mxu1  ;;  %5021 = vmatmul.mubr.f32.gmra.mxu1 %v1838_v49 }
 0x1f7   : > { %6981 = vst [vmem:[#allocation37_spill] sm:$0xff] %v6370_v9  ;;  %6982 = vst [vmem:[#allocation38_spill] sm:$0xff] %v6372_v1  ;;  %4774 = vmatprep.mubr.f32.mxu0 %v1673_v32  ;;  %5023 = vmatprep.mubr.f32.mxu1 %v1839_v40  ;;  %v1676_v32 = vld [vmem:[%s5918_s17 + $0x478] sm:$0xff]  ;;  %v1842_v40 = vld [vmem:[%s5918_s17 + $0x9a8] sm:$0xff] }
 0x1f8   : > { %v6376_v16 = vpop.f32.mrf.mxu0  ;;  %v6378_v25 = vpop.f32.mrf.mxu1  ;;  %v1677_v9 = vld [vmem:[%s5918_s17 + $0x480] sm:$0xff] }
 0x1f9   : > { %6983 = vst [vmem:[#allocation39_spill] sm:$0xff] %v6376_v16  ;;  %6984 = vst [vmem:[#allocation40_spill] sm:$0xff] %v6378_v25  ;;  %v1843_v25 = vld [vmem:[%s5918_s17 + $0x9b0] sm:$0xff] }
 0x1fa   : > { %v6382_v48 = vpop.f32.mrf.mxu0  ;;  %4775 = vmatmul.mubr.f32.gmra.mxu0 %v1674_v0  ;;  %v6384_v33 = vpop.f32.mrf.mxu1  ;;  %5024 = vmatmul.mubr.f32.gmra.mxu1 %v1840_v17 }
 0x1fb   : > { %6985 = vst [vmem:[#allocation41_spill] sm:$0xff] %v6382_v48  ;;  %6986 = vst [vmem:[#allocation42_spill] sm:$0xff] %v6384_v33  ;;  %4777 = vmatprep.mubr.f32.mxu0 %v1675_v8  ;;  %5026 = vmatprep.mubr.f32.mxu1 %v1841_v41  ;;  %v1678_v8 = vld [vmem:[%s5918_s17 + $0x488] sm:$0xff]  ;;  %v1844_v41 = vld [vmem:[%s5918_s17 + $0x9b8] sm:$0xff] }
 0x1fc   : > { %v6388_v49 = vpop.f32.mrf.mxu0  ;;  %v6390_v1 = vpop.f32.mrf.mxu1  ;;  %v1679_v48 = vld [vmem:[%s5918_s17 + $0x490] sm:$0xff] }
 0x1fd   : > { %6987 = vst [vmem:[#allocation43_spill] sm:$0xff] %v6388_v49  ;;  %6988 = vst [vmem:[#allocation44_spill] sm:$0xff] %v6390_v1  ;;  %v1845_v1 = vld [vmem:[%s5918_s17 + $0x9c0] sm:$0xff] }
 0x1fe   : > { %v6394_v16 = vpop.f32.mrf.mxu0  ;;  %4778 = vmatmul.mubr.f32.gmra.mxu0 %v1676_v32  ;;  %v6396_v0 = vpop.f32.mrf.mxu1  ;;  %5027 = vmatmul.mubr.f32.gmra.mxu1 %v1842_v40 }
 0x1ff   : > { %6989 = vst [vmem:[#allocation45_spill] sm:$0xff] %v6394_v16  ;;  %6990 = vst [vmem:[#allocation46_spill] sm:$0xff] %v6396_v0  ;;  %4780 = vmatprep.mubr.f32.mxu0 %v1677_v9  ;;  %5029 = vmatprep.mubr.f32.mxu1 %v1843_v25  ;;  %v1680_v9 = vld [vmem:[%s5918_s17 + $0x498] sm:$0xff]  ;;  %v1846_v25 = vld [vmem:[%s5918_s17 + $0x9c8] sm:$0xff] }
 0x200   : > { %v6400_v17 = vpop.f32.mrf.mxu0  ;;  %v6402_v33 = vpop.f32.mrf.mxu1  ;;  %v1681_v16 = vld [vmem:[%s5918_s17 + $0x4a0] sm:$0xff] }
 0x201   : > { %6991 = vst [vmem:[#allocation47_spill] sm:$0xff] %v6400_v17  ;;  %6992 = vst [vmem:[#allocation48_spill] sm:$0xff] %v6402_v33  ;;  %v1847_v33 = vld [vmem:[%s5918_s17 + $0x9d0] sm:$0xff] }
 0x202   : > { %v6406_v49 = vpop.f32.mrf.mxu0  ;;  %4781 = vmatmul.mubr.f32.gmra.mxu0 %v1678_v8  ;;  %v6408_v32 = vpop.f32.mrf.mxu1  ;;  %5030 = vmatmul.mubr.f32.gmra.mxu1 %v1844_v41 }
 0x203   : > { %6993 = vst [vmem:[#allocation49_spill] sm:$0xff] %v6406_v49  ;;  %6994 = vst [vmem:[#allocation50_spill] sm:$0xff] %v6408_v32  ;;  %4783 = vmatprep.mubr.f32.mxu0 %v1679_v48  ;;  %5032 = vmatprep.mubr.f32.mxu1 %v1845_v1  ;;  %v1682_v48 = vld [vmem:[%s5918_s17 + $0x4a8] sm:$0xff]  ;;  %v1848_v1 = vld [vmem:[%s5918_s17 + $0x9d8] sm:$0xff] }
 0x204   : > { %v6412_v40 = vpop.f32.mrf.mxu0  ;;  %v6414_v0 = vpop.f32.mrf.mxu1  ;;  %v1683_v49 = vld [vmem:[%s5918_s17 + $0x4b0] sm:$0xff] }
 0x205   : > { %6995 = vst [vmem:[#allocation51_spill] sm:$0xff] %v6412_v40  ;;  %6996 = vst [vmem:[#allocation52_spill] sm:$0xff] %v6414_v0  ;;  %v1849_v0 = vld [vmem:[%s5918_s17 + $0x9e0] sm:$0xff] }
 0x206   : > { %v6418_v17 = vpop.f32.mrf.mxu0  ;;  %4784 = vmatmul.mubr.f32.gmra.mxu0 %v1680_v9  ;;  %v6420_v8 = vpop.f32.mrf.mxu1  ;;  %5033 = vmatmul.mubr.f32.gmra.mxu1 %v1846_v25 }
 0x207   : > { %6997 = vst [vmem:[#allocation53_spill] sm:$0xff] %v6418_v17  ;;  %6998 = vst [vmem:[#allocation54_spill] sm:$0xff] %v6420_v8  ;;  %4786 = vmatprep.mubr.f32.mxu0 %v1681_v16  ;;  %5035 = vmatprep.mubr.f32.mxu1 %v1847_v33  ;;  %v1684_v16 = vld [vmem:[%s5918_s17 + $0x4b8] sm:$0xff]  ;;  %v1850_v33 = vld [vmem:[%s5918_s17 + $0x9e8] sm:$0xff] }
 0x208   : > { %v6424_v41 = vpop.f32.mrf.mxu0  ;;  %v6426_v32 = vpop.f32.mrf.mxu1  ;;  %v1685_v17 = vld [vmem:[%s5918_s17 + $0x4c0] sm:$0xff] }
 0x209   : > { %6999 = vst [vmem:[#allocation55_spill] sm:$0xff] %v6424_v41  ;;  %7000 = vst [vmem:[#allocation56_spill] sm:$0xff] %v6426_v32  ;;  %v1851_v32 = vld [vmem:[%s5918_s17 + $0x9f0] sm:$0xff] }
 0x20a   : > { %v6430_v40 = vpop.f32.mrf.mxu0  ;;  %4787 = vmatmul.mubr.f32.gmra.mxu0 %v1682_v48  ;;  %v6432_v9 = vpop.f32.mrf.mxu1  ;;  %5036 = vmatmul.mubr.f32.gmra.mxu1 %v1848_v1 }
 0x20b   : > { %7001 = vst [vmem:[#allocation57_spill] sm:$0xff] %v6430_v40  ;;  %7002 = vst [vmem:[#allocation58_spill] sm:$0xff] %v6432_v9  ;;  %4789 = vmatprep.mubr.f32.mxu0 %v1683_v49  ;;  %5038 = vmatprep.mubr.f32.mxu1 %v1849_v0  ;;  %v1686_v49 = vld [vmem:[%s5918_s17 + $0x4c8] sm:$0xff]  ;;  %v1852_v0 = vld [vmem:[%s5918_s17 + $0x9f8] sm:$0xff] }
 0x20c   : > { %v6436_v25 = vpop.f32.mrf.mxu0  ;;  %v6438_v8 = vpop.f32.mrf.mxu1  ;;  %v1687_v40 = vld [vmem:[%s5918_s17 + $0x4d0] sm:$0xff] }
 0x20d   : > { %7003 = vst [vmem:[#allocation59_spill] sm:$0xff] %v6436_v25  ;;  %7004 = vst [vmem:[#allocation60_spill] sm:$0xff] %v6438_v8  ;;  %v1853_v8 = vld [vmem:[%s5918_s17 + $0xa00] sm:$0xff] }
 0x20e   : > { %v6442_v41 = vpop.f32.mrf.mxu0  ;;  %4790 = vmatmul.mubr.f32.gmra.mxu0 %v1684_v16  ;;  %v6444_v48 = vpop.f32.mrf.mxu1  ;;  %5039 = vmatmul.mubr.f32.gmra.mxu1 %v1850_v33 }
 0x20f   : > { %7005 = vst [vmem:[#allocation61_spill] sm:$0xff] %v6442_v41  ;;  %7006 = vst [vmem:[#allocation62_spill] sm:$0xff] %v6444_v48  ;;  %4792 = vmatprep.mubr.f32.mxu0 %v1685_v17  ;;  %5041 = vmatprep.mubr.f32.mxu1 %v1851_v32  ;;  %v1688_v17 = vld [vmem:[%s5918_s17 + $0x4d8] sm:$0xff]  ;;  %v1854_v32 = vld [vmem:[%s5918_s17 + $0xa08] sm:$0xff] }
 0x210   : > { %v6448_v1 = vpop.f32.mrf.mxu0  ;;  %v6450_v9 = vpop.f32.mrf.mxu1  ;;  %v1689_v41 = vld [vmem:[%s5918_s17 + $0x4e0] sm:$0xff] }
 0x211   : > { %7007 = vst [vmem:[#allocation63_spill] sm:$0xff] %v6448_v1  ;;  %7008 = vst [vmem:[#allocation64_spill] sm:$0xff] %v6450_v9  ;;  %v1855_v9 = vld [vmem:[%s5918_s17 + $0xa10] sm:$0xff] }
 0x212   : > { %v6454_v25 = vpop.f32.mrf.mxu0  ;;  %4793 = vmatmul.mubr.f32.gmra.mxu0 %v1686_v49  ;;  %v6456_v16 = vpop.f32.mrf.mxu1  ;;  %5042 = vmatmul.mubr.f32.gmra.mxu1 %v1852_v0 }
 0x213   : > { %7009 = vst [vmem:[#allocation65_spill] sm:$0xff] %v6454_v25  ;;  %7010 = vst [vmem:[#allocation66_spill] sm:$0xff] %v6456_v16  ;;  %4795 = vmatprep.mubr.f32.mxu0 %v1687_v40  ;;  %5044 = vmatprep.mubr.f32.mxu1 %v1853_v8  ;;  %v1690_v40 = vld [vmem:[%s5918_s17 + $0x4e8] sm:$0xff]  ;;  %v1856_v8 = vld [vmem:[%s5918_s17 + $0xa18] sm:$0xff] }
 0x214   : > { %v6460_v33 = vpop.f32.mrf.mxu0  ;;  %v6462_v48 = vpop.f32.mrf.mxu1  ;;  %v1691_v25 = vld [vmem:[%s5918_s17 + $0x4f0] sm:$0xff] }
 0x215   : > { %7011 = vst [vmem:[#allocation67_spill] sm:$0xff] %v6460_v33  ;;  %7012 = vst [vmem:[#allocation68_spill] sm:$0xff] %v6462_v48  ;;  %v1857_v48 = vld [vmem:[%s5918_s17 + $0xa20] sm:$0xff] }
 0x216   : > { %v6466_v1 = vpop.f32.mrf.mxu0  ;;  %4796 = vmatmul.mubr.f32.gmra.mxu0 %v1688_v17  ;;  %v6468_v49 = vpop.f32.mrf.mxu1  ;;  %5045 = vmatmul.mubr.f32.gmra.mxu1 %v1854_v32 }
 0x217   : > { %7013 = vst [vmem:[#allocation69_spill] sm:$0xff] %v6466_v1  ;;  %7014 = vst [vmem:[#allocation70_spill] sm:$0xff] %v6468_v49  ;;  %4798 = vmatprep.mubr.f32.mxu0 %v1689_v41  ;;  %5047 = vmatprep.mubr.f32.mxu1 %v1855_v9  ;;  %v1692_v41 = vld [vmem:[%s5918_s17 + $0x4f8] sm:$0xff]  ;;  %v1858_v9 = vld [vmem:[%s5918_s17 + $0xa28] sm:$0xff] }
 0x218   : > { %v6472_v0 = vpop.f32.mrf.mxu0  ;;  %v6474_v16 = vpop.f32.mrf.mxu1  ;;  %v1693_v1 = vld [vmem:[%s5918_s17 + $0x500] sm:$0xff] }
 0x219   : > { %7015 = vst [vmem:[#allocation71_spill] sm:$0xff] %v6472_v0  ;;  %7016 = vst [vmem:[#allocation72_spill] sm:$0xff] %v6474_v16  ;;  %v1859_v16 = vld [vmem:[%s5918_s17 + $0xa30] sm:$0xff] }
 0x21a   : > { %v6478_v33 = vpop.f32.mrf.mxu0  ;;  %4799 = vmatmul.mubr.f32.gmra.mxu0 %v1690_v40  ;;  %v6480_v17 = vpop.f32.mrf.mxu1  ;;  %5048 = vmatmul.mubr.f32.gmra.mxu1 %v1856_v8 }
 0x21b   : > { %7017 = vst [vmem:[#allocation73_spill] sm:$0xff] %v6478_v33  ;;  %7018 = vst [vmem:[#allocation74_spill] sm:$0xff] %v6480_v17  ;;  %4801 = vmatprep.mubr.f32.mxu0 %v1691_v25  ;;  %5050 = vmatprep.mubr.f32.mxu1 %v1857_v48  ;;  %v1694_v25 = vld [vmem:[%s5918_s17 + $0x508] sm:$0xff]  ;;  %v1860_v48 = vld [vmem:[%s5918_s17 + $0xa38] sm:$0xff] }
 0x21c   : > { %v6484_v32 = vpop.f32.mrf.mxu0  ;;  %v6486_v49 = vpop.f32.mrf.mxu1  ;;  %v1695_v33 = vld [vmem:[%s5918_s17 + $0x510] sm:$0xff] }
 0x21d   : > { %7019 = vst [vmem:[#allocation75_spill] sm:$0xff] %v6484_v32  ;;  %7020 = vst [vmem:[#allocation76_spill] sm:$0xff] %v6486_v49  ;;  %v1861_v49 = vld [vmem:[%s5918_s17 + $0xa40] sm:$0xff] }
 0x21e   : > { %v6490_v0 = vpop.f32.mrf.mxu0  ;;  %4802 = vmatmul.mubr.f32.gmra.mxu0 %v1692_v41  ;;  %v6492_v40 = vpop.f32.mrf.mxu1  ;;  %5051 = vmatmul.mubr.f32.gmra.mxu1 %v1858_v9 }
 0x21f   : > { %7021 = vst [vmem:[#allocation77_spill] sm:$0xff] %v6490_v0  ;;  %7022 = vst [vmem:[#allocation78_spill] sm:$0xff] %v6492_v40  ;;  %4804 = vmatprep.mubr.f32.mxu0 %v1693_v1  ;;  %5053 = vmatprep.mubr.f32.mxu1 %v1859_v16  ;;  %v1696_v1 = vld [vmem:[%s5918_s17 + $0x518] sm:$0xff]  ;;  %v1862_v16 = vld [vmem:[%s5918_s17 + $0xa48] sm:$0xff] }
 0x220   : > { %v6496_v8 = vpop.f32.mrf.mxu0  ;;  %v6498_v17 = vpop.f32.mrf.mxu1  ;;  %v1697_v0 = vld [vmem:[%s5918_s17 + $0x520] sm:$0xff] }
 0x221   : > { %7023 = vst [vmem:[#allocation79_spill] sm:$0xff] %v6496_v8  ;;  %7024 = vst [vmem:[#allocation80_spill] sm:$0xff] %v6498_v17  ;;  %v1863_v17 = vld [vmem:[%s5918_s17 + $0xa50] sm:$0xff] }
 0x222   : > { %v6502_v32 = vpop.f32.mrf.mxu0  ;;  %4805 = vmatmul.mubr.f32.gmra.mxu0 %v1694_v25  ;;  %v6504_v41 = vpop.f32.mrf.mxu1  ;;  %5054 = vmatmul.mubr.f32.gmra.mxu1 %v1860_v48  ;;  %v1698_v25 = vld [vmem:[%s5918_s17 + $0x528] sm:$0xff]  ;;  %v1864_v48 = vld [vmem:[%s5918_s17 + $0xa58] sm:$0xff] }
 0x223   : > { %7025 = vst [vmem:[#allocation81_spill] sm:$0xff] %v6502_v32  ;;  %7026 = vst [vmem:[#allocation82_spill] sm:$0xff] %v6504_v41  ;;  %4807 = vmatprep.mubr.f32.mxu0 %v1695_v33  ;;  %5056 = vmatprep.mubr.f32.mxu1 %v1861_v49 }
 0x224   : > { %v6508_v9 = vpop.f32.mrf.mxu0  ;;  %v6510_v40 = vpop.f32.mrf.mxu1 }
 0x225   : > { %7027 = vst [vmem:[#allocation83_spill] sm:$0xff] %v6508_v9  ;;  %7028 = vst [vmem:[#allocation84_spill] sm:$0xff] %v6510_v40 }
 0x226   : > { %v6514_v8 = vpop.f32.mrf.mxu0  ;;  %4808 = vmatmul.mubr.f32.gmra.mxu0 %v1696_v1  ;;  %v6516_v32 = vpop.f32.mrf.mxu1  ;;  %5057 = vmatmul.mubr.f32.gmra.mxu1 %v1862_v16 }
 0x227   : > { %7029 = vst [vmem:[#allocation85_spill] sm:$0xff] %v6514_v8  ;;  %7030 = vst [vmem:[#allocation86_spill] sm:$0xff] %v6516_v32  ;;  %4810 = vmatprep.mubr.f32.mxu0 %v1697_v0  ;;  %5059 = vmatprep.mubr.f32.mxu1 %v1863_v17 }
 0x228   : > { %v6520_v33 = vpop.f32.mrf.mxu0  ;;  %v6522_v49 = vpop.f32.mrf.mxu1 }
 0x229   : > { %7031 = vst [vmem:[#allocation87_spill] sm:$0xff] %v6520_v33  ;;  %7032 = vst [vmem:[#allocation88_spill] sm:$0xff] %v6522_v49 }
 0x22a   : > { %v6524_v41 = vpop.f32.mrf.mxu0  ;;  %4811 = vmatmul.mubr.f32.gmra.mxu0 %v1698_v25  ;;  %v6526_v40 = vpop.f32.mrf.mxu1  ;;  %5060 = vmatmul.mubr.f32.gmra.mxu1 %v1864_v48 }
 0x22b   : > { %7033 = vst [vmem:[#allocation89_spill] sm:$0xff] %v6524_v41  ;;  %7034 = vst [vmem:[#allocation90_spill] sm:$0xff] %v6526_v40 }
 0x22c   : > { %v6528_v9 = vpop.f32.mrf.mxu0  ;;  %v6530_v1 = vpop.f32.mrf.mxu1 }
 0x22d   : > { %7035 = vst [vmem:[#allocation91_spill] sm:$0xff] %v6528_v9  ;;  %7036 = vst [vmem:[#allocation92_spill] sm:$0xff] %v6530_v1 }
 0x22e   : > { %v6532_v32 = vpop.f32.mrf.mxu0  ;;  %v6534_v0 = vpop.f32.mrf.mxu1 }
 0x22f   : > { %7037 = vst [vmem:[#allocation93_spill] sm:$0xff] %v6532_v32  ;;  %7038 = vst [vmem:[#allocation94_spill] sm:$0xff] %v6534_v0 }
 0x230   : > { %v6536_v17 = vpop.f32.mrf.mxu0  ;;  %v6538_v16 = vpop.f32.mrf.mxu1 }
 0x231   : > { %7039 = vst [vmem:[#allocation95_spill] sm:$0xff] %v6536_v17  ;;  %7040 = vst [vmem:[#allocation96_spill] sm:$0xff] %v6538_v16 }
 0x232   : > { %v6540_v8 = vpop.f32.mrf.mxu0  ;;  %v6542_v41 = vpop.f32.mrf.mxu1 }
 0x233   : > { %7041 = vst [vmem:[#allocation97_spill] sm:$0xff] %v6540_v8  ;;  %7042 = vst [vmem:[#allocation98_spill] sm:$0xff] %v6542_v41 }
 0x234   : > { %v6544_v25 = vpop.f32.mrf.mxu0  ;;  %v6546_v48 = vpop.f32.mrf.mxu1 }
 0x235   : > { %7043 = vst [vmem:[#allocation99_spill] sm:$0xff] %v6544_v25  ;;  %7044 = vst [vmem:[#allocation100_spill] sm:$0xff] %v6546_v48 }
 0x236   : > { %v6548_v40 = vpop.f32.mrf.mxu0  ;;  %v6550_v1 = vpop.f32.mrf.mxu1 }
 0x237   : > { %7045 = vst [vmem:[#allocation101_spill] sm:$0xff] %v6548_v40  ;;  %7046 = vst [vmem:[#allocation102_spill] sm:$0xff] %v6550_v1 }
 0x238   : > { %v6552_v32 = vpop.f32.mrf.mxu0  ;;  %v6554_v9 = vpop.f32.mrf.mxu1 }
 0x239   : > { %7047 = vst [vmem:[#allocation103_spill] sm:$0xff] %v6552_v32  ;;  %7048 = vst [vmem:[#allocation104_spill] sm:$0xff] %v6554_v9 }
 0x23a   : > { %v6556_v0 = vpop.f32.mrf.mxu0  ;;  %v6558_v17 = vpop.f32.mrf.mxu1 }
 0x23b   : > { %7049 = vst [vmem:[#allocation105_spill] sm:$0xff] %v6556_v0  ;;  %7050 = vst [vmem:[#allocation106_spill] sm:$0xff] %v6558_v17 }
 0x23c   : > { %v6560_v16 = vpop.f32.mrf.mxu0  ;;  %v6562_v8 = vpop.f32.mrf.mxu1 }
 0x23d   : > { %7051 = vst [vmem:[#allocation107_spill] sm:$0xff] %v6560_v16  ;;  %7052 = vst [vmem:[#allocation108_spill] sm:$0xff] %v6562_v8 }
 0x23e   : > { %v6566_v41 = vpop.f32.mrf.mxu0  ;;  %v6568_v48 = vpop.f32.mrf.mxu1 }
 0x23f   : > { %7053 = vst [vmem:[#allocation109_spill] sm:$0xff] %v6566_v41  ;;  %7054 = vst [vmem:[#allocation110_spill] sm:$0xff] %v6568_v48 }
 0x240   : > { %v6570_v40 = vpop.f32.mrf.mxu0  ;;  %v6572_v1 = vpop.f32.mrf.mxu1 }
 0x241   : > { %7055 = vst [vmem:[#allocation111_spill] sm:$0xff] %v6570_v40  ;;  %7056 = vst [vmem:[#allocation112_spill] sm:$0xff] %v6572_v1  ;;  %v6587_v1 = vld [vmem:[%s6945_s2] ss:$0 sm:$0xff] }
 0x242   : > { %v6574_v9 = vpop.f32.mrf.mxu0  ;;  %v6576_v0 = vpop.f32.mrf.mxu1 }
 0x243   : > { %7057 = vst [vmem:[#allocation113_spill] sm:$0xff] %v6574_v9  ;;  %7058 = vst [vmem:[#allocation114_spill] sm:$0xff] %v6576_v0 }
 0x244   : > { %v6578_v17 = vpop.f32.mrf.mxu0  ;;  %v6580_v16 = vpop.f32.mrf.mxu1 }
 0x245   : > { %7059 = vst [vmem:[#allocation115_spill] sm:$0xff] %v6578_v17  ;;  %7060 = vst [vmem:[#allocation116_spill] sm:$0xff] %v6580_v16 }
 0x246   : > { %v4689_v8 = vpop.f32.mrf.mxu0  ;;  %v4938_v32 = vpop.f32.mrf.mxu1 }
 0x247   : > { %v3606_v41 = vmax.f32 %v6124_v38, %v4689_v8  ;;  %v3689_v48 = vmax.f32 %v6126_v39, %v4938_v32 }
 0x248   : > { %v6589_v40 = vpop.f32.mrf.mxu0  ;;  %v6591_v9 = vpop.f32.mrf.mxu1 }
 0x249   : > { %7061 = vst [vmem:[#allocation117_spill] sm:$0xff] %v6589_v40  ;;  %7062 = vst [vmem:[#allocation118_spill] sm:$0xff] %v6591_v9  ;;  %v3772_v0 = vmax.f32 %v3606_v41, %v3689_v48 }
 0x24a   : > { %v4692_v17 = vpop.f32.mrf.mxu0  ;;  %v4941_v16 = vpop.f32.mrf.mxu1 }
 0x24b   : > { %v3862_v25 = vadd.f32 %v6587_v1, %v3772_v0  ;;  %v3608_v49 = vmax.f32 %v6136_v46, %v4692_v17  ;;  %v3691_v38 = vmax.f32 %v6138_v47, %v4941_v16 }
 0x24c   : > { %v2367_v39 = vpop.f32.mrf.mxu0  ;;  %v3197_v32 = vpop.f32.mrf.mxu1 }
 0x24d   : > { %v3945_v8 = vmax.f32 %v3862_v25, 0.0  ;;  %v3774_v9 = vmax.f32 %v3608_v49, %v3691_v38  ;;  %v3607_v41 = vmax.f32 %v6118_v34, %v2367_v39  ;;  %v3690_v48 = vmax.f32 %v6120_v35, %v3197_v32 }
 0x24e   : > { %v4695_v40 = vpop.f32.mrf.mxu0  ;;  %v4944_v0 = vpop.f32.mrf.mxu1 }
 0x24f   : > { %4028 = vst [vmem:[%s6599_s23] sm:$0xff] %v3945_v8  ;;  %v3864_v46 = vadd.f32 %v6587_v1, %v3774_v9  ;;  %v3773_v47 = vmax.f32 %v3607_v41, %v3690_v48  ;;  %v3610_v17 = vmax.f32 %v6148_v54, %v4695_v40  ;;  %v3693_v16 = vmax.f32 %v6150_v55, %v4944_v0 }
 0x250   : > { %v2377_v33 = vpop.f32.mrf.mxu0  ;;  %v3207_v24 = vpop.f32.mrf.mxu1 }
 0x251   : > { %v3947_v25 = vmax.f32 %v3864_v46, 0.0  ;;  %v3863_v49 = vadd.f32 %v6587_v1, %v3773_v47  ;;  %v3776_v34 = vmax.f32 %v3610_v17, %v3693_v16  ;;  %v3609_v35 = vmax.f32 %v6130_v42, %v2377_v33 }
 0x252   : > { %v3692_v38 = vmax.f32 %v6132_v43, %v3207_v24  ;;  %v4698_v39 = vpop.f32.mrf.mxu0  ;;  %v4947_v32 = vpop.f32.mrf.mxu1 }
 0x253   : > { %4030 = vst [vmem:[%s6599_s23 + $0x10] sm:$0xff] %v3947_v25  ;;  %v3946_v9 = vmax.f32 %v3863_v49, 0.0  ;;  %v3866_v54 = vadd.f32 %v6587_v1, %v3776_v34  ;;  %v3612_v55 = vmax.f32 %v6160_v62, %v4698_v39  ;;  %v3695_v40 = vmax.f32 %v6162_v63, %v4947_v32 }
 0x254   : > { %v3775_v8 = vmax.f32 %v3609_v35, %v3692_v38  ;;  %v2387_v41 = vpop.f32.mrf.mxu0  ;;  %v3217_v48 = vpop.f32.mrf.mxu1 }
 0x255   : > { %4029 = vst [vmem:[%s6599_s23 + $0x8] sm:$0xff] %v3946_v9  ;;  %v3949_v0 = vmax.f32 %v3866_v54, 0.0  ;;  %v3778_v46 = vmax.f32 %v3612_v55, %v3695_v40  ;;  %v3611_v42 = vmax.f32 %v6142_v50, %v2387_v41  ;;  %v3694_v43 = vmax.f32 %v6144_v51, %v3217_v48 }
 0x256   : > { %v3865_v24 = vadd.f32 %v6587_v1, %v3775_v8  ;;  %v4701_v33 = vpop.f32.mrf.mxu0  ;;  %v4950_v47 = vpop.f32.mrf.mxu1 }
 0x257   : > { %4032 = vst [vmem:[%s6599_s23 + $0x20] sm:$0xff] %v3949_v0  ;;  %v3868_v62 = vadd.f32 %v6587_v1, %v3778_v46  ;;  %v3777_v63 = vmax.f32 %v3611_v42, %v3694_v43  ;;  %v3614_v17 = vmax.f32 %v6172_v6, %v4701_v33  ;;  %v3697_v16 = vmax.f32 %v6174_v7, %v4950_v47 }
 0x258   : > { %v3948_v25 = vmax.f32 %v3865_v24, 0.0  ;;  %v2397_v49 = vpop.f32.mrf.mxu0  ;;  %v3227_v34 = vpop.f32.mrf.mxu1 }
 0x259   : > { %v3951_v50 = vmax.f32 %v3868_v62, 0.0  ;;  %v3867_v51 = vadd.f32 %v6587_v1, %v3777_v63  ;;  %v3780_v35 = vmax.f32 %v3614_v17, %v3697_v16  ;;  %v3613_v38 = vmax.f32 %v6154_v58, %v2397_v49 }
 0x25a   : > { %4031 = vst [vmem:[%s6599_s23 + $0x18] sm:$0xff] %v3948_v25  ;;  %v3696_v39 = vmax.f32 %v6156_v59, %v3227_v34  ;;  %v4704_v32 = vpop.f32.mrf.mxu0  ;;  %v4953_v9 = vpop.f32.mrf.mxu1 }
 0x25b   : > { %4034 = vst [vmem:[%s6599_s23 + $0x30] sm:$0xff] %v3951_v50  ;;  %v3950_v6 = vmax.f32 %v3867_v51, 0.0  ;;  %v3870_v7 = vadd.f32 %v6587_v1, %v3780_v35  ;;  %v3616_v54 = vmax.f32 %v6184_v14, %v4704_v32  ;;  %v3699_v55 = vmax.f32 %v6186_v15, %v4953_v9 }
 0x25c   : > { %v3779_v40 = vmax.f32 %v3613_v38, %v3696_v39  ;;  %v2407_v8 = vpop.f32.mrf.mxu0  ;;  %v3237_v41 = vpop.f32.mrf.mxu1 }
 0x25d   : > { %4033 = vst [vmem:[%s6599_s23 + $0x28] sm:$0xff] %v3950_v6  ;;  %v3953_v48 = vmax.f32 %v3870_v7, 0.0  ;;  %v3782_v58 = vmax.f32 %v3616_v54, %v3699_v55  ;;  %v3615_v0 = vmax.f32 %v6166_v2, %v2407_v8  ;;  %v3698_v59 = vmax.f32 %v6168_v3, %v3237_v41 }
 0x25e   : > { %v3869_v46 = vadd.f32 %v6587_v1, %v3779_v40  ;;  %v4707_v42 = vpop.f32.mrf.mxu0  ;;  %v4956_v43 = vpop.f32.mrf.mxu1 }
 0x25f   : > { %4036 = vst [vmem:[%s6599_s23 + $0x40] sm:$0xff] %v3953_v48  ;;  %v3872_v14 = vadd.f32 %v6587_v1, %v3782_v58  ;;  %v3781_v15 = vmax.f32 %v3615_v0, %v3698_v59  ;;  %v3618_v24 = vmax.f32 %v6196_v22, %v4707_v42  ;;  %v3701_v33 = vmax.f32 %v6198_v23, %v4956_v43 }
 0x260   : > { %v3952_v47 = vmax.f32 %v3869_v46, 0.0  ;;  %v2417_v62 = vpop.f32.mrf.mxu0  ;;  %v3247_v63 = vpop.f32.mrf.mxu1 }
 0x261   : > { %v3955_v2 = vmax.f32 %v3872_v14, 0.0  ;;  %v3871_v3 = vadd.f32 %v6587_v1, %v3781_v15  ;;  %v3784_v17 = vmax.f32 %v3618_v24, %v3701_v33  ;;  %v3617_v16 = vmax.f32 %v6178_v10, %v2417_v62 }
 0x262   : > { %4035 = vst [vmem:[%s6599_s23 + $0x38] sm:$0xff] %v3952_v47  ;;  %v3700_v25 = vmax.f32 %v6180_v11, %v3247_v63  ;;  %v4710_v49 = vpop.f32.mrf.mxu0  ;;  %v4959_v34 = vpop.f32.mrf.mxu1 }
 0x263   : > { %4038 = vst [vmem:[%s6599_s23 + $0x50] sm:$0xff] %v3955_v2  ;;  %v3954_v22 = vmax.f32 %v3871_v3, 0.0  ;;  %v3874_v23 = vadd.f32 %v6587_v1, %v3784_v17  ;;  %v3620_v50 = vmax.f32 %v6208_v30, %v4710_v49  ;;  %v3703_v51 = vmax.f32 %v6210_v31, %v4959_v34 }
 0x264   : > { %v3783_v35 = vmax.f32 %v3617_v16, %v3700_v25  ;;  %v2427_v38 = vpop.f32.mrf.mxu0  ;;  %v3257_v39 = vpop.f32.mrf.mxu1 }
 0x265   : > { %4037 = vst [vmem:[%s6599_s23 + $0x48] sm:$0xff] %v3954_v22  ;;  %v3957_v32 = vmax.f32 %v3874_v23, 0.0  ;;  %v3786_v10 = vmax.f32 %v3620_v50, %v3703_v51  ;;  %v3619_v9 = vmax.f32 %v6190_v18, %v2427_v38  ;;  %v3702_v11 = vmax.f32 %v6192_v19, %v3257_v39 }
 0x266   : > { %v3873_v6 = vadd.f32 %v6587_v1, %v3783_v35  ;;  %v4713_v7 = vpop.f32.mrf.mxu0  ;;  %v4962_v54 = vpop.f32.mrf.mxu1 }
 0x267   : > { %4040 = vst [vmem:[%s6599_s23 + $0x60] sm:$0xff] %v3957_v32  ;;  %v3876_v30 = vadd.f32 %v6587_v1, %v3786_v10  ;;  %v3785_v31 = vmax.f32 %v3619_v9, %v3702_v11  ;;  %v3622_v55 = vmax.f32 %v6220_v44, %v4713_v7  ;;  %v3705_v40 = vmax.f32 %v6222_v45, %v4962_v54 }
 0x268   : > { %v3956_v8 = vmax.f32 %v3873_v6, 0.0  ;;  %v2437_v41 = vpop.f32.mrf.mxu0  ;;  %v3267_v48 = vpop.f32.mrf.mxu1 }
 0x269   : > { %v3959_v18 = vmax.f32 %v3876_v30, 0.0  ;;  %v3875_v19 = vadd.f32 %v6587_v1, %v3785_v31  ;;  %v3788_v58 = vmax.f32 %v3622_v55, %v3705_v40  ;;  %v3621_v0 = vmax.f32 %v6202_v26, %v2437_v41 }
 0x26a   : > { %4039 = vst [vmem:[%s6599_s23 + $0x58] sm:$0xff] %v3956_v8  ;;  %v3704_v59 = vmax.f32 %v6204_v27, %v3267_v48  ;;  %v4716_v46 = vpop.f32.mrf.mxu0  ;;  %v4965_v42 = vpop.f32.mrf.mxu1 }
 0x26b   : > { %4042 = vst [vmem:[%s6599_s23 + $0x70] sm:$0xff] %v3959_v18  ;;  %v3958_v44 = vmax.f32 %v3875_v19, 0.0  ;;  %v3878_v45 = vadd.f32 %v6587_v1, %v3788_v58  ;;  %v3624_v43 = vmax.f32 %v6232_v60, %v4716_v46  ;;  %v3707_v14 = vmax.f32 %v6234_v61, %v4965_v42  ;;  %v7064_v42 = vld [vmem:[#allocation8_spill] sm:$0xff] }
 0x26c   : > { %v3787_v15 = vmax.f32 %v3621_v0, %v3704_v59  ;;  %v2447_v24 = vpop.f32.mrf.mxu0  ;;  %v3277_v33 = vpop.f32.mrf.mxu1  ;;  %v7063_v59 = vld [vmem:[#allocation7_spill] sm:$0xff] }
 0x26d   : > { %4041 = vst [vmem:[%s6599_s23 + $0x68] sm:$0xff] %v3958_v44  ;;  %v3961_v47 = vmax.f32 %v3878_v45, 0.0  ;;  %v3790_v26 = vmax.f32 %v3624_v43, %v3707_v14  ;;  %v3623_v62 = vmax.f32 %v6214_v36, %v2447_v24  ;;  %v3706_v27 = vmax.f32 %v6216_v37, %v3277_v33  ;;  %v7065_v24 = vld [vmem:[#allocation3_spill] sm:$0xff] }
 0x26e   : > { %v3877_v63 = vadd.f32 %v6587_v1, %v3787_v15  ;;  %v4719_v2 = vpop.f32.mrf.mxu0  ;;  %v4968_v3 = vpop.f32.mrf.mxu1 }
 0x26f   : > { %4044 = vst [vmem:[%s6599_s23 + $0x80] sm:$0xff] %v3961_v47  ;;  %v3880_v60 = vadd.f32 %v6587_v1, %v3790_v26  ;;  %v3789_v61 = vmax.f32 %v3623_v62, %v3706_v27  ;;  %v3626_v17 = vmax.f32 %v6244_v12, %v4719_v2  ;;  %v3709_v16 = vmax.f32 %v6246_v13, %v4968_v3  ;;  %v7067_v3 = vld [vmem:[#allocation11_spill] sm:$0xff] }
 0x270   : > { %v3960_v25 = vmax.f32 %v3877_v63, 0.0  ;;  %v2457_v49 = vpop.f32.mrf.mxu0  ;;  %v3287_v34 = vpop.f32.mrf.mxu1 }
 0x271   : > { %v3963_v36 = vmax.f32 %v3880_v60, 0.0  ;;  %v3879_v37 = vadd.f32 %v6587_v1, %v3789_v61  ;;  %v3792_v22 = vmax.f32 %v3626_v17, %v3709_v16  ;;  %v3625_v23 = vmax.f32 %v6226_v52, %v2457_v49  ;;  %v7068_v61 = vld [vmem:[#allocation12_spill] sm:$0xff] }
 0x272   : > { %4043 = vst [vmem:[%s6599_s23 + $0x78] sm:$0xff] %v3960_v25  ;;  %v3708_v50 = vmax.f32 %v6228_v53, %v3287_v34  ;;  %v4722_v51 = vpop.f32.mrf.mxu0  ;;  %v4971_v35 = vpop.f32.mrf.mxu1 }
 0x273   : > { %4046 = vst [vmem:[%s6599_s23 + $0x90] sm:$0xff] %v3963_v36  ;;  %v3962_v12 = vmax.f32 %v3879_v37, 0.0  ;;  %v3882_v13 = vadd.f32 %v6587_v1, %v3792_v22  ;;  %v3628_v38 = vmax.f32 %v6256_v28, %v4722_v51  ;;  %v3711_v39 = vmax.f32 %v6258_v29, %v4971_v35  ;;  %v7069_v22 = vld [vmem:[#allocation5_spill] sm:$0xff] }
 0x274   : > { %v3791_v32 = vmax.f32 %v3625_v23, %v3708_v50  ;;  %v2467_v10 = vpop.f32.mrf.mxu0  ;;  %v3297_v9 = vpop.f32.mrf.mxu1  ;;  %v7070_v50 = vld [vmem:[#allocation6_spill] sm:$0xff] }
 0x275   : > { %4045 = vst [vmem:[%s6599_s23 + $0x88] sm:$0xff] %v3962_v12  ;;  %v3965_v11 = vmax.f32 %v3882_v13, 0.0  ;;  %v3794_v52 = vmax.f32 %v3628_v38, %v3711_v39  ;;  %v3627_v6 = vmax.f32 %v6238_v4, %v2467_v10  ;;  %v3710_v53 = vmax.f32 %v6240_v5, %v3297_v9  ;;  %v7071_v39 = vld [vmem:[#allocation15_spill] sm:$0xff]  ;;  %v7072_v10 = vld [vmem:[#allocation16_spill] sm:$0xff] }
 0x276   : > { %v3881_v7 = vadd.f32 %v6587_v1, %v3791_v32  ;;  %v4725_v54 = vpop.f32.mrf.mxu0  ;;  %v4974_v30 = vpop.f32.mrf.mxu1 }
 0x277   : > { %4048 = vst [vmem:[%s6599_s23 + $0xa0] sm:$0xff] %v3965_v11  ;;  %v3884_v28 = vadd.f32 %v6587_v1, %v3794_v52  ;;  %v3793_v29 = vmax.f32 %v3627_v6, %v3710_v53  ;;  %v3630_v31 = vmax.f32 %v6268_v56, %v4725_v54  ;;  %v3713_v55 = vmax.f32 %v6270_v57, %v4974_v30  ;;  %v7073_v54 = vld [vmem:[#allocation9_spill] sm:$0xff] }
 0x278   : > { %v3964_v40 = vmax.f32 %v3881_v7, 0.0  ;;  %v2477_v8 = vpop.f32.mrf.mxu0  ;;  %v3307_v41 = vpop.f32.mrf.mxu1 }
 0x279   : > { %v3967_v4 = vmax.f32 %v3884_v28, 0.0  ;;  %v3883_v5 = vadd.f32 %v6587_v1, %v3793_v29  ;;  %v3796_v48 = vmax.f32 %v3630_v31, %v3713_v55  ;;  %v3629_v18 = vmax.f32 %v6250_v20, %v2477_v8  ;;  %v7074_v28 = vld [vmem:[#allocation10_spill] sm:$0xff] }
 0x27a   : > { %4047 = vst [vmem:[%s6599_s23 + $0x98] sm:$0xff] %v3964_v40  ;;  %v3712_v19 = vmax.f32 %v6252_v21, %v3307_v41  ;;  %v4728_v58 = vpop.f32.mrf.mxu0  ;;  %v4977_v0 = vpop.f32.mrf.mxu1  ;;  %v7066_v21 = vld [vmem:[#allocation4_spill] sm:$0xff] }
 0x27b   : > { %4050 = vst [vmem:[%s6599_s23 + $0xb0] sm:$0xff] %v3967_v4  ;;  %v3966_v56 = vmax.f32 %v3883_v5, 0.0  ;;  %v3886_v57 = vadd.f32 %v6587_v1, %v3796_v48  ;;  %v3632_v46 = vmax.f32 %v7063_v59, %v4728_v58  ;;  %v3715_v44 = vmax.f32 %v7064_v42, %v4977_v0  ;;  %v7075_v4 = vld [vmem:[#allocation19_spill] sm:$0xff]  ;;  %v7076_v48 = vld [vmem:[#allocation20_spill] sm:$0xff] }
 0x27c   : > { %v3795_v45 = vmax.f32 %v3629_v18, %v3712_v19  ;;  %v2487_v43 = vpop.f32.mrf.mxu0  ;;  %v3317_v14 = vpop.f32.mrf.mxu1 }
 0x27d   : > { %4049 = vst [vmem:[%s6599_s23 + $0xa8] sm:$0xff] %v3966_v56  ;;  %v3969_v15 = vmax.f32 %v3886_v57, 0.0  ;;  %v3798_v20 = vmax.f32 %v3632_v46, %v3715_v44  ;;  %v3631_v33 = vmax.f32 %v7065_v24, %v2487_v43  ;;  %v3714_v47 = vmax.f32 %v7066_v21, %v3317_v14  ;;  %v7077_v46 = vld [vmem:[#allocation13_spill] sm:$0xff]  ;;  %v7078_v44 = vld [vmem:[#allocation14_spill] sm:$0xff]  ;;  %v7079_v24 = vld [vmem:[#allocation23_spill] sm:$0xff] }
 0x27e   : > { %v3885_v26 = vadd.f32 %v6587_v1, %v3795_v45  ;;  %v4731_v62 = vpop.f32.mrf.mxu0  ;;  %v4980_v27 = vpop.f32.mrf.mxu1  ;;  %v7080_v21 = vld [vmem:[#allocation24_spill] sm:$0xff] }
 0x27f   : > { %4052 = vst [vmem:[%s6599_s23 + $0xc0] sm:$0xff] %v3969_v15  ;;  %v3888_v63 = vadd.f32 %v6587_v1, %v3798_v20  ;;  %v3797_v2 = vmax.f32 %v3631_v33, %v3714_v47  ;;  %v3634_v60 = vmax.f32 %v7067_v3, %v4731_v62  ;;  %v3717_v17 = vmax.f32 %v7068_v61, %v4980_v27  ;;  %v7081_v3 = vld [vmem:[#allocation17_spill] sm:$0xff]  ;;  %v7082_v61 = vld [vmem:[#allocation18_spill] sm:$0xff] }
 0x280   : > { %v3968_v16 = vmax.f32 %v3885_v26, 0.0  ;;  %v2497_v25 = vpop.f32.mrf.mxu0  ;;  %v3327_v49 = vpop.f32.mrf.mxu1 }
 0x281   : > { %v3971_v34 = vmax.f32 %v3888_v63, 0.0  ;;  %v3887_v36 = vadd.f32 %v6587_v1, %v3797_v2  ;;  %v3800_v37 = vmax.f32 %v3634_v60, %v3717_v17  ;;  %v3633_v23 = vmax.f32 %v7069_v22, %v2497_v25 }
 0x282   : > { %4051 = vst [vmem:[%s6599_s23 + $0xb8] sm:$0xff] %v3968_v16  ;;  %v3716_v51 = vmax.f32 %v7070_v50, %v3327_v49  ;;  %v4734_v35 = vpop.f32.mrf.mxu0  ;;  %v4983_v12 = vpop.f32.mrf.mxu1 }
 0x283   : > { %4054 = vst [vmem:[%s6599_s23 + $0xd0] sm:$0xff] %v3971_v34  ;;  %v3970_v13 = vmax.f32 %v3887_v36, 0.0  ;;  %v3890_v38 = vadd.f32 %v6587_v1, %v3800_v37  ;;  %v3636_v32 = vmax.f32 %v7071_v39, %v4734_v35  ;;  %v3719_v9 = vmax.f32 %v7072_v10, %v4983_v12  ;;  %v7083_v37 = vld [vmem:[#allocation27_spill] sm:$0xff] }
 0x284   : > { %v3799_v11 = vmax.f32 %v3633_v23, %v3716_v51  ;;  %v2507_v52 = vpop.f32.mrf.mxu0  ;;  %v3337_v6 = vpop.f32.mrf.mxu1  ;;  %v7084_v23 = vld [vmem:[#allocation28_spill] sm:$0xff] }
 0x285   : > { %4053 = vst [vmem:[%s6599_s23 + $0xc8] sm:$0xff] %v3970_v13  ;;  %v3973_v53 = vmax.f32 %v3890_v38, 0.0  ;;  %v3802_v7 = vmax.f32 %v3636_v32, %v3719_v9  ;;  %v3635_v30 = vmax.f32 %v7073_v54, %v2507_v52  ;;  %v3718_v29 = vmax.f32 %v7074_v28, %v3337_v6  ;;  %v7085_v32 = vld [vmem:[#allocation21_spill] sm:$0xff]  ;;  %v7086_v9 = vld [vmem:[#allocation22_spill] sm:$0xff]  ;;  %v7087_v54 = vld [vmem:[#allocation31_spill] sm:$0xff] }
 0x286   : > { %v3889_v31 = vadd.f32 %v6587_v1, %v3799_v11  ;;  %v4737_v55 = vpop.f32.mrf.mxu0  ;;  %v4986_v40 = vpop.f32.mrf.mxu1  ;;  %v7088_v28 = vld [vmem:[#allocation32_spill] sm:$0xff] }
 0x287   : > { %4056 = vst [vmem:[%s6599_s23 + $0xe0] sm:$0xff] %v3973_v53  ;;  %v3892_v8 = vadd.f32 %v6587_v1, %v3802_v7  ;;  %v3801_v41 = vmax.f32 %v3635_v30, %v3718_v29  ;;  %v3638_v5 = vmax.f32 %v7075_v4, %v4737_v55  ;;  %v3721_v18 = vmax.f32 %v7076_v48, %v4986_v40  ;;  %v7089_v4 = vld [vmem:[#allocation25_spill] sm:$0xff]  ;;  %v7090_v48 = vld [vmem:[#allocation26_spill] sm:$0xff] }
 0x288   : > { %v3972_v19 = vmax.f32 %v3889_v31, 0.0  ;;  %v2517_v58 = vpop.f32.mrf.mxu0  ;;  %v3347_v0 = vpop.f32.mrf.mxu1 }
 0x289   : > { %v3975_v56 = vmax.f32 %v3892_v8, 0.0  ;;  %v3891_v57 = vadd.f32 %v6587_v1, %v3801_v41  ;;  %v3804_v59 = vmax.f32 %v3638_v5, %v3721_v18  ;;  %v3637_v42 = vmax.f32 %v7077_v46, %v2517_v58 }
 0x28a   : > { %4055 = vst [vmem:[%s6599_s23 + $0xd8] sm:$0xff] %v3972_v19  ;;  %v3720_v45 = vmax.f32 %v7078_v44, %v3347_v0  ;;  %v4740_v43 = vpop.f32.mrf.mxu0  ;;  %v4989_v14 = vpop.f32.mrf.mxu1 }
 0x28b   : > { %4058 = vst [vmem:[%s6599_s23 + $0xf0] sm:$0xff] %v3975_v56  ;;  %v3974_v15 = vmax.f32 %v3891_v57, 0.0  ;;  %v3894_v20 = vadd.f32 %v6587_v1, %v3804_v59  ;;  %v3640_v33 = vmax.f32 %v7079_v24, %v4740_v43  ;;  %v3723_v47 = vmax.f32 %v7080_v21, %v4989_v14  ;;  %v7091_v59 = vld [vmem:[#allocation35_spill] sm:$0xff] }
 0x28c   : > { %v3803_v26 = vmax.f32 %v3637_v42, %v3720_v45  ;;  %v2527_v62 = vpop.f32.mrf.mxu0  ;;  %v3357_v27 = vpop.f32.mrf.mxu1  ;;  %v7092_v42 = vld [vmem:[#allocation36_spill] sm:$0xff] }
 0x28d   : > { %4057 = vst [vmem:[%s6599_s23 + $0xe8] sm:$0xff] %v3974_v15  ;;  %v3977_v63 = vmax.f32 %v3894_v20, 0.0  ;;  %v3806_v2 = vmax.f32 %v3640_v33, %v3723_v47  ;;  %v3639_v60 = vmax.f32 %v7081_v3, %v2527_v62  ;;  %v3722_v17 = vmax.f32 %v7082_v61, %v3357_v27  ;;  %v7093_v33 = vld [vmem:[#allocation29_spill] sm:$0xff]  ;;  %v7094_v47 = vld [vmem:[#allocation30_spill] sm:$0xff]  ;;  %v7095_v3 = vld [vmem:[#allocation39_spill] sm:$0xff] }
 0x28e   : > { %v3893_v16 = vadd.f32 %v6587_v1, %v3803_v26  ;;  %v4743_v25 = vpop.f32.mrf.mxu0  ;;  %v4992_v49 = vpop.f32.mrf.mxu1  ;;  %v7096_v61 = vld [vmem:[#allocation40_spill] sm:$0xff] }
 0x28f   : > { %4060 = vst [vmem:[%s6599_s23 + $0x100] sm:$0xff] %v3977_v63  ;;  %v3896_v34 = vadd.f32 %v6587_v1, %v3806_v2  ;;  %v3805_v36 = vmax.f32 %v3639_v60, %v3722_v17  ;;  %v3642_v22 = vmax.f32 %v7083_v37, %v4743_v25  ;;  %v3725_v50 = vmax.f32 %v7084_v23, %v4992_v49  ;;  %v7097_v37 = vld [vmem:[#allocation33_spill] sm:$0xff]  ;;  %v7098_v23 = vld [vmem:[#allocation34_spill] sm:$0xff] }
 0x290   : > { %v3976_v51 = vmax.f32 %v3893_v16, 0.0  ;;  %v2537_v35 = vpop.f32.mrf.mxu0  ;;  %v3367_v12 = vpop.f32.mrf.mxu1 }
 0x291   : > { %v3979_v13 = vmax.f32 %v3896_v34, 0.0  ;;  %v3895_v38 = vadd.f32 %v6587_v1, %v3805_v36  ;;  %v3808_v39 = vmax.f32 %v3642_v22, %v3725_v50  ;;  %v3641_v10 = vmax.f32 %v7085_v32, %v2537_v35 }
 0x292   : > { %4059 = vst [vmem:[%s6599_s23 + $0xf8] sm:$0xff] %v3976_v51  ;;  %v3724_v11 = vmax.f32 %v7086_v9, %v3367_v12  ;;  %v4746_v52 = vpop.f32.mrf.mxu0  ;;  %v4995_v6 = vpop.f32.mrf.mxu1 }
 0x293   : > { %4062 = vst [vmem:[%s6599_s23 + $0x110] sm:$0xff] %v3979_v13  ;;  %v3978_v53 = vmax.f32 %v3895_v38, 0.0  ;;  %v3898_v7 = vadd.f32 %v6587_v1, %v3808_v39  ;;  %v3644_v30 = vmax.f32 %v7087_v54, %v4746_v52  ;;  %v3727_v29 = vmax.f32 %v7088_v28, %v4995_v6  ;;  %v7099_v39 = vld [vmem:[#allocation43_spill] sm:$0xff] }
 0x294   : > { %v3807_v31 = vmax.f32 %v3641_v10, %v3724_v11  ;;  %v2547_v55 = vpop.f32.mrf.mxu0  ;;  %v3377_v40 = vpop.f32.mrf.mxu1  ;;  %v7100_v10 = vld [vmem:[#allocation44_spill] sm:$0xff] }
 0x295   : > { %4061 = vst [vmem:[%s6599_s23 + $0x108] sm:$0xff] %v3978_v53  ;;  %v3981_v8 = vmax.f32 %v3898_v7, 0.0  ;;  %v3810_v41 = vmax.f32 %v3644_v30, %v3727_v29  ;;  %v3643_v5 = vmax.f32 %v7089_v4, %v2547_v55  ;;  %v3726_v18 = vmax.f32 %v7090_v48, %v3377_v40  ;;  %v7101_v30 = vld [vmem:[#allocation37_spill] sm:$0xff]  ;;  %v7102_v29 = vld [vmem:[#allocation38_spill] sm:$0xff]  ;;  %v7103_v4 = vld [vmem:[#allocation47_spill] sm:$0xff] }
 0x296   : > { %v3897_v19 = vadd.f32 %v6587_v1, %v3807_v31  ;;  %v4749_v58 = vpop.f32.mrf.mxu0  ;;  %v4998_v0 = vpop.f32.mrf.mxu1  ;;  %v7104_v48 = vld [vmem:[#allocation48_spill] sm:$0xff] }
 0x297   : > { %4064 = vst [vmem:[%s6599_s23 + $0x120] sm:$0xff] %v3981_v8  ;;  %v3900_v56 = vadd.f32 %v6587_v1, %v3810_v41  ;;  %v3809_v57 = vmax.f32 %v3643_v5, %v3726_v18  ;;  %v3646_v46 = vmax.f32 %v7091_v59, %v4749_v58  ;;  %v3729_v44 = vmax.f32 %v7092_v42, %v4998_v0  ;;  %v7105_v59 = vld [vmem:[#allocation41_spill] sm:$0xff]  ;;  %v7106_v42 = vld [vmem:[#allocation42_spill] sm:$0xff] }
 0x298   : > { %v3980_v45 = vmax.f32 %v3897_v19, 0.0  ;;  %v2557_v43 = vpop.f32.mrf.mxu0  ;;  %v3387_v14 = vpop.f32.mrf.mxu1 }
 0x299   : > { %v3983_v15 = vmax.f32 %v3900_v56, 0.0  ;;  %v3899_v20 = vadd.f32 %v6587_v1, %v3809_v57  ;;  %v3812_v24 = vmax.f32 %v3646_v46, %v3729_v44  ;;  %v3645_v21 = vmax.f32 %v7093_v33, %v2557_v43 }
 0x29a   : > { %4063 = vst [vmem:[%s6599_s23 + $0x118] sm:$0xff] %v3980_v45  ;;  %v3728_v26 = vmax.f32 %v7094_v47, %v3387_v14  ;;  %v4752_v62 = vpop.f32.mrf.mxu0  ;;  %v5001_v27 = vpop.f32.mrf.mxu1 }
 0x29b   : > { %4066 = vst [vmem:[%s6599_s23 + $0x130] sm:$0xff] %v3983_v15  ;;  %v3982_v63 = vmax.f32 %v3899_v20, 0.0  ;;  %v3902_v2 = vadd.f32 %v6587_v1, %v3812_v24  ;;  %v3648_v60 = vmax.f32 %v7095_v3, %v4752_v62  ;;  %v3731_v17 = vmax.f32 %v7096_v61, %v5001_v27  ;;  %v7107_v24 = vld [vmem:[#allocation51_spill] sm:$0xff] }
 0x29c   : > { %v3811_v16 = vmax.f32 %v3645_v21, %v3728_v26  ;;  %v2567_v25 = vpop.f32.mrf.mxu0  ;;  %v3397_v49 = vpop.f32.mrf.mxu1  ;;  %v7108_v21 = vld [vmem:[#allocation52_spill] sm:$0xff] }
 0x29d   : > { %4065 = vst [vmem:[%s6599_s23 + $0x128] sm:$0xff] %v3982_v63  ;;  %v3985_v34 = vmax.f32 %v3902_v2, 0.0  ;;  %v3814_v36 = vmax.f32 %v3648_v60, %v3731_v17  ;;  %v3647_v22 = vmax.f32 %v7097_v37, %v2567_v25  ;;  %v3730_v50 = vmax.f32 %v7098_v23, %v3397_v49  ;;  %v7109_v60 = vld [vmem:[#allocation45_spill] sm:$0xff]  ;;  %v7110_v17 = vld [vmem:[#allocation46_spill] sm:$0xff]  ;;  %v7111_v37 = vld [vmem:[#allocation55_spill] sm:$0xff] }
 0x29e   : > { %v3901_v51 = vadd.f32 %v6587_v1, %v3811_v16  ;;  %v4755_v35 = vpop.f32.mrf.mxu0  ;;  %v5004_v12 = vpop.f32.mrf.mxu1  ;;  %v7112_v23 = vld [vmem:[#allocation56_spill] sm:$0xff] }
 0x29f   : > { %4068 = vst [vmem:[%s6599_s23 + $0x140] sm:$0xff] %v3985_v34  ;;  %v3904_v13 = vadd.f32 %v6587_v1, %v3814_v36  ;;  %v3813_v38 = vmax.f32 %v3647_v22, %v3730_v50  ;;  %v3650_v32 = vmax.f32 %v7099_v39, %v4755_v35  ;;  %v3733_v9 = vmax.f32 %v7100_v10, %v5004_v12  ;;  %v7113_v39 = vld [vmem:[#allocation49_spill] sm:$0xff]  ;;  %v7114_v10 = vld [vmem:[#allocation50_spill] sm:$0xff] }
 0x2a0   : > { %v3984_v11 = vmax.f32 %v3901_v51, 0.0  ;;  %v2577_v52 = vpop.f32.mrf.mxu0  ;;  %v3407_v6 = vpop.f32.mrf.mxu1 }
 0x2a1   : > { %v3987_v53 = vmax.f32 %v3904_v13, 0.0  ;;  %v3903_v7 = vadd.f32 %v6587_v1, %v3813_v38  ;;  %v3816_v54 = vmax.f32 %v3650_v32, %v3733_v9  ;;  %v3649_v28 = vmax.f32 %v7101_v30, %v2577_v52 }
 0x2a2   : > { %4067 = vst [vmem:[%s6599_s23 + $0x138] sm:$0xff] %v3984_v11  ;;  %v3732_v31 = vmax.f32 %v7102_v29, %v3407_v6  ;;  %v4758_v55 = vpop.f32.mrf.mxu0  ;;  %v5007_v40 = vpop.f32.mrf.mxu1 }
 0x2a3   : > { %4070 = vst [vmem:[%s6599_s23 + $0x150] sm:$0xff] %v3987_v53  ;;  %v3986_v8 = vmax.f32 %v3903_v7, 0.0  ;;  %v3906_v41 = vadd.f32 %v6587_v1, %v3816_v54  ;;  %v3652_v5 = vmax.f32 %v7103_v4, %v4758_v55  ;;  %v3735_v18 = vmax.f32 %v7104_v48, %v5007_v40  ;;  %v7115_v54 = vld [vmem:[#allocation59_spill] sm:$0xff] }
 0x2a4   : > { %v3815_v19 = vmax.f32 %v3649_v28, %v3732_v31  ;;  %v2587_v58 = vpop.f32.mrf.mxu0  ;;  %v3417_v0 = vpop.f32.mrf.mxu1  ;;  %v7116_v28 = vld [vmem:[#allocation60_spill] sm:$0xff] }
 0x2a5   : > { %4069 = vst [vmem:[%s6599_s23 + $0x148] sm:$0xff] %v3986_v8  ;;  %v3989_v56 = vmax.f32 %v3906_v41, 0.0  ;;  %v3818_v57 = vmax.f32 %v3652_v5, %v3735_v18  ;;  %v3651_v46 = vmax.f32 %v7105_v59, %v2587_v58  ;;  %v3734_v44 = vmax.f32 %v7106_v42, %v3417_v0  ;;  %v7117_v5 = vld [vmem:[#allocation53_spill] sm:$0xff]  ;;  %v7118_v18 = vld [vmem:[#allocation54_spill] sm:$0xff]  ;;  %v7119_v59 = vld [vmem:[#allocation63_spill] sm:$0xff] }
 0x2a6   : > { %v3905_v45 = vadd.f32 %v6587_v1, %v3815_v19  ;;  %v4761_v43 = vpop.f32.mrf.mxu0  ;;  %v5010_v14 = vpop.f32.mrf.mxu1  ;;  %v7120_v42 = vld [vmem:[#allocation64_spill] sm:$0xff] }
 0x2a7   : > { %4072 = vst [vmem:[%s6599_s23 + $0x160] sm:$0xff] %v3989_v56  ;;  %v3908_v15 = vadd.f32 %v6587_v1, %v3818_v57  ;;  %v3817_v20 = vmax.f32 %v3651_v46, %v3734_v44  ;;  %v3654_v33 = vmax.f32 %v7107_v24, %v4761_v43  ;;  %v3737_v47 = vmax.f32 %v7108_v21, %v5010_v14  ;;  %v7121_v24 = vld [vmem:[#allocation57_spill] sm:$0xff]  ;;  %v7122_v21 = vld [vmem:[#allocation58_spill] sm:$0xff] }
 0x2a8   : > { %v3988_v26 = vmax.f32 %v3905_v45, 0.0  ;;  %v2597_v62 = vpop.f32.mrf.mxu0  ;;  %v3427_v27 = vpop.f32.mrf.mxu1 }
 0x2a9   : > { %v3991_v63 = vmax.f32 %v3908_v15, 0.0  ;;  %v3907_v2 = vadd.f32 %v6587_v1, %v3817_v20  ;;  %v3820_v3 = vmax.f32 %v3654_v33, %v3737_v47  ;;  %v3653_v61 = vmax.f32 %v7109_v60, %v2597_v62 }
 0x2aa   : > { %4071 = vst [vmem:[%s6599_s23 + $0x158] sm:$0xff] %v3988_v26  ;;  %v3736_v16 = vmax.f32 %v7110_v17, %v3427_v27  ;;  %v4764_v25 = vpop.f32.mrf.mxu0  ;;  %v5013_v49 = vpop.f32.mrf.mxu1 }
 0x2ab   : > { %4074 = vst [vmem:[%s6599_s23 + $0x170] sm:$0xff] %v3991_v63  ;;  %v3990_v34 = vmax.f32 %v3907_v2, 0.0  ;;  %v3910_v36 = vadd.f32 %v6587_v1, %v3820_v3  ;;  %v3656_v22 = vmax.f32 %v7111_v37, %v4764_v25  ;;  %v3739_v50 = vmax.f32 %v7112_v23, %v5013_v49  ;;  %v7123_v3 = vld [vmem:[#allocation67_spill] sm:$0xff] }
 0x2ac   : > { %v3819_v51 = vmax.f32 %v3653_v61, %v3736_v16  ;;  %v2607_v35 = vpop.f32.mrf.mxu0  ;;  %v3437_v12 = vpop.f32.mrf.mxu1  ;;  %v7124_v61 = vld [vmem:[#allocation68_spill] sm:$0xff] }
 0x2ad   : > { %4073 = vst [vmem:[%s6599_s23 + $0x168] sm:$0xff] %v3990_v34  ;;  %v3993_v13 = vmax.f32 %v3910_v36, 0.0  ;;  %v3822_v38 = vmax.f32 %v3656_v22, %v3739_v50  ;;  %v3655_v32 = vmax.f32 %v7113_v39, %v2607_v35  ;;  %v3738_v9 = vmax.f32 %v7114_v10, %v3437_v12  ;;  %v7125_v22 = vld [vmem:[#allocation61_spill] sm:$0xff]  ;;  %v7126_v50 = vld [vmem:[#allocation62_spill] sm:$0xff]  ;;  %v7127_v39 = vld [vmem:[#allocation71_spill] sm:$0xff] }
 0x2ae   : > { %v3909_v11 = vadd.f32 %v6587_v1, %v3819_v51  ;;  %v4767_v52 = vpop.f32.mrf.mxu0  ;;  %v5016_v6 = vpop.f32.mrf.mxu1  ;;  %v7128_v10 = vld [vmem:[#allocation72_spill] sm:$0xff] }
 0x2af   : > { %4076 = vst [vmem:[%s6599_s23 + $0x180] sm:$0xff] %v3993_v13  ;;  %v3912_v53 = vadd.f32 %v6587_v1, %v3822_v38  ;;  %v3821_v7 = vmax.f32 %v3655_v32, %v3738_v9  ;;  %v3658_v30 = vmax.f32 %v7115_v54, %v4767_v52  ;;  %v3741_v29 = vmax.f32 %v7116_v28, %v5016_v6  ;;  %v7129_v54 = vld [vmem:[#allocation65_spill] sm:$0xff]  ;;  %v7130_v28 = vld [vmem:[#allocation66_spill] sm:$0xff] }
 0x2b0   : > { %v3992_v31 = vmax.f32 %v3909_v11, 0.0  ;;  %v2617_v55 = vpop.f32.mrf.mxu0  ;;  %v3447_v40 = vpop.f32.mrf.mxu1 }
 0x2b1   : > { %v3995_v8 = vmax.f32 %v3912_v53, 0.0  ;;  %v3911_v41 = vadd.f32 %v6587_v1, %v3821_v7  ;;  %v3824_v4 = vmax.f32 %v3658_v30, %v3741_v29  ;;  %v3657_v48 = vmax.f32 %v7117_v5, %v2617_v55 }
 0x2b2   : > { %4075 = vst [vmem:[%s6599_s23 + $0x178] sm:$0xff] %v3992_v31  ;;  %v3740_v19 = vmax.f32 %v7118_v18, %v3447_v40  ;;  %v4770_v58 = vpop.f32.mrf.mxu0  ;;  %v5019_v0 = vpop.f32.mrf.mxu1 }
 0x2b3   : > { %4078 = vst [vmem:[%s6599_s23 + $0x190] sm:$0xff] %v3995_v8  ;;  %v3994_v56 = vmax.f32 %v3911_v41, 0.0  ;;  %v3914_v57 = vadd.f32 %v6587_v1, %v3824_v4  ;;  %v3660_v46 = vmax.f32 %v7119_v59, %v4770_v58  ;;  %v3743_v44 = vmax.f32 %v7120_v42, %v5019_v0  ;;  %v7131_v4 = vld [vmem:[#allocation75_spill] sm:$0xff] }
 0x2b4   : > { %v3823_v45 = vmax.f32 %v3657_v48, %v3740_v19  ;;  %v2627_v43 = vpop.f32.mrf.mxu0  ;;  %v3457_v14 = vpop.f32.mrf.mxu1  ;;  %v7132_v48 = vld [vmem:[#allocation76_spill] sm:$0xff] }
 0x2b5   : > { %4077 = vst [vmem:[%s6599_s23 + $0x188] sm:$0xff] %v3994_v56  ;;  %v3997_v15 = vmax.f32 %v3914_v57, 0.0  ;;  %v3826_v20 = vmax.f32 %v3660_v46, %v3743_v44  ;;  %v3659_v33 = vmax.f32 %v7121_v24, %v2627_v43  ;;  %v3742_v47 = vmax.f32 %v7122_v21, %v3457_v14  ;;  %v7133_v46 = vld [vmem:[#allocation69_spill] sm:$0xff]  ;;  %v7134_v44 = vld [vmem:[#allocation70_spill] sm:$0xff]  ;;  %v7135_v24 = vld [vmem:[#allocation79_spill] sm:$0xff] }
 0x2b6   : > { %v3913_v26 = vadd.f32 %v6587_v1, %v3823_v45  ;;  %v4773_v62 = vpop.f32.mrf.mxu0  ;;  %v5022_v27 = vpop.f32.mrf.mxu1  ;;  %v7136_v21 = vld [vmem:[#allocation80_spill] sm:$0xff] }
 0x2b7   : > { %4080 = vst [vmem:[%s6599_s23 + $0x1a0] sm:$0xff] %v3997_v15  ;;  %v3916_v63 = vadd.f32 %v6587_v1, %v3826_v20  ;;  %v3825_v2 = vmax.f32 %v3659_v33, %v3742_v47  ;;  %v3662_v60 = vmax.f32 %v7123_v3, %v4773_v62  ;;  %v3745_v17 = vmax.f32 %v7124_v61, %v5022_v27  ;;  %v7137_v3 = vld [vmem:[#allocation73_spill] sm:$0xff]  ;;  %v7138_v61 = vld [vmem:[#allocation74_spill] sm:$0xff] }
 0x2b8   : > { %v3996_v16 = vmax.f32 %v3913_v26, 0.0  ;;  %v2637_v25 = vpop.f32.mrf.mxu0  ;;  %v3467_v49 = vpop.f32.mrf.mxu1 }
 0x2b9   : > { %v3999_v34 = vmax.f32 %v3916_v63, 0.0  ;;  %v3915_v36 = vadd.f32 %v6587_v1, %v3825_v2  ;;  %v3828_v37 = vmax.f32 %v3662_v60, %v3745_v17  ;;  %v3661_v23 = vmax.f32 %v7125_v22, %v2637_v25 }
 0x2ba   : > { %4079 = vst [vmem:[%s6599_s23 + $0x198] sm:$0xff] %v3996_v16  ;;  %v3744_v51 = vmax.f32 %v7126_v50, %v3467_v49  ;;  %v4776_v35 = vpop.f32.mrf.mxu0  ;;  %v5025_v12 = vpop.f32.mrf.mxu1 }
 0x2bb   : > { %4082 = vst [vmem:[%s6599_s23 + $0x1b0] sm:$0xff] %v3999_v34  ;;  %v3998_v13 = vmax.f32 %v3915_v36, 0.0  ;;  %v3918_v38 = vadd.f32 %v6587_v1, %v3828_v37  ;;  %v3664_v32 = vmax.f32 %v7127_v39, %v4776_v35  ;;  %v3747_v9 = vmax.f32 %v7128_v10, %v5025_v12  ;;  %v7139_v37 = vld [vmem:[#allocation83_spill] sm:$0xff] }
 0x2bc   : > { %v3827_v11 = vmax.f32 %v3661_v23, %v3744_v51  ;;  %v2647_v52 = vpop.f32.mrf.mxu0  ;;  %v3477_v6 = vpop.f32.mrf.mxu1  ;;  %v7140_v23 = vld [vmem:[#allocation84_spill] sm:$0xff] }
 0x2bd   : > { %4081 = vst [vmem:[%s6599_s23 + $0x1a8] sm:$0xff] %v3998_v13  ;;  %v4001_v53 = vmax.f32 %v3918_v38, 0.0  ;;  %v3830_v7 = vmax.f32 %v3664_v32, %v3747_v9  ;;  %v3663_v30 = vmax.f32 %v7129_v54, %v2647_v52  ;;  %v3746_v29 = vmax.f32 %v7130_v28, %v3477_v6  ;;  %v7141_v32 = vld [vmem:[#allocation77_spill] sm:$0xff]  ;;  %v7142_v9 = vld [vmem:[#allocation78_spill] sm:$0xff]  ;;  %v7144_v28 = vld [vmem:[#allocation88_spill] sm:$0xff] }
 0x2be   : > { %v3917_v31 = vadd.f32 %v6587_v1, %v3827_v11  ;;  %v4779_v55 = vpop.f32.mrf.mxu0  ;;  %v5028_v40 = vpop.f32.mrf.mxu1 }
 0x2bf   : > { %4084 = vst [vmem:[%s6599_s23 + $0x1c0] sm:$0xff] %v4001_v53  ;;  %v3920_v8 = vadd.f32 %v6587_v1, %v3830_v7  ;;  %v3829_v41 = vmax.f32 %v3663_v30, %v3746_v29  ;;  %v3666_v5 = vmax.f32 %v7131_v4, %v4779_v55  ;;  %v3749_v18 = vmax.f32 %v7132_v48, %v5028_v40  ;;  %v6854_v7 = vld [vmem:[%s6945_s2] ss:$0 sm:$0xff]  ;;  %v7145_v4 = vld [vmem:[#allocation81_spill] sm:$0xff]  ;;  %v7146_v48 = vld [vmem:[#allocation82_spill] sm:$0xff] }
 0x2c0   : > { %v4000_v19 = vmax.f32 %v3917_v31, 0.0  ;;  %v2657_v58 = vpop.f32.mrf.mxu0  ;;  %v3487_v0 = vpop.f32.mrf.mxu1 }
 0x2c1   : > { %v4003_v56 = vmax.f32 %v3920_v8, 0.0  ;;  %v3919_v57 = vadd.f32 %v6587_v1, %v3829_v41  ;;  %v3832_v59 = vmax.f32 %v3666_v5, %v3749_v18  ;;  %v3665_v42 = vmax.f32 %v7133_v46, %v2657_v58 }
 0x2c2   : > { %4083 = vst [vmem:[%s6599_s23 + $0x1b8] sm:$0xff] %v4000_v19  ;;  %v3748_v45 = vmax.f32 %v7134_v44, %v3487_v0  ;;  %v4782_v43 = vpop.f32.mrf.mxu0  ;;  %v5031_v14 = vpop.f32.mrf.mxu1 }
 0x2c3   : > { %4086 = vst [vmem:[%s6599_s23 + $0x1d0] sm:$0xff] %v4003_v56  ;;  %v4002_v15 = vmax.f32 %v3919_v57, 0.0  ;;  %v3922_v20 = vadd.f32 %v6587_v1, %v3832_v59  ;;  %v3668_v33 = vmax.f32 %v7135_v24, %v4782_v43  ;;  %v3751_v47 = vmax.f32 %v7136_v21, %v5031_v14  ;;  %v7147_v59 = vld [vmem:[#allocation91_spill] sm:$0xff] }
 0x2c4   : > { %v3831_v26 = vmax.f32 %v3665_v42, %v3748_v45  ;;  %v2667_v62 = vpop.f32.mrf.mxu0  ;;  %v3497_v27 = vpop.f32.mrf.mxu1  ;;  %v7148_v42 = vld [vmem:[#allocation92_spill] sm:$0xff] }
 0x2c5   : > { %4085 = vst [vmem:[%s6599_s23 + $0x1c8] sm:$0xff] %v4002_v15  ;;  %v4005_v63 = vmax.f32 %v3922_v20, 0.0  ;;  %v3834_v2 = vmax.f32 %v3668_v33, %v3751_v47  ;;  %v3667_v60 = vmax.f32 %v7137_v3, %v2667_v62  ;;  %v3750_v17 = vmax.f32 %v7138_v61, %v3497_v27  ;;  %v7149_v33 = vld [vmem:[#allocation85_spill] sm:$0xff]  ;;  %v7150_v47 = vld [vmem:[#allocation86_spill] sm:$0xff]  ;;  %v7151_v3 = vld [vmem:[#allocation95_spill] sm:$0xff] }
 0x2c6   : > { %v3921_v16 = vadd.f32 %v6587_v1, %v3831_v26  ;;  %v4785_v25 = vpop.f32.mrf.mxu0  ;;  %v5034_v49 = vpop.f32.mrf.mxu1  ;;  %v7152_v61 = vld [vmem:[#allocation96_spill] sm:$0xff] }
 0x2c7   : > { %4088 = vst [vmem:[%s6599_s23 + $0x1e0] sm:$0xff] %v4005_v63  ;;  %v3924_v34 = vadd.f32 %v6587_v1, %v3834_v2  ;;  %v3833_v36 = vmax.f32 %v3667_v60, %v3750_v17  ;;  %v3670_v22 = vmax.f32 %v7139_v37, %v4785_v25  ;;  %v3753_v50 = vmax.f32 %v7140_v23, %v5034_v49  ;;  %v7153_v37 = vld [vmem:[#allocation89_spill] sm:$0xff]  ;;  %v7154_v23 = vld [vmem:[#allocation90_spill] sm:$0xff] }
 0x2c8   : > { %v4004_v51 = vmax.f32 %v3921_v16, 0.0  ;;  %v2677_v35 = vpop.f32.mrf.mxu0  ;;  %v3507_v12 = vpop.f32.mrf.mxu1 }
 0x2c9   : > { %v4007_v13 = vmax.f32 %v3924_v34, 0.0  ;;  %v3923_v38 = vadd.f32 %v6587_v1, %v3833_v36  ;;  %v3836_v39 = vmax.f32 %v3670_v22, %v3753_v50  ;;  %v3669_v10 = vmax.f32 %v7141_v32, %v2677_v35  ;;  %v7143_v1 = vld [vmem:[#allocation87_spill] sm:$0xff] }
 0x2ca   : > { %4087 = vst [vmem:[%s6599_s23 + $0x1d8] sm:$0xff] %v4004_v51  ;;  %v3752_v11 = vmax.f32 %v7142_v9, %v3507_v12  ;;  %v4788_v52 = vpop.f32.mrf.mxu0  ;;  %v5037_v6 = vpop.f32.mrf.mxu1 }
 0x2cb   : > { %4090 = vst [vmem:[%s6599_s23 + $0x1f0] sm:$0xff] %v4007_v13  ;;  %v4006_v53 = vmax.f32 %v3923_v38, 0.0  ;;  %v3926_v54 = vadd.f32 %v6854_v7, %v3836_v39  ;;  %v3672_v30 = vmax.f32 %v7143_v1, %v4788_v52  ;;  %v3755_v29 = vmax.f32 %v7144_v28, %v5037_v6  ;;  %v7155_v39 = vld [vmem:[#allocation99_spill] sm:$0xff] }
 0x2cc   : > { %v3835_v31 = vmax.f32 %v3669_v10, %v3752_v11  ;;  %v2687_v55 = vpop.f32.mrf.mxu0  ;;  %v3517_v40 = vpop.f32.mrf.mxu1  ;;  %v7156_v10 = vld [vmem:[#allocation100_spill] sm:$0xff] }
 0x2cd   : > { %4089 = vst [vmem:[%s6599_s23 + $0x1e8] sm:$0xff] %v4006_v53  ;;  %v4009_v8 = vmax.f32 %v3926_v54, 0.0  ;;  %v3838_v41 = vmax.f32 %v3672_v30, %v3755_v29  ;;  %v3671_v5 = vmax.f32 %v7145_v4, %v2687_v55  ;;  %v3754_v18 = vmax.f32 %v7146_v48, %v3517_v40  ;;  %v7157_v30 = vld [vmem:[#allocation93_spill] sm:$0xff]  ;;  %v7158_v29 = vld [vmem:[#allocation94_spill] sm:$0xff]  ;;  %v7159_v4 = vld [vmem:[#allocation103_spill] sm:$0xff] }
 0x2ce   : > { %v3925_v19 = vadd.f32 %v6854_v7, %v3835_v31  ;;  %v4791_v58 = vpop.f32.mrf.mxu0  ;;  %v5040_v0 = vpop.f32.mrf.mxu1  ;;  %v7160_v48 = vld [vmem:[#allocation104_spill] sm:$0xff] }
 0x2cf   : > { %4092 = vst [vmem:[%s6599_s23 + $0x200] sm:$0xff] %v4009_v8  ;;  %v3928_v56 = vadd.f32 %v6854_v7, %v3838_v41  ;;  %v3837_v57 = vmax.f32 %v3671_v5, %v3754_v18  ;;  %v3674_v46 = vmax.f32 %v7147_v59, %v4791_v58  ;;  %v3757_v44 = vmax.f32 %v7148_v42, %v5040_v0  ;;  %v7161_v59 = vld [vmem:[#allocation97_spill] sm:$0xff]  ;;  %v7162_v42 = vld [vmem:[#allocation98_spill] sm:$0xff] }
 0x2d0   : > { %v4008_v45 = vmax.f32 %v3925_v19, 0.0  ;;  %v2697_v43 = vpop.f32.mrf.mxu0  ;;  %v3527_v14 = vpop.f32.mrf.mxu1 }
 0x2d1   : > { %v4011_v15 = vmax.f32 %v3928_v56, 0.0  ;;  %v3927_v20 = vadd.f32 %v6854_v7, %v3837_v57  ;;  %v3840_v24 = vmax.f32 %v3674_v46, %v3757_v44  ;;  %v3673_v21 = vmax.f32 %v7149_v33, %v2697_v43 }
 0x2d2   : > { %4091 = vst [vmem:[%s6599_s23 + $0x1f8] sm:$0xff] %v4008_v45  ;;  %v3756_v26 = vmax.f32 %v7150_v47, %v3527_v14  ;;  %v4794_v62 = vpop.f32.mrf.mxu0  ;;  %v5043_v27 = vpop.f32.mrf.mxu1 }
 0x2d3   : > { %4094 = vst [vmem:[%s6599_s23 + $0x210] sm:$0xff] %v4011_v15  ;;  %v4010_v63 = vmax.f32 %v3927_v20, 0.0  ;;  %v3930_v2 = vadd.f32 %v6854_v7, %v3840_v24  ;;  %v3676_v60 = vmax.f32 %v7151_v3, %v4794_v62  ;;  %v3759_v17 = vmax.f32 %v7152_v61, %v5043_v27  ;;  %v7163_v24 = vld [vmem:[#allocation107_spill] sm:$0xff] }
 0x2d4   : > { %v3839_v16 = vmax.f32 %v3673_v21, %v3756_v26  ;;  %v2707_v25 = vpop.f32.mrf.mxu0  ;;  %v3537_v49 = vpop.f32.mrf.mxu1  ;;  %v7164_v21 = vld [vmem:[#allocation108_spill] sm:$0xff] }
 0x2d5   : > { %4093 = vst [vmem:[%s6599_s23 + $0x208] sm:$0xff] %v4010_v63  ;;  %v4013_v34 = vmax.f32 %v3930_v2, 0.0  ;;  %v3842_v36 = vmax.f32 %v3676_v60, %v3759_v17  ;;  %v3675_v22 = vmax.f32 %v7153_v37, %v2707_v25  ;;  %v3758_v50 = vmax.f32 %v7154_v23, %v3537_v49  ;;  %v7165_v60 = vld [vmem:[#allocation101_spill] sm:$0xff]  ;;  %v7166_v17 = vld [vmem:[#allocation102_spill] sm:$0xff]  ;;  %v7167_v37 = vld [vmem:[#allocation111_spill] sm:$0xff] }
 0x2d6   : > { %v3929_v51 = vadd.f32 %v6854_v7, %v3839_v16  ;;  %v4797_v35 = vpop.f32.mrf.mxu0  ;;  %v5046_v12 = vpop.f32.mrf.mxu1  ;;  %v7168_v23 = vld [vmem:[#allocation112_spill] sm:$0xff] }
 0x2d7   : > { %4096 = vst [vmem:[%s6599_s23 + $0x220] sm:$0xff] %v4013_v34  ;;  %v3932_v13 = vadd.f32 %v6854_v7, %v3842_v36  ;;  %v3841_v38 = vmax.f32 %v3675_v22, %v3758_v50  ;;  %v3678_v32 = vmax.f32 %v7155_v39, %v4797_v35  ;;  %v3761_v9 = vmax.f32 %v7156_v10, %v5046_v12  ;;  %v7169_v39 = vld [vmem:[#allocation105_spill] sm:$0xff]  ;;  %v7170_v10 = vld [vmem:[#allocation106_spill] sm:$0xff] }
 0x2d8   : > { %v4012_v11 = vmax.f32 %v3929_v51, 0.0  ;;  %v2717_v52 = vpop.f32.mrf.mxu0  ;;  %v3547_v6 = vpop.f32.mrf.mxu1 }
 0x2d9   : > { %v4015_v53 = vmax.f32 %v3932_v13, 0.0  ;;  %v3931_v54 = vadd.f32 %v6854_v7, %v3841_v38  ;;  %v3844_v1 = vmax.f32 %v3678_v32, %v3761_v9  ;;  %v3677_v28 = vmax.f32 %v7157_v30, %v2717_v52 }
 0x2da   : > { %4095 = vst [vmem:[%s6599_s23 + $0x218] sm:$0xff] %v4012_v11  ;;  %v3760_v31 = vmax.f32 %v7158_v29, %v3547_v6  ;;  %v4800_v55 = vpop.f32.mrf.mxu0  ;;  %v5049_v40 = vpop.f32.mrf.mxu1 }
 0x2db   : > { %4098 = vst [vmem:[%s6599_s23 + $0x230] sm:$0xff] %v4015_v53  ;;  %v4014_v8 = vmax.f32 %v3931_v54, 0.0  ;;  %v3934_v41 = vadd.f32 %v6854_v7, %v3844_v1  ;;  %v3680_v5 = vmax.f32 %v7159_v4, %v4800_v55  ;;  %v3763_v18 = vmax.f32 %v7160_v48, %v5049_v40  ;;  %v7171_v1 = vld [vmem:[#allocation115_spill] sm:$0xff] }
 0x2dc   : > { %v3843_v19 = vmax.f32 %v3677_v28, %v3760_v31  ;;  %v2727_v58 = vpop.f32.mrf.mxu0  ;;  %v3557_v0 = vpop.f32.mrf.mxu1  ;;  %v7172_v28 = vld [vmem:[#allocation116_spill] sm:$0xff] }
 0x2dd   : > { %4097 = vst [vmem:[%s6599_s23 + $0x228] sm:$0xff] %v4014_v8  ;;  %v4017_v56 = vmax.f32 %v3934_v41, 0.0  ;;  %v3846_v57 = vmax.f32 %v3680_v5, %v3763_v18  ;;  %v3679_v46 = vmax.f32 %v7161_v59, %v2727_v58  ;;  %v3762_v44 = vmax.f32 %v7162_v42, %v3557_v0  ;;  %v7173_v5 = vld [vmem:[#allocation109_spill] sm:$0xff]  ;;  %v7174_v18 = vld [vmem:[#allocation110_spill] sm:$0xff] }
 0x2de   : > { %v3933_v45 = vadd.f32 %v6854_v7, %v3843_v19  ;;  %v4803_v43 = vpop.f32.mrf.mxu0  ;;  %v5052_v14 = vpop.f32.mrf.mxu1  ;;  %v7175_v59 = vld [vmem:[#allocation117_spill] sm:$0xff]  ;;  %v7176_v42 = vld [vmem:[#allocation118_spill] sm:$0xff] }
 0x2df   : > { %4100 = vst [vmem:[%s6599_s23 + $0x240] sm:$0xff] %v4017_v56  ;;  %v3936_v15 = vadd.f32 %v6854_v7, %v3846_v57  ;;  %v3845_v20 = vmax.f32 %v3679_v46, %v3762_v44  ;;  %v3682_v33 = vmax.f32 %v7163_v24, %v4803_v43  ;;  %v3765_v47 = vmax.f32 %v7164_v21, %v5052_v14  ;;  %v7177_v24 = vld [vmem:[#allocation113_spill] sm:$0xff]  ;;  %v7178_v21 = vld [vmem:[#allocation114_spill] sm:$0xff] }
 0x2e0   : > { %v4016_v26 = vmax.f32 %v3933_v45, 0.0  ;;  %v2737_v62 = vpop.f32.mrf.mxu0  ;;  %v3567_v27 = vpop.f32.mrf.mxu1 }
 0x2e1   : > { %v4019_v63 = vmax.f32 %v3936_v15, 0.0  ;;  %v3935_v2 = vadd.f32 %v6854_v7, %v3845_v20  ;;  %v3848_v3 = vmax.f32 %v3682_v33, %v3765_v47  ;;  %v3681_v61 = vmax.f32 %v7165_v60, %v2737_v62 }
 0x2e2   : > { %4099 = vst [vmem:[%s6599_s23 + $0x238] sm:$0xff] %v4016_v26  ;;  %v3764_v16 = vmax.f32 %v7166_v17, %v3567_v27  ;;  %v4806_v25 = vpop.f32.mrf.mxu0  ;;  %v5055_v49 = vpop.f32.mrf.mxu1 }
 0x2e3   : > { %4102 = vst [vmem:[%s6599_s23 + $0x250] sm:$0xff] %v4019_v63  ;;  %v4018_v34 = vmax.f32 %v3935_v2, 0.0  ;;  %v3938_v36 = vadd.f32 %v6854_v7, %v3848_v3  ;;  %v3684_v22 = vmax.f32 %v7167_v37, %v4806_v25  ;;  %v3767_v50 = vmax.f32 %v7168_v23, %v5055_v49 }
 0x2e4   : > { %v3847_v51 = vmax.f32 %v3681_v61, %v3764_v16  ;;  %v2747_v35 = vpop.f32.mrf.mxu0  ;;  %v3577_v12 = vpop.f32.mrf.mxu1 }
 0x2e5   : > { %4101 = vst [vmem:[%s6599_s23 + $0x248] sm:$0xff] %v4018_v34  ;;  %v4021_v13 = vmax.f32 %v3938_v36, 0.0  ;;  %v3850_v38 = vmax.f32 %v3684_v22, %v3767_v50  ;;  %v3683_v32 = vmax.f32 %v7169_v39, %v2747_v35  ;;  %v3766_v9 = vmax.f32 %v7170_v10, %v3577_v12 }
 0x2e6   : > { %v3937_v11 = vadd.f32 %v6854_v7, %v3847_v51  ;;  %v4809_v52 = vpop.f32.mrf.mxu0  ;;  %v5058_v6 = vpop.f32.mrf.mxu1 }
 0x2e7   : > { %4104 = vst [vmem:[%s6599_s23 + $0x260] sm:$0xff] %v4021_v13  ;;  %v3940_v53 = vadd.f32 %v6854_v7, %v3850_v38  ;;  %v3849_v54 = vmax.f32 %v3683_v32, %v3766_v9  ;;  %v3686_v30 = vmax.f32 %v7171_v1, %v4809_v52  ;;  %v3769_v29 = vmax.f32 %v7172_v28, %v5058_v6 }
 0x2e8   : > { %v4020_v31 = vmax.f32 %v3937_v11, 0.0  ;;  %v2757_v55 = vpop.f32.mrf.mxu0  ;;  %v3587_v40 = vpop.f32.mrf.mxu1 }
 0x2e9   : > { %v4023_v8 = vmax.f32 %v3940_v53, 0.0  ;;  %v3939_v41 = vadd.f32 %v6854_v7, %v3849_v54  ;;  %v3852_v4 = vmax.f32 %v3686_v30, %v3769_v29  ;;  %v3685_v48 = vmax.f32 %v7173_v5, %v2757_v55 }
 0x2ea   : > { %4103 = vst [vmem:[%s6599_s23 + $0x258] sm:$0xff] %v4020_v31  ;;  %v3768_v19 = vmax.f32 %v7174_v18, %v3587_v40  ;;  %v4812_v58 = vpop.f32.mrf.mxu0  ;;  %v5061_v0 = vpop.f32.mrf.mxu1 }
 0x2eb   : > { %4106 = vst [vmem:[%s6599_s23 + $0x270] sm:$0xff] %v4023_v8  ;;  %v4022_v56 = vmax.f32 %v3939_v41, 0.0  ;;  %v3942_v57 = vadd.f32 %v6854_v7, %v3852_v4  ;;  %v3688_v46 = vmax.f32 %v7175_v59, %v4812_v58  ;;  %v3771_v44 = vmax.f32 %v7176_v42, %v5061_v0 }
 0x2ec   : > { %v3851_v45 = vmax.f32 %v3685_v48, %v3768_v19  ;;  %v2767_v43 = vpop.f32.mrf.mxu0  ;;  %v3597_v14 = vpop.f32.mrf.mxu1 }
 0x2ed   : > { %4105 = vst [vmem:[%s6599_s23 + $0x268] sm:$0xff] %v4022_v56  ;;  %v4025_v15 = vmax.f32 %v3942_v57, 0.0  ;;  %v3854_v20 = vmax.f32 %v3688_v46, %v3771_v44  ;;  %v3687_v33 = vmax.f32 %v7177_v24, %v2767_v43  ;;  %v3770_v47 = vmax.f32 %v7178_v21, %v3597_v14 }
 0x2ee   : > { %v3941_v26 = vadd.f32 %v6854_v7, %v3851_v45 }
 0x2ef   : > { %4108 = vst [vmem:[%s6599_s23 + $0x280] sm:$0xff] %v4025_v15  ;;  %v3944_v62 = vadd.f32 %v6854_v7, %v3854_v20  ;;  %v3853_v27 = vmax.f32 %v3687_v33, %v3770_v47 }
 0x2f0   : > { %v4024_v63 = vmax.f32 %v3941_v26, 0.0 }
 0x2f1   : > { %v4027_v2 = vmax.f32 %v3944_v62, 0.0  ;;  %v3943_v3 = vadd.f32 %v6854_v7, %v3853_v27 }
 0x2f2   : > { %4107 = vst [vmem:[%s6599_s23 + $0x278] sm:$0xff] %v4024_v63 }
 0x2f3   : > { %4110 = vst [vmem:[%s6599_s23 + $0x290] sm:$0xff] %v4027_v2  ;;  %v4026_v60 = vmax.f32 %v3943_v3, 0.0 }
 0x2f5   : > { %4109 = vst [vmem:[%s6599_s23 + $0x288] sm:$0xff] %v4026_v60 }
 0x2f6 PF: > { %p10_p9 = scmp.ge.s32.totalorder %s5182_s16, 4   ;;  %s7179_s12 = smov %s5139_s13 }
 0x2f7   : > { %s7180_s13 = smov %s5191_s19  ;;  %s7181_s14 = smov %s5182_s16 }
 0x2f8   :  { %12 = sbr.rel (!%p10_p9) target bundleno = 2 (0x2), region = 105 }

// kernel: cnn_lstm_forward.5
= control target key start
LH: loop header
LB: loop body
LE: loop exit
PB: predicated region body
PF: predicated region fallthrough
CT: control target
= control target key end

     0   :  { %s1951_s12 = smov 0   ;;  %s1953_s13 = smov 0   ;;  %s3247_s0 = inlined_call_operand.vmem [shape: f32[4,240,512], index: 0, kind: input, shape index: {}]   ;;  %s3248_s1 = inlined_call_operand.vmem [shape: f32[512,128], index: 1, kind: input, shape index: {}]   ;;  %s3249_s2 = inlined_call_operand.vmem [shape: f32[1,128], index: 2, kind: input, shape index: {}]   ;;  %s3250_s3 = inlined_call_operand.vmem [shape: f32[240,128], index: 3, kind: output, shape index: {}]  }
   0x1   :  { %s1955_s14 = smov 0  }
   0x2 LB: > { %s1865_s15 = sadd.s32 4294967295, %s1928_s14   ;;  %s1968_s16 = sadd.s32 1, %s1928_s14   ;;  %s1928_s14 = sphi %s1955_s14, %s3290_s14   ;;  %s1924_s13 = sphi %s1953_s13, %s3289_s13   ;;  %s1920_s12 = sphi %s1951_s12, %s3288_s12  }
   0x3   : > { %s17_s17 = ssub.s32 %s1928_s14, %s1968_s16  ;;  %s20_s18 = sadd.s32 1, %s1924_s13 }
   0x4   : > { %p18_p0 = scmp.eq.s32.totalorder %s17_s17, 0  ;;  %p27_p1 = scmp.ne.s32.totalorder %s1924_s13, %s1920_s12 }
   0x5   : > { %p28_p2 = scmp.eq.s32.totalorder %s1928_s14, 0  ;;  %p1868_p4 = scmp.ge.s32.totalorder %s1928_s14, 2 }
   0x6   : > { %s1977_s19 = scalar_select %p18_p0, %s1924_s13, %s20_s18  }
   0x7   : > { %p29_p3 = por %p28_p2, %p27_p1  ;;  %127 = sbr.rel (%p1868_p4) target bundleno = 137 (0x89), region = 24 }
   0xc   : > { %130 = sbr.rel (!%p29_p3) target bundleno = 137 (0x89), region = 28  ;;  %s132_s20 = sand.u32 (%p29_p3), 1, %s1924_s13  }
   0xd   : > { %s1878_s21 = smul.u32 (%p29_p3), 480, %s1928_s14 }
   0xe   : > { %s1879_s22 = smul.u32 (%p29_p3), 1920, %s132_s20 }
   0xf   : > { %s1985_s25 = scalar_lea.vmem (%p29_p3), %s3247_s0, %s1878_s21 }
  0x10   : > { %v151_v0 = vld [vmem:[%s1985_s25] sm:$0xff] (%p29_p3)  ;;  %v153_v1 = vld [vmem:[%s1985_s25 + $0x8] sm:$0xff] (%p29_p3)  ;;  %v155_v2 = vld [vmem:[%s1985_s25 + $0x10] sm:$0xff] (%p29_p3)  ;;  %s1990_s26 = scalar_lea.vmem (%p29_p3), [#allocation2], %s1879_s22 }
  0x11   : > { %152 = vst [vmem:[%s1990_s26] sm:$0xff] %v151_v0  ;;  %154 = vst [vmem:[%s1990_s26 + $0x8] sm:$0xff] %v153_v1  ;;  %v157_v3 = vld [vmem:[%s1985_s25 + $0x18] sm:$0xff]  ;;  %v159_v4 = vld [vmem:[%s1985_s25 + $0x20] sm:$0xff] }
  0x12   : > { %156 = vst [vmem:[%s1990_s26 + $0x10] sm:$0xff] %v155_v2  ;;  %v161_v5 = vld [vmem:[%s1985_s25 + $0x28] sm:$0xff]  ;;  %158 = vst [vmem:[%s1990_s26 + $0x18] sm:$0xff] %v157_v3  ;;  %v163_v6 = vld [vmem:[%s1985_s25 + $0x30] sm:$0xff] }
  0x13   : > { %160 = vst [vmem:[%s1990_s26 + $0x20] sm:$0xff] %v159_v4  ;;  %162 = vst [vmem:[%s1990_s26 + $0x28] sm:$0xff] %v161_v5  ;;  %v165_v7 = vld [vmem:[%s1985_s25 + $0x38] sm:$0xff]  ;;  %v167_v8 = vld [vmem:[%s1985_s25 + $0x40] sm:$0xff] }
  0x14   : > { %164 = vst [vmem:[%s1990_s26 + $0x30] sm:$0xff] %v163_v6  ;;  %166 = vst [vmem:[%s1990_s26 + $0x38] sm:$0xff] %v165_v7  ;;  %v169_v9 = vld [vmem:[%s1985_s25 + $0x48] sm:$0xff]  ;;  %v171_v10 = vld [vmem:[%s1985_s25 + $0x50] sm:$0xff] }
  0x15   : > { %168 = vst [vmem:[%s1990_s26 + $0x40] sm:$0xff] %v167_v8  ;;  %v173_v11 = vld [vmem:[%s1985_s25 + $0x58] sm:$0xff]  ;;  %170 = vst [vmem:[%s1990_s26 + $0x48] sm:$0xff] %v169_v9  ;;  %v175_v12 = vld [vmem:[%s1985_s25 + $0x60] sm:$0xff] }
  0x16   : > { %172 = vst [vmem:[%s1990_s26 + $0x50] sm:$0xff] %v171_v10  ;;  %174 = vst [vmem:[%s1990_s26 + $0x58] sm:$0xff] %v173_v11  ;;  %v177_v13 = vld [vmem:[%s1985_s25 + $0x68] sm:$0xff]  ;;  %v179_v14 = vld [vmem:[%s1985_s25 + $0x70] sm:$0xff] }
  0x17   : > { %176 = vst [vmem:[%s1990_s26 + $0x60] sm:$0xff] %v175_v12  ;;  %178 = vst [vmem:[%s1990_s26 + $0x68] sm:$0xff] %v177_v13  ;;  %v181_v15 = vld [vmem:[%s1985_s25 + $0x78] sm:$0xff]  ;;  %v183_v16 = vld [vmem:[%s1985_s25 + $0x80] sm:$0xff] }
  0x18   : > { %180 = vst [vmem:[%s1990_s26 + $0x70] sm:$0xff] %v179_v14  ;;  %v185_v17 = vld [vmem:[%s1985_s25 + $0x88] sm:$0xff]  ;;  %182 = vst [vmem:[%s1990_s26 + $0x78] sm:$0xff] %v181_v15  ;;  %v187_v18 = vld [vmem:[%s1985_s25 + $0x90] sm:$0xff] }
  0x19   : > { %184 = vst [vmem:[%s1990_s26 + $0x80] sm:$0xff] %v183_v16  ;;  %186 = vst [vmem:[%s1990_s26 + $0x88] sm:$0xff] %v185_v17  ;;  %v189_v19 = vld [vmem:[%s1985_s25 + $0x98] sm:$0xff]  ;;  %v191_v20 = vld [vmem:[%s1985_s25 + $0xa0] sm:$0xff] }
  0x1a   : > { %188 = vst [vmem:[%s1990_s26 + $0x90] sm:$0xff] %v187_v18  ;;  %190 = vst [vmem:[%s1990_s26 + $0x98] sm:$0xff] %v189_v19  ;;  %v193_v21 = vld [vmem:[%s1985_s25 + $0xa8] sm:$0xff]  ;;  %v195_v22 = vld [vmem:[%s1985_s25 + $0xb0] sm:$0xff] }
  0x1b   : > { %192 = vst [vmem:[%s1990_s26 + $0xa0] sm:$0xff] %v191_v20  ;;  %v197_v23 = vld [vmem:[%s1985_s25 + $0xb8] sm:$0xff]  ;;  %194 = vst [vmem:[%s1990_s26 + $0xa8] sm:$0xff] %v193_v21  ;;  %v199_v24 = vld [vmem:[%s1985_s25 + $0xc0] sm:$0xff] }
  0x1c   : > { %196 = vst [vmem:[%s1990_s26 + $0xb0] sm:$0xff] %v195_v22  ;;  %198 = vst [vmem:[%s1990_s26 + $0xb8] sm:$0xff] %v197_v23  ;;  %v201_v25 = vld [vmem:[%s1985_s25 + $0xc8] sm:$0xff]  ;;  %v203_v26 = vld [vmem:[%s1985_s25 + $0xd0] sm:$0xff] }
  0x1d   : > { %200 = vst [vmem:[%s1990_s26 + $0xc0] sm:$0xff] %v199_v24  ;;  %202 = vst [vmem:[%s1990_s26 + $0xc8] sm:$0xff] %v201_v25  ;;  %v205_v27 = vld [vmem:[%s1985_s25 + $0xd8] sm:$0xff]  ;;  %v207_v28 = vld [vmem:[%s1985_s25 + $0xe0] sm:$0xff] }
  0x1e   : > { %204 = vst [vmem:[%s1990_s26 + $0xd0] sm:$0xff] %v203_v26  ;;  %v209_v29 = vld [vmem:[%s1985_s25 + $0xe8] sm:$0xff]  ;;  %206 = vst [vmem:[%s1990_s26 + $0xd8] sm:$0xff] %v205_v27  ;;  %v211_v30 = vld [vmem:[%s1985_s25 + $0xf0] sm:$0xff] }
  0x1f   : > { %208 = vst [vmem:[%s1990_s26 + $0xe0] sm:$0xff] %v207_v28  ;;  %210 = vst [vmem:[%s1990_s26 + $0xe8] sm:$0xff] %v209_v29  ;;  %v213_v31 = vld [vmem:[%s1985_s25 + $0xf8] sm:$0xff]  ;;  %v215_v32 = vld [vmem:[%s1985_s25 + $0x100] sm:$0xff] }
  0x20   : > { %212 = vst [vmem:[%s1990_s26 + $0xf0] sm:$0xff] %v211_v30  ;;  %214 = vst [vmem:[%s1990_s26 + $0xf8] sm:$0xff] %v213_v31  ;;  %v217_v33 = vld [vmem:[%s1985_s25 + $0x108] sm:$0xff]  ;;  %v219_v34 = vld [vmem:[%s1985_s25 + $0x110] sm:$0xff] }
  0x21   : > { %216 = vst [vmem:[%s1990_s26 + $0x100] sm:$0xff] %v215_v32  ;;  %v221_v35 = vld [vmem:[%s1985_s25 + $0x118] sm:$0xff]  ;;  %218 = vst [vmem:[%s1990_s26 + $0x108] sm:$0xff] %v217_v33  ;;  %v223_v36 = vld [vmem:[%s1985_s25 + $0x120] sm:$0xff] }
  0x22   : > { %220 = vst [vmem:[%s1990_s26 + $0x110] sm:$0xff] %v219_v34  ;;  %222 = vst [vmem:[%s1990_s26 + $0x118] sm:$0xff] %v221_v35  ;;  %v225_v37 = vld [vmem:[%s1985_s25 + $0x128] sm:$0xff]  ;;  %v227_v38 = vld [vmem:[%s1985_s25 + $0x130] sm:$0xff] }
  0x23   : > { %224 = vst [vmem:[%s1990_s26 + $0x120] sm:$0xff] %v223_v36  ;;  %226 = vst [vmem:[%s1990_s26 + $0x128] sm:$0xff] %v225_v37  ;;  %v229_v39 = vld [vmem:[%s1985_s25 + $0x138] sm:$0xff]  ;;  %v231_v40 = vld [vmem:[%s1985_s25 + $0x140] sm:$0xff] }
  0x24   : > { %228 = vst [vmem:[%s1990_s26 + $0x130] sm:$0xff] %v227_v38  ;;  %v233_v41 = vld [vmem:[%s1985_s25 + $0x148] sm:$0xff]  ;;  %230 = vst [vmem:[%s1990_s26 + $0x138] sm:$0xff] %v229_v39  ;;  %v235_v42 = vld [vmem:[%s1985_s25 + $0x150] sm:$0xff] }
  0x25   : > { %232 = vst [vmem:[%s1990_s26 + $0x140] sm:$0xff] %v231_v40  ;;  %234 = vst [vmem:[%s1990_s26 + $0x148] sm:$0xff] %v233_v41  ;;  %v237_v43 = vld [vmem:[%s1985_s25 + $0x158] sm:$0xff]  ;;  %v239_v44 = vld [vmem:[%s1985_s25 + $0x160] sm:$0xff] }
  0x26   : > { %236 = vst [vmem:[%s1990_s26 + $0x150] sm:$0xff] %v235_v42  ;;  %238 = vst [vmem:[%s1990_s26 + $0x158] sm:$0xff] %v237_v43  ;;  %v241_v45 = vld [vmem:[%s1985_s25 + $0x168] sm:$0xff]  ;;  %v243_v46 = vld [vmem:[%s1985_s25 + $0x170] sm:$0xff] }
  0x27   : > { %240 = vst [vmem:[%s1990_s26 + $0x160] sm:$0xff] %v239_v44  ;;  %v245_v47 = vld [vmem:[%s1985_s25 + $0x178] sm:$0xff]  ;;  %242 = vst [vmem:[%s1990_s26 + $0x168] sm:$0xff] %v241_v45  ;;  %v247_v48 = vld [vmem:[%s1985_s25 + $0x180] sm:$0xff] }
  0x28   : > { %244 = vst [vmem:[%s1990_s26 + $0x170] sm:$0xff] %v243_v46  ;;  %246 = vst [vmem:[%s1990_s26 + $0x178] sm:$0xff] %v245_v47  ;;  %v249_v49 = vld [vmem:[%s1985_s25 + $0x188] sm:$0xff]  ;;  %v251_v50 = vld [vmem:[%s1985_s25 + $0x190] sm:$0xff] }
  0x29   : > { %248 = vst [vmem:[%s1990_s26 + $0x180] sm:$0xff] %v247_v48  ;;  %250 = vst [vmem:[%s1990_s26 + $0x188] sm:$0xff] %v249_v49  ;;  %v253_v51 = vld [vmem:[%s1985_s25 + $0x198] sm:$0xff]  ;;  %v255_v52 = vld [vmem:[%s1985_s25 + $0x1a0] sm:$0xff] }
  0x2a   : > { %252 = vst [vmem:[%s1990_s26 + $0x190] sm:$0xff] %v251_v50  ;;  %v257_v53 = vld [vmem:[%s1985_s25 + $0x1a8] sm:$0xff]  ;;  %254 = vst [vmem:[%s1990_s26 + $0x198] sm:$0xff] %v253_v51  ;;  %v259_v54 = vld [vmem:[%s1985_s25 + $0x1b0] sm:$0xff] }
  0x2b   : > { %256 = vst [vmem:[%s1990_s26 + $0x1a0] sm:$0xff] %v255_v52  ;;  %258 = vst [vmem:[%s1990_s26 + $0x1a8] sm:$0xff] %v257_v53  ;;  %v261_v55 = vld [vmem:[%s1985_s25 + $0x1b8] sm:$0xff]  ;;  %v263_v56 = vld [vmem:[%s1985_s25 + $0x1c0] sm:$0xff] }
  0x2c   : > { %260 = vst [vmem:[%s1990_s26 + $0x1b0] sm:$0xff] %v259_v54  ;;  %262 = vst [vmem:[%s1990_s26 + $0x1b8] sm:$0xff] %v261_v55  ;;  %v265_v57 = vld [vmem:[%s1985_s25 + $0x1c8] sm:$0xff]  ;;  %v267_v58 = vld [vmem:[%s1985_s25 + $0x1d0] sm:$0xff] }
  0x2d   : > { %264 = vst [vmem:[%s1990_s26 + $0x1c0] sm:$0xff] %v263_v56  ;;  %v269_v59 = vld [vmem:[%s1985_s25 + $0x1d8] sm:$0xff]  ;;  %266 = vst [vmem:[%s1990_s26 + $0x1c8] sm:$0xff] %v265_v57  ;;  %v271_v60 = vld [vmem:[%s1985_s25 + $0x3c0] sm:$0xff] }
  0x2e   : > { %268 = vst [vmem:[%s1990_s26 + $0x1d0] sm:$0xff] %v267_v58  ;;  %270 = vst [vmem:[%s1990_s26 + $0x1d8] sm:$0xff] %v269_v59  ;;  %v273_v61 = vld [vmem:[%s1985_s25 + $0x3c8] sm:$0xff]  ;;  %v275_v62 = vld [vmem:[%s1985_s25 + $0x3d0] sm:$0xff] }
  0x2f   : > { %272 = vst [vmem:[%s1990_s26 + $0x1e0] sm:$0xff] %v271_v60  ;;  %274 = vst [vmem:[%s1990_s26 + $0x1e8] sm:$0xff] %v273_v61  ;;  %v277_v63 = vld [vmem:[%s1985_s25 + $0x3d8] sm:$0xff]  ;;  %v279_v0 = vld [vmem:[%s1985_s25 + $0x3e0] sm:$0xff] }
  0x30   : > { %276 = vst [vmem:[%s1990_s26 + $0x1f0] sm:$0xff] %v275_v62  ;;  %v281_v1 = vld [vmem:[%s1985_s25 + $0x3e8] sm:$0xff]  ;;  %278 = vst [vmem:[%s1990_s26 + $0x1f8] sm:$0xff] %v277_v63  ;;  %v283_v2 = vld [vmem:[%s1985_s25 + $0x3f0] sm:$0xff] }
  0x31   : > { %280 = vst [vmem:[%s1990_s26 + $0x200] sm:$0xff] %v279_v0  ;;  %282 = vst [vmem:[%s1990_s26 + $0x208] sm:$0xff] %v281_v1  ;;  %v285_v3 = vld [vmem:[%s1985_s25 + $0x3f8] sm:$0xff]  ;;  %v287_v4 = vld [vmem:[%s1985_s25 + $0x400] sm:$0xff] }
  0x32   : > { %284 = vst [vmem:[%s1990_s26 + $0x210] sm:$0xff] %v283_v2  ;;  %286 = vst [vmem:[%s1990_s26 + $0x218] sm:$0xff] %v285_v3  ;;  %v289_v5 = vld [vmem:[%s1985_s25 + $0x408] sm:$0xff]  ;;  %v291_v6 = vld [vmem:[%s1985_s25 + $0x410] sm:$0xff] }
  0x33   : > { %288 = vst [vmem:[%s1990_s26 + $0x220] sm:$0xff] %v287_v4  ;;  %v293_v7 = vld [vmem:[%s1985_s25 + $0x418] sm:$0xff]  ;;  %290 = vst [vmem:[%s1990_s26 + $0x228] sm:$0xff] %v289_v5  ;;  %v295_v8 = vld [vmem:[%s1985_s25 + $0x420] sm:$0xff] }
  0x34   : > { %292 = vst [vmem:[%s1990_s26 + $0x230] sm:$0xff] %v291_v6  ;;  %294 = vst [vmem:[%s1990_s26 + $0x238] sm:$0xff] %v293_v7  ;;  %v297_v9 = vld [vmem:[%s1985_s25 + $0x428] sm:$0xff]  ;;  %v299_v10 = vld [vmem:[%s1985_s25 + $0x430] sm:$0xff] }
  0x35   : > { %296 = vst [vmem:[%s1990_s26 + $0x240] sm:$0xff] %v295_v8  ;;  %298 = vst [vmem:[%s1990_s26 + $0x248] sm:$0xff] %v297_v9  ;;  %v301_v11 = vld [vmem:[%s1985_s25 + $0x438] sm:$0xff]  ;;  %v303_v12 = vld [vmem:[%s1985_s25 + $0x440] sm:$0xff] }
  0x36   : > { %300 = vst [vmem:[%s1990_s26 + $0x250] sm:$0xff] %v299_v10  ;;  %v305_v13 = vld [vmem:[%s1985_s25 + $0x448] sm:$0xff]  ;;  %302 = vst [vmem:[%s1990_s26 + $0x258] sm:$0xff] %v301_v11  ;;  %v307_v14 = vld [vmem:[%s1985_s25 + $0x450] sm:$0xff] }
  0x37   : > { %304 = vst [vmem:[%s1990_s26 + $0x260] sm:$0xff] %v303_v12  ;;  %306 = vst [vmem:[%s1990_s26 + $0x268] sm:$0xff] %v305_v13  ;;  %v309_v15 = vld [vmem:[%s1985_s25 + $0x458] sm:$0xff]  ;;  %v311_v16 = vld [vmem:[%s1985_s25 + $0x460] sm:$0xff] }
  0x38   : > { %308 = vst [vmem:[%s1990_s26 + $0x270] sm:$0xff] %v307_v14  ;;  %310 = vst [vmem:[%s1990_s26 + $0x278] sm:$0xff] %v309_v15  ;;  %v313_v17 = vld [vmem:[%s1985_s25 + $0x468] sm:$0xff]  ;;  %v315_v18 = vld [vmem:[%s1985_s25 + $0x470] sm:$0xff] }
  0x39   : > { %312 = vst [vmem:[%s1990_s26 + $0x280] sm:$0xff] %v311_v16  ;;  %v317_v19 = vld [vmem:[%s1985_s25 + $0x478] sm:$0xff]  ;;  %314 = vst [vmem:[%s1990_s26 + $0x288] sm:$0xff] %v313_v17  ;;  %v319_v20 = vld [vmem:[%s1985_s25 + $0x480] sm:$0xff] }
  0x3a   : > { %316 = vst [vmem:[%s1990_s26 + $0x290] sm:$0xff] %v315_v18  ;;  %318 = vst [vmem:[%s1990_s26 + $0x298] sm:$0xff] %v317_v19  ;;  %v321_v21 = vld [vmem:[%s1985_s25 + $0x488] sm:$0xff]  ;;  %v323_v22 = vld [vmem:[%s1985_s25 + $0x490] sm:$0xff] }
  0x3b   : > { %320 = vst [vmem:[%s1990_s26 + $0x2a0] sm:$0xff] %v319_v20  ;;  %322 = vst [vmem:[%s1990_s26 + $0x2a8] sm:$0xff] %v321_v21  ;;  %v325_v23 = vld [vmem:[%s1985_s25 + $0x498] sm:$0xff]  ;;  %v327_v24 = vld [vmem:[%s1985_s25 + $0x4a0] sm:$0xff] }
  0x3c   : > { %324 = vst [vmem:[%s1990_s26 + $0x2b0] sm:$0xff] %v323_v22  ;;  %v329_v25 = vld [vmem:[%s1985_s25 + $0x4a8] sm:$0xff]  ;;  %326 = vst [vmem:[%s1990_s26 + $0x2b8] sm:$0xff] %v325_v23  ;;  %v331_v26 = vld [vmem:[%s1985_s25 + $0x4b0] sm:$0xff] }
  0x3d   : > { %328 = vst [vmem:[%s1990_s26 + $0x2c0] sm:$0xff] %v327_v24  ;;  %330 = vst [vmem:[%s1990_s26 + $0x2c8] sm:$0xff] %v329_v25  ;;  %v333_v27 = vld [vmem:[%s1985_s25 + $0x4b8] sm:$0xff]  ;;  %v335_v28 = vld [vmem:[%s1985_s25 + $0x4c0] sm:$0xff] }
  0x3e   : > { %332 = vst [vmem:[%s1990_s26 + $0x2d0] sm:$0xff] %v331_v26  ;;  %334 = vst [vmem:[%s1990_s26 + $0x2d8] sm:$0xff] %v333_v27  ;;  %v337_v29 = vld [vmem:[%s1985_s25 + $0x4c8] sm:$0xff]  ;;  %v339_v30 = vld [vmem:[%s1985_s25 + $0x4d0] sm:$0xff] }
  0x3f   : > { %336 = vst [vmem:[%s1990_s26 + $0x2e0] sm:$0xff] %v335_v28  ;;  %v341_v31 = vld [vmem:[%s1985_s25 + $0x4d8] sm:$0xff]  ;;  %338 = vst [vmem:[%s1990_s26 + $0x2e8] sm:$0xff] %v337_v29  ;;  %v343_v32 = vld [vmem:[%s1985_s25 + $0x4e0] sm:$0xff] }
  0x40   : > { %340 = vst [vmem:[%s1990_s26 + $0x2f0] sm:$0xff] %v339_v30  ;;  %342 = vst [vmem:[%s1990_s26 + $0x2f8] sm:$0xff] %v341_v31  ;;  %v345_v33 = vld [vmem:[%s1985_s25 + $0x4e8] sm:$0xff]  ;;  %v347_v34 = vld [vmem:[%s1985_s25 + $0x4f0] sm:$0xff] }
  0x41   : > { %344 = vst [vmem:[%s1990_s26 + $0x300] sm:$0xff] %v343_v32  ;;  %346 = vst [vmem:[%s1990_s26 + $0x308] sm:$0xff] %v345_v33  ;;  %v349_v35 = vld [vmem:[%s1985_s25 + $0x4f8] sm:$0xff]  ;;  %v351_v36 = vld [vmem:[%s1985_s25 + $0x500] sm:$0xff] }
  0x42   : > { %348 = vst [vmem:[%s1990_s26 + $0x310] sm:$0xff] %v347_v34  ;;  %v353_v37 = vld [vmem:[%s1985_s25 + $0x508] sm:$0xff]  ;;  %350 = vst [vmem:[%s1990_s26 + $0x318] sm:$0xff] %v349_v35  ;;  %v355_v38 = vld [vmem:[%s1985_s25 + $0x510] sm:$0xff] }
  0x43   : > { %352 = vst [vmem:[%s1990_s26 + $0x320] sm:$0xff] %v351_v36  ;;  %354 = vst [vmem:[%s1990_s26 + $0x328] sm:$0xff] %v353_v37  ;;  %v357_v39 = vld [vmem:[%s1985_s25 + $0x518] sm:$0xff]  ;;  %v359_v40 = vld [vmem:[%s1985_s25 + $0x520] sm:$0xff] }
  0x44   : > { %356 = vst [vmem:[%s1990_s26 + $0x330] sm:$0xff] %v355_v38  ;;  %358 = vst [vmem:[%s1990_s26 + $0x338] sm:$0xff] %v357_v39  ;;  %v361_v41 = vld [vmem:[%s1985_s25 + $0x528] sm:$0xff]  ;;  %v363_v42 = vld [vmem:[%s1985_s25 + $0x530] sm:$0xff] }
  0x45   : > { %360 = vst [vmem:[%s1990_s26 + $0x340] sm:$0xff] %v359_v40  ;;  %v365_v43 = vld [vmem:[%s1985_s25 + $0x538] sm:$0xff]  ;;  %362 = vst [vmem:[%s1990_s26 + $0x348] sm:$0xff] %v361_v41  ;;  %v367_v44 = vld [vmem:[%s1985_s25 + $0x540] sm:$0xff] }
  0x46   : > { %364 = vst [vmem:[%s1990_s26 + $0x350] sm:$0xff] %v363_v42  ;;  %366 = vst [vmem:[%s1990_s26 + $0x358] sm:$0xff] %v365_v43  ;;  %v369_v45 = vld [vmem:[%s1985_s25 + $0x548] sm:$0xff]  ;;  %v371_v46 = vld [vmem:[%s1985_s25 + $0x550] sm:$0xff] }
  0x47   : > { %368 = vst [vmem:[%s1990_s26 + $0x360] sm:$0xff] %v367_v44  ;;  %370 = vst [vmem:[%s1990_s26 + $0x368] sm:$0xff] %v369_v45  ;;  %v373_v47 = vld [vmem:[%s1985_s25 + $0x558] sm:$0xff]  ;;  %v375_v48 = vld [vmem:[%s1985_s25 + $0x560] sm:$0xff] }
  0x48   : > { %372 = vst [vmem:[%s1990_s26 + $0x370] sm:$0xff] %v371_v46  ;;  %v377_v49 = vld [vmem:[%s1985_s25 + $0x568] sm:$0xff]  ;;  %374 = vst [vmem:[%s1990_s26 + $0x378] sm:$0xff] %v373_v47  ;;  %v379_v50 = vld [vmem:[%s1985_s25 + $0x570] sm:$0xff] }
  0x49   : > { %376 = vst [vmem:[%s1990_s26 + $0x380] sm:$0xff] %v375_v48  ;;  %378 = vst [vmem:[%s1990_s26 + $0x388] sm:$0xff] %v377_v49  ;;  %v381_v51 = vld [vmem:[%s1985_s25 + $0x578] sm:$0xff]  ;;  %v383_v52 = vld [vmem:[%s1985_s25 + $0x580] sm:$0xff] }
  0x4a   : > { %380 = vst [vmem:[%s1990_s26 + $0x390] sm:$0xff] %v379_v50  ;;  %382 = vst [vmem:[%s1990_s26 + $0x398] sm:$0xff] %v381_v51  ;;  %v385_v53 = vld [vmem:[%s1985_s25 + $0x588] sm:$0xff]  ;;  %v387_v54 = vld [vmem:[%s1985_s25 + $0x590] sm:$0xff] }
  0x4b   : > { %384 = vst [vmem:[%s1990_s26 + $0x3a0] sm:$0xff] %v383_v52  ;;  %v389_v55 = vld [vmem:[%s1985_s25 + $0x598] sm:$0xff]  ;;  %386 = vst [vmem:[%s1990_s26 + $0x3a8] sm:$0xff] %v385_v53  ;;  %v391_v56 = vld [vmem:[%s1985_s25 + $0x780] sm:$0xff] }
  0x4c   : > { %388 = vst [vmem:[%s1990_s26 + $0x3b0] sm:$0xff] %v387_v54  ;;  %390 = vst [vmem:[%s1990_s26 + $0x3b8] sm:$0xff] %v389_v55  ;;  %v393_v57 = vld [vmem:[%s1985_s25 + $0x788] sm:$0xff]  ;;  %v395_v58 = vld [vmem:[%s1985_s25 + $0x790] sm:$0xff] }
  0x4d   : > { %392 = vst [vmem:[%s1990_s26 + $0x3c0] sm:$0xff] %v391_v56  ;;  %394 = vst [vmem:[%s1990_s26 + $0x3c8] sm:$0xff] %v393_v57  ;;  %v397_v59 = vld [vmem:[%s1985_s25 + $0x798] sm:$0xff]  ;;  %v399_v60 = vld [vmem:[%s1985_s25 + $0x7a0] sm:$0xff] }
  0x4e   : > { %396 = vst [vmem:[%s1990_s26 + $0x3d0] sm:$0xff] %v395_v58  ;;  %v401_v61 = vld [vmem:[%s1985_s25 + $0x7a8] sm:$0xff]  ;;  %398 = vst [vmem:[%s1990_s26 + $0x3d8] sm:$0xff] %v397_v59  ;;  %v403_v62 = vld [vmem:[%s1985_s25 + $0x7b0] sm:$0xff] }
  0x4f   : > { %400 = vst [vmem:[%s1990_s26 + $0x3e0] sm:$0xff] %v399_v60  ;;  %402 = vst [vmem:[%s1990_s26 + $0x3e8] sm:$0xff] %v401_v61  ;;  %v405_v63 = vld [vmem:[%s1985_s25 + $0x7b8] sm:$0xff]  ;;  %v407_v0 = vld [vmem:[%s1985_s25 + $0x7c0] sm:$0xff] }
  0x50   : > { %404 = vst [vmem:[%s1990_s26 + $0x3f0] sm:$0xff] %v403_v62  ;;  %406 = vst [vmem:[%s1990_s26 + $0x3f8] sm:$0xff] %v405_v63  ;;  %v409_v1 = vld [vmem:[%s1985_s25 + $0x7c8] sm:$0xff]  ;;  %v411_v2 = vld [vmem:[%s1985_s25 + $0x7d0] sm:$0xff] }
  0x51   : > { %408 = vst [vmem:[%s1990_s26 + $0x400] sm:$0xff] %v407_v0  ;;  %v413_v3 = vld [vmem:[%s1985_s25 + $0x7d8] sm:$0xff]  ;;  %410 = vst [vmem:[%s1990_s26 + $0x408] sm:$0xff] %v409_v1  ;;  %v415_v4 = vld [vmem:[%s1985_s25 + $0x7e0] sm:$0xff] }
  0x52   : > { %412 = vst [vmem:[%s1990_s26 + $0x410] sm:$0xff] %v411_v2  ;;  %414 = vst [vmem:[%s1990_s26 + $0x418] sm:$0xff] %v413_v3  ;;  %v417_v5 = vld [vmem:[%s1985_s25 + $0x7e8] sm:$0xff]  ;;  %v419_v6 = vld [vmem:[%s1985_s25 + $0x7f0] sm:$0xff] }
  0x53   : > { %416 = vst [vmem:[%s1990_s26 + $0x420] sm:$0xff] %v415_v4  ;;  %418 = vst [vmem:[%s1990_s26 + $0x428] sm:$0xff] %v417_v5  ;;  %v421_v7 = vld [vmem:[%s1985_s25 + $0x7f8] sm:$0xff]  ;;  %v423_v8 = vld [vmem:[%s1985_s25 + $0x800] sm:$0xff] }
  0x54   : > { %420 = vst [vmem:[%s1990_s26 + $0x430] sm:$0xff] %v419_v6  ;;  %v425_v9 = vld [vmem:[%s1985_s25 + $0x808] sm:$0xff]  ;;  %422 = vst [vmem:[%s1990_s26 + $0x438] sm:$0xff] %v421_v7  ;;  %v427_v10 = vld [vmem:[%s1985_s25 + $0x810] sm:$0xff] }
  0x55   : > { %424 = vst [vmem:[%s1990_s26 + $0x440] sm:$0xff] %v423_v8  ;;  %426 = vst [vmem:[%s1990_s26 + $0x448] sm:$0xff] %v425_v9  ;;  %v429_v11 = vld [vmem:[%s1985_s25 + $0x818] sm:$0xff]  ;;  %v431_v12 = vld [vmem:[%s1985_s25 + $0x820] sm:$0xff] }
  0x56   : > { %428 = vst [vmem:[%s1990_s26 + $0x450] sm:$0xff] %v427_v10  ;;  %430 = vst [vmem:[%s1990_s26 + $0x458] sm:$0xff] %v429_v11  ;;  %v433_v13 = vld [vmem:[%s1985_s25 + $0x828] sm:$0xff]  ;;  %v435_v14 = vld [vmem:[%s1985_s25 + $0x830] sm:$0xff] }
  0x57   : > { %432 = vst [vmem:[%s1990_s26 + $0x460] sm:$0xff] %v431_v12  ;;  %v437_v15 = vld [vmem:[%s1985_s25 + $0x838] sm:$0xff]  ;;  %434 = vst [vmem:[%s1990_s26 + $0x468] sm:$0xff] %v433_v13  ;;  %v439_v16 = vld [vmem:[%s1985_s25 + $0x840] sm:$0xff] }
  0x58   : > { %436 = vst [vmem:[%s1990_s26 + $0x470] sm:$0xff] %v435_v14  ;;  %438 = vst [vmem:[%s1990_s26 + $0x478] sm:$0xff] %v437_v15  ;;  %v441_v17 = vld [vmem:[%s1985_s25 + $0x848] sm:$0xff]  ;;  %v443_v18 = vld [vmem:[%s1985_s25 + $0x850] sm:$0xff] }
  0x59   : > { %440 = vst [vmem:[%s1990_s26 + $0x480] sm:$0xff] %v439_v16  ;;  %442 = vst [vmem:[%s1990_s26 + $0x488] sm:$0xff] %v441_v17  ;;  %v445_v19 = vld [vmem:[%s1985_s25 + $0x858] sm:$0xff]  ;;  %v447_v20 = vld [vmem:[%s1985_s25 + $0x860] sm:$0xff] }
  0x5a   : > { %444 = vst [vmem:[%s1990_s26 + $0x490] sm:$0xff] %v443_v18  ;;  %v449_v21 = vld [vmem:[%s1985_s25 + $0x868] sm:$0xff]  ;;  %446 = vst [vmem:[%s1990_s26 + $0x498] sm:$0xff] %v445_v19  ;;  %v451_v22 = vld [vmem:[%s1985_s25 + $0x870] sm:$0xff] }
  0x5b   : > { %448 = vst [vmem:[%s1990_s26 + $0x4a0] sm:$0xff] %v447_v20  ;;  %450 = vst [vmem:[%s1990_s26 + $0x4a8] sm:$0xff] %v449_v21  ;;  %v453_v23 = vld [vmem:[%s1985_s25 + $0x878] sm:$0xff]  ;;  %v455_v24 = vld [vmem:[%s1985_s25 + $0x880] sm:$0xff] }
  0x5c   : > { %452 = vst [vmem:[%s1990_s26 + $0x4b0] sm:$0xff] %v451_v22  ;;  %454 = vst [vmem:[%s1990_s26 + $0x4b8] sm:$0xff] %v453_v23  ;;  %v457_v25 = vld [vmem:[%s1985_s25 + $0x888] sm:$0xff]  ;;  %v459_v26 = vld [vmem:[%s1985_s25 + $0x890] sm:$0xff] }
  0x5d   : > { %456 = vst [vmem:[%s1990_s26 + $0x4c0] sm:$0xff] %v455_v24  ;;  %v461_v27 = vld [vmem:[%s1985_s25 + $0x898] sm:$0xff]  ;;  %458 = vst [vmem:[%s1990_s26 + $0x4c8] sm:$0xff] %v457_v25  ;;  %v463_v28 = vld [vmem:[%s1985_s25 + $0x8a0] sm:$0xff] }
  0x5e   : > { %460 = vst [vmem:[%s1990_s26 + $0x4d0] sm:$0xff] %v459_v26  ;;  %462 = vst [vmem:[%s1990_s26 + $0x4d8] sm:$0xff] %v461_v27  ;;  %v465_v29 = vld [vmem:[%s1985_s25 + $0x8a8] sm:$0xff]  ;;  %v467_v30 = vld [vmem:[%s1985_s25 + $0x8b0] sm:$0xff] }
  0x5f   : > { %464 = vst [vmem:[%s1990_s26 + $0x4e0] sm:$0xff] %v463_v28  ;;  %466 = vst [vmem:[%s1990_s26 + $0x4e8] sm:$0xff] %v465_v29  ;;  %v469_v31 = vld [vmem:[%s1985_s25 + $0x8b8] sm:$0xff]  ;;  %v471_v32 = vld [vmem:[%s1985_s25 + $0x8c0] sm:$0xff] }
  0x60   : > { %468 = vst [vmem:[%s1990_s26 + $0x4f0] sm:$0xff] %v467_v30  ;;  %v473_v33 = vld [vmem:[%s1985_s25 + $0x8c8] sm:$0xff]  ;;  %470 = vst [vmem:[%s1990_s26 + $0x4f8] sm:$0xff] %v469_v31  ;;  %v475_v34 = vld [vmem:[%s1985_s25 + $0x8d0] sm:$0xff] }
  0x61   : > { %472 = vst [vmem:[%s1990_s26 + $0x500] sm:$0xff] %v471_v32  ;;  %474 = vst [vmem:[%s1990_s26 + $0x508] sm:$0xff] %v473_v33  ;;  %v477_v35 = vld [vmem:[%s1985_s25 + $0x8d8] sm:$0xff]  ;;  %v479_v36 = vld [vmem:[%s1985_s25 + $0x8e0] sm:$0xff] }
  0x62   : > { %476 = vst [vmem:[%s1990_s26 + $0x510] sm:$0xff] %v475_v34  ;;  %478 = vst [vmem:[%s1990_s26 + $0x518] sm:$0xff] %v477_v35  ;;  %v481_v37 = vld [vmem:[%s1985_s25 + $0x8e8] sm:$0xff]  ;;  %v483_v38 = vld [vmem:[%s1985_s25 + $0x8f0] sm:$0xff] }
  0x63   : > { %480 = vst [vmem:[%s1990_s26 + $0x520] sm:$0xff] %v479_v36  ;;  %v485_v39 = vld [vmem:[%s1985_s25 + $0x8f8] sm:$0xff]  ;;  %482 = vst [vmem:[%s1990_s26 + $0x528] sm:$0xff] %v481_v37  ;;  %v487_v40 = vld [vmem:[%s1985_s25 + $0x900] sm:$0xff] }
  0x64   : > { %484 = vst [vmem:[%s1990_s26 + $0x530] sm:$0xff] %v483_v38  ;;  %486 = vst [vmem:[%s1990_s26 + $0x538] sm:$0xff] %v485_v39  ;;  %v489_v41 = vld [vmem:[%s1985_s25 + $0x908] sm:$0xff]  ;;  %v491_v42 = vld [vmem:[%s1985_s25 + $0x910] sm:$0xff] }
  0x65   : > { %488 = vst [vmem:[%s1990_s26 + $0x540] sm:$0xff] %v487_v40  ;;  %490 = vst [vmem:[%s1990_s26 + $0x548] sm:$0xff] %v489_v41  ;;  %v493_v43 = vld [vmem:[%s1985_s25 + $0x918] sm:$0xff]  ;;  %v495_v44 = vld [vmem:[%s1985_s25 + $0x920] sm:$0xff] }
  0x66   : > { %492 = vst [vmem:[%s1990_s26 + $0x550] sm:$0xff] %v491_v42  ;;  %v497_v45 = vld [vmem:[%s1985_s25 + $0x928] sm:$0xff]  ;;  %494 = vst [vmem:[%s1990_s26 + $0x558] sm:$0xff] %v493_v43  ;;  %v499_v46 = vld [vmem:[%s1985_s25 + $0x930] sm:$0xff] }
  0x67   : > { %496 = vst [vmem:[%s1990_s26 + $0x560] sm:$0xff] %v495_v44  ;;  %498 = vst [vmem:[%s1990_s26 + $0x568] sm:$0xff] %v497_v45  ;;  %v501_v47 = vld [vmem:[%s1985_s25 + $0x938] sm:$0xff]  ;;  %v503_v48 = vld [vmem:[%s1985_s25 + $0x940] sm:$0xff] }
  0x68   : > { %500 = vst [vmem:[%s1990_s26 + $0x570] sm:$0xff] %v499_v46  ;;  %502 = vst [vmem:[%s1990_s26 + $0x578] sm:$0xff] %v501_v47  ;;  %v505_v49 = vld [vmem:[%s1985_s25 + $0x948] sm:$0xff]  ;;  %v507_v50 = vld [vmem:[%s1985_s25 + $0x950] sm:$0xff] }
  0x69   : > { %504 = vst [vmem:[%s1990_s26 + $0x580] sm:$0xff] %v503_v48  ;;  %v509_v51 = vld [vmem:[%s1985_s25 + $0x958] sm:$0xff]  ;;  %506 = vst [vmem:[%s1990_s26 + $0x588] sm:$0xff] %v505_v49  ;;  %v511_v52 = vld [vmem:[%s1985_s25 + $0xb40] sm:$0xff] }
  0x6a   : > { %508 = vst [vmem:[%s1990_s26 + $0x590] sm:$0xff] %v507_v50  ;;  %510 = vst [vmem:[%s1990_s26 + $0x598] sm:$0xff] %v509_v51  ;;  %v513_v53 = vld [vmem:[%s1985_s25 + $0xb48] sm:$0xff]  ;;  %v515_v54 = vld [vmem:[%s1985_s25 + $0xb50] sm:$0xff] }
  0x6b   : > { %512 = vst [vmem:[%s1990_s26 + $0x5a0] sm:$0xff] %v511_v52  ;;  %514 = vst [vmem:[%s1990_s26 + $0x5a8] sm:$0xff] %v513_v53  ;;  %v517_v55 = vld [vmem:[%s1985_s25 + $0xb58] sm:$0xff]  ;;  %v519_v56 = vld [vmem:[%s1985_s25 + $0xb60] sm:$0xff] }
  0x6c   : > { %516 = vst [vmem:[%s1990_s26 + $0x5b0] sm:$0xff] %v515_v54  ;;  %v521_v57 = vld [vmem:[%s1985_s25 + $0xb68] sm:$0xff]  ;;  %518 = vst [vmem:[%s1990_s26 + $0x5b8] sm:$0xff] %v517_v55  ;;  %v523_v58 = vld [vmem:[%s1985_s25 + $0xb70] sm:$0xff] }
  0x6d   : > { %520 = vst [vmem:[%s1990_s26 + $0x5c0] sm:$0xff] %v519_v56  ;;  %522 = vst [vmem:[%s1990_s26 + $0x5c8] sm:$0xff] %v521_v57  ;;  %v525_v59 = vld [vmem:[%s1985_s25 + $0xb78] sm:$0xff]  ;;  %v527_v60 = vld [vmem:[%s1985_s25 + $0xb80] sm:$0xff] }
  0x6e   : > { %524 = vst [vmem:[%s1990_s26 + $0x5d0] sm:$0xff] %v523_v58  ;;  %526 = vst [vmem:[%s1990_s26 + $0x5d8] sm:$0xff] %v525_v59  ;;  %v529_v61 = vld [vmem:[%s1985_s25 + $0xb88] sm:$0xff]  ;;  %v531_v62 = vld [vmem:[%s1985_s25 + $0xb90] sm:$0xff] }
  0x6f   : > { %528 = vst [vmem:[%s1990_s26 + $0x5e0] sm:$0xff] %v527_v60  ;;  %v533_v63 = vld [vmem:[%s1985_s25 + $0xb98] sm:$0xff]  ;;  %530 = vst [vmem:[%s1990_s26 + $0x5e8] sm:$0xff] %v529_v61  ;;  %v535_v0 = vld [vmem:[%s1985_s25 + $0xba0] sm:$0xff] }
  0x70   : > { %532 = vst [vmem:[%s1990_s26 + $0x5f0] sm:$0xff] %v531_v62  ;;  %534 = vst [vmem:[%s1990_s26 + $0x5f8] sm:$0xff] %v533_v63  ;;  %v537_v1 = vld [vmem:[%s1985_s25 + $0xba8] sm:$0xff]  ;;  %v539_v2 = vld [vmem:[%s1985_s25 + $0xbb0] sm:$0xff] }
  0x71   : > { %536 = vst [vmem:[%s1990_s26 + $0x600] sm:$0xff] %v535_v0  ;;  %538 = vst [vmem:[%s1990_s26 + $0x608] sm:$0xff] %v537_v1  ;;  %v541_v3 = vld [vmem:[%s1985_s25 + $0xbb8] sm:$0xff]  ;;  %v543_v4 = vld [vmem:[%s1985_s25 + $0xbc0] sm:$0xff] }
  0x72   : > { %540 = vst [vmem:[%s1990_s26 + $0x610] sm:$0xff] %v539_v2  ;;  %v545_v5 = vld [vmem:[%s1985_s25 + $0xbc8] sm:$0xff]  ;;  %542 = vst [vmem:[%s1990_s26 + $0x618] sm:$0xff] %v541_v3  ;;  %v547_v6 = vld [vmem:[%s1985_s25 + $0xbd0] sm:$0xff] }
  0x73   : > { %544 = vst [vmem:[%s1990_s26 + $0x620] sm:$0xff] %v543_v4  ;;  %546 = vst [vmem:[%s1990_s26 + $0x628] sm:$0xff] %v545_v5  ;;  %v549_v7 = vld [vmem:[%s1985_s25 + $0xbd8] sm:$0xff]  ;;  %v551_v8 = vld [vmem:[%s1985_s25 + $0xbe0] sm:$0xff] }
  0x74   : > { %548 = vst [vmem:[%s1990_s26 + $0x630] sm:$0xff] %v547_v6  ;;  %550 = vst [vmem:[%s1990_s26 + $0x638] sm:$0xff] %v549_v7  ;;  %v553_v9 = vld [vmem:[%s1985_s25 + $0xbe8] sm:$0xff]  ;;  %v555_v10 = vld [vmem:[%s1985_s25 + $0xbf0] sm:$0xff] }
  0x75   : > { %552 = vst [vmem:[%s1990_s26 + $0x640] sm:$0xff] %v551_v8  ;;  %v557_v11 = vld [vmem:[%s1985_s25 + $0xbf8] sm:$0xff]  ;;  %554 = vst [vmem:[%s1990_s26 + $0x648] sm:$0xff] %v553_v9  ;;  %v559_v12 = vld [vmem:[%s1985_s25 + $0xc00] sm:$0xff] }
  0x76   : > { %556 = vst [vmem:[%s1990_s26 + $0x650] sm:$0xff] %v555_v10  ;;  %558 = vst [vmem:[%s1990_s26 + $0x658] sm:$0xff] %v557_v11  ;;  %v561_v13 = vld [vmem:[%s1985_s25 + $0xc08] sm:$0xff]  ;;  %v563_v14 = vld [vmem:[%s1985_s25 + $0xc10] sm:$0xff] }
  0x77   : > { %560 = vst [vmem:[%s1990_s26 + $0x660] sm:$0xff] %v559_v12  ;;  %562 = vst [vmem:[%s1990_s26 + $0x668] sm:$0xff] %v561_v13  ;;  %v565_v15 = vld [vmem:[%s1985_s25 + $0xc18] sm:$0xff]  ;;  %v567_v16 = vld [vmem:[%s1985_s25 + $0xc20] sm:$0xff] }
  0x78   : > { %564 = vst [vmem:[%s1990_s26 + $0x670] sm:$0xff] %v563_v14  ;;  %v569_v17 = vld [vmem:[%s1985_s25 + $0xc28] sm:$0xff]  ;;  %566 = vst [vmem:[%s1990_s26 + $0x678] sm:$0xff] %v565_v15  ;;  %v571_v18 = vld [vmem:[%s1985_s25 + $0xc30] sm:$0xff] }
  0x79   : > { %568 = vst [vmem:[%s1990_s26 + $0x680] sm:$0xff] %v567_v16  ;;  %570 = vst [vmem:[%s1990_s26 + $0x688] sm:$0xff] %v569_v17  ;;  %v573_v19 = vld [vmem:[%s1985_s25 + $0xc38] sm:$0xff]  ;;  %v575_v20 = vld [vmem:[%s1985_s25 + $0xc40] sm:$0xff] }
  0x7a   : > { %572 = vst [vmem:[%s1990_s26 + $0x690] sm:$0xff] %v571_v18  ;;  %574 = vst [vmem:[%s1990_s26 + $0x698] sm:$0xff] %v573_v19  ;;  %v577_v21 = vld [vmem:[%s1985_s25 + $0xc48] sm:$0xff]  ;;  %v579_v22 = vld [vmem:[%s1985_s25 + $0xc50] sm:$0xff] }
  0x7b   : > { %576 = vst [vmem:[%s1990_s26 + $0x6a0] sm:$0xff] %v575_v20  ;;  %v581_v23 = vld [vmem:[%s1985_s25 + $0xc58] sm:$0xff]  ;;  %578 = vst [vmem:[%s1990_s26 + $0x6a8] sm:$0xff] %v577_v21  ;;  %v583_v24 = vld [vmem:[%s1985_s25 + $0xc60] sm:$0xff] }
  0x7c   : > { %580 = vst [vmem:[%s1990_s26 + $0x6b0] sm:$0xff] %v579_v22  ;;  %582 = vst [vmem:[%s1990_s26 + $0x6b8] sm:$0xff] %v581_v23  ;;  %v585_v25 = vld [vmem:[%s1985_s25 + $0xc68] sm:$0xff]  ;;  %v587_v26 = vld [vmem:[%s1985_s25 + $0xc70] sm:$0xff] }
  0x7d   : > { %584 = vst [vmem:[%s1990_s26 + $0x6c0] sm:$0xff] %v583_v24  ;;  %586 = vst [vmem:[%s1990_s26 + $0x6c8] sm:$0xff] %v585_v25  ;;  %v589_v27 = vld [vmem:[%s1985_s25 + $0xc78] sm:$0xff]  ;;  %v591_v28 = vld [vmem:[%s1985_s25 + $0xc80] sm:$0xff] }
  0x7e   : > { %588 = vst [vmem:[%s1990_s26 + $0x6d0] sm:$0xff] %v587_v26  ;;  %v593_v29 = vld [vmem:[%s1985_s25 + $0xc88] sm:$0xff]  ;;  %590 = vst [vmem:[%s1990_s26 + $0x6d8] sm:$0xff] %v589_v27  ;;  %v595_v30 = vld [vmem:[%s1985_s25 + $0xc90] sm:$0xff] }
  0x7f   : > { %592 = vst [vmem:[%s1990_s26 + $0x6e0] sm:$0xff] %v591_v28  ;;  %594 = vst [vmem:[%s1990_s26 + $0x6e8] sm:$0xff] %v593_v29  ;;  %v597_v31 = vld [vmem:[%s1985_s25 + $0xc98] sm:$0xff]  ;;  %v599_v32 = vld [vmem:[%s1985_s25 + $0xca0] sm:$0xff] }
  0x80   : > { %596 = vst [vmem:[%s1990_s26 + $0x6f0] sm:$0xff] %v595_v30  ;;  %598 = vst [vmem:[%s1990_s26 + $0x6f8] sm:$0xff] %v597_v31  ;;  %v601_v33 = vld [vmem:[%s1985_s25 + $0xca8] sm:$0xff]  ;;  %v603_v34 = vld [vmem:[%s1985_s25 + $0xcb0] sm:$0xff] }
  0x81   : > { %600 = vst [vmem:[%s1990_s26 + $0x700] sm:$0xff] %v599_v32  ;;  %v605_v35 = vld [vmem:[%s1985_s25 + $0xcb8] sm:$0xff]  ;;  %602 = vst [vmem:[%s1990_s26 + $0x708] sm:$0xff] %v601_v33  ;;  %v607_v36 = vld [vmem:[%s1985_s25 + $0xcc0] sm:$0xff] }
  0x82   : > { %604 = vst [vmem:[%s1990_s26 + $0x710] sm:$0xff] %v603_v34  ;;  %606 = vst [vmem:[%s1990_s26 + $0x718] sm:$0xff] %v605_v35  ;;  %v609_v37 = vld [vmem:[%s1985_s25 + $0xcc8] sm:$0xff]  ;;  %v611_v38 = vld [vmem:[%s1985_s25 + $0xcd0] sm:$0xff] }
  0x83   : > { %608 = vst [vmem:[%s1990_s26 + $0x720] sm:$0xff] %v607_v36  ;;  %610 = vst [vmem:[%s1990_s26 + $0x728] sm:$0xff] %v609_v37  ;;  %v613_v39 = vld [vmem:[%s1985_s25 + $0xcd8] sm:$0xff]  ;;  %v615_v40 = vld [vmem:[%s1985_s25 + $0xce0] sm:$0xff] }
  0x84   : > { %612 = vst [vmem:[%s1990_s26 + $0x730] sm:$0xff] %v611_v38  ;;  %v617_v41 = vld [vmem:[%s1985_s25 + $0xce8] sm:$0xff]  ;;  %614 = vst [vmem:[%s1990_s26 + $0x738] sm:$0xff] %v613_v39  ;;  %v619_v42 = vld [vmem:[%s1985_s25 + $0xcf0] sm:$0xff] }
  0x85   : > { %616 = vst [vmem:[%s1990_s26 + $0x740] sm:$0xff] %v615_v40  ;;  %618 = vst [vmem:[%s1990_s26 + $0x748] sm:$0xff] %v617_v41  ;;  %v621_v43 = vld [vmem:[%s1985_s25 + $0xcf8] sm:$0xff]  ;;  %v623_v44 = vld [vmem:[%s1985_s25 + $0xd00] sm:$0xff] }
  0x86   : > { %620 = vst [vmem:[%s1990_s26 + $0x750] sm:$0xff] %v619_v42  ;;  %622 = vst [vmem:[%s1990_s26 + $0x758] sm:$0xff] %v621_v43  ;;  %v625_v45 = vld [vmem:[%s1985_s25 + $0xd08] sm:$0xff]  ;;  %v627_v46 = vld [vmem:[%s1985_s25 + $0xd10] sm:$0xff] }
  0x87   : > { %624 = vst [vmem:[%s1990_s26 + $0x760] sm:$0xff] %v623_v44  ;;  %v629_v47 = vld [vmem:[%s1985_s25 + $0xd18] sm:$0xff]  ;;  %626 = vst [vmem:[%s1990_s26 + $0x768] sm:$0xff] %v625_v45 }
  0x88   : > { %628 = vst [vmem:[%s1990_s26 + $0x770] sm:$0xff] %v627_v46  ;;  %630 = vst [vmem:[%s1990_s26 + $0x778] sm:$0xff] %v629_v47 }
  0x89 PF: > { %p1871_p5 = scmp.ge.s32.totalorder %s1928_s14, 1  ;;  %p635_p6 = scmp.lt.s32.totalorder %s1928_s14, 3 }
  0x8b   : > { %p636_p7 = pnand %p1871_p5, %p635_p6 }
  0x8d   : > { %639 = sbr.rel (%p636_p7) target bundleno = 652 (0x28c), region = 51 }
  0x92   : > { %v927_v48 = vld [vmem:[%s3248_s1 + $0x78] sm:$0xff]  ;;  %v1930_v50 = vmov 0.0   ;;  %v926_v51 = vld [vmem:[%s3248_s1 + $0x70] sm:$0xff]  ;;  %v925_v53 = vld [vmem:[%s3248_s1 + $0x68] sm:$0xff]  ;;  %s642_s30 = sand.u32 1, %s1920_s12   ;;  %s666_s4 = smul.u32 15, %s1865_s15 }
  0x93   : > { %v959_v49 = vld [vmem:[%s3248_s1 + $0x178] sm:$0xff]  ;;  %976 = vmatprep.subr.mxu0 %v1930_v50  ;;  %1341 = vmatprep.subr.mxu1 %v1930_v50  ;;  %v958_v52 = vld [vmem:[%s3248_s1 + $0x170] sm:$0xff]  ;;  %v957_v54 = vld [vmem:[%s3248_s1 + $0x168] sm:$0xff]  ;;  %s1880_s8 = smul.u32 1920, %s642_s30 }
  0x94   : > { %977 = vmatpush1.msra.mxu0 %v927_v48  ;;  %1342 = vmatpush1.msra.mxu1 %v959_v49  ;;  %v924_v55 = vld [vmem:[%s3248_s1 + $0x60] sm:$0xff]  ;;  %v923_v57 = vld [vmem:[%s3248_s1 + $0x58] sm:$0xff]  ;;  %v922_v59 = vld [vmem:[%s3248_s1 + $0x50] sm:$0xff]  ;;  %p667_p8 = scmp.lt.s32.totalorder %s666_s4, 29 }
  0x95   : > { %978 = vmatprep.subr.mxu0 %v1930_v50  ;;  %1343 = vmatprep.subr.mxu1 %v1930_v50  ;;  %v956_v56 = vld [vmem:[%s3248_s1 + $0x160] sm:$0xff]  ;;  %v955_v58 = vld [vmem:[%s3248_s1 + $0x158] sm:$0xff]  ;;  %v954_v60 = vld [vmem:[%s3248_s1 + $0x150] sm:$0xff]  ;;  %s2723_s28 = scalar_lea.vmem [#allocation2], %s1880_s8 }
  0x96   : > { %979 = vmatpush1.msra.mxu0 %v926_v51  ;;  %1344 = vmatpush1.msra.mxu1 %v958_v52  ;;  %v921_v61 = vld [vmem:[%s3248_s1 + $0x48] sm:$0xff]  ;;  %v920_v63 = vld [vmem:[%s3248_s1 + $0x40] sm:$0xff]  ;;  %v919_v1 = vld [vmem:[%s3248_s1 + $0x38] sm:$0xff]  ;;  %s3292_s4 = smov (!%p667_p8, %s666_s4), 29 }
  0x97   : > { %980 = vmatprep.subr.mxu0 %v1930_v50  ;;  %1345 = vmatprep.subr.mxu1 %v1930_v50  ;;  %v953_v62 = vld [vmem:[%s3248_s1 + $0x148] sm:$0xff]  ;;  %v952_v0 = vld [vmem:[%s3248_s1 + $0x140] sm:$0xff]  ;;  %v951_v2 = vld [vmem:[%s3248_s1 + $0x138] sm:$0xff]  ;;  %s1872_s5 = sshll.u32 %s3292_s4, 3 }
  0x98   : > { %981 = vmatpush1.msra.mxu0 %v925_v53  ;;  %1346 = vmatpush1.msra.mxu1 %v957_v54  ;;  %v918_v3 = vld [vmem:[%s3248_s1 + $0x30] sm:$0xff]  ;;  %v917_v5 = vld [vmem:[%s3248_s1 + $0x28] sm:$0xff]  ;;  %v916_v7 = vld [vmem:[%s3248_s1 + $0x20] sm:$0xff]  ;;  %s3138_s8 = scalar_lea.vmem %s3250_s3, %s1872_s5 }
  0x99   : > { %982 = vmatprep.subr.mxu0 %v1930_v50  ;;  %1347 = vmatprep.subr.mxu1 %v1930_v50  ;;  %v950_v4 = vld [vmem:[%s3248_s1 + $0x130] sm:$0xff]  ;;  %v949_v6 = vld [vmem:[%s3248_s1 + $0x128] sm:$0xff]  ;;  %v948_v8 = vld [vmem:[%s3248_s1 + $0x120] sm:$0xff] }
  0x9a   : > { %983 = vmatpush1.msra.mxu0 %v924_v55  ;;  %1348 = vmatpush1.msra.mxu1 %v956_v56  ;;  %v915_v9 = vld [vmem:[%s3248_s1 + $0x18] sm:$0xff]  ;;  %v914_v11 = vld [vmem:[%s3248_s1 + $0x10] sm:$0xff]  ;;  %v913_v13 = vld [vmem:[%s3248_s1 + $0x8] sm:$0xff] }
  0x9b   : > { %984 = vmatprep.subr.mxu0 %v1930_v50  ;;  %1349 = vmatprep.subr.mxu1 %v1930_v50  ;;  %v947_v10 = vld [vmem:[%s3248_s1 + $0x118] sm:$0xff]  ;;  %v946_v12 = vld [vmem:[%s3248_s1 + $0x110] sm:$0xff]  ;;  %v945_v14 = vld [vmem:[%s3248_s1 + $0x108] sm:$0xff] }
  0x9c   : > { %985 = vmatpush1.msra.mxu0 %v923_v57  ;;  %1350 = vmatpush1.msra.mxu1 %v955_v58  ;;  %v912_v15 = vld [vmem:[%s3248_s1] sm:$0xff]  ;;  %v943_v17 = vld [vmem:[%s3248_s1 + $0xf8] sm:$0xff]  ;;  %v942_v19 = vld [vmem:[%s3248_s1 + $0xf0] sm:$0xff] }
  0x9d   : > { %986 = vmatprep.subr.mxu0 %v1930_v50  ;;  %1351 = vmatprep.subr.mxu1 %v1930_v50  ;;  %v944_v16 = vld [vmem:[%s3248_s1 + $0x100] sm:$0xff]  ;;  %v975_v18 = vld [vmem:[%s3248_s1 + $0x1f8] sm:$0xff]  ;;  %v974_v20 = vld [vmem:[%s3248_s1 + $0x1f0] sm:$0xff] }
  0x9e   : > { %987 = vmatpush1.msra.mxu0 %v922_v59  ;;  %1352 = vmatpush1.msra.mxu1 %v954_v60  ;;  %v941_v21 = vld [vmem:[%s3248_s1 + $0xe8] sm:$0xff]  ;;  %v940_v23 = vld [vmem:[%s3248_s1 + $0xe0] sm:$0xff]  ;;  %v939_v25 = vld [vmem:[%s3248_s1 + $0xd8] sm:$0xff] }
  0x9f   : > { %988 = vmatprep.subr.mxu0 %v1930_v50  ;;  %1353 = vmatprep.subr.mxu1 %v1930_v50  ;;  %v973_v22 = vld [vmem:[%s3248_s1 + $0x1e8] sm:$0xff]  ;;  %v972_v24 = vld [vmem:[%s3248_s1 + $0x1e0] sm:$0xff]  ;;  %v971_v26 = vld [vmem:[%s3248_s1 + $0x1d8] sm:$0xff] }
  0xa0   : > { %989 = vmatpush1.msra.mxu0 %v921_v61  ;;  %1354 = vmatpush1.msra.mxu1 %v953_v62  ;;  %v938_v27 = vld [vmem:[%s3248_s1 + $0xd0] sm:$0xff]  ;;  %v937_v29 = vld [vmem:[%s3248_s1 + $0xc8] sm:$0xff]  ;;  %v936_v31 = vld [vmem:[%s3248_s1 + $0xc0] sm:$0xff] }
  0xa1   : > { %990 = vmatprep.subr.mxu0 %v1930_v50  ;;  %1355 = vmatprep.subr.mxu1 %v1930_v50  ;;  %v970_v28 = vld [vmem:[%s3248_s1 + $0x1d0] sm:$0xff]  ;;  %v969_v30 = vld [vmem:[%s3248_s1 + $0x1c8] sm:$0xff]  ;;  %v968_v32 = vld [vmem:[%s3248_s1 + $0x1c0] sm:$0xff] }
  0xa2   : > { %991 = vmatpush1.msra.mxu0 %v920_v63  ;;  %1356 = vmatpush1.msra.mxu1 %v952_v0  ;;  %v935_v33 = vld [vmem:[%s3248_s1 + $0xb8] sm:$0xff]  ;;  %v934_v35 = vld [vmem:[%s3248_s1 + $0xb0] sm:$0xff]  ;;  %v933_v37 = vld [vmem:[%s3248_s1 + $0xa8] sm:$0xff] }
  0xa3   : > { %992 = vmatprep.subr.mxu0 %v1930_v50  ;;  %1357 = vmatprep.subr.mxu1 %v1930_v50  ;;  %v967_v34 = vld [vmem:[%s3248_s1 + $0x1b8] sm:$0xff]  ;;  %v966_v36 = vld [vmem:[%s3248_s1 + $0x1b0] sm:$0xff]  ;;  %v965_v38 = vld [vmem:[%s3248_s1 + $0x1a8] sm:$0xff] }
  0xa4   : > { %993 = vmatpush1.msra.mxu0 %v919_v1  ;;  %1358 = vmatpush1.msra.mxu1 %v951_v2  ;;  %v932_v39 = vld [vmem:[%s3248_s1 + $0xa0] sm:$0xff]  ;;  %v931_v41 = vld [vmem:[%s3248_s1 + $0x98] sm:$0xff]  ;;  %v930_v43 = vld [vmem:[%s3248_s1 + $0x90] sm:$0xff] }
  0xa5   : > { %994 = vmatprep.subr.mxu0 %v1930_v50  ;;  %1359 = vmatprep.subr.mxu1 %v1930_v50  ;;  %v964_v40 = vld [vmem:[%s3248_s1 + $0x1a0] sm:$0xff]  ;;  %v963_v42 = vld [vmem:[%s3248_s1 + $0x198] sm:$0xff]  ;;  %v962_v44 = vld [vmem:[%s3248_s1 + $0x190] sm:$0xff] }
  0xa6   : > { %995 = vmatpush1.msra.mxu0 %v918_v3  ;;  %1360 = vmatpush1.msra.mxu1 %v950_v4  ;;  %v929_v45 = vld [vmem:[%s3248_s1 + $0x88] sm:$0xff]  ;;  %v928_v47 = vld [vmem:[%s3248_s1 + $0x80] sm:$0xff]  ;;  %v675_v51 = vld [vmem:[%s2723_s28 + $0x18] sm:$0xff] }
  0xa7   : > { %996 = vmatprep.subr.mxu0 %v1930_v50  ;;  %1361 = vmatprep.subr.mxu1 %v1930_v50  ;;  %v961_v46 = vld [vmem:[%s3248_s1 + $0x188] sm:$0xff]  ;;  %v960_v49 = vld [vmem:[%s3248_s1 + $0x180] sm:$0xff]  ;;  %v674_v53 = vld [vmem:[%s2723_s28 + $0x10] sm:$0xff] }
  0xa8   : > { %997 = vmatpush1.msra.mxu0 %v917_v5  ;;  %1362 = vmatpush1.msra.mxu1 %v949_v6  ;;  %v673_v48 = vld [vmem:[%s2723_s28 + $0x8] sm:$0xff]  ;;  %v672_v52 = vld [vmem:[%s2723_s28] sm:$0xff]  ;;  %v679_v55 = vld [vmem:[%s2723_s28 + $0x38] sm:$0xff] }
  0xa9   : > { %998 = vmatprep.subr.mxu0 %v1930_v50  ;;  %1363 = vmatprep.subr.mxu1 %v1930_v50  ;;  %v677_v54 = vld [vmem:[%s2723_s28 + $0x28] sm:$0xff]  ;;  %v676_v56 = vld [vmem:[%s2723_s28 + $0x20] sm:$0xff]  ;;  %v683_v58 = vld [vmem:[%s2723_s28 + $0x58] sm:$0xff] }
  0xaa   : > { %999 = vmatpush1.msra.mxu0 %v916_v7  ;;  %1364 = vmatpush1.msra.mxu1 %v948_v8  ;;  %v681_v57 = vld [vmem:[%s2723_s28 + $0x48] sm:$0xff]  ;;  %v680_v59 = vld [vmem:[%s2723_s28 + $0x40] sm:$0xff]  ;;  %v682_v60 = vld [vmem:[%s2723_s28 + $0x50] sm:$0xff] }
  0xab   : > { %1000 = vmatprep.subr.mxu0 %v1930_v50  ;;  %1365 = vmatprep.subr.mxu1 %v1930_v50  ;;  %v685_v61 = vld [vmem:[%s2723_s28 + $0x68] sm:$0xff]  ;;  %v687_v62 = vld [vmem:[%s2723_s28 + $0x78] sm:$0xff]  ;;  %v684_v63 = vld [vmem:[%s2723_s28 + $0x60] sm:$0xff] }
  0xac   : > { %1001 = vmatpush1.msra.mxu0 %v915_v9  ;;  %1366 = vmatpush1.msra.mxu1 %v947_v10  ;;  %v686_v0 = vld [vmem:[%s2723_s28 + $0x70] sm:$0xff]  ;;  %v689_v1 = vld [vmem:[%s2723_s28 + $0x88] sm:$0xff]  ;;  %v691_v2 = vld [vmem:[%s2723_s28 + $0x98] sm:$0xff] }
  0xad   : > { %1002 = vmatprep.subr.mxu0 %v1930_v50  ;;  %1367 = vmatprep.subr.mxu1 %v1930_v50  ;;  %v688_v3 = vld [vmem:[%s2723_s28 + $0x80] sm:$0xff]  ;;  %v690_v4 = vld [vmem:[%s2723_s28 + $0x90] sm:$0xff]  ;;  %v693_v5 = vld [vmem:[%s2723_s28 + $0xa8] sm:$0xff] }
  0xae   : > { %1003 = vmatpush1.msra.mxu0 %v914_v11  ;;  %1368 = vmatpush1.msra.mxu1 %v946_v12  ;;  %v695_v6 = vld [vmem:[%s2723_s28 + $0xb8] sm:$0xff]  ;;  %v692_v7 = vld [vmem:[%s2723_s28 + $0xa0] sm:$0xff]  ;;  %v694_v8 = vld [vmem:[%s2723_s28 + $0xb0] sm:$0xff] }
  0xaf   : > { %1004 = vmatprep.subr.mxu0 %v1930_v50  ;;  %1369 = vmatprep.subr.mxu1 %v1930_v50  ;;  %v697_v9 = vld [vmem:[%s2723_s28 + $0xc8] sm:$0xff]  ;;  %v699_v10 = vld [vmem:[%s2723_s28 + $0xd8] sm:$0xff]  ;;  %v696_v11 = vld [vmem:[%s2723_s28 + $0xc0] sm:$0xff] }
  0xb0   : > { %1005 = vmatpush1.msra.mxu0 %v913_v13  ;;  %1370 = vmatpush1.msra.mxu1 %v945_v14  ;;  %v698_v12 = vld [vmem:[%s2723_s28 + $0xd0] sm:$0xff]  ;;  %v701_v13 = vld [vmem:[%s2723_s28 + $0xe8] sm:$0xff]  ;;  %v703_v14 = vld [vmem:[%s2723_s28 + $0xf8] sm:$0xff] }
  0xb1   : > { %1006 = vmatprep.subr.mxu0 %v1930_v50  ;;  %1371 = vmatprep.subr.mxu1 %v1930_v50 }
  0xb2   : > { %1007 = vmatpush1.msra.mxu0 %v912_v15  ;;  %1372 = vmatpush1.msra.mxu1 %v944_v16  ;;  %v700_v15 = vld [vmem:[%s2723_s28 + $0xe0] sm:$0xff]  ;;  %v702_v16 = vld [vmem:[%s2723_s28 + $0xf0] sm:$0xff] }
  0xb3   : > { %1008 = vmatprep.subr.mxu0 %v1930_v50  ;;  %1373 = vmatprep.subr.mxu1 %v1930_v50 }
  0xb4   : > { %1009 = vmatpush2.msra.mxu0 %v943_v17  ;;  %1374 = vmatpush2.msra.mxu1 %v975_v18  ;;  %v705_v17 = vld [vmem:[%s2723_s28 + $0x108] sm:$0xff]  ;;  %v707_v18 = vld [vmem:[%s2723_s28 + $0x118] sm:$0xff] }
  0xb5   : > { %1010 = vmatprep.subr.mxu0 %v1930_v50  ;;  %1375 = vmatprep.subr.mxu1 %v1930_v50 }
  0xb6   : > { %1011 = vmatpush2.msra.mxu0 %v942_v19  ;;  %1376 = vmatpush2.msra.mxu1 %v974_v20  ;;  %v704_v19 = vld [vmem:[%s2723_s28 + $0x100] sm:$0xff]  ;;  %v706_v20 = vld [vmem:[%s2723_s28 + $0x110] sm:$0xff] }
  0xb7   : > { %1012 = vmatprep.subr.mxu0 %v1930_v50  ;;  %1377 = vmatprep.subr.mxu1 %v1930_v50 }
  0xb8   : > { %1013 = vmatpush2.msra.mxu0 %v941_v21  ;;  %1378 = vmatpush2.msra.mxu1 %v973_v22  ;;  %v709_v21 = vld [vmem:[%s2723_s28 + $0x128] sm:$0xff]  ;;  %v711_v22 = vld [vmem:[%s2723_s28 + $0x138] sm:$0xff] }
  0xb9   : > { %1014 = vmatprep.subr.mxu0 %v1930_v50  ;;  %1379 = vmatprep.subr.mxu1 %v1930_v50 }
  0xba   : > { %1015 = vmatpush2.msra.mxu0 %v940_v23  ;;  %1380 = vmatpush2.msra.mxu1 %v972_v24  ;;  %v708_v23 = vld [vmem:[%s2723_s28 + $0x120] sm:$0xff]  ;;  %v710_v24 = vld [vmem:[%s2723_s28 + $0x130] sm:$0xff] }
  0xbb   : > { %1016 = vmatprep.subr.mxu0 %v1930_v50  ;;  %1381 = vmatprep.subr.mxu1 %v1930_v50 }
  0xbc   : > { %1017 = vmatpush2.msra.mxu0 %v939_v25  ;;  %1382 = vmatpush2.msra.mxu1 %v971_v26  ;;  %v713_v25 = vld [vmem:[%s2723_s28 + $0x148] sm:$0xff]  ;;  %v715_v26 = vld [vmem:[%s2723_s28 + $0x158] sm:$0xff] }
  0xbd   : > { %1018 = vmatprep.subr.mxu0 %v1930_v50  ;;  %1383 = vmatprep.subr.mxu1 %v1930_v50 }
  0xbe   : > { %1019 = vmatpush2.msra.mxu0 %v938_v27  ;;  %1384 = vmatpush2.msra.mxu1 %v970_v28  ;;  %v712_v27 = vld [vmem:[%s2723_s28 + $0x140] sm:$0xff]  ;;  %v714_v28 = vld [vmem:[%s2723_s28 + $0x150] sm:$0xff] }
  0xbf   : > { %1020 = vmatprep.subr.mxu0 %v1930_v50  ;;  %1385 = vmatprep.subr.mxu1 %v1930_v50 }
  0xc0   : > { %1021 = vmatpush2.msra.mxu0 %v937_v29  ;;  %1386 = vmatpush2.msra.mxu1 %v969_v30  ;;  %v717_v29 = vld [vmem:[%s2723_s28 + $0x168] sm:$0xff]  ;;  %v719_v30 = vld [vmem:[%s2723_s28 + $0x178] sm:$0xff] }
  0xc1   : > { %1022 = vmatprep.subr.mxu0 %v1930_v50  ;;  %1387 = vmatprep.subr.mxu1 %v1930_v50 }
  0xc2   : > { %1023 = vmatpush2.msra.mxu0 %v936_v31  ;;  %1388 = vmatpush2.msra.mxu1 %v968_v32  ;;  %v716_v31 = vld [vmem:[%s2723_s28 + $0x160] sm:$0xff]  ;;  %v718_v32 = vld [vmem:[%s2723_s28 + $0x170] sm:$0xff] }
  0xc3   : > { %1024 = vmatprep.subr.mxu0 %v1930_v50  ;;  %1389 = vmatprep.subr.mxu1 %v1930_v50 }
  0xc4   : > { %1025 = vmatpush2.msra.mxu0 %v935_v33  ;;  %1390 = vmatpush2.msra.mxu1 %v967_v34  ;;  %v721_v33 = vld [vmem:[%s2723_s28 + $0x188] sm:$0xff]  ;;  %v723_v34 = vld [vmem:[%s2723_s28 + $0x198] sm:$0xff] }
  0xc5   : > { %1026 = vmatprep.subr.mxu0 %v1930_v50  ;;  %1391 = vmatprep.subr.mxu1 %v1930_v50 }
  0xc6   : > { %1027 = vmatpush2.msra.mxu0 %v934_v35  ;;  %1392 = vmatpush2.msra.mxu1 %v966_v36  ;;  %v720_v35 = vld [vmem:[%s2723_s28 + $0x180] sm:$0xff]  ;;  %v722_v36 = vld [vmem:[%s2723_s28 + $0x190] sm:$0xff] }
  0xc7   : > { %1028 = vmatprep.subr.mxu0 %v1930_v50  ;;  %1393 = vmatprep.subr.mxu1 %v1930_v50 }
  0xc8   : > { %1029 = vmatpush2.msra.mxu0 %v933_v37  ;;  %1394 = vmatpush2.msra.mxu1 %v965_v38  ;;  %v725_v37 = vld [vmem:[%s2723_s28 + $0x1a8] sm:$0xff]  ;;  %v727_v38 = vld [vmem:[%s2723_s28 + $0x1b8] sm:$0xff] }
  0xc9   : > { %1030 = vmatprep.subr.mxu0 %v1930_v50  ;;  %1395 = vmatprep.subr.mxu1 %v1930_v50 }
  0xca   : > { %1031 = vmatpush2.msra.mxu0 %v932_v39  ;;  %1396 = vmatpush2.msra.mxu1 %v964_v40  ;;  %v724_v39 = vld [vmem:[%s2723_s28 + $0x1a0] sm:$0xff]  ;;  %v726_v40 = vld [vmem:[%s2723_s28 + $0x1b0] sm:$0xff] }
  0xcb   : > { %1032 = vmatprep.subr.mxu0 %v1930_v50  ;;  %1397 = vmatprep.subr.mxu1 %v1930_v50 }
  0xcc   : > { %1033 = vmatpush2.msra.mxu0 %v931_v41  ;;  %1398 = vmatpush2.msra.mxu1 %v963_v42  ;;  %v729_v41 = vld [vmem:[%s2723_s28 + $0x1c8] sm:$0xff]  ;;  %v731_v42 = vld [vmem:[%s2723_s28 + $0x1d8] sm:$0xff] }
  0xcd   : > { %1034 = vmatprep.subr.mxu0 %v1930_v50  ;;  %1399 = vmatprep.subr.mxu1 %v1930_v50 }
  0xce   : > { %1035 = vmatpush2.msra.mxu0 %v930_v43  ;;  %1400 = vmatpush2.msra.mxu1 %v962_v44  ;;  %v728_v43 = vld [vmem:[%s2723_s28 + $0x1c0] sm:$0xff]  ;;  %v730_v44 = vld [vmem:[%s2723_s28 + $0x1d0] sm:$0xff] }
  0xcf   : > { %1036 = vmatprep.subr.mxu0 %v1930_v50  ;;  %1401 = vmatprep.subr.mxu1 %v1930_v50 }
  0xd0   : > { %1037 = vmatpush2.msra.mxu0 %v929_v45  ;;  %1402 = vmatpush2.msra.mxu1 %v961_v46  ;;  %v733_v45 = vld [vmem:[%s2723_s28 + $0x1e8] sm:$0xff]  ;;  %v735_v46 = vld [vmem:[%s2723_s28 + $0x1f8] sm:$0xff] }
  0xd1   : > { %1038 = vmatprep.subr.mxu0 %v1930_v50  ;;  %1403 = vmatprep.subr.mxu1 %v1930_v50  ;;  %v678_v50 = vld [vmem:[%s2723_s28 + $0x30] sm:$0xff] }
  0xd2   : > { %1039 = vmatpush2.msra.mxu0 %v928_v47  ;;  %1040 = vmatprep.mubr.f32.mxu0 %v673_v48  ;;  %v732_v47 = vld [vmem:[%s2723_s28 + $0x1e0] sm:$0xff]  ;;  %v734_v48 = vld [vmem:[%s2723_s28 + $0x1f0] sm:$0xff] }
  0xd3   : > { %1404 = vmatpush2.msra.mxu1 %v960_v49  ;;  %1405 = vmatprep.mubr.f32.mxu1 %v675_v51  ;;  %v737_v49 = vld [vmem:[%s2723_s28 + $0x208] sm:$0xff]  ;;  %v739_v51 = vld [vmem:[%s2723_s28 + $0x218] sm:$0xff] }
  0xd4   : > { %1041 = vmatmul.mubr.f32.vlgmr.msra.gmra.mxu0 %v672_v52  ;;  %1406 = vmatmul.mubr.f32.vlgmr.msra.gmra.mxu1 %v674_v53  ;;  %v736_v52 = vld [vmem:[%s2723_s28 + $0x200] sm:$0xff]  ;;  %v738_v53 = vld [vmem:[%s2723_s28 + $0x210] sm:$0xff] }
  0xd5   : > { %1045 = vmatprep.mubr.f32.mxu0 %v677_v54  ;;  %1410 = vmatprep.mubr.f32.mxu1 %v679_v55  ;;  %v741_v54 = vld [vmem:[%s2723_s28 + $0x228] sm:$0xff]  ;;  %v743_v55 = vld [vmem:[%s2723_s28 + $0x238] sm:$0xff] }
  0xd8   : > { %1046 = vmatmul.mubr.f32.gmra.mxu0 %v676_v56  ;;  %1411 = vmatmul.mubr.f32.gmra.mxu1 %v678_v50  ;;  %v740_v56 = vld [vmem:[%s2723_s28 + $0x220] sm:$0xff]  ;;  %v742_v50 = vld [vmem:[%s2723_s28 + $0x230] sm:$0xff] }
  0xd9   : > { %1050 = vmatprep.mubr.f32.mxu0 %v681_v57  ;;  %1415 = vmatprep.mubr.f32.mxu1 %v683_v58  ;;  %v745_v57 = vld [vmem:[%s2723_s28 + $0x248] sm:$0xff]  ;;  %v747_v58 = vld [vmem:[%s2723_s28 + $0x258] sm:$0xff] }
  0xdc   : > { %1051 = vmatmul.mubr.f32.gmra.mxu0 %v680_v59  ;;  %1416 = vmatmul.mubr.f32.gmra.mxu1 %v682_v60  ;;  %v744_v59 = vld [vmem:[%s2723_s28 + $0x240] sm:$0xff]  ;;  %v746_v60 = vld [vmem:[%s2723_s28 + $0x250] sm:$0xff] }
  0xdd   : > { %1055 = vmatprep.mubr.f32.mxu0 %v685_v61  ;;  %1420 = vmatprep.mubr.f32.mxu1 %v687_v62  ;;  %v749_v61 = vld [vmem:[%s2723_s28 + $0x268] sm:$0xff]  ;;  %v751_v62 = vld [vmem:[%s2723_s28 + $0x278] sm:$0xff] }
  0xe0   : > { %1056 = vmatmul.mubr.f32.gmra.mxu0 %v684_v63  ;;  %1421 = vmatmul.mubr.f32.gmra.mxu1 %v686_v0  ;;  %v748_v63 = vld [vmem:[%s2723_s28 + $0x260] sm:$0xff]  ;;  %v750_v0 = vld [vmem:[%s2723_s28 + $0x270] sm:$0xff] }
  0xe1   : > { %1060 = vmatprep.mubr.f32.mxu0 %v689_v1  ;;  %1425 = vmatprep.mubr.f32.mxu1 %v691_v2  ;;  %v753_v1 = vld [vmem:[%s2723_s28 + $0x288] sm:$0xff]  ;;  %v755_v2 = vld [vmem:[%s2723_s28 + $0x298] sm:$0xff] }
  0xe4   : > { %1061 = vmatmul.mubr.f32.gmra.mxu0 %v688_v3  ;;  %1426 = vmatmul.mubr.f32.gmra.mxu1 %v690_v4  ;;  %v752_v3 = vld [vmem:[%s2723_s28 + $0x280] sm:$0xff]  ;;  %v754_v4 = vld [vmem:[%s2723_s28 + $0x290] sm:$0xff] }
  0xe5   : > { %1065 = vmatprep.mubr.f32.mxu0 %v693_v5  ;;  %1430 = vmatprep.mubr.f32.mxu1 %v695_v6  ;;  %v757_v5 = vld [vmem:[%s2723_s28 + $0x2a8] sm:$0xff]  ;;  %v759_v6 = vld [vmem:[%s2723_s28 + $0x2b8] sm:$0xff] }
  0xe8   : > { %1066 = vmatmul.mubr.f32.gmra.mxu0 %v692_v7  ;;  %1431 = vmatmul.mubr.f32.gmra.mxu1 %v694_v8  ;;  %v756_v7 = vld [vmem:[%s2723_s28 + $0x2a0] sm:$0xff]  ;;  %v758_v8 = vld [vmem:[%s2723_s28 + $0x2b0] sm:$0xff] }
  0xe9   : > { %1070 = vmatprep.mubr.f32.mxu0 %v697_v9  ;;  %1435 = vmatprep.mubr.f32.mxu1 %v699_v10  ;;  %v761_v9 = vld [vmem:[%s2723_s28 + $0x2c8] sm:$0xff]  ;;  %v763_v10 = vld [vmem:[%s2723_s28 + $0x2d8] sm:$0xff] }
  0xec   : > { %1071 = vmatmul.mubr.f32.gmra.mxu0 %v696_v11  ;;  %1436 = vmatmul.mubr.f32.gmra.mxu1 %v698_v12  ;;  %v760_v11 = vld [vmem:[%s2723_s28 + $0x2c0] sm:$0xff]  ;;  %v762_v12 = vld [vmem:[%s2723_s28 + $0x2d0] sm:$0xff] }
  0xed   : > { %1075 = vmatprep.mubr.f32.mxu0 %v701_v13  ;;  %1440 = vmatprep.mubr.f32.mxu1 %v703_v14  ;;  %v765_v13 = vld [vmem:[%s2723_s28 + $0x2e8] sm:$0xff]  ;;  %v767_v14 = vld [vmem:[%s2723_s28 + $0x2f8] sm:$0xff] }
  0xf0   : > { %1076 = vmatmul.mubr.f32.gmra.mxu0 %v700_v15  ;;  %1441 = vmatmul.mubr.f32.gmra.mxu1 %v702_v16  ;;  %v764_v15 = vld [vmem:[%s2723_s28 + $0x2e0] sm:$0xff]  ;;  %v766_v16 = vld [vmem:[%s2723_s28 + $0x2f0] sm:$0xff] }
  0xf1   : > { %1080 = vmatprep.mubr.f32.mxu0 %v705_v17  ;;  %1445 = vmatprep.mubr.f32.mxu1 %v707_v18  ;;  %v769_v17 = vld [vmem:[%s2723_s28 + $0x308] sm:$0xff]  ;;  %v771_v18 = vld [vmem:[%s2723_s28 + $0x318] sm:$0xff] }
  0xf4   : > { %1081 = vmatmul.mubr.f32.gmra.mxu0 %v704_v19  ;;  %1446 = vmatmul.mubr.f32.gmra.mxu1 %v706_v20  ;;  %v768_v19 = vld [vmem:[%s2723_s28 + $0x300] sm:$0xff]  ;;  %v770_v20 = vld [vmem:[%s2723_s28 + $0x310] sm:$0xff] }
  0xf5   : > { %1085 = vmatprep.mubr.f32.mxu0 %v709_v21  ;;  %1450 = vmatprep.mubr.f32.mxu1 %v711_v22  ;;  %v773_v21 = vld [vmem:[%s2723_s28 + $0x328] sm:$0xff]  ;;  %v775_v22 = vld [vmem:[%s2723_s28 + $0x338] sm:$0xff] }
  0xf8   : > { %1086 = vmatmul.mubr.f32.gmra.mxu0 %v708_v23  ;;  %1451 = vmatmul.mubr.f32.gmra.mxu1 %v710_v24  ;;  %v772_v23 = vld [vmem:[%s2723_s28 + $0x320] sm:$0xff]  ;;  %v774_v24 = vld [vmem:[%s2723_s28 + $0x330] sm:$0xff] }
  0xf9   : > { %1090 = vmatprep.mubr.f32.mxu0 %v713_v25  ;;  %1455 = vmatprep.mubr.f32.mxu1 %v715_v26  ;;  %v777_v25 = vld [vmem:[%s2723_s28 + $0x348] sm:$0xff]  ;;  %v779_v26 = vld [vmem:[%s2723_s28 + $0x358] sm:$0xff] }
  0xfc   : > { %1091 = vmatmul.mubr.f32.gmra.mxu0 %v712_v27  ;;  %1456 = vmatmul.mubr.f32.gmra.mxu1 %v714_v28  ;;  %v776_v27 = vld [vmem:[%s2723_s28 + $0x340] sm:$0xff]  ;;  %v778_v28 = vld [vmem:[%s2723_s28 + $0x350] sm:$0xff] }
  0xfd   : > { %1095 = vmatprep.mubr.f32.mxu0 %v717_v29  ;;  %1460 = vmatprep.mubr.f32.mxu1 %v719_v30  ;;  %v781_v29 = vld [vmem:[%s2723_s28 + $0x368] sm:$0xff]  ;;  %v783_v30 = vld [vmem:[%s2723_s28 + $0x378] sm:$0xff] }
 0x100   : > { %1096 = vmatmul.mubr.f32.gmra.mxu0 %v716_v31  ;;  %1461 = vmatmul.mubr.f32.gmra.mxu1 %v718_v32  ;;  %v780_v31 = vld [vmem:[%s2723_s28 + $0x360] sm:$0xff]  ;;  %v782_v32 = vld [vmem:[%s2723_s28 + $0x370] sm:$0xff] }
 0x101   : > { %1100 = vmatprep.mubr.f32.mxu0 %v721_v33  ;;  %1465 = vmatprep.mubr.f32.mxu1 %v723_v34  ;;  %v785_v33 = vld [vmem:[%s2723_s28 + $0x388] sm:$0xff]  ;;  %v787_v34 = vld [vmem:[%s2723_s28 + $0x398] sm:$0xff] }
 0x104   : > { %1101 = vmatmul.mubr.f32.gmra.mxu0 %v720_v35  ;;  %1466 = vmatmul.mubr.f32.gmra.mxu1 %v722_v36  ;;  %v784_v35 = vld [vmem:[%s2723_s28 + $0x380] sm:$0xff]  ;;  %v786_v36 = vld [vmem:[%s2723_s28 + $0x390] sm:$0xff] }
 0x105   : > { %1105 = vmatprep.mubr.f32.mxu0 %v725_v37  ;;  %1470 = vmatprep.mubr.f32.mxu1 %v727_v38  ;;  %v789_v37 = vld [vmem:[%s2723_s28 + $0x3a8] sm:$0xff]  ;;  %v791_v38 = vld [vmem:[%s2723_s28 + $0x3b8] sm:$0xff] }
 0x108   : > { %1106 = vmatmul.mubr.f32.gmra.mxu0 %v724_v39  ;;  %1471 = vmatmul.mubr.f32.gmra.mxu1 %v726_v40  ;;  %v788_v39 = vld [vmem:[%s2723_s28 + $0x3a0] sm:$0xff]  ;;  %v790_v40 = vld [vmem:[%s2723_s28 + $0x3b0] sm:$0xff] }
 0x109   : > { %1110 = vmatprep.mubr.f32.mxu0 %v729_v41  ;;  %1475 = vmatprep.mubr.f32.mxu1 %v731_v42  ;;  %v793_v41 = vld [vmem:[%s2723_s28 + $0x3c8] sm:$0xff]  ;;  %v795_v42 = vld [vmem:[%s2723_s28 + $0x3d8] sm:$0xff] }
 0x10c   : > { %1111 = vmatmul.mubr.f32.gmra.mxu0 %v728_v43  ;;  %1476 = vmatmul.mubr.f32.gmra.mxu1 %v730_v44  ;;  %v792_v43 = vld [vmem:[%s2723_s28 + $0x3c0] sm:$0xff]  ;;  %v794_v44 = vld [vmem:[%s2723_s28 + $0x3d0] sm:$0xff] }
 0x10d   : > { %1115 = vmatprep.mubr.f32.mxu0 %v733_v45  ;;  %1480 = vmatprep.mubr.f32.mxu1 %v735_v46  ;;  %v797_v45 = vld [vmem:[%s2723_s28 + $0x3e8] sm:$0xff]  ;;  %v799_v46 = vld [vmem:[%s2723_s28 + $0x3f8] sm:$0xff] }
 0x110   : > { %1116 = vmatmul.mubr.f32.gmra.mxu0 %v732_v47  ;;  %1481 = vmatmul.mubr.f32.gmra.mxu1 %v734_v48  ;;  %v796_v47 = vld [vmem:[%s2723_s28 + $0x3e0] sm:$0xff]  ;;  %v798_v48 = vld [vmem:[%s2723_s28 + $0x3f0] sm:$0xff] }
 0x111   : > { %1120 = vmatprep.mubr.f32.mxu0 %v737_v49  ;;  %1485 = vmatprep.mubr.f32.mxu1 %v739_v51  ;;  %v801_v49 = vld [vmem:[%s2723_s28 + $0x408] sm:$0xff]  ;;  %v803_v51 = vld [vmem:[%s2723_s28 + $0x418] sm:$0xff] }
 0x114   : > { %1121 = vmatmul.mubr.f32.gmra.mxu0 %v736_v52  ;;  %1486 = vmatmul.mubr.f32.gmra.mxu1 %v738_v53  ;;  %v800_v52 = vld [vmem:[%s2723_s28 + $0x400] sm:$0xff]  ;;  %v802_v53 = vld [vmem:[%s2723_s28 + $0x410] sm:$0xff] }
 0x115   : > { %1125 = vmatprep.mubr.f32.mxu0 %v741_v54  ;;  %1490 = vmatprep.mubr.f32.mxu1 %v743_v55  ;;  %v805_v54 = vld [vmem:[%s2723_s28 + $0x428] sm:$0xff]  ;;  %v807_v55 = vld [vmem:[%s2723_s28 + $0x438] sm:$0xff] }
 0x118   : > { %1126 = vmatmul.mubr.f32.gmra.mxu0 %v740_v56  ;;  %1491 = vmatmul.mubr.f32.gmra.mxu1 %v742_v50  ;;  %v804_v56 = vld [vmem:[%s2723_s28 + $0x420] sm:$0xff]  ;;  %v806_v50 = vld [vmem:[%s2723_s28 + $0x430] sm:$0xff] }
 0x119   : > { %1130 = vmatprep.mubr.f32.mxu0 %v745_v57  ;;  %1495 = vmatprep.mubr.f32.mxu1 %v747_v58  ;;  %v809_v57 = vld [vmem:[%s2723_s28 + $0x448] sm:$0xff]  ;;  %v811_v58 = vld [vmem:[%s2723_s28 + $0x458] sm:$0xff] }
 0x11c   : > { %1131 = vmatmul.mubr.f32.gmra.mxu0 %v744_v59  ;;  %1496 = vmatmul.mubr.f32.gmra.mxu1 %v746_v60  ;;  %v808_v59 = vld [vmem:[%s2723_s28 + $0x440] sm:$0xff]  ;;  %v810_v60 = vld [vmem:[%s2723_s28 + $0x450] sm:$0xff] }
 0x11d   : > { %1135 = vmatprep.mubr.f32.mxu0 %v749_v61  ;;  %1500 = vmatprep.mubr.f32.mxu1 %v751_v62  ;;  %v813_v61 = vld [vmem:[%s2723_s28 + $0x468] sm:$0xff]  ;;  %v815_v62 = vld [vmem:[%s2723_s28 + $0x478] sm:$0xff] }
 0x120   : > { %1136 = vmatmul.mubr.f32.gmra.mxu0 %v748_v63  ;;  %1501 = vmatmul.mubr.f32.gmra.mxu1 %v750_v0  ;;  %v812_v63 = vld [vmem:[%s2723_s28 + $0x460] sm:$0xff]  ;;  %v814_v0 = vld [vmem:[%s2723_s28 + $0x470] sm:$0xff] }
 0x121   : > { %1140 = vmatprep.mubr.f32.mxu0 %v753_v1  ;;  %1505 = vmatprep.mubr.f32.mxu1 %v755_v2  ;;  %v817_v1 = vld [vmem:[%s2723_s28 + $0x488] sm:$0xff]  ;;  %v819_v2 = vld [vmem:[%s2723_s28 + $0x498] sm:$0xff] }
 0x124   : > { %1141 = vmatmul.mubr.f32.gmra.mxu0 %v752_v3  ;;  %1506 = vmatmul.mubr.f32.gmra.mxu1 %v754_v4  ;;  %v816_v3 = vld [vmem:[%s2723_s28 + $0x480] sm:$0xff]  ;;  %v818_v4 = vld [vmem:[%s2723_s28 + $0x490] sm:$0xff] }
 0x125   : > { %1145 = vmatprep.mubr.f32.mxu0 %v757_v5  ;;  %1510 = vmatprep.mubr.f32.mxu1 %v759_v6  ;;  %v821_v5 = vld [vmem:[%s2723_s28 + $0x4a8] sm:$0xff]  ;;  %v823_v6 = vld [vmem:[%s2723_s28 + $0x4b8] sm:$0xff] }
 0x128   : > { %1146 = vmatmul.mubr.f32.gmra.mxu0 %v756_v7  ;;  %1511 = vmatmul.mubr.f32.gmra.mxu1 %v758_v8  ;;  %v820_v7 = vld [vmem:[%s2723_s28 + $0x4a0] sm:$0xff]  ;;  %v822_v8 = vld [vmem:[%s2723_s28 + $0x4b0] sm:$0xff] }
 0x129   : > { %1150 = vmatprep.mubr.f32.mxu0 %v761_v9  ;;  %1515 = vmatprep.mubr.f32.mxu1 %v763_v10  ;;  %v825_v9 = vld [vmem:[%s2723_s28 + $0x4c8] sm:$0xff]  ;;  %v827_v10 = vld [vmem:[%s2723_s28 + $0x4d8] sm:$0xff] }
 0x12c   : > { %1151 = vmatmul.mubr.f32.gmra.mxu0 %v760_v11  ;;  %1516 = vmatmul.mubr.f32.gmra.mxu1 %v762_v12  ;;  %v824_v11 = vld [vmem:[%s2723_s28 + $0x4c0] sm:$0xff]  ;;  %v826_v12 = vld [vmem:[%s2723_s28 + $0x4d0] sm:$0xff] }
 0x12d   : > { %1155 = vmatprep.mubr.f32.mxu0 %v765_v13  ;;  %1520 = vmatprep.mubr.f32.mxu1 %v767_v14  ;;  %v829_v13 = vld [vmem:[%s2723_s28 + $0x4e8] sm:$0xff]  ;;  %v831_v14 = vld [vmem:[%s2723_s28 + $0x4f8] sm:$0xff] }
 0x130   : > { %1156 = vmatmul.mubr.f32.gmra.mxu0 %v764_v15  ;;  %1521 = vmatmul.mubr.f32.gmra.mxu1 %v766_v16  ;;  %v828_v15 = vld [vmem:[%s2723_s28 + $0x4e0] sm:$0xff]  ;;  %v830_v16 = vld [vmem:[%s2723_s28 + $0x4f0] sm:$0xff] }
 0x131   : > { %1160 = vmatprep.mubr.f32.mxu0 %v769_v17  ;;  %1525 = vmatprep.mubr.f32.mxu1 %v771_v18  ;;  %v833_v17 = vld [vmem:[%s2723_s28 + $0x508] sm:$0xff]  ;;  %v835_v18 = vld [vmem:[%s2723_s28 + $0x518] sm:$0xff] }
 0x134   : > { %1161 = vmatmul.mubr.f32.gmra.mxu0 %v768_v19  ;;  %1526 = vmatmul.mubr.f32.gmra.mxu1 %v770_v20  ;;  %v832_v19 = vld [vmem:[%s2723_s28 + $0x500] sm:$0xff]  ;;  %v834_v20 = vld [vmem:[%s2723_s28 + $0x510] sm:$0xff] }
 0x135   : > { %1165 = vmatprep.mubr.f32.mxu0 %v773_v21  ;;  %1530 = vmatprep.mubr.f32.mxu1 %v775_v22  ;;  %v837_v21 = vld [vmem:[%s2723_s28 + $0x528] sm:$0xff]  ;;  %v839_v22 = vld [vmem:[%s2723_s28 + $0x538] sm:$0xff] }
 0x138   : > { %1166 = vmatmul.mubr.f32.gmra.mxu0 %v772_v23  ;;  %1531 = vmatmul.mubr.f32.gmra.mxu1 %v774_v24  ;;  %v836_v23 = vld [vmem:[%s2723_s28 + $0x520] sm:$0xff]  ;;  %v838_v24 = vld [vmem:[%s2723_s28 + $0x530] sm:$0xff] }
 0x139   : > { %1170 = vmatprep.mubr.f32.mxu0 %v777_v25  ;;  %1535 = vmatprep.mubr.f32.mxu1 %v779_v26  ;;  %v841_v25 = vld [vmem:[%s2723_s28 + $0x548] sm:$0xff]  ;;  %v843_v26 = vld [vmem:[%s2723_s28 + $0x558] sm:$0xff] }
 0x13c   : > { %1171 = vmatmul.mubr.f32.gmra.mxu0 %v776_v27  ;;  %1536 = vmatmul.mubr.f32.gmra.mxu1 %v778_v28  ;;  %v840_v27 = vld [vmem:[%s2723_s28 + $0x540] sm:$0xff]  ;;  %v842_v28 = vld [vmem:[%s2723_s28 + $0x550] sm:$0xff] }
 0x13d   : > { %1175 = vmatprep.mubr.f32.mxu0 %v781_v29  ;;  %1540 = vmatprep.mubr.f32.mxu1 %v783_v30  ;;  %v845_v29 = vld [vmem:[%s2723_s28 + $0x568] sm:$0xff]  ;;  %v847_v30 = vld [vmem:[%s2723_s28 + $0x578] sm:$0xff] }
 0x140   : > { %1176 = vmatmul.mubr.f32.gmra.mxu0 %v780_v31  ;;  %1541 = vmatmul.mubr.f32.gmra.mxu1 %v782_v32  ;;  %v844_v31 = vld [vmem:[%s2723_s28 + $0x560] sm:$0xff]  ;;  %v846_v32 = vld [vmem:[%s2723_s28 + $0x570] sm:$0xff] }
 0x141   : > { %1180 = vmatprep.mubr.f32.mxu0 %v785_v33  ;;  %1545 = vmatprep.mubr.f32.mxu1 %v787_v34  ;;  %v849_v33 = vld [vmem:[%s2723_s28 + $0x588] sm:$0xff]  ;;  %v851_v34 = vld [vmem:[%s2723_s28 + $0x598] sm:$0xff] }
 0x144   : > { %1181 = vmatmul.mubr.f32.gmra.mxu0 %v784_v35  ;;  %1546 = vmatmul.mubr.f32.gmra.mxu1 %v786_v36  ;;  %v848_v35 = vld [vmem:[%s2723_s28 + $0x580] sm:$0xff]  ;;  %v850_v36 = vld [vmem:[%s2723_s28 + $0x590] sm:$0xff] }
 0x145   : > { %1185 = vmatprep.mubr.f32.mxu0 %v789_v37  ;;  %1550 = vmatprep.mubr.f32.mxu1 %v791_v38  ;;  %v853_v37 = vld [vmem:[%s2723_s28 + $0x5a8] sm:$0xff]  ;;  %v855_v38 = vld [vmem:[%s2723_s28 + $0x5b8] sm:$0xff] }
 0x148   : > { %1186 = vmatmul.mubr.f32.gmra.mxu0 %v788_v39  ;;  %1551 = vmatmul.mubr.f32.gmra.mxu1 %v790_v40  ;;  %v852_v39 = vld [vmem:[%s2723_s28 + $0x5a0] sm:$0xff]  ;;  %v854_v40 = vld [vmem:[%s2723_s28 + $0x5b0] sm:$0xff] }
 0x149   : > { %1190 = vmatprep.mubr.f32.mxu0 %v793_v41  ;;  %1555 = vmatprep.mubr.f32.mxu1 %v795_v42  ;;  %v857_v41 = vld [vmem:[%s2723_s28 + $0x5c8] sm:$0xff]  ;;  %v859_v42 = vld [vmem:[%s2723_s28 + $0x5d8] sm:$0xff] }
 0x14c   : > { %1191 = vmatmul.mubr.f32.gmra.mxu0 %v792_v43  ;;  %1556 = vmatmul.mubr.f32.gmra.mxu1 %v794_v44  ;;  %v856_v43 = vld [vmem:[%s2723_s28 + $0x5c0] sm:$0xff]  ;;  %v858_v44 = vld [vmem:[%s2723_s28 + $0x5d0] sm:$0xff] }
 0x14d   : > { %1195 = vmatprep.mubr.f32.mxu0 %v797_v45  ;;  %1560 = vmatprep.mubr.f32.mxu1 %v799_v46  ;;  %v861_v45 = vld [vmem:[%s2723_s28 + $0x5e8] sm:$0xff]  ;;  %v863_v46 = vld [vmem:[%s2723_s28 + $0x5f8] sm:$0xff] }
 0x150   : > { %1196 = vmatmul.mubr.f32.gmra.mxu0 %v796_v47  ;;  %1561 = vmatmul.mubr.f32.gmra.mxu1 %v798_v48  ;;  %v860_v47 = vld [vmem:[%s2723_s28 + $0x5e0] sm:$0xff]  ;;  %v862_v48 = vld [vmem:[%s2723_s28 + $0x5f0] sm:$0xff] }
 0x151   : > { %1200 = vmatprep.mubr.f32.mxu0 %v801_v49  ;;  %1565 = vmatprep.mubr.f32.mxu1 %v803_v51  ;;  %v865_v49 = vld [vmem:[%s2723_s28 + $0x608] sm:$0xff]  ;;  %v867_v51 = vld [vmem:[%s2723_s28 + $0x618] sm:$0xff] }
 0x154   : > { %1201 = vmatmul.mubr.f32.gmra.mxu0 %v800_v52  ;;  %1566 = vmatmul.mubr.f32.gmra.mxu1 %v802_v53  ;;  %v864_v52 = vld [vmem:[%s2723_s28 + $0x600] sm:$0xff]  ;;  %v866_v53 = vld [vmem:[%s2723_s28 + $0x610] sm:$0xff] }
 0x155   : > { %1205 = vmatprep.mubr.f32.mxu0 %v805_v54  ;;  %1570 = vmatprep.mubr.f32.mxu1 %v807_v55  ;;  %v869_v54 = vld [vmem:[%s2723_s28 + $0x628] sm:$0xff]  ;;  %v871_v55 = vld [vmem:[%s2723_s28 + $0x638] sm:$0xff] }
 0x158   : > { %1206 = vmatmul.mubr.f32.gmra.mxu0 %v804_v56  ;;  %1571 = vmatmul.mubr.f32.gmra.mxu1 %v806_v50 }
 0x159   : > { %1210 = vmatprep.mubr.f32.mxu0 %v809_v57  ;;  %1575 = vmatprep.mubr.f32.mxu1 %v811_v58  ;;  %v868_v58 = vld [vmem:[%s2723_s28 + $0x620] sm:$0xff] }
 0x15c   : > { %1211 = vmatmul.mubr.f32.gmra.mxu0 %v808_v59  ;;  %1576 = vmatmul.mubr.f32.gmra.mxu1 %v810_v60  ;;  %v870_v59 = vld [vmem:[%s2723_s28 + $0x630] sm:$0xff] }
 0x15d   : > { %1215 = vmatprep.mubr.f32.mxu0 %v813_v61  ;;  %1580 = vmatprep.mubr.f32.mxu1 %v815_v62  ;;  %v873_v62 = vld [vmem:[%s2723_s28 + $0x648] sm:$0xff] }
 0x160   : > { %1216 = vmatmul.mubr.f32.gmra.mxu0 %v812_v63  ;;  %1581 = vmatmul.mubr.f32.gmra.mxu1 %v814_v0  ;;  %v875_v63 = vld [vmem:[%s2723_s28 + $0x658] sm:$0xff] }
 0x161   : > { %1220 = vmatprep.mubr.f32.mxu0 %v817_v1  ;;  %1585 = vmatprep.mubr.f32.mxu1 %v819_v2 }
 0x164   : > { %1221 = vmatmul.mubr.f32.gmra.mxu0 %v816_v3  ;;  %1586 = vmatmul.mubr.f32.gmra.mxu1 %v818_v4  ;;  %v872_v3 = vld [vmem:[%s2723_s28 + $0x640] sm:$0xff]  ;;  %v874_v4 = vld [vmem:[%s2723_s28 + $0x650] sm:$0xff] }
 0x165   : > { %1225 = vmatprep.mubr.f32.mxu0 %v821_v5  ;;  %1590 = vmatprep.mubr.f32.mxu1 %v823_v6 }
 0x168   : > { %1226 = vmatmul.mubr.f32.gmra.mxu0 %v820_v7  ;;  %1591 = vmatmul.mubr.f32.gmra.mxu1 %v822_v8  ;;  %v877_v7 = vld [vmem:[%s2723_s28 + $0x668] sm:$0xff]  ;;  %v879_v8 = vld [vmem:[%s2723_s28 + $0x678] sm:$0xff] }
 0x169   : > { %1230 = vmatprep.mubr.f32.mxu0 %v825_v9  ;;  %1595 = vmatprep.mubr.f32.mxu1 %v827_v10 }
 0x16c   : > { %1231 = vmatmul.mubr.f32.gmra.mxu0 %v824_v11  ;;  %1596 = vmatmul.mubr.f32.gmra.mxu1 %v826_v12  ;;  %v876_v12 = vld [vmem:[%s2723_s28 + $0x660] sm:$0xff] }
 0x16d   : > { %1235 = vmatprep.mubr.f32.mxu0 %v829_v13  ;;  %1600 = vmatprep.mubr.f32.mxu1 %v831_v14  ;;  %v878_v13 = vld [vmem:[%s2723_s28 + $0x670] sm:$0xff] }
 0x170   : > { %1236 = vmatmul.mubr.f32.gmra.mxu0 %v828_v15  ;;  %1601 = vmatmul.mubr.f32.gmra.mxu1 %v830_v16  ;;  %v881_v16 = vld [vmem:[%s2723_s28 + $0x688] sm:$0xff] }
 0x171   : > { %1240 = vmatprep.mubr.f32.mxu0 %v833_v17  ;;  %1605 = vmatprep.mubr.f32.mxu1 %v835_v18  ;;  %v883_v17 = vld [vmem:[%s2723_s28 + $0x698] sm:$0xff] }
 0x174   : > { %1241 = vmatmul.mubr.f32.gmra.mxu0 %v832_v19  ;;  %1606 = vmatmul.mubr.f32.gmra.mxu1 %v834_v20 }
 0x175   : > { %1245 = vmatprep.mubr.f32.mxu0 %v837_v21  ;;  %1610 = vmatprep.mubr.f32.mxu1 %v839_v22  ;;  %v880_v21 = vld [vmem:[%s2723_s28 + $0x680] sm:$0xff]  ;;  %v882_v22 = vld [vmem:[%s2723_s28 + $0x690] sm:$0xff] }
 0x178   : > { %1246 = vmatmul.mubr.f32.gmra.mxu0 %v836_v23  ;;  %1611 = vmatmul.mubr.f32.gmra.mxu1 %v838_v24 }
 0x179   : > { %1250 = vmatprep.mubr.f32.mxu0 %v841_v25  ;;  %1615 = vmatprep.mubr.f32.mxu1 %v843_v26  ;;  %v885_v25 = vld [vmem:[%s2723_s28 + $0x6a8] sm:$0xff]  ;;  %v887_v26 = vld [vmem:[%s2723_s28 + $0x6b8] sm:$0xff] }
 0x17c   : > { %1251 = vmatmul.mubr.f32.gmra.mxu0 %v840_v27  ;;  %1616 = vmatmul.mubr.f32.gmra.mxu1 %v842_v28 }
 0x17d   : > { %1255 = vmatprep.mubr.f32.mxu0 %v845_v29  ;;  %1620 = vmatprep.mubr.f32.mxu1 %v847_v30  ;;  %v884_v30 = vld [vmem:[%s2723_s28 + $0x6a0] sm:$0xff] }
 0x180   : > { %1256 = vmatmul.mubr.f32.gmra.mxu0 %v844_v31  ;;  %1621 = vmatmul.mubr.f32.gmra.mxu1 %v846_v32  ;;  %v886_v31 = vld [vmem:[%s2723_s28 + $0x6b0] sm:$0xff] }
 0x181   : > { %1260 = vmatprep.mubr.f32.mxu0 %v849_v33  ;;  %1625 = vmatprep.mubr.f32.mxu1 %v851_v34  ;;  %v889_v34 = vld [vmem:[%s2723_s28 + $0x6c8] sm:$0xff] }
 0x184   : > { %1261 = vmatmul.mubr.f32.gmra.mxu0 %v848_v35  ;;  %1626 = vmatmul.mubr.f32.gmra.mxu1 %v850_v36  ;;  %v891_v35 = vld [vmem:[%s2723_s28 + $0x6d8] sm:$0xff] }
 0x185   : > { %1265 = vmatprep.mubr.f32.mxu0 %v853_v37  ;;  %1630 = vmatprep.mubr.f32.mxu1 %v855_v38 }
 0x188   : > { %1266 = vmatmul.mubr.f32.gmra.mxu0 %v852_v39  ;;  %1631 = vmatmul.mubr.f32.gmra.mxu1 %v854_v40  ;;  %v888_v39 = vld [vmem:[%s2723_s28 + $0x6c0] sm:$0xff]  ;;  %v890_v40 = vld [vmem:[%s2723_s28 + $0x6d0] sm:$0xff] }
 0x189   : > { %1270 = vmatprep.mubr.f32.mxu0 %v857_v41  ;;  %1635 = vmatprep.mubr.f32.mxu1 %v859_v42 }
 0x18c   : > { %1271 = vmatmul.mubr.f32.gmra.mxu0 %v856_v43  ;;  %1636 = vmatmul.mubr.f32.gmra.mxu1 %v858_v44  ;;  %v893_v43 = vld [vmem:[%s2723_s28 + $0x6e8] sm:$0xff]  ;;  %v895_v44 = vld [vmem:[%s2723_s28 + $0x6f8] sm:$0xff] }
 0x18d   : > { %1275 = vmatprep.mubr.f32.mxu0 %v861_v45  ;;  %1640 = vmatprep.mubr.f32.mxu1 %v863_v46 }
 0x190   : > { %1276 = vmatmul.mubr.f32.gmra.mxu0 %v860_v47  ;;  %1641 = vmatmul.mubr.f32.gmra.mxu1 %v862_v48  ;;  %v892_v48 = vld [vmem:[%s2723_s28 + $0x6e0] sm:$0xff] }
 0x191   : > { %1280 = vmatprep.mubr.f32.mxu0 %v865_v49  ;;  %1645 = vmatprep.mubr.f32.mxu1 %v867_v51  ;;  %v894_v49 = vld [vmem:[%s2723_s28 + $0x6f0] sm:$0xff] }
 0x194   : > { %v1042_v56 = vpop.f32.mrf.mxu0  ;;  %1281 = vmatmul.mubr.f32.gmra.mxu0 %v864_v52  ;;  %v1407_v50 = vpop.f32.mrf.mxu1  ;;  %1646 = vmatmul.mubr.f32.gmra.mxu1 %v866_v53  ;;  %v897_v53 = vld [vmem:[%s2723_s28 + $0x708] sm:$0xff] }
 0x195   : > { %v2928_v57 = vadd.f32 %v1407_v50, %v1042_v56  ;;  %1285 = vmatprep.mubr.f32.mxu0 %v869_v54  ;;  %1650 = vmatprep.mubr.f32.mxu1 %v871_v55  ;;  %v899_v54 = vld [vmem:[%s2723_s28 + $0x718] sm:$0xff] }
 0x196   : > { %v1044_v60 = vpop.f32.mrf.mxu0  ;;  %v1409_v61 = vpop.f32.mrf.mxu1 }
 0x198   : > { %v1047_v0 = vpop.f32.mrf.mxu0  ;;  %1286 = vmatmul.mubr.f32.gmra.mxu0 %v868_v58  ;;  %v1412_v1 = vpop.f32.mrf.mxu1  ;;  %1651 = vmatmul.mubr.f32.gmra.mxu1 %v870_v59  ;;  %v896_v58 = vld [vmem:[%s2723_s28 + $0x700] sm:$0xff]  ;;  %v898_v59 = vld [vmem:[%s2723_s28 + $0x710] sm:$0xff] }
 0x199   : > { %v2934_v2 = vadd.f32 %v1412_v1, %v1047_v0  ;;  %1290 = vmatprep.mubr.f32.mxu0 %v873_v62  ;;  %1655 = vmatprep.mubr.f32.mxu1 %v875_v63  ;;  %v901_v62 = vld [vmem:[%s2723_s28 + $0x728] sm:$0xff]  ;;  %v903_v63 = vld [vmem:[%s2723_s28 + $0x738] sm:$0xff] }
 0x19a   : > { %v1049_v5 = vpop.f32.mrf.mxu0  ;;  %v1414_v6 = vpop.f32.mrf.mxu1 }
 0x19b   : > { %v902_v5 = vld [vmem:[%s2723_s28 + $0x730] sm:$0xff] }
 0x19c   : > { %v1052_v9 = vpop.f32.mrf.mxu0  ;;  %1291 = vmatmul.mubr.f32.gmra.mxu0 %v872_v3  ;;  %v1417_v10 = vpop.f32.mrf.mxu1  ;;  %1656 = vmatmul.mubr.f32.gmra.mxu1 %v874_v4  ;;  %v900_v4 = vld [vmem:[%s2723_s28 + $0x720] sm:$0xff] }
 0x19d   : > { %v2940_v11 = vadd.f32 %v1417_v10, %v1052_v9  ;;  %1295 = vmatprep.mubr.f32.mxu0 %v877_v7  ;;  %1660 = vmatprep.mubr.f32.mxu1 %v879_v8  ;;  %v905_v8 = vld [vmem:[%s2723_s28 + $0x748] sm:$0xff]  ;;  %v907_v9 = vld [vmem:[%s2723_s28 + $0x758] sm:$0xff] }
 0x19e   : > { %v1054_v14 = vpop.f32.mrf.mxu0  ;;  %v1419_v15 = vpop.f32.mrf.mxu1 }
 0x19f   : > { %v904_v14 = vld [vmem:[%s2723_s28 + $0x740] sm:$0xff]  ;;  %v906_v15 = vld [vmem:[%s2723_s28 + $0x750] sm:$0xff] }
 0x1a0   : > { %v1057_v18 = vpop.f32.mrf.mxu0  ;;  %1296 = vmatmul.mubr.f32.gmra.mxu0 %v876_v12  ;;  %v1422_v19 = vpop.f32.mrf.mxu1  ;;  %1661 = vmatmul.mubr.f32.gmra.mxu1 %v878_v13 }
 0x1a1   : > { %v2946_v20 = vadd.f32 %v1422_v19, %v1057_v18  ;;  %1300 = vmatprep.mubr.f32.mxu0 %v881_v16  ;;  %1665 = vmatprep.mubr.f32.mxu1 %v883_v17  ;;  %v909_v18 = vld [vmem:[%s2723_s28 + $0x768] sm:$0xff]  ;;  %v911_v19 = vld [vmem:[%s2723_s28 + $0x778] sm:$0xff] }
 0x1a2   : > { %v1059_v23 = vpop.f32.mrf.mxu0  ;;  %v1424_v24 = vpop.f32.mrf.mxu1 }
 0x1a3   : > { %v908_v24 = vld [vmem:[%s2723_s28 + $0x760] sm:$0xff] }
 0x1a4   : > { %v1062_v27 = vpop.f32.mrf.mxu0  ;;  %1301 = vmatmul.mubr.f32.gmra.mxu0 %v880_v21  ;;  %v1427_v28 = vpop.f32.mrf.mxu1  ;;  %1666 = vmatmul.mubr.f32.gmra.mxu1 %v882_v22 }
 0x1a5   : > { %v2952_v29 = vadd.f32 %v1427_v28, %v1062_v27  ;;  %1305 = vmatprep.mubr.f32.mxu0 %v885_v25  ;;  %1670 = vmatprep.mubr.f32.mxu1 %v887_v26  ;;  %v910_v25 = vld [vmem:[%s2723_s28 + $0x770] sm:$0xff] }
 0x1a6   : > { %v1064_v32 = vpop.f32.mrf.mxu0  ;;  %v1429_v33 = vpop.f32.mrf.mxu1 }
 0x1a8   : > { %v1067_v36 = vpop.f32.mrf.mxu0  ;;  %1306 = vmatmul.mubr.f32.gmra.mxu0 %v884_v30  ;;  %v1432_v37 = vpop.f32.mrf.mxu1  ;;  %1671 = vmatmul.mubr.f32.gmra.mxu1 %v886_v31 }
 0x1a9   : > { %v2958_v38 = vadd.f32 %v1432_v37, %v1067_v36  ;;  %1310 = vmatprep.mubr.f32.mxu0 %v889_v34  ;;  %1675 = vmatprep.mubr.f32.mxu1 %v891_v35 }
 0x1aa   : > { %v1069_v41 = vpop.f32.mrf.mxu0  ;;  %v1434_v42 = vpop.f32.mrf.mxu1 }
 0x1ac   : > { %v1072_v45 = vpop.f32.mrf.mxu0  ;;  %1311 = vmatmul.mubr.f32.gmra.mxu0 %v888_v39  ;;  %v1437_v46 = vpop.f32.mrf.mxu1  ;;  %1676 = vmatmul.mubr.f32.gmra.mxu1 %v890_v40 }
 0x1ad   : > { %v2964_v47 = vadd.f32 %v1437_v46, %v1072_v45  ;;  %1315 = vmatprep.mubr.f32.mxu0 %v893_v43  ;;  %1680 = vmatprep.mubr.f32.mxu1 %v895_v44 }
 0x1ae   : > { %v1074_v51 = vpop.f32.mrf.mxu0  ;;  %v1439_v52 = vpop.f32.mrf.mxu1 }
 0x1b0   : > { %v1077_v55 = vpop.f32.mrf.mxu0  ;;  %1316 = vmatmul.mubr.f32.gmra.mxu0 %v892_v48  ;;  %v1442_v56 = vpop.f32.mrf.mxu1  ;;  %1681 = vmatmul.mubr.f32.gmra.mxu1 %v894_v49 }
 0x1b1   : > { %v2970_v50 = vadd.f32 %v1442_v56, %v1077_v55  ;;  %1320 = vmatprep.mubr.f32.mxu0 %v897_v53  ;;  %1685 = vmatprep.mubr.f32.mxu1 %v899_v54 }
 0x1b2   : > { %v1079_v60 = vpop.f32.mrf.mxu0  ;;  %v1444_v61 = vpop.f32.mrf.mxu1 }
 0x1b4   : > { %v1082_v0 = vpop.f32.mrf.mxu0  ;;  %1321 = vmatmul.mubr.f32.gmra.mxu0 %v896_v58  ;;  %v1447_v1 = vpop.f32.mrf.mxu1  ;;  %1686 = vmatmul.mubr.f32.gmra.mxu1 %v898_v59 }
 0x1b5   : > { %v2976_v3 = vadd.f32 %v1447_v1, %v1082_v0  ;;  %1325 = vmatprep.mubr.f32.mxu0 %v901_v62  ;;  %1690 = vmatprep.mubr.f32.mxu1 %v903_v63 }
 0x1b6   : > { %v1084_v6 = vpop.f32.mrf.mxu0  ;;  %v1449_v7 = vpop.f32.mrf.mxu1 }
 0x1b8   : > { %v1087_v10 = vpop.f32.mrf.mxu0  ;;  %1326 = vmatmul.mubr.f32.gmra.mxu0 %v900_v4  ;;  %v1452_v12 = vpop.f32.mrf.mxu1  ;;  %1691 = vmatmul.mubr.f32.gmra.mxu1 %v902_v5 }
 0x1b9   : > { %v2982_v13 = vadd.f32 %v1452_v12, %v1087_v10  ;;  %1330 = vmatprep.mubr.f32.mxu0 %v905_v8  ;;  %1695 = vmatprep.mubr.f32.mxu1 %v907_v9 }
 0x1ba   : > { %v1089_v16 = vpop.f32.mrf.mxu0  ;;  %v1454_v17 = vpop.f32.mrf.mxu1 }
 0x1bc   : > { %v1092_v21 = vpop.f32.mrf.mxu0  ;;  %1331 = vmatmul.mubr.f32.gmra.mxu0 %v904_v14  ;;  %v1457_v22 = vpop.f32.mrf.mxu1  ;;  %1696 = vmatmul.mubr.f32.gmra.mxu1 %v906_v15 }
 0x1bd   : > { %v2988_v23 = vadd.f32 %v1457_v22, %v1092_v21  ;;  %1335 = vmatprep.mubr.f32.mxu0 %v909_v18  ;;  %1700 = vmatprep.mubr.f32.mxu1 %v911_v19 }
 0x1be   : > { %v1094_v26 = vpop.f32.mrf.mxu0  ;;  %v1459_v27 = vpop.f32.mrf.mxu1 }
 0x1c0   : > { %v1097_v28 = vpop.f32.mrf.mxu0  ;;  %1336 = vmatmul.mubr.f32.gmra.mxu0 %v908_v24  ;;  %v1462_v30 = vpop.f32.mrf.mxu1  ;;  %1701 = vmatmul.mubr.f32.gmra.mxu1 %v910_v25 }
 0x1c1   : > { %v2992_v31 = vadd.f32 %v1462_v30, %v1097_v28 }
 0x1c2   : > { %v1099_v32 = vpop.f32.mrf.mxu0  ;;  %v1464_v33 = vpop.f32.mrf.mxu1 }
 0x1c4   : > { %v1102_v34 = vpop.f32.mrf.mxu0  ;;  %v1467_v35 = vpop.f32.mrf.mxu1 }
 0x1c5   : > { %v2994_v36 = vadd.f32 %v1467_v35, %v1102_v34 }
 0x1c6   : > { %v1104_v37 = vpop.f32.mrf.mxu0  ;;  %v1469_v39 = vpop.f32.mrf.mxu1 }
 0x1c7   : > { %3257 = vst [vmem:[#allocation3_spill] sm:$0xff] %v2994_v36 }
 0x1c8   : > { %v1107_v40 = vpop.f32.mrf.mxu0  ;;  %v1472_v41 = vpop.f32.mrf.mxu1 }
 0x1c9   : > { %v2996_v42 = vadd.f32 %v1472_v41, %v1107_v40 }
 0x1ca   : > { %v1109_v43 = vpop.f32.mrf.mxu0  ;;  %v1474_v44 = vpop.f32.mrf.mxu1 }
 0x1cb   : > { %3258 = vst [vmem:[#allocation4_spill] sm:$0xff] %v2996_v42 }
 0x1cc   : > { %v1112_v45 = vpop.f32.mrf.mxu0  ;;  %v1477_v46 = vpop.f32.mrf.mxu1 }
 0x1cd   : > { %v2998_v48 = vadd.f32 %v1477_v46, %v1112_v45 }
 0x1ce   : > { %v1114_v49 = vpop.f32.mrf.mxu0  ;;  %v1479_v51 = vpop.f32.mrf.mxu1 }
 0x1cf   : > { %3259 = vst [vmem:[#allocation5_spill] sm:$0xff] %v2998_v48 }
 0x1d0   : > { %v1117_v52 = vpop.f32.mrf.mxu0  ;;  %v1482_v53 = vpop.f32.mrf.mxu1 }
 0x1d1   : > { %v3000_v54 = vadd.f32 %v1482_v53, %v1117_v52 }
 0x1d2   : > { %v1119_v55 = vpop.f32.mrf.mxu0  ;;  %v1484_v56 = vpop.f32.mrf.mxu1 }
 0x1d4   : > { %v1122_v59 = vpop.f32.mrf.mxu0  ;;  %v1487_v60 = vpop.f32.mrf.mxu1 }
 0x1d5   : > { %v3004_v61 = vadd.f32 %v1487_v60, %v1122_v59 }
 0x1d6   : > { %v1124_v62 = vpop.f32.mrf.mxu0  ;;  %v1489_v63 = vpop.f32.mrf.mxu1 }
 0x1d8   : > { %v1127_v1 = vpop.f32.mrf.mxu0  ;;  %v1492_v4 = vpop.f32.mrf.mxu1 }
 0x1d9   : > { %v3008_v5 = vadd.f32 %v1492_v4, %v1127_v1 }
 0x1da   : > { %v1129_v6 = vpop.f32.mrf.mxu0  ;;  %v1494_v7 = vpop.f32.mrf.mxu1 }
 0x1dc   : > { %v1132_v9 = vpop.f32.mrf.mxu0  ;;  %v1497_v10 = vpop.f32.mrf.mxu1 }
 0x1dd   : > { %v3012_v12 = vadd.f32 %v1497_v10, %v1132_v9 }
 0x1de   : > { %v1134_v14 = vpop.f32.mrf.mxu0  ;;  %v1499_v15 = vpop.f32.mrf.mxu1 }
 0x1e0   : > { %v1137_v17 = vpop.f32.mrf.mxu0  ;;  %v1502_v18 = vpop.f32.mrf.mxu1 }
 0x1e1   : > { %v3016_v19 = vadd.f32 %v1502_v18, %v1137_v17 }
 0x1e2   : > { %v1139_v21 = vpop.f32.mrf.mxu0  ;;  %v1504_v22 = vpop.f32.mrf.mxu1 }
 0x1e4   : > { %v1142_v25 = vpop.f32.mrf.mxu0  ;;  %v1507_v26 = vpop.f32.mrf.mxu1 }
 0x1e5   : > { %v3020_v27 = vadd.f32 %v1507_v26, %v1142_v25 }
 0x1e6   : > { %v1144_v28 = vpop.f32.mrf.mxu0  ;;  %v1509_v30 = vpop.f32.mrf.mxu1 }
 0x1e8   : > { %v1147_v33 = vpop.f32.mrf.mxu0  ;;  %v1512_v34 = vpop.f32.mrf.mxu1 }
 0x1e9   : > { %v3024_v35 = vadd.f32 %v1512_v34, %v1147_v33 }
 0x1ea   : > { %v1149_v37 = vpop.f32.mrf.mxu0  ;;  %v1514_v39 = vpop.f32.mrf.mxu1 }
 0x1ec   : > { %v1152_v41 = vpop.f32.mrf.mxu0  ;;  %v1517_v43 = vpop.f32.mrf.mxu1 }
 0x1ed   : > { %v3028_v44 = vadd.f32 %v1517_v43, %v1152_v41 }
 0x1ee   : > { %v1154_v45 = vpop.f32.mrf.mxu0  ;;  %v1519_v46 = vpop.f32.mrf.mxu1 }
 0x1f0   : > { %v1157_v51 = vpop.f32.mrf.mxu0  ;;  %v1522_v52 = vpop.f32.mrf.mxu1 }
 0x1f1   : > { %v3032_v53 = vadd.f32 %v1522_v52, %v1157_v51 }
 0x1f2   : > { %v1159_v55 = vpop.f32.mrf.mxu0  ;;  %v1524_v56 = vpop.f32.mrf.mxu1 }
 0x1f4   : > { %v1162_v60 = vpop.f32.mrf.mxu0  ;;  %v1527_v62 = vpop.f32.mrf.mxu1 }
 0x1f5   : > { %v3036_v63 = vadd.f32 %v1527_v62, %v1162_v60 }
 0x1f6   : > { %v1164_v1 = vpop.f32.mrf.mxu0  ;;  %v1529_v4 = vpop.f32.mrf.mxu1 }
 0x1f8   : > { %v1167_v7 = vpop.f32.mrf.mxu0  ;;  %v1532_v9 = vpop.f32.mrf.mxu1 }
 0x1f9   : > { %v3040_v10 = vadd.f32 %v1532_v9, %v1167_v7 }
 0x1fa   : > { %v1169_v14 = vpop.f32.mrf.mxu0  ;;  %v1534_v15 = vpop.f32.mrf.mxu1 }
 0x1fc   : > { %v1172_v18 = vpop.f32.mrf.mxu0  ;;  %v1537_v21 = vpop.f32.mrf.mxu1 }
 0x1fd   : > { %v3044_v22 = vadd.f32 %v1537_v21, %v1172_v18 }
 0x1fe   : > { %v1174_v25 = vpop.f32.mrf.mxu0  ;;  %v1539_v26 = vpop.f32.mrf.mxu1 }
 0x200   : > { %v1177_v30 = vpop.f32.mrf.mxu0  ;;  %v1542_v33 = vpop.f32.mrf.mxu1 }
 0x201   : > { %v3048_v34 = vadd.f32 %v1542_v33, %v1177_v30 }
 0x202   : > { %v1179_v37 = vpop.f32.mrf.mxu0  ;;  %v1544_v39 = vpop.f32.mrf.mxu1 }
 0x203   : > { %3260 = vst [vmem:[#allocation6_spill] sm:$0xff] %v3048_v34 }
 0x204   : > { %v1182_v43 = vpop.f32.mrf.mxu0  ;;  %v1547_v45 = vpop.f32.mrf.mxu1 }
 0x205   : > { %v3052_v46 = vadd.f32 %v1547_v45, %v1182_v43 }
 0x206   : > { %v1184_v51 = vpop.f32.mrf.mxu0  ;;  %v1549_v52 = vpop.f32.mrf.mxu1 }
 0x207   : > { %3261 = vst [vmem:[#allocation7_spill] sm:$0xff] %v3052_v46 }
 0x208   : > { %v1187_v56 = vpop.f32.mrf.mxu0  ;;  %v1552_v60 = vpop.f32.mrf.mxu1 }
 0x209   : > { %v3056_v62 = vadd.f32 %v1552_v60, %v1187_v56 }
 0x20a   : > { %v1189_v1 = vpop.f32.mrf.mxu0  ;;  %v1554_v4 = vpop.f32.mrf.mxu1 }
 0x20b   : > { %3262 = vst [vmem:[#allocation8_spill] sm:$0xff] %v3056_v62 }
 0x20c   : > { %v3060_v9 = vpop.f32.mrf.mxu0  ;;  %v3062_v14 = vpop.f32.mrf.mxu1 }
 0x20e   : > { %v1194_v15 = vpop.f32.mrf.mxu0  ;;  %v1559_v18 = vpop.f32.mrf.mxu1 }
 0x210   : > { %v3064_v21 = vpop.f32.mrf.mxu0  ;;  %v3066_v25 = vpop.f32.mrf.mxu1 }
 0x212   : > { %v1199_v26 = vpop.f32.mrf.mxu0  ;;  %v1564_v30 = vpop.f32.mrf.mxu1 }
 0x214   : > { %v3068_v33 = vpop.f32.mrf.mxu0  ;;  %v3070_v37 = vpop.f32.mrf.mxu1 }
 0x216   : > { %v1204_v39 = vpop.f32.mrf.mxu0  ;;  %v1569_v43 = vpop.f32.mrf.mxu1 }
 0x218   : > { %v3072_v45 = vpop.f32.mrf.mxu0  ;;  %v3074_v51 = vpop.f32.mrf.mxu1 }
 0x21a   : > { %v1209_v52 = vpop.f32.mrf.mxu0  ;;  %v1574_v56 = vpop.f32.mrf.mxu1 }
 0x21c   : > { %v3076_v60 = vpop.f32.mrf.mxu0  ;;  %v3078_v1 = vpop.f32.mrf.mxu1 }
 0x21e   : > { %v1214_v4 = vpop.f32.mrf.mxu0  ;;  %v1579_v15 = vpop.f32.mrf.mxu1 }
 0x220   : > { %v3080_v18 = vpop.f32.mrf.mxu0  ;;  %v3082_v26 = vpop.f32.mrf.mxu1 }
 0x222   : > { %v1219_v30 = vpop.f32.mrf.mxu0  ;;  %v1584_v7 = vpop.f32.mrf.mxu1 }
 0x224   : > { %v3084_v39 = vpop.f32.mrf.mxu0  ;;  %v3086_v43 = vpop.f32.mrf.mxu1 }
 0x226   : > { %v1224_v55 = vpop.f32.mrf.mxu0  ;;  %v1589_v41 = vpop.f32.mrf.mxu1 }
 0x228   : > { %v3088_v52 = vpop.f32.mrf.mxu0  ;;  %v3090_v56 = vpop.f32.mrf.mxu1 }
 0x22a   : > { %v1229_v28 = vpop.f32.mrf.mxu0  ;;  %v1594_v17 = vpop.f32.mrf.mxu1 }
 0x22c   : > { %v3092_v4 = vpop.f32.mrf.mxu0  ;;  %v3094_v15 = vpop.f32.mrf.mxu1 }
 0x22e   : > { %v1234_v6 = vpop.f32.mrf.mxu0  ;;  %v1599_v59 = vpop.f32.mrf.mxu1 }
 0x230   : > { %v3096_v30 = vpop.f32.mrf.mxu0  ;;  %v3098_v7 = vpop.f32.mrf.mxu1 }
 0x232   : > { %v1239_v49 = vpop.f32.mrf.mxu0  ;;  %v1604_v55 = vpop.f32.mrf.mxu1 }
 0x234   : > { %v3100_v41 = vpop.f32.mrf.mxu0  ;;  %v3102_v40 = vpop.f32.mrf.mxu1 }
 0x236   : > { %v1244_v32 = vpop.f32.mrf.mxu0  ;;  %v1609_v28 = vpop.f32.mrf.mxu1 }
 0x238   : > { %v3104_v17 = vpop.f32.mrf.mxu0  ;;  %v3106_v24 = vpop.f32.mrf.mxu1 }
 0x23a   : > { %v1249_v16 = vpop.f32.mrf.mxu0  ;;  %v1614_v6 = vpop.f32.mrf.mxu1 }
 0x23c   : > { %v3108_v59 = vpop.f32.mrf.mxu0  ;;  %v3110_v8 = vpop.f32.mrf.mxu1 }
 0x23e   : > { %v1254_v0 = vpop.f32.mrf.mxu0  ;;  %v1619_v49 = vpop.f32.mrf.mxu1 }
 0x23f   : > { %v1558_v0 = vadd.f32 %v3062_v14, %v3060_v9 }
 0x240   : > { %v3112_v58 = vpop.f32.mrf.mxu0  ;;  %v3114_v55 = vpop.f32.mrf.mxu1 }
 0x241   : > { %3263 = vst [vmem:[#allocation9_spill] sm:$0xff] %v3114_v55 }
 0x242   : > { %v1259_v32 = vpop.f32.mrf.mxu0  ;;  %v1624_v28 = vpop.f32.mrf.mxu1 }
 0x243   : > { %v3127_v32 = vld [vmem:[%s3249_s2] ss:$0 sm:$0xff] }
 0x244   : > { %v3118_v62 = vpop.f32.mrf.mxu0  ;;  %v3120_v48 = vpop.f32.mrf.mxu1 }
 0x245   : > { %3264 = vst [vmem:[#allocation10_spill] sm:$0xff] %v3120_v48 }
 0x246   : > { %v1264_v16 = vpop.f32.mrf.mxu0  ;;  %v1629_v6 = vpop.f32.mrf.mxu1 }
 0x247   : > { %v1563_v16 = vadd.f32 %v3066_v25, %v3064_v21  ;;  %v3265_v6 = vmax.f32 %v2928_v57, %v3000_v54  ;;  %v1568_v21 = vadd.f32 %v3070_v37, %v3068_v33  ;;  %v3266_v57 = vmax.f32 %v2934_v2, %v3004_v61 }
 0x248   : > { %v1267_v46 = vpop.f32.mrf.mxu0  ;;  %v1632_v42 = vpop.f32.mrf.mxu1  ;;  %v3267_v33 = vmax.f32 %v2940_v11, %v3008_v5 }
 0x249   : > { %v1633_v49 = vadd.f32 %v1632_v42, %v1267_v46 }
 0x24a   : > { %v1269_v34 = vpop.f32.mrf.mxu0  ;;  %v1634_v36 = vpop.f32.mrf.mxu1 }
 0x24b   : > { %v1721_v55 = vmax.f32 %v1558_v0, %v1633_v49 }
 0x24c   : > { %v1272_v28 = vpop.f32.mrf.mxu0  ;;  %v1637_v48 = vpop.f32.mrf.mxu1 }
 0x24d   : > { %v1736_v9 = vmax.f32 %v3265_v6, %v1721_v55  ;;  %v1638_v14 = vadd.f32 %v1637_v48, %v1272_v28 }
 0x24e   : > { %v1274_v42 = vpop.f32.mrf.mxu0  ;;  %v1639_v34 = vpop.f32.mrf.mxu1 }
 0x24f   : > { %v1758_v36 = vadd.f32 %v3127_v32, %v1736_v9  ;;  %v1722_v46 = vmax.f32 %v1563_v16, %v1638_v14  ;;  %v1573_v42 = vadd.f32 %v3074_v51, %v3072_v45  ;;  %v3268_v45 = vmax.f32 %v2946_v20, %v3012_v12 }
 0x250   : > { %v1277_v0 = vpop.f32.mrf.mxu0  ;;  %v1642_v49 = vpop.f32.mrf.mxu1 }
 0x251   : > { %v1773_v25 = vmax.f32 %v1758_v36, 0.0  ;;  %v1737_v48 = vmax.f32 %v3266_v57, %v1722_v46  ;;  %v1643_v54 = vadd.f32 %v1642_v49, %v1277_v0 }
 0x252   : > { %v1279_v55 = vpop.f32.mrf.mxu0  ;;  %v1644_v28 = vpop.f32.mrf.mxu1 }
 0x253   : > { %1788 = vst [vmem:[%s3138_s8] sm:$0xff] %v1773_v25  ;;  %v1759_v16 = vadd.f32 %v3127_v32, %v1737_v48  ;;  %v1723_v6 = vmax.f32 %v1568_v21, %v1643_v54  ;;  %v1578_v25 = vadd.f32 %v3078_v1, %v3076_v60  ;;  %v3269_v60 = vmax.f32 %v2952_v29, %v3016_v19 }
 0x254   : > { %v1282_v9 = vpop.f32.mrf.mxu0  ;;  %v1647_v14 = vpop.f32.mrf.mxu1 }
 0x255   : > { %v1774_v34 = vmax.f32 %v1759_v16, 0.0  ;;  %v1738_v2 = vmax.f32 %v3267_v33, %v1723_v6  ;;  %v1648_v61 = vadd.f32 %v1647_v14, %v1282_v9  ;;  %v1583_v6 = vadd.f32 %v3082_v26, %v3080_v18 }
 0x256   : > { %v1284_v37 = vpop.f32.mrf.mxu0  ;;  %v1649_v36 = vpop.f32.mrf.mxu1  ;;  %v3270_v18 = vmax.f32 %v2958_v38, %v3020_v27 }
 0x257   : > { %1789 = vst [vmem:[%s3138_s8 + $0x8] sm:$0xff] %v1774_v34  ;;  %v1760_v46 = vadd.f32 %v3127_v32, %v1738_v2  ;;  %v1724_v0 = vmax.f32 %v1573_v42, %v1648_v61  ;;  %v1588_v61 = vadd.f32 %v3086_v43, %v3084_v39  ;;  %v3271_v39 = vmax.f32 %v2964_v47, %v3024_v35 }
 0x258   : > { %v1287_v49 = vpop.f32.mrf.mxu0  ;;  %v1652_v21 = vpop.f32.mrf.mxu1 }
 0x259   : > { %v1775_v57 = vmax.f32 %v1760_v46, 0.0  ;;  %v1739_v11 = vmax.f32 %v3268_v45, %v1724_v0  ;;  %v1653_v5 = vadd.f32 %v1652_v21, %v1287_v49 }
 0x25a   : > { %v1289_v51 = vpop.f32.mrf.mxu0  ;;  %v1654_v48 = vpop.f32.mrf.mxu1 }
 0x25b   : > { %1790 = vst [vmem:[%s3138_s8 + $0x10] sm:$0xff] %v1775_v57  ;;  %v1761_v54 = vadd.f32 %v3127_v32, %v1739_v11  ;;  %v1725_v55 = vmax.f32 %v1578_v25, %v1653_v5  ;;  %v1593_v25 = vadd.f32 %v3090_v56, %v3088_v52  ;;  %v3272_v52 = vmax.f32 %v2970_v50, %v3028_v44 }
 0x25c   : > { %v1292_v28 = vpop.f32.mrf.mxu0  ;;  %v1657_v16 = vpop.f32.mrf.mxu1 }
 0x25d   : > { %v1776_v9 = vmax.f32 %v1761_v54, 0.0  ;;  %v1740_v20 = vmax.f32 %v3269_v60, %v1725_v55  ;;  %v1658_v12 = vadd.f32 %v1657_v16, %v1292_v28  ;;  %v1598_v54 = vadd.f32 %v3094_v15, %v3092_v4 }
 0x25e   : > { %v1294_v1 = vpop.f32.mrf.mxu0  ;;  %v1659_v14 = vpop.f32.mrf.mxu1  ;;  %v3273_v4 = vmax.f32 %v2976_v3, %v3032_v53 }
 0x25f   : > { %1791 = vst [vmem:[%s3138_s8 + $0x18] sm:$0xff] %v1776_v9  ;;  %v1762_v42 = vadd.f32 %v3127_v32, %v1740_v20  ;;  %v1726_v34 = vmax.f32 %v1583_v6, %v1658_v12  ;;  %v1603_v20 = vadd.f32 %v3098_v7, %v3096_v30  ;;  %v3274_v30 = vmax.f32 %v2982_v13, %v3036_v63 }
 0x260   : > { %v1297_v33 = vpop.f32.mrf.mxu0  ;;  %v1662_v2 = vpop.f32.mrf.mxu1 }
 0x261   : > { %v1777_v37 = vmax.f32 %v1762_v42, 0.0  ;;  %v1741_v29 = vmax.f32 %v3270_v18, %v1726_v34  ;;  %v1663_v19 = vadd.f32 %v1662_v2, %v1297_v33  ;;  %v1608_v2 = vadd.f32 %v3102_v40, %v3100_v41 }
 0x262   : > { %v1299_v26 = vpop.f32.mrf.mxu0  ;;  %v1664_v36 = vpop.f32.mrf.mxu1  ;;  %v3275_v40 = vmax.f32 %v2988_v23, %v3040_v10 }
 0x263   : > { %1792 = vst [vmem:[%s3138_s8 + $0x20] sm:$0xff] %v1777_v37  ;;  %v1763_v46 = vadd.f32 %v3127_v32, %v1741_v29  ;;  %v1727_v0 = vmax.f32 %v1588_v61, %v1663_v19  ;;  %v1613_v36 = vadd.f32 %v3106_v24, %v3104_v17  ;;  %v3276_v24 = vmax.f32 %v2992_v31, %v3044_v22 }
 0x264   : > { %v1302_v49 = vpop.f32.mrf.mxu0  ;;  %v1667_v21 = vpop.f32.mrf.mxu1 }
 0x265   : > { %v1778_v57 = vmax.f32 %v1763_v46, 0.0  ;;  %v1742_v38 = vmax.f32 %v3271_v39, %v1727_v0  ;;  %v1668_v27 = vadd.f32 %v1667_v21, %v1302_v49  ;;  %v1618_v39 = vadd.f32 %v3110_v8, %v3108_v59  ;;  %v3278_v8 = vld [vmem:[#allocation3_spill] sm:$0xff]  ;;  %v3279_v59 = vld [vmem:[#allocation6_spill] sm:$0xff] }
 0x266   : > { %v1304_v43 = vpop.f32.mrf.mxu0  ;;  %v1669_v45 = vpop.f32.mrf.mxu1 }
 0x267   : > { %1793 = vst [vmem:[%s3138_s8 + $0x28] sm:$0xff] %v1778_v57  ;;  %v1764_v11 = vadd.f32 %v3127_v32, %v1742_v38  ;;  %v1728_v5 = vmax.f32 %v1593_v25, %v1668_v27 }
 0x268   : > { %v1307_v51 = vpop.f32.mrf.mxu0  ;;  %v1672_v48 = vpop.f32.mrf.mxu1 }
 0x269   : > { %v1779_v55 = vmax.f32 %v1764_v11, 0.0  ;;  %v1743_v47 = vmax.f32 %v3272_v52, %v1728_v5  ;;  %v1673_v35 = vadd.f32 %v1672_v48, %v1307_v51  ;;  %v3277_v51 = vld [vmem:[#allocation9_spill] sm:$0xff] }
 0x26a   : > { %v1309_v56 = vpop.f32.mrf.mxu0  ;;  %v1674_v28 = vpop.f32.mrf.mxu1  ;;  %v1623_v48 = vadd.f32 %v3277_v51, %v3112_v58 }
 0x26b   : > { %1794 = vst [vmem:[%s3138_s8 + $0x30] sm:$0xff] %v1779_v55  ;;  %v1765_v16 = vadd.f32 %v3127_v32, %v1743_v47  ;;  %v1729_v6 = vmax.f32 %v1598_v54, %v1673_v35  ;;  %v3280_v55 = vmax.f32 %v3278_v8, %v3279_v59 }
 0x26c   : > { %v1312_v9 = vpop.f32.mrf.mxu0  ;;  %v1677_v60 = vpop.f32.mrf.mxu1 }
 0x26d   : > { %v1780_v12 = vmax.f32 %v1765_v16, 0.0  ;;  %v1744_v50 = vmax.f32 %v3273_v4, %v1729_v6  ;;  %v1678_v44 = vadd.f32 %v1677_v60, %v1312_v9  ;;  %v3281_v6 = vld [vmem:[#allocation10_spill] sm:$0xff]  ;;  %v3282_v60 = vld [vmem:[#allocation4_spill] sm:$0xff] }
 0x26e   : > { %v1314_v15 = vpop.f32.mrf.mxu0  ;;  %v1679_v1 = vpop.f32.mrf.mxu1  ;;  %v1628_v58 = vadd.f32 %v3281_v6, %v3118_v62 }
 0x26f   : > { %1795 = vst [vmem:[%s3138_s8 + $0x38] sm:$0xff] %v1780_v12  ;;  %v1766_v14 = vadd.f32 %v3127_v32, %v1744_v50  ;;  %v1730_v42 = vmax.f32 %v1603_v20, %v1678_v44  ;;  %v3283_v20 = vld [vmem:[#allocation7_spill] sm:$0xff] }
 0x270   : > { %v1317_v34 = vpop.f32.mrf.mxu0  ;;  %v1682_v33 = vpop.f32.mrf.mxu1  ;;  %v3284_v12 = vmax.f32 %v3282_v60, %v3283_v20 }
 0x271   : > { %v1781_v61 = vmax.f32 %v1766_v14, 0.0  ;;  %v1745_v3 = vmax.f32 %v3274_v30, %v1730_v42  ;;  %v1683_v53 = vadd.f32 %v1682_v33, %v1317_v34  ;;  %v3285_v34 = vld [vmem:[#allocation5_spill] sm:$0xff]  ;;  %v3286_v33 = vld [vmem:[#allocation8_spill] sm:$0xff] }
 0x272   : > { %v1319_v7 = vpop.f32.mrf.mxu0  ;;  %v1684_v37 = vpop.f32.mrf.mxu1 }
 0x273   : > { %1796 = vst [vmem:[%s3138_s8 + $0x40] sm:$0xff] %v1781_v61  ;;  %v1767_v18 = vadd.f32 %v3127_v32, %v1745_v3  ;;  %v1731_v29 = vmax.f32 %v1608_v2, %v1683_v53  ;;  %v3287_v2 = vmax.f32 %v3285_v34, %v3286_v33 }
 0x274   : > { %v1322_v19 = vpop.f32.mrf.mxu0  ;;  %v1687_v26 = vpop.f32.mrf.mxu1 }
 0x275   : > { %v1782_v46 = vmax.f32 %v1767_v18, 0.0  ;;  %v1746_v13 = vmax.f32 %v3275_v40, %v1731_v29  ;;  %v1688_v63 = vadd.f32 %v1687_v26, %v1322_v19 }
 0x276   : > { %v1324_v41 = vpop.f32.mrf.mxu0  ;;  %v1689_v0 = vpop.f32.mrf.mxu1 }
 0x277   : > { %1797 = vst [vmem:[%s3138_s8 + $0x48] sm:$0xff] %v1782_v46  ;;  %v1768_v49 = vadd.f32 %v3127_v32, %v1746_v13  ;;  %v1732_v21 = vmax.f32 %v1613_v36, %v1688_v63 }
 0x278   : > { %v1327_v25 = vpop.f32.mrf.mxu0  ;;  %v1692_v57 = vpop.f32.mrf.mxu1 }
 0x279   : > { %v1783_v38 = vmax.f32 %v1768_v49, 0.0  ;;  %v1747_v23 = vmax.f32 %v3276_v24, %v1732_v21  ;;  %v1693_v10 = vadd.f32 %v1692_v57, %v1327_v25 }
 0x27a   : > { %v1329_v17 = vpop.f32.mrf.mxu0  ;;  %v1694_v27 = vpop.f32.mrf.mxu1 }
 0x27b   : > { %1798 = vst [vmem:[%s3138_s8 + $0x50] sm:$0xff] %v1783_v38  ;;  %v1769_v43 = vadd.f32 %v3127_v32, %v1747_v23  ;;  %v1733_v45 = vmax.f32 %v1618_v39, %v1693_v10 }
 0x27c   : > { %v1332_v11 = vpop.f32.mrf.mxu0  ;;  %v1697_v5 = vpop.f32.mrf.mxu1 }
 0x27d   : > { %v1784_v54 = vmax.f32 %v1769_v43, 0.0  ;;  %v1748_v31 = vmax.f32 %v3280_v55, %v1733_v45  ;;  %v1698_v22 = vadd.f32 %v1697_v5, %v1332_v11 }
 0x27e   : > { %v1334_v52 = vpop.f32.mrf.mxu0  ;;  %v1699_v47 = vpop.f32.mrf.mxu1 }
 0x27f   : > { %1799 = vst [vmem:[%s3138_s8 + $0x58] sm:$0xff] %v1784_v54  ;;  %v1770_v35 = vadd.f32 %v3127_v32, %v1748_v31  ;;  %v1734_v56 = vmax.f32 %v1623_v48, %v1698_v22 }
 0x280   : > { %v1337_v28 = vpop.f32.mrf.mxu0  ;;  %v1702_v16 = vpop.f32.mrf.mxu1 }
 0x281   : > { %v1785_v9 = vmax.f32 %v1770_v35, 0.0  ;;  %v1749_v4 = vmax.f32 %v3284_v12, %v1734_v56  ;;  %v1703_v50 = vadd.f32 %v1702_v16, %v1337_v28 }
 0x282   : > { %v1339_v44 = vpop.f32.mrf.mxu0  ;;  %v1704_v15 = vpop.f32.mrf.mxu1 }
 0x283   : > { %1800 = vst [vmem:[%s3138_s8 + $0x60] sm:$0xff] %v1785_v9  ;;  %v1771_v1 = vadd.f32 %v3127_v32, %v1749_v4  ;;  %v1735_v14 = vmax.f32 %v1628_v58, %v1703_v50 }
 0x285   : > { %v1786_v42 = vmax.f32 %v1771_v1, 0.0  ;;  %v1750_v61 = vmax.f32 %v3287_v2, %v1735_v14 }
 0x287   : > { %1801 = vst [vmem:[%s3138_s8 + $0x68] sm:$0xff] %v1786_v42  ;;  %v1772_v62 = vadd.f32 %v3127_v32, %v1750_v61 }
 0x289   : > { %v1787_v30 = vmax.f32 %v1772_v62, 0.0 }
 0x28b   : > { %1802 = vst [vmem:[%s3138_s8 + $0x70] sm:$0xff] %v1787_v30 }
 0x28c PF: > { %p10_p9 = scmp.ge.s32.totalorder %s1968_s16, 4   ;;  %s3288_s12 = smov %s1924_s13 }
 0x28d   : > { %s3289_s13 = smov %s1977_s19  ;;  %s3290_s14 = smov %s1968_s16 }
 0x28e   :  { %12 = sbr.rel (!%p10_p9) target bundleno = 2 (0x2), region = 90 }

// kernel: cnn_lstm_forward.6
= control target key start
LH: loop header
LB: loop body
LE: loop exit
PB: predicated region body
PF: predicated region fallthrough
CT: control target
= control target key end

     0   :  { %s692_s12 = smov 0   ;;  %s694_s13 = smov 0   ;;  %s921_s0 = inlined_call_operand.vmem [shape: f32[4,48,256], index: 0, kind: input, shape index: {}]   ;;  %s922_s1 = inlined_call_operand.vmem [shape: f32[256,128], index: 1, kind: input, shape index: {}]   ;;  %s923_s2 = inlined_call_operand.vmem [shape: f32[1,128], index: 2, kind: input, shape index: {}]   ;;  %s924_s3 = inlined_call_operand.vmem [shape: f32[48,128], index: 3, kind: output, shape index: {}]  }
   0x1   :  { %s696_s14 = smov 0  }
   0x2 LB: > { %s508_s15 = sadd.s32 4294967295, %s670_s14   ;;  %s709_s16 = sadd.s32 1, %s670_s14   ;;  %s670_s14 = sphi %s696_s14, %s927_s14   ;;  %s666_s13 = sphi %s694_s13, %s926_s13   ;;  %s662_s12 = sphi %s692_s12, %s925_s12  }
   0x3   : > { %s17_s17 = ssub.s32 %s670_s14, %s709_s16  ;;  %s20_s18 = sadd.s32 1, %s666_s13 }
   0x4   : > { %p18_p0 = scmp.eq.s32.totalorder %s17_s17, 0  ;;  %p27_p1 = scmp.ne.s32.totalorder %s666_s13, %s662_s12 }
   0x5   : > { %p28_p2 = scmp.eq.s32.totalorder %s670_s14, 0  ;;  %p511_p4 = scmp.ge.s32.totalorder %s670_s14, 2 }
   0x6   : > { %s718_s19 = scalar_select %p18_p0, %s666_s13, %s20_s18  }
   0x7   : > { %p29_p3 = por %p28_p2, %p27_p1  ;;  %127 = sbr.rel (%p511_p4) target bundleno = 29 (0x1d), region = 24 }
   0xc   : > { %130 = sbr.rel (!%p29_p3) target bundleno = 29 (0x1d), region = 28  ;;  %s132_s20 = sand.u32 (%p29_p3), 1, %s666_s13  }
   0xd   : > { %s521_s21 = smul.u32 (%p29_p3), 48, %s670_s14 }
   0xe   : > { %s622_s22 = smul.u32 (%p29_p3), 192, %s132_s20 }
   0xf   : > { %s726_s25 = scalar_lea.vmem (%p29_p3), %s921_s0, %s521_s21 }
  0x10   : > { %v151_v0 = vld [vmem:[%s726_s25] sm:$0xff] (%p29_p3)  ;;  %v153_v1 = vld [vmem:[%s726_s25 + $0x8] sm:$0xff] (%p29_p3)  ;;  %v155_v2 = vld [vmem:[%s726_s25 + $0x10] sm:$0xff] (%p29_p3)  ;;  %s731_s26 = scalar_lea.vmem (%p29_p3), [#allocation2], %s622_s22 }
  0x11   : > { %152 = vst [vmem:[%s731_s26] sm:$0xff] %v151_v0  ;;  %154 = vst [vmem:[%s731_s26 + $0x8] sm:$0xff] %v153_v1  ;;  %v157_v3 = vld [vmem:[%s726_s25 + $0x18] sm:$0xff]  ;;  %v159_v4 = vld [vmem:[%s726_s25 + $0x20] sm:$0xff] }
  0x12   : > { %156 = vst [vmem:[%s731_s26 + $0x10] sm:$0xff] %v155_v2  ;;  %v161_v5 = vld [vmem:[%s726_s25 + $0x28] sm:$0xff]  ;;  %158 = vst [vmem:[%s731_s26 + $0x18] sm:$0xff] %v157_v3  ;;  %v163_v6 = vld [vmem:[%s726_s25 + $0x60] sm:$0xff] }
  0x13   : > { %160 = vst [vmem:[%s731_s26 + $0x20] sm:$0xff] %v159_v4  ;;  %162 = vst [vmem:[%s731_s26 + $0x28] sm:$0xff] %v161_v5  ;;  %v165_v7 = vld [vmem:[%s726_s25 + $0x68] sm:$0xff]  ;;  %v167_v8 = vld [vmem:[%s726_s25 + $0x70] sm:$0xff] }
  0x14   : > { %164 = vst [vmem:[%s731_s26 + $0x30] sm:$0xff] %v163_v6  ;;  %166 = vst [vmem:[%s731_s26 + $0x38] sm:$0xff] %v165_v7  ;;  %v169_v9 = vld [vmem:[%s726_s25 + $0x78] sm:$0xff]  ;;  %v171_v10 = vld [vmem:[%s726_s25 + $0x80] sm:$0xff] }
  0x15   : > { %168 = vst [vmem:[%s731_s26 + $0x40] sm:$0xff] %v167_v8  ;;  %v173_v11 = vld [vmem:[%s726_s25 + $0x88] sm:$0xff]  ;;  %170 = vst [vmem:[%s731_s26 + $0x48] sm:$0xff] %v169_v9  ;;  %v175_v12 = vld [vmem:[%s726_s25 + $0xc0] sm:$0xff] }
  0x16   : > { %172 = vst [vmem:[%s731_s26 + $0x50] sm:$0xff] %v171_v10  ;;  %174 = vst [vmem:[%s731_s26 + $0x58] sm:$0xff] %v173_v11  ;;  %v177_v13 = vld [vmem:[%s726_s25 + $0xc8] sm:$0xff]  ;;  %v179_v14 = vld [vmem:[%s726_s25 + $0xd0] sm:$0xff] }
  0x17   : > { %176 = vst [vmem:[%s731_s26 + $0x60] sm:$0xff] %v175_v12  ;;  %178 = vst [vmem:[%s731_s26 + $0x68] sm:$0xff] %v177_v13  ;;  %v181_v15 = vld [vmem:[%s726_s25 + $0xd8] sm:$0xff]  ;;  %v183_v16 = vld [vmem:[%s726_s25 + $0xe0] sm:$0xff] }
  0x18   : > { %180 = vst [vmem:[%s731_s26 + $0x70] sm:$0xff] %v179_v14  ;;  %v185_v17 = vld [vmem:[%s726_s25 + $0xe8] sm:$0xff]  ;;  %182 = vst [vmem:[%s731_s26 + $0x78] sm:$0xff] %v181_v15  ;;  %v187_v18 = vld [vmem:[%s726_s25 + $0x120] sm:$0xff] }
  0x19   : > { %184 = vst [vmem:[%s731_s26 + $0x80] sm:$0xff] %v183_v16  ;;  %186 = vst [vmem:[%s731_s26 + $0x88] sm:$0xff] %v185_v17  ;;  %v189_v19 = vld [vmem:[%s726_s25 + $0x128] sm:$0xff]  ;;  %v191_v20 = vld [vmem:[%s726_s25 + $0x130] sm:$0xff] }
  0x1a   : > { %188 = vst [vmem:[%s731_s26 + $0x90] sm:$0xff] %v187_v18  ;;  %190 = vst [vmem:[%s731_s26 + $0x98] sm:$0xff] %v189_v19  ;;  %v193_v21 = vld [vmem:[%s726_s25 + $0x138] sm:$0xff]  ;;  %v195_v22 = vld [vmem:[%s726_s25 + $0x140] sm:$0xff] }
  0x1b   : > { %192 = vst [vmem:[%s731_s26 + $0xa0] sm:$0xff] %v191_v20  ;;  %v197_v23 = vld [vmem:[%s726_s25 + $0x148] sm:$0xff]  ;;  %194 = vst [vmem:[%s731_s26 + $0xa8] sm:$0xff] %v193_v21 }
  0x1c   : > { %196 = vst [vmem:[%s731_s26 + $0xb0] sm:$0xff] %v195_v22  ;;  %198 = vst [vmem:[%s731_s26 + $0xb8] sm:$0xff] %v197_v23 }
  0x1d PF: > { %p514_p5 = scmp.ge.s32.totalorder %s670_s14, 1  ;;  %p203_p6 = scmp.lt.s32.totalorder %s670_s14, 3 }
  0x1f   : > { %p204_p7 = pnand %p514_p5, %p203_p6 }
  0x20   : > { %s210_s4 = sand.u32 (!%p204_p7), 1, %s662_s12   ;;  %s234_s30 = smul.u32 (!%p204_p7), 3, %s508_s15 }
  0x21   : > { %207 = sbr.rel (%p204_p7) target bundleno = 298 (0x12a), region = 51 }
  0x22   : > { %s623_s11 = smul.u32 (!%p204_p7), 192, %s210_s4  ;;  %p235_p8 = scmp.lt.s32.totalorder (!%p204_p7), %s234_s30, 5 }
  0x24   : > { %s877_s29 = scalar_lea.vmem (!%p204_p7), [#allocation2], %s623_s11 }
  0x26   : > { %v295_v24 = vld [vmem:[%s922_s1 + $0xf8] sm:$0xff]  ;;  %v294_v26 = vld [vmem:[%s922_s1 + $0xf0] sm:$0xff]  ;;  %v293_v28 = vld [vmem:[%s922_s1 + $0xe8] sm:$0xff]  ;;  %s929_s30 = smov (!%p235_p8, %s234_s30), 5 }
  0x27   : > { %v279_v25 = vld [vmem:[%s922_s1 + $0x78] sm:$0xff]  ;;  %522 = vmatprep.subr.mxu0 %v295_v24  ;;  %590 = vmatprep.subr.mxu1 %v295_v24  ;;  %v278_v27 = vld [vmem:[%s922_s1 + $0x70] sm:$0xff]  ;;  %v277_v29 = vld [vmem:[%s922_s1 + $0x68] sm:$0xff]  ;;  %s515_s4 = sshll.u32 %s929_s30, 3 }
  0x28   : > { %523 = vmatpush3.msra.mxu0 %v279_v25  ;;  %606 = vmatpush3.msra.mxu1 %v279_v25  ;;  %v292_v30 = vld [vmem:[%s922_s1 + $0xe0] sm:$0xff]  ;;  %v291_v32 = vld [vmem:[%s922_s1 + $0xd8] sm:$0xff]  ;;  %v290_v34 = vld [vmem:[%s922_s1 + $0xd0] sm:$0xff]  ;;  %s238_s7 = scalar_lea.vmem %s924_s3, %s515_s4 }
  0x29   : > { %524 = vmatprep.subr.mxu0 %v294_v26  ;;  %591 = vmatprep.subr.mxu1 %v294_v26  ;;  %v276_v31 = vld [vmem:[%s922_s1 + $0x60] sm:$0xff]  ;;  %v275_v33 = vld [vmem:[%s922_s1 + $0x58] sm:$0xff]  ;;  %v274_v35 = vld [vmem:[%s922_s1 + $0x50] sm:$0xff] }
  0x2a   : > { %525 = vmatpush3.msra.mxu0 %v278_v27  ;;  %607 = vmatpush3.msra.mxu1 %v278_v27  ;;  %v289_v36 = vld [vmem:[%s922_s1 + $0xc8] sm:$0xff]  ;;  %v288_v38 = vld [vmem:[%s922_s1 + $0xc0] sm:$0xff]  ;;  %v287_v40 = vld [vmem:[%s922_s1 + $0xb8] sm:$0xff] }
  0x2b   : > { %526 = vmatprep.subr.mxu0 %v293_v28  ;;  %592 = vmatprep.subr.mxu1 %v293_v28  ;;  %v273_v37 = vld [vmem:[%s922_s1 + $0x48] sm:$0xff]  ;;  %v272_v39 = vld [vmem:[%s922_s1 + $0x40] sm:$0xff]  ;;  %v271_v41 = vld [vmem:[%s922_s1 + $0x38] sm:$0xff] }
  0x2c   : > { %527 = vmatpush3.msra.mxu0 %v277_v29  ;;  %608 = vmatpush3.msra.mxu1 %v277_v29  ;;  %v286_v42 = vld [vmem:[%s922_s1 + $0xb0] sm:$0xff]  ;;  %v285_v44 = vld [vmem:[%s922_s1 + $0xa8] sm:$0xff]  ;;  %v284_v46 = vld [vmem:[%s922_s1 + $0xa0] sm:$0xff] }
  0x2d   : > { %528 = vmatprep.subr.mxu0 %v292_v30  ;;  %593 = vmatprep.subr.mxu1 %v292_v30  ;;  %v270_v43 = vld [vmem:[%s922_s1 + $0x30] sm:$0xff]  ;;  %v269_v45 = vld [vmem:[%s922_s1 + $0x28] sm:$0xff]  ;;  %v268_v47 = vld [vmem:[%s922_s1 + $0x20] sm:$0xff] }
  0x2e   : > { %529 = vmatpush3.msra.mxu0 %v276_v31  ;;  %609 = vmatpush3.msra.mxu1 %v276_v31  ;;  %v283_v48 = vld [vmem:[%s922_s1 + $0x98] sm:$0xff]  ;;  %v282_v50 = vld [vmem:[%s922_s1 + $0x90] sm:$0xff]  ;;  %v281_v52 = vld [vmem:[%s922_s1 + $0x88] sm:$0xff] }
  0x2f   : > { %530 = vmatprep.subr.mxu0 %v291_v32  ;;  %594 = vmatprep.subr.mxu1 %v291_v32  ;;  %v267_v49 = vld [vmem:[%s922_s1 + $0x18] sm:$0xff]  ;;  %v266_v51 = vld [vmem:[%s922_s1 + $0x10] sm:$0xff]  ;;  %v265_v53 = vld [vmem:[%s922_s1 + $0x8] sm:$0xff] }
  0x30   : > { %531 = vmatpush3.msra.mxu0 %v275_v33  ;;  %610 = vmatpush3.msra.mxu1 %v275_v33  ;;  %v280_v54 = vld [vmem:[%s922_s1 + $0x80] sm:$0xff]  ;;  %v241_v56 = vld [vmem:[%s877_s29 + $0x8] sm:$0xff]  ;;  %v243_v60 = vld [vmem:[%s877_s29 + $0x18] sm:$0xff] }
  0x31   : > { %532 = vmatprep.subr.mxu0 %v290_v34  ;;  %595 = vmatprep.subr.mxu1 %v290_v34  ;;  %v264_v55 = vld [vmem:[%s922_s1] sm:$0xff]  ;;  %v253_v57 = vld [vmem:[%s877_s29 + $0x68] sm:$0xff]  ;;  %v255_v61 = vld [vmem:[%s877_s29 + $0x78] sm:$0xff] }
  0x32   : > { %533 = vmatpush3.msra.mxu0 %v274_v35  ;;  %611 = vmatpush3.msra.mxu1 %v274_v35  ;;  %v240_v58 = vld [vmem:[%s877_s29] sm:$0xff]  ;;  %v242_v62 = vld [vmem:[%s877_s29 + $0x10] sm:$0xff]  ;;  %v245_v0 = vld [vmem:[%s877_s29 + $0x28] sm:$0xff] }
  0x33   : > { %534 = vmatprep.subr.mxu0 %v289_v36  ;;  %596 = vmatprep.subr.mxu1 %v289_v36  ;;  %v252_v59 = vld [vmem:[%s877_s29 + $0x60] sm:$0xff]  ;;  %v254_v63 = vld [vmem:[%s877_s29 + $0x70] sm:$0xff]  ;;  %v257_v1 = vld [vmem:[%s877_s29 + $0x88] sm:$0xff] }
  0x34   : > { %535 = vmatpush3.msra.mxu0 %v273_v37  ;;  %612 = vmatpush3.msra.mxu1 %v273_v37  ;;  %v244_v2 = vld [vmem:[%s877_s29 + $0x20] sm:$0xff]  ;;  %v247_v4 = vld [vmem:[%s877_s29 + $0x38] sm:$0xff]  ;;  %v246_v6 = vld [vmem:[%s877_s29 + $0x30] sm:$0xff] }
  0x35   : > { %536 = vmatprep.subr.mxu0 %v288_v38  ;;  %597 = vmatprep.subr.mxu1 %v288_v38  ;;  %v256_v3 = vld [vmem:[%s877_s29 + $0x80] sm:$0xff]  ;;  %v259_v5 = vld [vmem:[%s877_s29 + $0x98] sm:$0xff]  ;;  %v258_v7 = vld [vmem:[%s877_s29 + $0x90] sm:$0xff] }
  0x36   : > { %537 = vmatpush3.msra.mxu0 %v272_v39  ;;  %613 = vmatpush3.msra.mxu1 %v272_v39  ;;  %v249_v8 = vld [vmem:[%s877_s29 + $0x48] sm:$0xff]  ;;  %v248_v10 = vld [vmem:[%s877_s29 + $0x40] sm:$0xff]  ;;  %v251_v12 = vld [vmem:[%s877_s29 + $0x58] sm:$0xff] }
  0x37   : > { %538 = vmatprep.subr.mxu0 %v287_v40  ;;  %598 = vmatprep.subr.mxu1 %v287_v40  ;;  %v261_v9 = vld [vmem:[%s877_s29 + $0xa8] sm:$0xff]  ;;  %v260_v11 = vld [vmem:[%s877_s29 + $0xa0] sm:$0xff]  ;;  %v263_v13 = vld [vmem:[%s877_s29 + $0xb8] sm:$0xff] }
  0x38   : > { %539 = vmatpush3.msra.mxu0 %v271_v41  ;;  %614 = vmatpush3.msra.mxu1 %v271_v41  ;;  %v250_v14 = vld [vmem:[%s877_s29 + $0x50] sm:$0xff]  ;;  %v516_v41 = vld [vmem:[%s923_s2] ss:$0 sm:$0xff] }
  0x39   : > { %540 = vmatprep.subr.mxu0 %v286_v42  ;;  %599 = vmatprep.subr.mxu1 %v286_v42  ;;  %v262_v15 = vld [vmem:[%s877_s29 + $0xb0] sm:$0xff] }
  0x3a   : > { %541 = vmatpush3.msra.mxu0 %v270_v43  ;;  %615 = vmatpush3.msra.mxu1 %v270_v43 }
  0x3b   : > { %542 = vmatprep.subr.mxu0 %v285_v44  ;;  %600 = vmatprep.subr.mxu1 %v285_v44 }
  0x3c   : > { %543 = vmatpush3.msra.mxu0 %v269_v45  ;;  %616 = vmatpush3.msra.mxu1 %v269_v45 }
  0x3d   : > { %544 = vmatprep.subr.mxu0 %v284_v46  ;;  %601 = vmatprep.subr.mxu1 %v284_v46 }
  0x3e   : > { %545 = vmatpush3.msra.mxu0 %v268_v47  ;;  %617 = vmatpush3.msra.mxu1 %v268_v47 }
  0x3f   : > { %546 = vmatprep.subr.mxu0 %v283_v48  ;;  %602 = vmatprep.subr.mxu1 %v283_v48 }
  0x40   : > { %547 = vmatpush3.msra.mxu0 %v267_v49  ;;  %618 = vmatpush3.msra.mxu1 %v267_v49 }
  0x41   : > { %548 = vmatprep.subr.mxu0 %v282_v50  ;;  %603 = vmatprep.subr.mxu1 %v282_v50 }
  0x42   : > { %549 = vmatpush3.msra.mxu0 %v266_v51  ;;  %619 = vmatpush3.msra.mxu1 %v266_v51 }
  0x43   : > { %550 = vmatprep.subr.mxu0 %v281_v52  ;;  %604 = vmatprep.subr.mxu1 %v281_v52 }
  0x44   : > { %551 = vmatpush3.msra.mxu0 %v265_v53  ;;  %620 = vmatpush3.msra.mxu1 %v265_v53 }
  0x45   : > { %552 = vmatprep.subr.mxu0 %v280_v54  ;;  %605 = vmatprep.subr.mxu1 %v280_v54 }
  0x46   : > { %553 = vmatpush3.msra.mxu0 %v264_v55  ;;  %621 = vmatpush3.msra.mxu1 %v264_v55 }
  0x47   : > { %360 = vmatprep.mubr.f32.mxu0 %v241_v56  ;;  %390 = vmatprep.mubr.f32.mxu1 %v253_v57 }
  0x48   : > { %361 = vmatmul.mubr.f32.vlgmr.msra.gmra.mxu0 %v240_v58  ;;  %391 = vmatmul.mubr.f32.vlgmr.msra.gmra.mxu1 %v252_v59 }
  0x49   : > { %365 = vmatprep.mubr.f32.mxu0 %v243_v60  ;;  %395 = vmatprep.mubr.f32.mxu1 %v255_v61 }
  0x4c   : > { %366 = vmatmul.mubr.f32.gmra.mxu0 %v242_v62  ;;  %396 = vmatmul.mubr.f32.gmra.mxu1 %v254_v63 }
  0x4d   : > { %370 = vmatprep.mubr.f32.mxu0 %v245_v0  ;;  %400 = vmatprep.mubr.f32.mxu1 %v257_v1 }
  0x50   : > { %371 = vmatmul.mubr.f32.gmra.mxu0 %v244_v2  ;;  %401 = vmatmul.mubr.f32.gmra.mxu1 %v256_v3 }
  0x51   : > { %375 = vmatprep.mubr.f32.mxu0 %v247_v4  ;;  %405 = vmatprep.mubr.f32.mxu1 %v259_v5 }
  0x54   : > { %376 = vmatmul.mubr.f32.gmra.mxu0 %v246_v6  ;;  %406 = vmatmul.mubr.f32.gmra.mxu1 %v258_v7 }
  0x55   : > { %380 = vmatprep.mubr.f32.mxu0 %v249_v8  ;;  %410 = vmatprep.mubr.f32.mxu1 %v261_v9 }
  0x58   : > { %381 = vmatmul.mubr.f32.gmra.mxu0 %v248_v10  ;;  %411 = vmatmul.mubr.f32.gmra.mxu1 %v260_v11 }
  0x59   : > { %385 = vmatprep.mubr.f32.mxu0 %v251_v12  ;;  %415 = vmatprep.mubr.f32.mxu1 %v263_v13 }
  0x5c   : > { %386 = vmatmul.mubr.f32.gmra.mxu0 %v250_v14  ;;  %416 = vmatmul.mubr.f32.gmra.mxu1 %v262_v15 }
 0x108   : > { %v554_v16 = vpop.f32.mrf.mxu0  ;;  %v572_v17 = vpop.f32.mrf.mxu1 }
 0x10a   : > { %v555_v18 = vpop.f32.mrf.mxu0  ;;  %v573_v19 = vpop.f32.mrf.mxu1 }
 0x10b   : > { %v556_v32 = vadd.f32 %v555_v18, %v554_v16  ;;  %v574_v33 = vadd.f32 %v573_v19, %v572_v17 }
 0x10c   : > { %v557_v20 = vpop.f32.mrf.mxu0  ;;  %v575_v21 = vpop.f32.mrf.mxu1 }
 0x10e   : > { %v558_v22 = vpop.f32.mrf.mxu0  ;;  %v576_v23 = vpop.f32.mrf.mxu1 }
 0x10f   : > { %v559_v40 = vadd.f32 %v558_v22, %v557_v20  ;;  %v577_v44 = vadd.f32 %v576_v23, %v575_v21 }
 0x110   : > { %v560_v24 = vpop.f32.mrf.mxu0  ;;  %v578_v25 = vpop.f32.mrf.mxu1 }
 0x112   : > { %v561_v26 = vpop.f32.mrf.mxu0  ;;  %v579_v27 = vpop.f32.mrf.mxu1 }
 0x113   : > { %v562_v53 = vadd.f32 %v561_v26, %v560_v24  ;;  %v580_v54 = vadd.f32 %v579_v27, %v578_v25 }
 0x114   : > { %v563_v28 = vpop.f32.mrf.mxu0  ;;  %v581_v29 = vpop.f32.mrf.mxu1 }
 0x116   : > { %v564_v30 = vpop.f32.mrf.mxu0  ;;  %v582_v31 = vpop.f32.mrf.mxu1 }
 0x117   : > { %v565_v34 = vadd.f32 %v564_v30, %v563_v28  ;;  %v583_v35 = vadd.f32 %v582_v31, %v581_v29 }
 0x118   : > { %v566_v36 = vpop.f32.mrf.mxu0  ;;  %v584_v37 = vpop.f32.mrf.mxu1 }
 0x119   : > { %v421_v38 = vmax.f32 %v556_v32, %v565_v34  ;;  %v424_v39 = vmax.f32 %v574_v33, %v583_v35 }
 0x11a   : > { %v567_v42 = vpop.f32.mrf.mxu0  ;;  %v585_v43 = vpop.f32.mrf.mxu1 }
 0x11b   : > { %v427_v45 = vmax.f32 %v421_v38, %v424_v39  ;;  %v568_v46 = vadd.f32 %v567_v42, %v566_v36  ;;  %v586_v47 = vadd.f32 %v585_v43, %v584_v37 }
 0x11c   : > { %v569_v48 = vpop.f32.mrf.mxu0  ;;  %v587_v49 = vpop.f32.mrf.mxu1 }
 0x11d   : > { %v437_v50 = vadd.f32 %v516_v41, %v427_v45  ;;  %v422_v51 = vmax.f32 %v559_v40, %v568_v46  ;;  %v425_v52 = vmax.f32 %v577_v44, %v586_v47 }
 0x11e   : > { %v570_v55 = vpop.f32.mrf.mxu0  ;;  %v588_v56 = vpop.f32.mrf.mxu1 }
 0x11f   : > { %v440_v57 = vmax.f32 %v437_v50, 0.0  ;;  %v428_v58 = vmax.f32 %v422_v51, %v425_v52  ;;  %v571_v59 = vadd.f32 %v570_v55, %v569_v48  ;;  %v589_v60 = vadd.f32 %v588_v56, %v587_v49 }
 0x121   : > { %443 = vst [vmem:[%s238_s7] sm:$0xff] %v440_v57  ;;  %v438_v61 = vadd.f32 %v516_v41, %v428_v58  ;;  %v423_v62 = vmax.f32 %v562_v53, %v571_v59  ;;  %v426_v63 = vmax.f32 %v580_v54, %v589_v60 }
 0x123   : > { %v441_v0 = vmax.f32 %v438_v61, 0.0  ;;  %v429_v1 = vmax.f32 %v423_v62, %v426_v63 }
 0x125   : > { %444 = vst [vmem:[%s238_s7 + $0x8] sm:$0xff] %v441_v0  ;;  %v439_v2 = vadd.f32 %v516_v41, %v429_v1 }
 0x127   : > { %v442_v3 = vmax.f32 %v439_v2, 0.0 }
 0x129   : > { %445 = vst [vmem:[%s238_s7 + $0x10] sm:$0xff] %v442_v3 }
 0x12a PF: > { %p10_p9 = scmp.ge.s32.totalorder %s709_s16, 4   ;;  %s925_s12 = smov %s666_s13 }
 0x12b   : > { %s926_s13 = smov %s718_s19  ;;  %s927_s14 = smov %s709_s16 }
 0x12c   :  { %12 = sbr.rel (!%p10_p9) target bundleno = 2 (0x2), region = 90 }

// kernel: cnn_lstm_forward.7
= control target key start
LH: loop header
LB: loop body
LE: loop exit
PB: predicated region body
PF: predicated region fallthrough
CT: control target
= control target key end

     0   :  { %vm671_vm0 = vcmask 392192   ;;  %vm2640_vm1 = vmmov 0   ;;  %s5755_s1 = inlined_call_operand.vmem [shape: f32[1200,512], index: 1, kind: input, shape index: {}]   ;;  %s5756_s0 = inlined_call_operand.vmem [shape: f32[8,1200], index: 0, kind: input, shape index: {}]   ;;  %s5757_s3 = inlined_call_operand.vmem [shape: f32[512,512], index: 3, kind: input, shape index: {}]   ;;  %s5758_s2 = inlined_call_operand.vmem [shape: f32[1,512], index: 2, kind: input, shape index: {}]   ;;  %s5759_s10 = inlined_call_operand.vmem [shape: f32[8,512], index: 10, kind: output, shape index: {0}]   ;;  %s5760_s4 = inlined_call_operand.vmem [shape: f32[128,512], index: 4, kind: input, shape index: {}]   ;;  %s5761_s6 = inlined_call_operand.vmem [shape: f32[1,128], index: 6, kind: input, shape index: {}]   ;;  %s5762_s11 = inlined_call_operand.vmem [shape: f32[8,128], index: 11, kind: output, shape index: {1}]   ;;  %s5763_s5 = inlined_call_operand.vmem [shape: f32[1,512], index: 5, kind: input, shape index: {}]   ;;  %s5764_s7 = inlined_call_operand.vmem [shape: f32[1,128], index: 7, kind: input, shape index: {}]   ;;  %s5765_s8 = inlined_call_operand.vmem [shape: f32[128,128], index: 8, kind: input, shape index: {}]   ;;  %s5766_s13 = inlined_call_operand.vmem [shape: f32[1,128], index: 13, kind: output, shape index: {3}]   ;;  %s5767_s9 = inlined_call_operand.vmem [shape: f32[1,128], index: 9, kind: input, shape index: {}]   ;;  %s5768_s12 = inlined_call_operand.vmem [shape: f32[1,128], index: 12, kind: output, shape index: {2}]  }
   0x1   :  { %v110_v0 = vld [vmem:[%s5755_s1 + $0x1e8] sm:$0xff]  ;;  %v109_v2 = vld [vmem:[%s5755_s1 + $0x1e0] sm:$0xff] }
   0x2   :  { %v238_v1 = vld [vmem:[%s5755_s1 + $0x5e8] sm:$0xff]  ;;  %675 = vmatprep.subr.mxu0 %v110_v0  ;;  %v237_v3 = vld [vmem:[%s5755_s1 + $0x5e0] sm:$0xff] }
   0x3   :  { %746 = vmatprep.subr.mxu1 %v238_v1  ;;  %v106_v4 = vld [vmem:[%s5755_s1 + $0x1c8] sm:$0xff]  ;;  %676 = vmatpush1.msra.mxu0 %v109_v2  ;;  %v105_v6 = vld [vmem:[%s5755_s1 + $0x1c0] sm:$0xff] }
   0x4   :  { %v234_v5 = vld [vmem:[%s5755_s1 + $0x5c8] sm:$0xff]  ;;  %747 = vmatpush1.msra.mxu1 %v237_v3  ;;  %v233_v7 = vld [vmem:[%s5755_s1 + $0x5c0] sm:$0xff]  ;;  %677 = vmatprep.subr.mxu0 %v106_v4 }
   0x5   :  { %v102_v8 = vld [vmem:[%s5755_s1 + $0x1a8] sm:$0xff]  ;;  %748 = vmatprep.subr.mxu1 %v234_v5  ;;  %v101_v10 = vld [vmem:[%s5755_s1 + $0x1a0] sm:$0xff]  ;;  %678 = vmatpush1.msra.mxu0 %v105_v6 }
   0x6   :  { %v230_v9 = vld [vmem:[%s5755_s1 + $0x5a8] sm:$0xff]  ;;  %v229_v11 = vld [vmem:[%s5755_s1 + $0x5a0] sm:$0xff]  ;;  %749 = vmatpush1.msra.mxu1 %v233_v7  ;;  %679 = vmatprep.subr.mxu0 %v102_v8 }
   0x7   :  { %v98_v12 = vld [vmem:[%s5755_s1 + $0x188] sm:$0xff]  ;;  %750 = vmatprep.subr.mxu1 %v230_v9  ;;  %v97_v14 = vld [vmem:[%s5755_s1 + $0x180] sm:$0xff]  ;;  %680 = vmatpush1.msra.mxu0 %v101_v10 }
   0x8   :  { %v226_v13 = vld [vmem:[%s5755_s1 + $0x588] sm:$0xff]  ;;  %v225_v15 = vld [vmem:[%s5755_s1 + $0x580] sm:$0xff]  ;;  %751 = vmatpush1.msra.mxu1 %v229_v11  ;;  %681 = vmatprep.subr.mxu0 %v98_v12 }
   0x9   :  { %v94_v16 = vld [vmem:[%s5755_s1 + $0x168] sm:$0xff]  ;;  %752 = vmatprep.subr.mxu1 %v226_v13  ;;  %v93_v18 = vld [vmem:[%s5755_s1 + $0x160] sm:$0xff]  ;;  %682 = vmatpush1.msra.mxu0 %v97_v14 }
   0xa   :  { %v222_v17 = vld [vmem:[%s5755_s1 + $0x568] sm:$0xff]  ;;  %v221_v19 = vld [vmem:[%s5755_s1 + $0x560] sm:$0xff]  ;;  %753 = vmatpush1.msra.mxu1 %v225_v15  ;;  %683 = vmatprep.subr.mxu0 %v94_v16 }
   0xb   :  { %v90_v20 = vld [vmem:[%s5755_s1 + $0x148] sm:$0xff]  ;;  %754 = vmatprep.subr.mxu1 %v222_v17  ;;  %v89_v22 = vld [vmem:[%s5755_s1 + $0x140] sm:$0xff]  ;;  %684 = vmatpush1.msra.mxu0 %v93_v18 }
   0xc   :  { %v218_v21 = vld [vmem:[%s5755_s1 + $0x548] sm:$0xff]  ;;  %v217_v23 = vld [vmem:[%s5755_s1 + $0x540] sm:$0xff]  ;;  %755 = vmatpush1.msra.mxu1 %v221_v19  ;;  %685 = vmatprep.subr.mxu0 %v90_v20 }
   0xd   :  { %v86_v24 = vld [vmem:[%s5755_s1 + $0x128] sm:$0xff]  ;;  %756 = vmatprep.subr.mxu1 %v218_v21  ;;  %v85_v26 = vld [vmem:[%s5755_s1 + $0x120] sm:$0xff]  ;;  %686 = vmatpush1.msra.mxu0 %v89_v22 }
   0xe   :  { %v214_v25 = vld [vmem:[%s5755_s1 + $0x528] sm:$0xff]  ;;  %v213_v27 = vld [vmem:[%s5755_s1 + $0x520] sm:$0xff]  ;;  %757 = vmatpush1.msra.mxu1 %v217_v23  ;;  %687 = vmatprep.subr.mxu0 %v86_v24 }
   0xf   :  { %v82_v28 = vld [vmem:[%s5755_s1 + $0x108] sm:$0xff]  ;;  %758 = vmatprep.subr.mxu1 %v214_v25  ;;  %v81_v30 = vld [vmem:[%s5755_s1 + $0x100] sm:$0xff]  ;;  %688 = vmatpush1.msra.mxu0 %v85_v26 }
  0x10   :  { %v210_v29 = vld [vmem:[%s5755_s1 + $0x508] sm:$0xff]  ;;  %v209_v31 = vld [vmem:[%s5755_s1 + $0x500] sm:$0xff]  ;;  %759 = vmatpush1.msra.mxu1 %v213_v27  ;;  %689 = vmatprep.subr.mxu0 %v82_v28 }
  0x11   :  { %v78_v32 = vld [vmem:[%s5755_s1 + $0xe8] sm:$0xff]  ;;  %760 = vmatprep.subr.mxu1 %v210_v29  ;;  %v77_v34 = vld [vmem:[%s5755_s1 + $0xe0] sm:$0xff]  ;;  %690 = vmatpush1.msra.mxu0 %v81_v30 }
  0x12   :  { %v206_v33 = vld [vmem:[%s5755_s1 + $0x4e8] sm:$0xff]  ;;  %v205_v35 = vld [vmem:[%s5755_s1 + $0x4e0] sm:$0xff]  ;;  %761 = vmatpush1.msra.mxu1 %v209_v31  ;;  %691 = vmatprep.subr.mxu0 %v78_v32 }
  0x13   :  { %v74_v36 = vld [vmem:[%s5755_s1 + $0xc8] sm:$0xff]  ;;  %762 = vmatprep.subr.mxu1 %v206_v33  ;;  %v73_v38 = vld [vmem:[%s5755_s1 + $0xc0] sm:$0xff]  ;;  %692 = vmatpush1.msra.mxu0 %v77_v34 }
  0x14   :  { %v202_v37 = vld [vmem:[%s5755_s1 + $0x4c8] sm:$0xff]  ;;  %v201_v39 = vld [vmem:[%s5755_s1 + $0x4c0] sm:$0xff]  ;;  %763 = vmatpush1.msra.mxu1 %v205_v35  ;;  %693 = vmatprep.subr.mxu0 %v74_v36 }
  0x15   :  { %v70_v40 = vld [vmem:[%s5755_s1 + $0xa8] sm:$0xff]  ;;  %764 = vmatprep.subr.mxu1 %v202_v37  ;;  %v69_v42 = vld [vmem:[%s5755_s1 + $0xa0] sm:$0xff]  ;;  %694 = vmatpush1.msra.mxu0 %v73_v38 }
  0x16   :  { %v198_v41 = vld [vmem:[%s5755_s1 + $0x4a8] sm:$0xff]  ;;  %v197_v43 = vld [vmem:[%s5755_s1 + $0x4a0] sm:$0xff]  ;;  %765 = vmatpush1.msra.mxu1 %v201_v39  ;;  %695 = vmatprep.subr.mxu0 %v70_v40 }
  0x17   :  { %v66_v44 = vld [vmem:[%s5755_s1 + $0x88] sm:$0xff]  ;;  %766 = vmatprep.subr.mxu1 %v198_v41  ;;  %v65_v46 = vld [vmem:[%s5755_s1 + $0x80] sm:$0xff]  ;;  %696 = vmatpush1.msra.mxu0 %v69_v42 }
  0x18   :  { %v194_v45 = vld [vmem:[%s5755_s1 + $0x488] sm:$0xff]  ;;  %v193_v47 = vld [vmem:[%s5755_s1 + $0x480] sm:$0xff]  ;;  %767 = vmatpush1.msra.mxu1 %v197_v43  ;;  %697 = vmatprep.subr.mxu0 %v66_v44 }
  0x19   :  { %v62_v48 = vld [vmem:[%s5755_s1 + $0x68] sm:$0xff]  ;;  %768 = vmatprep.subr.mxu1 %v194_v45  ;;  %v61_v50 = vld [vmem:[%s5755_s1 + $0x60] sm:$0xff]  ;;  %698 = vmatpush1.msra.mxu0 %v65_v46 }
  0x1a   :  { %v190_v49 = vld [vmem:[%s5755_s1 + $0x468] sm:$0xff]  ;;  %v189_v51 = vld [vmem:[%s5755_s1 + $0x460] sm:$0xff]  ;;  %769 = vmatpush1.msra.mxu1 %v193_v47  ;;  %699 = vmatprep.subr.mxu0 %v62_v48 }
  0x1b   :  { %v58_v52 = vld [vmem:[%s5755_s1 + $0x48] sm:$0xff]  ;;  %770 = vmatprep.subr.mxu1 %v190_v49  ;;  %v57_v54 = vld [vmem:[%s5755_s1 + $0x40] sm:$0xff]  ;;  %700 = vmatpush1.msra.mxu0 %v61_v50 }
  0x1c   :  { %v186_v53 = vld [vmem:[%s5755_s1 + $0x448] sm:$0xff]  ;;  %v185_v55 = vld [vmem:[%s5755_s1 + $0x440] sm:$0xff]  ;;  %771 = vmatpush1.msra.mxu1 %v189_v51  ;;  %701 = vmatprep.subr.mxu0 %v58_v52 }
  0x1d   :  { %v54_v56 = vld [vmem:[%s5755_s1 + $0x28] sm:$0xff]  ;;  %772 = vmatprep.subr.mxu1 %v186_v53  ;;  %v53_v58 = vld [vmem:[%s5755_s1 + $0x20] sm:$0xff]  ;;  %702 = vmatpush1.msra.mxu0 %v57_v54 }
  0x1e   :  { %v182_v57 = vld [vmem:[%s5755_s1 + $0x428] sm:$0xff]  ;;  %v181_v59 = vld [vmem:[%s5755_s1 + $0x420] sm:$0xff]  ;;  %773 = vmatpush1.msra.mxu1 %v185_v55  ;;  %703 = vmatprep.subr.mxu0 %v54_v56 }
  0x1f   :  { %v50_v60 = vld [vmem:[%s5755_s1 + $0x8] sm:$0xff]  ;;  %774 = vmatprep.subr.mxu1 %v182_v57  ;;  %v49_v62 = vld [vmem:[%s5755_s1] sm:$0xff]  ;;  %704 = vmatpush1.msra.mxu0 %v53_v58 }
  0x20   :  { %v178_v61 = vld [vmem:[%s5755_s1 + $0x408] sm:$0xff]  ;;  %v177_v63 = vld [vmem:[%s5755_s1 + $0x400] sm:$0xff]  ;;  %775 = vmatpush1.msra.mxu1 %v181_v59  ;;  %705 = vmatprep.subr.mxu0 %v50_v60 }
  0x21   :  { %v174_v0 = vld [vmem:[%s5755_s1 + $0x3e8] sm:$0xff]  ;;  %776 = vmatprep.subr.mxu1 %v178_v61  ;;  %v173_v2 = vld [vmem:[%s5755_s1 + $0x3e0] sm:$0xff]  ;;  %706 = vmatpush1.msra.mxu0 %v49_v62 }
  0x22   :  { %v302_v1 = vld [vmem:[%s5755_s1 + $0x7e8] sm:$0xff]  ;;  %v301_v3 = vld [vmem:[%s5755_s1 + $0x7e0] sm:$0xff]  ;;  %777 = vmatpush1.msra.mxu1 %v177_v63  ;;  %707 = vmatprep.subr.mxu0 %v174_v0 }
  0x23   :  { %v170_v4 = vld [vmem:[%s5755_s1 + $0x3c8] sm:$0xff]  ;;  %778 = vmatprep.subr.mxu1 %v302_v1  ;;  %v169_v6 = vld [vmem:[%s5755_s1 + $0x3c0] sm:$0xff]  ;;  %708 = vmatpush2.msra.mxu0 %v173_v2  ;;  %v42_v2 = vld [vmem:[%s5756_s0 + $0x18] sm:$0xff] }
  0x24   :  { %v298_v5 = vld [vmem:[%s5755_s1 + $0x7c8] sm:$0xff]  ;;  %v297_v7 = vld [vmem:[%s5755_s1 + $0x7c0] sm:$0xff]  ;;  %779 = vmatpush2.msra.mxu1 %v301_v3  ;;  %709 = vmatprep.subr.mxu0 %v170_v4 }
  0x25   :  { %v166_v8 = vld [vmem:[%s5755_s1 + $0x3a8] sm:$0xff]  ;;  %780 = vmatprep.subr.mxu1 %v298_v5  ;;  %v165_v10 = vld [vmem:[%s5755_s1 + $0x3a0] sm:$0xff]  ;;  %710 = vmatpush2.msra.mxu0 %v169_v6  ;;  %v41_v5 = vld [vmem:[%s5756_s0 + $0x10] sm:$0xff] }
  0x26   :  { %v294_v9 = vld [vmem:[%s5755_s1 + $0x7a8] sm:$0xff]  ;;  %v293_v11 = vld [vmem:[%s5755_s1 + $0x7a0] sm:$0xff]  ;;  %781 = vmatpush2.msra.mxu1 %v297_v7  ;;  %711 = vmatprep.subr.mxu0 %v166_v8 }
  0x27   :  { %v162_v12 = vld [vmem:[%s5755_s1 + $0x388] sm:$0xff]  ;;  %782 = vmatprep.subr.mxu1 %v294_v9  ;;  %v161_v14 = vld [vmem:[%s5755_s1 + $0x380] sm:$0xff]  ;;  %712 = vmatpush2.msra.mxu0 %v165_v10 }
  0x28   :  { %v290_v13 = vld [vmem:[%s5755_s1 + $0x788] sm:$0xff]  ;;  %v289_v15 = vld [vmem:[%s5755_s1 + $0x780] sm:$0xff]  ;;  %783 = vmatpush2.msra.mxu1 %v293_v11  ;;  %713 = vmatprep.subr.mxu0 %v162_v12 }
  0x29   :  { %v158_v16 = vld [vmem:[%s5755_s1 + $0x368] sm:$0xff]  ;;  %784 = vmatprep.subr.mxu1 %v290_v13  ;;  %v157_v18 = vld [vmem:[%s5755_s1 + $0x360] sm:$0xff]  ;;  %714 = vmatpush2.msra.mxu0 %v161_v14 }
  0x2a   :  { %v286_v17 = vld [vmem:[%s5755_s1 + $0x768] sm:$0xff]  ;;  %v285_v19 = vld [vmem:[%s5755_s1 + $0x760] sm:$0xff]  ;;  %785 = vmatpush2.msra.mxu1 %v289_v15  ;;  %715 = vmatprep.subr.mxu0 %v158_v16 }
  0x2b   :  { %v154_v20 = vld [vmem:[%s5755_s1 + $0x348] sm:$0xff]  ;;  %786 = vmatprep.subr.mxu1 %v286_v17  ;;  %v153_v22 = vld [vmem:[%s5755_s1 + $0x340] sm:$0xff]  ;;  %716 = vmatpush2.msra.mxu0 %v157_v18 }
  0x2c   :  { %v282_v21 = vld [vmem:[%s5755_s1 + $0x748] sm:$0xff]  ;;  %v281_v23 = vld [vmem:[%s5755_s1 + $0x740] sm:$0xff]  ;;  %787 = vmatpush2.msra.mxu1 %v285_v19  ;;  %717 = vmatprep.subr.mxu0 %v154_v20 }
  0x2d   :  { %v150_v24 = vld [vmem:[%s5755_s1 + $0x328] sm:$0xff]  ;;  %788 = vmatprep.subr.mxu1 %v282_v21  ;;  %v149_v26 = vld [vmem:[%s5755_s1 + $0x320] sm:$0xff]  ;;  %718 = vmatpush2.msra.mxu0 %v153_v22 }
  0x2e   :  { %v278_v25 = vld [vmem:[%s5755_s1 + $0x728] sm:$0xff]  ;;  %v277_v27 = vld [vmem:[%s5755_s1 + $0x720] sm:$0xff]  ;;  %789 = vmatpush2.msra.mxu1 %v281_v23  ;;  %719 = vmatprep.subr.mxu0 %v150_v24 }
  0x2f   :  { %v146_v28 = vld [vmem:[%s5755_s1 + $0x308] sm:$0xff]  ;;  %790 = vmatprep.subr.mxu1 %v278_v25  ;;  %v145_v30 = vld [vmem:[%s5755_s1 + $0x300] sm:$0xff]  ;;  %720 = vmatpush2.msra.mxu0 %v149_v26 }
  0x30   :  { %v274_v29 = vld [vmem:[%s5755_s1 + $0x708] sm:$0xff]  ;;  %v273_v31 = vld [vmem:[%s5755_s1 + $0x700] sm:$0xff]  ;;  %791 = vmatpush2.msra.mxu1 %v277_v27  ;;  %721 = vmatprep.subr.mxu0 %v146_v28 }
  0x31   :  { %v142_v32 = vld [vmem:[%s5755_s1 + $0x2e8] sm:$0xff]  ;;  %792 = vmatprep.subr.mxu1 %v274_v29  ;;  %v141_v34 = vld [vmem:[%s5755_s1 + $0x2e0] sm:$0xff]  ;;  %722 = vmatpush2.msra.mxu0 %v145_v30 }
  0x32   :  { %v270_v33 = vld [vmem:[%s5755_s1 + $0x6e8] sm:$0xff]  ;;  %v269_v35 = vld [vmem:[%s5755_s1 + $0x6e0] sm:$0xff]  ;;  %793 = vmatpush2.msra.mxu1 %v273_v31  ;;  %723 = vmatprep.subr.mxu0 %v142_v32 }
  0x33   :  { %v138_v36 = vld [vmem:[%s5755_s1 + $0x2c8] sm:$0xff]  ;;  %794 = vmatprep.subr.mxu1 %v270_v33  ;;  %v137_v38 = vld [vmem:[%s5755_s1 + $0x2c0] sm:$0xff]  ;;  %724 = vmatpush2.msra.mxu0 %v141_v34 }
  0x34   :  { %v266_v37 = vld [vmem:[%s5755_s1 + $0x6c8] sm:$0xff]  ;;  %v265_v39 = vld [vmem:[%s5755_s1 + $0x6c0] sm:$0xff]  ;;  %795 = vmatpush2.msra.mxu1 %v269_v35  ;;  %725 = vmatprep.subr.mxu0 %v138_v36 }
  0x35   :  { %v134_v40 = vld [vmem:[%s5755_s1 + $0x2a8] sm:$0xff]  ;;  %796 = vmatprep.subr.mxu1 %v266_v37  ;;  %v133_v42 = vld [vmem:[%s5755_s1 + $0x2a0] sm:$0xff]  ;;  %726 = vmatpush2.msra.mxu0 %v137_v38 }
  0x36   :  { %v262_v41 = vld [vmem:[%s5755_s1 + $0x6a8] sm:$0xff]  ;;  %v261_v43 = vld [vmem:[%s5755_s1 + $0x6a0] sm:$0xff]  ;;  %797 = vmatpush2.msra.mxu1 %v265_v39  ;;  %727 = vmatprep.subr.mxu0 %v134_v40 }
  0x37   :  { %v130_v44 = vld [vmem:[%s5755_s1 + $0x288] sm:$0xff]  ;;  %798 = vmatprep.subr.mxu1 %v262_v41  ;;  %v129_v46 = vld [vmem:[%s5755_s1 + $0x280] sm:$0xff]  ;;  %728 = vmatpush2.msra.mxu0 %v133_v42 }
  0x38   :  { %v258_v45 = vld [vmem:[%s5755_s1 + $0x688] sm:$0xff]  ;;  %v257_v47 = vld [vmem:[%s5755_s1 + $0x680] sm:$0xff]  ;;  %799 = vmatpush2.msra.mxu1 %v261_v43  ;;  %729 = vmatprep.subr.mxu0 %v130_v44 }
  0x39   :  { %v126_v48 = vld [vmem:[%s5755_s1 + $0x268] sm:$0xff]  ;;  %800 = vmatprep.subr.mxu1 %v258_v45  ;;  %v125_v50 = vld [vmem:[%s5755_s1 + $0x260] sm:$0xff]  ;;  %730 = vmatpush2.msra.mxu0 %v129_v46 }
  0x3a   :  { %v254_v49 = vld [vmem:[%s5755_s1 + $0x668] sm:$0xff]  ;;  %v253_v51 = vld [vmem:[%s5755_s1 + $0x660] sm:$0xff]  ;;  %801 = vmatpush2.msra.mxu1 %v257_v47  ;;  %731 = vmatprep.subr.mxu0 %v126_v48 }
  0x3b   :  { %v122_v52 = vld [vmem:[%s5755_s1 + $0x248] sm:$0xff]  ;;  %802 = vmatprep.subr.mxu1 %v254_v49  ;;  %v121_v54 = vld [vmem:[%s5755_s1 + $0x240] sm:$0xff]  ;;  %732 = vmatpush2.msra.mxu0 %v125_v50 }
  0x3c   :  { %v250_v53 = vld [vmem:[%s5755_s1 + $0x648] sm:$0xff]  ;;  %v249_v55 = vld [vmem:[%s5755_s1 + $0x640] sm:$0xff]  ;;  %803 = vmatpush2.msra.mxu1 %v253_v51  ;;  %733 = vmatprep.subr.mxu0 %v122_v52 }
  0x3d   :  { %v118_v56 = vld [vmem:[%s5755_s1 + $0x228] sm:$0xff]  ;;  %804 = vmatprep.subr.mxu1 %v250_v53  ;;  %v117_v58 = vld [vmem:[%s5755_s1 + $0x220] sm:$0xff]  ;;  %734 = vmatpush2.msra.mxu0 %v121_v54 }
  0x3e   :  { %v246_v57 = vld [vmem:[%s5755_s1 + $0x628] sm:$0xff]  ;;  %v245_v59 = vld [vmem:[%s5755_s1 + $0x620] sm:$0xff]  ;;  %805 = vmatpush2.msra.mxu1 %v249_v55  ;;  %735 = vmatprep.subr.mxu0 %v118_v56 }
  0x3f   :  { %v114_v60 = vld [vmem:[%s5755_s1 + $0x208] sm:$0xff]  ;;  %806 = vmatprep.subr.mxu1 %v246_v57  ;;  %v113_v62 = vld [vmem:[%s5755_s1 + $0x200] sm:$0xff]  ;;  %736 = vmatpush2.msra.mxu0 %v117_v58 }
  0x40   :  { %v242_v61 = vld [vmem:[%s5755_s1 + $0x608] sm:$0xff]  ;;  %807 = vmatpush2.msra.mxu1 %v245_v59  ;;  %v241_v0 = vld [vmem:[%s5755_s1 + $0x600] sm:$0xff]  ;;  %737 = vmatprep.subr.mxu0 %v114_v60 }
  0x41   :  { %v40_v63 = vld [vmem:[%s5756_s0 + $0x8] sm:$0xff]  ;;  %v39_v1 = vld [vmem:[%s5756_s0] sm:$0xff]  ;;  %808 = vmatprep.subr.mxu1 %v242_v61  ;;  %738 = vmatpush2.msra.mxu0 %v113_v62 }
  0x42   :  { %v366_v3 = vld [vmem:[%s5755_s1 + $0x9e8] sm:$0xff]  ;;  %739 = vmatprep.mubr.f32.mxu0 %v40_v63  ;;  %809 = vmatpush2.msra.mxu1 %v241_v0  ;;  %v365_v6 = vld [vmem:[%s5755_s1 + $0x9e0] sm:$0xff] }
  0x43   :  { %v494_v4 = vld [vmem:[%s5755_s1 + $0xde8] sm:$0xff]  ;;  %740 = vmatmul.mubr.f32.vlgmr.msra.gmra.mxu0 %v39_v1  ;;  %v493_v7 = vld [vmem:[%s5755_s1 + $0xde0] sm:$0xff]  ;;  %810 = vmatprep.mubr.f32.mxu1 %v42_v2 }
  0x44   :  { %817 = vmatprep.subr.mxu0 %v366_v3  ;;  %v362_v8 = vld [vmem:[%s5755_s1 + $0x9c8] sm:$0xff]  ;;  %888 = vmatprep.subr.mxu1 %v494_v4  ;;  %v361_v10 = vld [vmem:[%s5755_s1 + $0x9c0] sm:$0xff] }
  0x45   :  { %v490_v9 = vld [vmem:[%s5755_s1 + $0xdc8] sm:$0xff]  ;;  %811 = vmatmul.mubr.f32.vlgmr.msra.gmra.mxu1 %v41_v5  ;;  %v489_v11 = vld [vmem:[%s5755_s1 + $0xdc0] sm:$0xff]  ;;  %818 = vmatpush1.msra.mxu0 %v365_v6 }
  0x46   :  { %889 = vmatpush1.msra.mxu1 %v493_v7  ;;  %v358_v12 = vld [vmem:[%s5755_s1 + $0x9a8] sm:$0xff]  ;;  %819 = vmatprep.subr.mxu0 %v362_v8  ;;  %v357_v14 = vld [vmem:[%s5755_s1 + $0x9a0] sm:$0xff] }
  0x47   :  { %v486_v13 = vld [vmem:[%s5755_s1 + $0xda8] sm:$0xff]  ;;  %890 = vmatprep.subr.mxu1 %v490_v9  ;;  %v485_v15 = vld [vmem:[%s5755_s1 + $0xda0] sm:$0xff]  ;;  %820 = vmatpush1.msra.mxu0 %v361_v10 }
  0x48   :  { %891 = vmatpush1.msra.mxu1 %v489_v11  ;;  %v354_v16 = vld [vmem:[%s5755_s1 + $0x988] sm:$0xff]  ;;  %821 = vmatprep.subr.mxu0 %v358_v12  ;;  %v353_v18 = vld [vmem:[%s5755_s1 + $0x980] sm:$0xff] }
  0x49   :  { %v482_v17 = vld [vmem:[%s5755_s1 + $0xd88] sm:$0xff]  ;;  %892 = vmatprep.subr.mxu1 %v486_v13  ;;  %v481_v19 = vld [vmem:[%s5755_s1 + $0xd80] sm:$0xff]  ;;  %822 = vmatpush1.msra.mxu0 %v357_v14 }
  0x4a   :  { %893 = vmatpush1.msra.mxu1 %v485_v15  ;;  %v350_v20 = vld [vmem:[%s5755_s1 + $0x968] sm:$0xff]  ;;  %823 = vmatprep.subr.mxu0 %v354_v16  ;;  %v349_v22 = vld [vmem:[%s5755_s1 + $0x960] sm:$0xff] }
  0x4b   :  { %v478_v21 = vld [vmem:[%s5755_s1 + $0xd68] sm:$0xff]  ;;  %894 = vmatprep.subr.mxu1 %v482_v17  ;;  %v477_v23 = vld [vmem:[%s5755_s1 + $0xd60] sm:$0xff]  ;;  %824 = vmatpush1.msra.mxu0 %v353_v18 }
  0x4c   :  { %895 = vmatpush1.msra.mxu1 %v481_v19  ;;  %v346_v24 = vld [vmem:[%s5755_s1 + $0x948] sm:$0xff]  ;;  %825 = vmatprep.subr.mxu0 %v350_v20  ;;  %v345_v26 = vld [vmem:[%s5755_s1 + $0x940] sm:$0xff] }
  0x4d   :  { %v474_v25 = vld [vmem:[%s5755_s1 + $0xd48] sm:$0xff]  ;;  %896 = vmatprep.subr.mxu1 %v478_v21  ;;  %v473_v27 = vld [vmem:[%s5755_s1 + $0xd40] sm:$0xff]  ;;  %826 = vmatpush1.msra.mxu0 %v349_v22 }
  0x4e   :  { %897 = vmatpush1.msra.mxu1 %v477_v23  ;;  %v342_v28 = vld [vmem:[%s5755_s1 + $0x928] sm:$0xff]  ;;  %827 = vmatprep.subr.mxu0 %v346_v24  ;;  %v341_v30 = vld [vmem:[%s5755_s1 + $0x920] sm:$0xff] }
  0x4f   :  { %v470_v29 = vld [vmem:[%s5755_s1 + $0xd28] sm:$0xff]  ;;  %898 = vmatprep.subr.mxu1 %v474_v25  ;;  %v469_v31 = vld [vmem:[%s5755_s1 + $0xd20] sm:$0xff]  ;;  %828 = vmatpush1.msra.mxu0 %v345_v26 }
  0x50   :  { %899 = vmatpush1.msra.mxu1 %v473_v27  ;;  %v338_v32 = vld [vmem:[%s5755_s1 + $0x908] sm:$0xff]  ;;  %829 = vmatprep.subr.mxu0 %v342_v28  ;;  %v337_v34 = vld [vmem:[%s5755_s1 + $0x900] sm:$0xff] }
  0x51   :  { %v466_v33 = vld [vmem:[%s5755_s1 + $0xd08] sm:$0xff]  ;;  %900 = vmatprep.subr.mxu1 %v470_v29  ;;  %v465_v35 = vld [vmem:[%s5755_s1 + $0xd00] sm:$0xff]  ;;  %830 = vmatpush1.msra.mxu0 %v341_v30 }
  0x52   :  { %901 = vmatpush1.msra.mxu1 %v469_v31  ;;  %v334_v36 = vld [vmem:[%s5755_s1 + $0x8e8] sm:$0xff]  ;;  %831 = vmatprep.subr.mxu0 %v338_v32  ;;  %v333_v38 = vld [vmem:[%s5755_s1 + $0x8e0] sm:$0xff] }
  0x53   :  { %v462_v37 = vld [vmem:[%s5755_s1 + $0xce8] sm:$0xff]  ;;  %902 = vmatprep.subr.mxu1 %v466_v33  ;;  %v461_v39 = vld [vmem:[%s5755_s1 + $0xce0] sm:$0xff]  ;;  %832 = vmatpush1.msra.mxu0 %v337_v34 }
  0x54   :  { %903 = vmatpush1.msra.mxu1 %v465_v35  ;;  %v330_v40 = vld [vmem:[%s5755_s1 + $0x8c8] sm:$0xff]  ;;  %833 = vmatprep.subr.mxu0 %v334_v36  ;;  %v329_v42 = vld [vmem:[%s5755_s1 + $0x8c0] sm:$0xff] }
  0x55   :  { %v458_v41 = vld [vmem:[%s5755_s1 + $0xcc8] sm:$0xff]  ;;  %904 = vmatprep.subr.mxu1 %v462_v37  ;;  %v457_v43 = vld [vmem:[%s5755_s1 + $0xcc0] sm:$0xff]  ;;  %834 = vmatpush1.msra.mxu0 %v333_v38 }
  0x56   :  { %905 = vmatpush1.msra.mxu1 %v461_v39  ;;  %v326_v44 = vld [vmem:[%s5755_s1 + $0x8a8] sm:$0xff]  ;;  %835 = vmatprep.subr.mxu0 %v330_v40  ;;  %v325_v46 = vld [vmem:[%s5755_s1 + $0x8a0] sm:$0xff] }
  0x57   :  { %v454_v45 = vld [vmem:[%s5755_s1 + $0xca8] sm:$0xff]  ;;  %906 = vmatprep.subr.mxu1 %v458_v41  ;;  %v453_v47 = vld [vmem:[%s5755_s1 + $0xca0] sm:$0xff]  ;;  %836 = vmatpush1.msra.mxu0 %v329_v42 }
  0x58   :  { %907 = vmatpush1.msra.mxu1 %v457_v43  ;;  %v322_v48 = vld [vmem:[%s5755_s1 + $0x888] sm:$0xff]  ;;  %837 = vmatprep.subr.mxu0 %v326_v44  ;;  %v321_v50 = vld [vmem:[%s5755_s1 + $0x880] sm:$0xff] }
  0x59   :  { %v450_v49 = vld [vmem:[%s5755_s1 + $0xc88] sm:$0xff]  ;;  %908 = vmatprep.subr.mxu1 %v454_v45  ;;  %v449_v51 = vld [vmem:[%s5755_s1 + $0xc80] sm:$0xff]  ;;  %838 = vmatpush1.msra.mxu0 %v325_v46 }
  0x5a   :  { %909 = vmatpush1.msra.mxu1 %v453_v47  ;;  %v318_v52 = vld [vmem:[%s5755_s1 + $0x868] sm:$0xff]  ;;  %839 = vmatprep.subr.mxu0 %v322_v48  ;;  %v317_v54 = vld [vmem:[%s5755_s1 + $0x860] sm:$0xff] }
  0x5b   :  { %v446_v53 = vld [vmem:[%s5755_s1 + $0xc68] sm:$0xff]  ;;  %910 = vmatprep.subr.mxu1 %v450_v49  ;;  %v445_v55 = vld [vmem:[%s5755_s1 + $0xc60] sm:$0xff]  ;;  %840 = vmatpush1.msra.mxu0 %v321_v50 }
  0x5c   :  { %911 = vmatpush1.msra.mxu1 %v449_v51  ;;  %v314_v56 = vld [vmem:[%s5755_s1 + $0x848] sm:$0xff]  ;;  %841 = vmatprep.subr.mxu0 %v318_v52  ;;  %v313_v58 = vld [vmem:[%s5755_s1 + $0x840] sm:$0xff] }
  0x5d   :  { %v442_v57 = vld [vmem:[%s5755_s1 + $0xc48] sm:$0xff]  ;;  %912 = vmatprep.subr.mxu1 %v446_v53  ;;  %v441_v59 = vld [vmem:[%s5755_s1 + $0xc40] sm:$0xff]  ;;  %842 = vmatpush1.msra.mxu0 %v317_v54 }
  0x5e   :  { %913 = vmatpush1.msra.mxu1 %v445_v55  ;;  %v310_v60 = vld [vmem:[%s5755_s1 + $0x828] sm:$0xff]  ;;  %843 = vmatprep.subr.mxu0 %v314_v56  ;;  %v309_v62 = vld [vmem:[%s5755_s1 + $0x820] sm:$0xff] }
  0x5f   :  { %v438_v61 = vld [vmem:[%s5755_s1 + $0xc28] sm:$0xff]  ;;  %914 = vmatprep.subr.mxu1 %v442_v57  ;;  %v437_v63 = vld [vmem:[%s5755_s1 + $0xc20] sm:$0xff]  ;;  %844 = vmatpush1.msra.mxu0 %v313_v58 }
  0x60   :  { %915 = vmatpush1.msra.mxu1 %v441_v59  ;;  %v306_v0 = vld [vmem:[%s5755_s1 + $0x808] sm:$0xff]  ;;  %845 = vmatprep.subr.mxu0 %v310_v60  ;;  %v305_v2 = vld [vmem:[%s5755_s1 + $0x800] sm:$0xff] }
  0x61   :  { %v434_v1 = vld [vmem:[%s5755_s1 + $0xc08] sm:$0xff]  ;;  %916 = vmatprep.subr.mxu1 %v438_v61  ;;  %v433_v3 = vld [vmem:[%s5755_s1 + $0xc00] sm:$0xff]  ;;  %846 = vmatpush1.msra.mxu0 %v309_v62 }
  0x62   :  { %917 = vmatpush1.msra.mxu1 %v437_v63  ;;  %v430_v4 = vld [vmem:[%s5755_s1 + $0xbe8] sm:$0xff]  ;;  %847 = vmatprep.subr.mxu0 %v306_v0  ;;  %v429_v6 = vld [vmem:[%s5755_s1 + $0xbe0] sm:$0xff] }
  0x63   :  { %v558_v5 = vld [vmem:[%s5755_s1 + $0xfe8] sm:$0xff]  ;;  %918 = vmatprep.subr.mxu1 %v434_v1  ;;  %v557_v7 = vld [vmem:[%s5755_s1 + $0xfe0] sm:$0xff]  ;;  %848 = vmatpush1.msra.mxu0 %v305_v2 }
  0x64   :  { %919 = vmatpush1.msra.mxu1 %v433_v3  ;;  %v426_v8 = vld [vmem:[%s5755_s1 + $0xbc8] sm:$0xff]  ;;  %849 = vmatprep.subr.mxu0 %v430_v4  ;;  %v425_v10 = vld [vmem:[%s5755_s1 + $0xbc0] sm:$0xff] }
  0x65   :  { %v554_v9 = vld [vmem:[%s5755_s1 + $0xfc8] sm:$0xff]  ;;  %920 = vmatprep.subr.mxu1 %v558_v5  ;;  %v553_v11 = vld [vmem:[%s5755_s1 + $0xfc0] sm:$0xff]  ;;  %850 = vmatpush2.msra.mxu0 %v429_v6  ;;  %v46_v6 = vld [vmem:[%s5756_s0 + $0x38] sm:$0xff] }
  0x66   :  { %921 = vmatpush2.msra.mxu1 %v557_v7  ;;  %v422_v12 = vld [vmem:[%s5755_s1 + $0xba8] sm:$0xff]  ;;  %851 = vmatprep.subr.mxu0 %v426_v8  ;;  %v421_v14 = vld [vmem:[%s5755_s1 + $0xba0] sm:$0xff]  ;;  %v112_v8 = vld [vmem:[%s5755_s1 + $0x1f8] sm:$0xff] }
  0x67   :  { %v550_v13 = vld [vmem:[%s5755_s1 + $0xfa8] sm:$0xff]  ;;  %922 = vmatprep.subr.mxu1 %v554_v9  ;;  %v549_v15 = vld [vmem:[%s5755_s1 + $0xfa0] sm:$0xff]  ;;  %852 = vmatpush2.msra.mxu0 %v425_v10  ;;  %v45_v9 = vld [vmem:[%s5756_s0 + $0x30] sm:$0xff] }
  0x68   :  { %923 = vmatpush2.msra.mxu1 %v553_v11  ;;  %v418_v16 = vld [vmem:[%s5755_s1 + $0xb88] sm:$0xff]  ;;  %853 = vmatprep.subr.mxu0 %v422_v12  ;;  %v417_v18 = vld [vmem:[%s5755_s1 + $0xb80] sm:$0xff]  ;;  %v111_v11 = vld [vmem:[%s5755_s1 + $0x1f0] sm:$0xff] }
  0x69   :  { %v546_v17 = vld [vmem:[%s5755_s1 + $0xf88] sm:$0xff]  ;;  %924 = vmatprep.subr.mxu1 %v550_v13  ;;  %v545_v19 = vld [vmem:[%s5755_s1 + $0xf80] sm:$0xff]  ;;  %854 = vmatpush2.msra.mxu0 %v421_v14  ;;  %v108_v13 = vld [vmem:[%s5755_s1 + $0x1d8] sm:$0xff] }
  0x6a   :  { %925 = vmatpush2.msra.mxu1 %v549_v15  ;;  %v414_v20 = vld [vmem:[%s5755_s1 + $0xb68] sm:$0xff]  ;;  %855 = vmatprep.subr.mxu0 %v418_v16  ;;  %v413_v22 = vld [vmem:[%s5755_s1 + $0xb60] sm:$0xff]  ;;  %v107_v15 = vld [vmem:[%s5755_s1 + $0x1d0] sm:$0xff] }
  0x6b   :  { %v542_v21 = vld [vmem:[%s5755_s1 + $0xf68] sm:$0xff]  ;;  %926 = vmatprep.subr.mxu1 %v546_v17  ;;  %v541_v23 = vld [vmem:[%s5755_s1 + $0xf60] sm:$0xff]  ;;  %856 = vmatpush2.msra.mxu0 %v417_v18  ;;  %v104_v17 = vld [vmem:[%s5755_s1 + $0x1b8] sm:$0xff] }
  0x6c   :  { %927 = vmatpush2.msra.mxu1 %v545_v19  ;;  %v410_v24 = vld [vmem:[%s5755_s1 + $0xb48] sm:$0xff]  ;;  %857 = vmatprep.subr.mxu0 %v414_v20  ;;  %v409_v26 = vld [vmem:[%s5755_s1 + $0xb40] sm:$0xff]  ;;  %v103_v19 = vld [vmem:[%s5755_s1 + $0x1b0] sm:$0xff] }
  0x6d   :  { %v538_v25 = vld [vmem:[%s5755_s1 + $0xf48] sm:$0xff]  ;;  %928 = vmatprep.subr.mxu1 %v542_v21  ;;  %v537_v27 = vld [vmem:[%s5755_s1 + $0xf40] sm:$0xff]  ;;  %858 = vmatpush2.msra.mxu0 %v413_v22  ;;  %v100_v21 = vld [vmem:[%s5755_s1 + $0x198] sm:$0xff] }
  0x6e   :  { %929 = vmatpush2.msra.mxu1 %v541_v23  ;;  %v406_v28 = vld [vmem:[%s5755_s1 + $0xb28] sm:$0xff]  ;;  %859 = vmatprep.subr.mxu0 %v410_v24  ;;  %v405_v30 = vld [vmem:[%s5755_s1 + $0xb20] sm:$0xff]  ;;  %v99_v23 = vld [vmem:[%s5755_s1 + $0x190] sm:$0xff] }
  0x6f   :  { %v534_v29 = vld [vmem:[%s5755_s1 + $0xf28] sm:$0xff]  ;;  %930 = vmatprep.subr.mxu1 %v538_v25  ;;  %v533_v31 = vld [vmem:[%s5755_s1 + $0xf20] sm:$0xff]  ;;  %860 = vmatpush2.msra.mxu0 %v409_v26  ;;  %v96_v25 = vld [vmem:[%s5755_s1 + $0x178] sm:$0xff] }
  0x70   :  { %931 = vmatpush2.msra.mxu1 %v537_v27  ;;  %v402_v32 = vld [vmem:[%s5755_s1 + $0xb08] sm:$0xff]  ;;  %861 = vmatprep.subr.mxu0 %v406_v28  ;;  %v401_v34 = vld [vmem:[%s5755_s1 + $0xb00] sm:$0xff]  ;;  %v95_v27 = vld [vmem:[%s5755_s1 + $0x170] sm:$0xff] }
  0x71   :  { %v530_v33 = vld [vmem:[%s5755_s1 + $0xf08] sm:$0xff]  ;;  %932 = vmatprep.subr.mxu1 %v534_v29  ;;  %v529_v35 = vld [vmem:[%s5755_s1 + $0xf00] sm:$0xff]  ;;  %862 = vmatpush2.msra.mxu0 %v405_v30  ;;  %v92_v29 = vld [vmem:[%s5755_s1 + $0x158] sm:$0xff] }
  0x72   :  { %933 = vmatpush2.msra.mxu1 %v533_v31  ;;  %v398_v36 = vld [vmem:[%s5755_s1 + $0xae8] sm:$0xff]  ;;  %863 = vmatprep.subr.mxu0 %v402_v32  ;;  %v397_v38 = vld [vmem:[%s5755_s1 + $0xae0] sm:$0xff]  ;;  %v91_v31 = vld [vmem:[%s5755_s1 + $0x150] sm:$0xff] }
  0x73   :  { %v526_v37 = vld [vmem:[%s5755_s1 + $0xee8] sm:$0xff]  ;;  %934 = vmatprep.subr.mxu1 %v530_v33  ;;  %v525_v39 = vld [vmem:[%s5755_s1 + $0xee0] sm:$0xff]  ;;  %864 = vmatpush2.msra.mxu0 %v401_v34  ;;  %v88_v33 = vld [vmem:[%s5755_s1 + $0x138] sm:$0xff] }
  0x74   :  { %935 = vmatpush2.msra.mxu1 %v529_v35  ;;  %v394_v40 = vld [vmem:[%s5755_s1 + $0xac8] sm:$0xff]  ;;  %865 = vmatprep.subr.mxu0 %v398_v36  ;;  %v393_v42 = vld [vmem:[%s5755_s1 + $0xac0] sm:$0xff]  ;;  %v87_v35 = vld [vmem:[%s5755_s1 + $0x130] sm:$0xff] }
  0x75   :  { %v522_v41 = vld [vmem:[%s5755_s1 + $0xec8] sm:$0xff]  ;;  %936 = vmatprep.subr.mxu1 %v526_v37  ;;  %v521_v43 = vld [vmem:[%s5755_s1 + $0xec0] sm:$0xff]  ;;  %866 = vmatpush2.msra.mxu0 %v397_v38  ;;  %v84_v37 = vld [vmem:[%s5755_s1 + $0x118] sm:$0xff] }
  0x76   :  { %937 = vmatpush2.msra.mxu1 %v525_v39  ;;  %v390_v44 = vld [vmem:[%s5755_s1 + $0xaa8] sm:$0xff]  ;;  %867 = vmatprep.subr.mxu0 %v394_v40  ;;  %v389_v46 = vld [vmem:[%s5755_s1 + $0xaa0] sm:$0xff]  ;;  %v83_v39 = vld [vmem:[%s5755_s1 + $0x110] sm:$0xff] }
  0x77   :  { %v518_v45 = vld [vmem:[%s5755_s1 + $0xea8] sm:$0xff]  ;;  %938 = vmatprep.subr.mxu1 %v522_v41  ;;  %v517_v47 = vld [vmem:[%s5755_s1 + $0xea0] sm:$0xff]  ;;  %868 = vmatpush2.msra.mxu0 %v393_v42  ;;  %v80_v41 = vld [vmem:[%s5755_s1 + $0xf8] sm:$0xff] }
  0x78   :  { %939 = vmatpush2.msra.mxu1 %v521_v43  ;;  %v386_v48 = vld [vmem:[%s5755_s1 + $0xa88] sm:$0xff]  ;;  %869 = vmatprep.subr.mxu0 %v390_v44  ;;  %v385_v50 = vld [vmem:[%s5755_s1 + $0xa80] sm:$0xff]  ;;  %v79_v43 = vld [vmem:[%s5755_s1 + $0xf0] sm:$0xff] }
  0x79   :  { %v514_v49 = vld [vmem:[%s5755_s1 + $0xe88] sm:$0xff]  ;;  %940 = vmatprep.subr.mxu1 %v518_v45  ;;  %v513_v51 = vld [vmem:[%s5755_s1 + $0xe80] sm:$0xff]  ;;  %870 = vmatpush2.msra.mxu0 %v389_v46  ;;  %v76_v45 = vld [vmem:[%s5755_s1 + $0xd8] sm:$0xff] }
  0x7a   :  { %941 = vmatpush2.msra.mxu1 %v517_v47  ;;  %v382_v52 = vld [vmem:[%s5755_s1 + $0xa68] sm:$0xff]  ;;  %871 = vmatprep.subr.mxu0 %v386_v48  ;;  %v381_v54 = vld [vmem:[%s5755_s1 + $0xa60] sm:$0xff]  ;;  %v75_v47 = vld [vmem:[%s5755_s1 + $0xd0] sm:$0xff] }
  0x7b   :  { %v510_v53 = vld [vmem:[%s5755_s1 + $0xe68] sm:$0xff]  ;;  %942 = vmatprep.subr.mxu1 %v514_v49  ;;  %v509_v55 = vld [vmem:[%s5755_s1 + $0xe60] sm:$0xff]  ;;  %872 = vmatpush2.msra.mxu0 %v385_v50  ;;  %v72_v49 = vld [vmem:[%s5755_s1 + $0xb8] sm:$0xff] }
  0x7c   :  { %943 = vmatpush2.msra.mxu1 %v513_v51  ;;  %v378_v56 = vld [vmem:[%s5755_s1 + $0xa48] sm:$0xff]  ;;  %873 = vmatprep.subr.mxu0 %v382_v52  ;;  %v377_v58 = vld [vmem:[%s5755_s1 + $0xa40] sm:$0xff]  ;;  %v71_v51 = vld [vmem:[%s5755_s1 + $0xb0] sm:$0xff] }
  0x7d   :  { %v506_v57 = vld [vmem:[%s5755_s1 + $0xe48] sm:$0xff]  ;;  %944 = vmatprep.subr.mxu1 %v510_v53  ;;  %v505_v59 = vld [vmem:[%s5755_s1 + $0xe40] sm:$0xff]  ;;  %874 = vmatpush2.msra.mxu0 %v381_v54  ;;  %v68_v53 = vld [vmem:[%s5755_s1 + $0x98] sm:$0xff] }
  0x7e   :  { %945 = vmatpush2.msra.mxu1 %v509_v55  ;;  %v374_v60 = vld [vmem:[%s5755_s1 + $0xa28] sm:$0xff]  ;;  %875 = vmatprep.subr.mxu0 %v378_v56  ;;  %v373_v62 = vld [vmem:[%s5755_s1 + $0xa20] sm:$0xff]  ;;  %v67_v55 = vld [vmem:[%s5755_s1 + $0x90] sm:$0xff] }
  0x7f   :  { %v502_v61 = vld [vmem:[%s5755_s1 + $0xe28] sm:$0xff]  ;;  %946 = vmatprep.subr.mxu1 %v506_v57  ;;  %v501_v63 = vld [vmem:[%s5755_s1 + $0xe20] sm:$0xff]  ;;  %876 = vmatpush2.msra.mxu0 %v377_v58  ;;  %v64_v57 = vld [vmem:[%s5755_s1 + $0x78] sm:$0xff] }
  0x80   :  { %947 = vmatpush2.msra.mxu1 %v505_v59  ;;  %v370_v0 = vld [vmem:[%s5755_s1 + $0xa08] sm:$0xff]  ;;  %877 = vmatprep.subr.mxu0 %v374_v60  ;;  %v369_v2 = vld [vmem:[%s5755_s1 + $0xa00] sm:$0xff]  ;;  %v63_v59 = vld [vmem:[%s5755_s1 + $0x70] sm:$0xff] }
  0x81   :  { %v498_v1 = vld [vmem:[%s5755_s1 + $0xe08] sm:$0xff]  ;;  %948 = vmatprep.subr.mxu1 %v502_v61  ;;  %878 = vmatpush2.msra.mxu0 %v373_v62  ;;  %v497_v4 = vld [vmem:[%s5755_s1 + $0xe00] sm:$0xff]  ;;  %v60_v61 = vld [vmem:[%s5755_s1 + $0x58] sm:$0xff] }
  0x82   :  { %v44_v3 = vld [vmem:[%s5756_s0 + $0x28] sm:$0xff]  ;;  %949 = vmatpush2.msra.mxu1 %v501_v63  ;;  %v43_v5 = vld [vmem:[%s5756_s0 + $0x20] sm:$0xff]  ;;  %879 = vmatprep.subr.mxu0 %v370_v0  ;;  %v59_v63 = vld [vmem:[%s5755_s1 + $0x50] sm:$0xff] }
  0x83   :  { %950 = vmatprep.subr.mxu1 %v498_v1  ;;  %v622_v7 = vld [vmem:[%s5755_s1 + $0x11e8] sm:$0xff]  ;;  %880 = vmatpush2.msra.mxu0 %v369_v2  ;;  %v621_v10 = vld [vmem:[%s5755_s1 + $0x11e0] sm:$0xff]  ;;  %v56_v1 = vld [vmem:[%s5755_s1 + $0x38] sm:$0xff] }
  0x84   :  { %881 = vmatprep.mubr.f32.mxu0 %v44_v3  ;;  %951 = vmatpush2.msra.mxu1 %v497_v4  ;;  %v618_v12 = vld [vmem:[%s5755_s1 + $0x11c8] sm:$0xff]  ;;  %v617_v14 = vld [vmem:[%s5755_s1 + $0x11c0] sm:$0xff]  ;;  %v55_v3 = vld [vmem:[%s5755_s1 + $0x30] sm:$0xff] }
  0x85   :  { %882 = vmatmul.mubr.f32.vlgmr.msra.gmra.mxu0 %v43_v5  ;;  %952 = vmatprep.mubr.f32.mxu1 %v46_v6  ;;  %v614_v16 = vld [vmem:[%s5755_s1 + $0x11a8] sm:$0xff]  ;;  %v613_v18 = vld [vmem:[%s5755_s1 + $0x11a0] sm:$0xff]  ;;  %v52_v5 = vld [vmem:[%s5755_s1 + $0x18] sm:$0xff] }
  0x86   :  { %959 = vmatprep.subr.mxu0 %v622_v7  ;;  %1030 = vmatprep.subr.mxu1 %v112_v8  ;;  %v610_v20 = vld [vmem:[%s5755_s1 + $0x1188] sm:$0xff]  ;;  %v609_v22 = vld [vmem:[%s5755_s1 + $0x1180] sm:$0xff]  ;;  %v51_v7 = vld [vmem:[%s5755_s1 + $0x10] sm:$0xff] }
  0x87   :  { %953 = vmatmul.mubr.f32.vlgmr.msra.gmra.mxu1 %v45_v9  ;;  %960 = vmatpush1.msra.mxu0 %v621_v10  ;;  %v606_v24 = vld [vmem:[%s5755_s1 + $0x1168] sm:$0xff]  ;;  %v605_v26 = vld [vmem:[%s5755_s1 + $0x1160] sm:$0xff]  ;;  %v176_v9 = vld [vmem:[%s5755_s1 + $0x3f8] sm:$0xff] }
  0x88   :  { %1031 = vmatpush1.msra.mxu1 %v111_v11  ;;  %961 = vmatprep.subr.mxu0 %v618_v12  ;;  %v602_v28 = vld [vmem:[%s5755_s1 + $0x1148] sm:$0xff]  ;;  %v601_v30 = vld [vmem:[%s5755_s1 + $0x1140] sm:$0xff]  ;;  %v175_v11 = vld [vmem:[%s5755_s1 + $0x3f0] sm:$0xff] }
  0x89   :  { %1032 = vmatprep.subr.mxu1 %v108_v13  ;;  %962 = vmatpush1.msra.mxu0 %v617_v14  ;;  %v598_v32 = vld [vmem:[%s5755_s1 + $0x1128] sm:$0xff]  ;;  %v597_v34 = vld [vmem:[%s5755_s1 + $0x1120] sm:$0xff]  ;;  %v172_v13 = vld [vmem:[%s5755_s1 + $0x3d8] sm:$0xff] }
  0x8a   :  { %1033 = vmatpush1.msra.mxu1 %v107_v15  ;;  %963 = vmatprep.subr.mxu0 %v614_v16  ;;  %v594_v36 = vld [vmem:[%s5755_s1 + $0x1108] sm:$0xff]  ;;  %v593_v38 = vld [vmem:[%s5755_s1 + $0x1100] sm:$0xff]  ;;  %v171_v15 = vld [vmem:[%s5755_s1 + $0x3d0] sm:$0xff] }
  0x8b   :  { %1034 = vmatprep.subr.mxu1 %v104_v17  ;;  %964 = vmatpush1.msra.mxu0 %v613_v18  ;;  %v590_v40 = vld [vmem:[%s5755_s1 + $0x10e8] sm:$0xff]  ;;  %v589_v42 = vld [vmem:[%s5755_s1 + $0x10e0] sm:$0xff]  ;;  %v168_v17 = vld [vmem:[%s5755_s1 + $0x3b8] sm:$0xff] }
  0x8c   :  { %1035 = vmatpush1.msra.mxu1 %v103_v19  ;;  %965 = vmatprep.subr.mxu0 %v610_v20  ;;  %v586_v44 = vld [vmem:[%s5755_s1 + $0x10c8] sm:$0xff]  ;;  %v585_v46 = vld [vmem:[%s5755_s1 + $0x10c0] sm:$0xff]  ;;  %v167_v19 = vld [vmem:[%s5755_s1 + $0x3b0] sm:$0xff] }
  0x8d   :  { %1036 = vmatprep.subr.mxu1 %v100_v21  ;;  %966 = vmatpush1.msra.mxu0 %v609_v22  ;;  %v582_v48 = vld [vmem:[%s5755_s1 + $0x10a8] sm:$0xff]  ;;  %v581_v50 = vld [vmem:[%s5755_s1 + $0x10a0] sm:$0xff]  ;;  %v164_v21 = vld [vmem:[%s5755_s1 + $0x398] sm:$0xff] }
  0x8e   :  { %1037 = vmatpush1.msra.mxu1 %v99_v23  ;;  %967 = vmatprep.subr.mxu0 %v606_v24  ;;  %v578_v52 = vld [vmem:[%s5755_s1 + $0x1088] sm:$0xff]  ;;  %v577_v54 = vld [vmem:[%s5755_s1 + $0x1080] sm:$0xff]  ;;  %v163_v23 = vld [vmem:[%s5755_s1 + $0x390] sm:$0xff] }
  0x8f   :  { %1038 = vmatprep.subr.mxu1 %v96_v25  ;;  %968 = vmatpush1.msra.mxu0 %v605_v26  ;;  %v574_v56 = vld [vmem:[%s5755_s1 + $0x1068] sm:$0xff]  ;;  %v573_v58 = vld [vmem:[%s5755_s1 + $0x1060] sm:$0xff]  ;;  %v160_v25 = vld [vmem:[%s5755_s1 + $0x378] sm:$0xff] }
  0x90   :  { %1039 = vmatpush1.msra.mxu1 %v95_v27  ;;  %969 = vmatprep.subr.mxu0 %v602_v28  ;;  %v570_v60 = vld [vmem:[%s5755_s1 + $0x1048] sm:$0xff]  ;;  %v569_v62 = vld [vmem:[%s5755_s1 + $0x1040] sm:$0xff]  ;;  %v159_v27 = vld [vmem:[%s5755_s1 + $0x370] sm:$0xff] }
  0x91   :  { %1040 = vmatprep.subr.mxu1 %v92_v29  ;;  %970 = vmatpush1.msra.mxu0 %v601_v30  ;;  %v566_v0 = vld [vmem:[%s5755_s1 + $0x1028] sm:$0xff]  ;;  %v565_v2 = vld [vmem:[%s5755_s1 + $0x1020] sm:$0xff]  ;;  %v156_v29 = vld [vmem:[%s5755_s1 + $0x358] sm:$0xff] }
  0x92   :  { %1041 = vmatpush1.msra.mxu1 %v91_v31  ;;  %971 = vmatprep.subr.mxu0 %v598_v32  ;;  %v562_v4 = vld [vmem:[%s5755_s1 + $0x1008] sm:$0xff]  ;;  %v561_v6 = vld [vmem:[%s5755_s1 + $0x1000] sm:$0xff]  ;;  %v155_v32 = vld [vmem:[%s5755_s1 + $0x350] sm:$0xff] }
  0x93   :  { %1042 = vmatprep.subr.mxu1 %v88_v33  ;;  %972 = vmatpush1.msra.mxu0 %v597_v34  ;;  %v646_v8 = vld [vmem:[%s5755_s1 + $0x12a8] sm:$0xff]  ;;  %v645_v10 = vld [vmem:[%s5755_s1 + $0x12a0] sm:$0xff]  ;;  %v152_v34 = vld [vmem:[%s5755_s1 + $0x338] sm:$0xff] }
  0x94   :  { %1043 = vmatpush1.msra.mxu1 %v87_v35  ;;  %973 = vmatprep.subr.mxu0 %v594_v36  ;;  %v642_v12 = vld [vmem:[%s5755_s1 + $0x1288] sm:$0xff]  ;;  %v641_v14 = vld [vmem:[%s5755_s1 + $0x1280] sm:$0xff]  ;;  %v240_v35 = vld [vmem:[%s5755_s1 + $0x5f8] sm:$0xff] }
  0x95   :  { %1044 = vmatprep.subr.mxu1 %v84_v37  ;;  %974 = vmatpush1.msra.mxu0 %v593_v38  ;;  %v638_v16 = vld [vmem:[%s5755_s1 + $0x1268] sm:$0xff]  ;;  %v637_v18 = vld [vmem:[%s5755_s1 + $0x1260] sm:$0xff]  ;;  %v151_v36 = vld [vmem:[%s5755_s1 + $0x330] sm:$0xff] }
  0x96   :  { %1045 = vmatpush1.msra.mxu1 %v83_v39  ;;  %975 = vmatprep.subr.mxu0 %v590_v40  ;;  %v634_v20 = vld [vmem:[%s5755_s1 + $0x1248] sm:$0xff]  ;;  %v633_v22 = vld [vmem:[%s5755_s1 + $0x1240] sm:$0xff]  ;;  %v239_v37 = vld [vmem:[%s5755_s1 + $0x5f0] sm:$0xff] }
  0x97   :  { %1046 = vmatprep.subr.mxu1 %v80_v41  ;;  %976 = vmatpush1.msra.mxu0 %v589_v42  ;;  %v630_v24 = vld [vmem:[%s5755_s1 + $0x1228] sm:$0xff]  ;;  %v629_v26 = vld [vmem:[%s5755_s1 + $0x1220] sm:$0xff]  ;;  %v148_v38 = vld [vmem:[%s5755_s1 + $0x318] sm:$0xff] }
  0x98   :  { %1047 = vmatpush1.msra.mxu1 %v79_v43  ;;  %977 = vmatprep.subr.mxu0 %v586_v44  ;;  %v626_v28 = vld [vmem:[%s5755_s1 + $0x1208] sm:$0xff]  ;;  %v625_v30 = vld [vmem:[%s5755_s1 + $0x1200] sm:$0xff]  ;;  %v236_v39 = vld [vmem:[%s5755_s1 + $0x5d8] sm:$0xff] }
  0x99   :  { %1048 = vmatprep.subr.mxu1 %v76_v45  ;;  %978 = vmatpush1.msra.mxu0 %v585_v46  ;;  %v48_v31 = vld [vmem:[%s5756_s0 + $0x48] sm:$0xff]  ;;  %v47_v33 = vld [vmem:[%s5756_s0 + $0x40] sm:$0xff]  ;;  %v147_v40 = vld [vmem:[%s5755_s1 + $0x310] sm:$0xff] }
  0x9a   :  { %1049 = vmatpush1.msra.mxu1 %v75_v47  ;;  %979 = vmatprep.subr.mxu0 %v582_v48  ;;  %v235_v41 = vld [vmem:[%s5755_s1 + $0x5d0] sm:$0xff]  ;;  %v144_v42 = vld [vmem:[%s5755_s1 + $0x2f8] sm:$0xff] }
  0x9b   :  { %1050 = vmatprep.subr.mxu1 %v72_v49  ;;  %980 = vmatpush1.msra.mxu0 %v581_v50  ;;  %v232_v43 = vld [vmem:[%s5755_s1 + $0x5b8] sm:$0xff]  ;;  %v143_v44 = vld [vmem:[%s5755_s1 + $0x2f0] sm:$0xff] }
  0x9c   :  { %1051 = vmatpush1.msra.mxu1 %v71_v51  ;;  %981 = vmatprep.subr.mxu0 %v578_v52  ;;  %v231_v45 = vld [vmem:[%s5755_s1 + $0x5b0] sm:$0xff]  ;;  %v140_v46 = vld [vmem:[%s5755_s1 + $0x2d8] sm:$0xff] }
  0x9d   :  { %1052 = vmatprep.subr.mxu1 %v68_v53  ;;  %982 = vmatpush1.msra.mxu0 %v577_v54  ;;  %v228_v47 = vld [vmem:[%s5755_s1 + $0x598] sm:$0xff]  ;;  %v139_v48 = vld [vmem:[%s5755_s1 + $0x2d0] sm:$0xff] }
  0x9e   :  { %1053 = vmatpush1.msra.mxu1 %v67_v55  ;;  %983 = vmatprep.subr.mxu0 %v574_v56  ;;  %v227_v49 = vld [vmem:[%s5755_s1 + $0x590] sm:$0xff]  ;;  %v136_v50 = vld [vmem:[%s5755_s1 + $0x2b8] sm:$0xff] }
  0x9f   :  { %1054 = vmatprep.subr.mxu1 %v64_v57  ;;  %984 = vmatpush1.msra.mxu0 %v573_v58  ;;  %v224_v51 = vld [vmem:[%s5755_s1 + $0x578] sm:$0xff]  ;;  %v135_v52 = vld [vmem:[%s5755_s1 + $0x2b0] sm:$0xff] }
  0xa0   :  { %1055 = vmatpush1.msra.mxu1 %v63_v59  ;;  %985 = vmatprep.subr.mxu0 %v570_v60  ;;  %v223_v53 = vld [vmem:[%s5755_s1 + $0x570] sm:$0xff]  ;;  %v132_v54 = vld [vmem:[%s5755_s1 + $0x298] sm:$0xff] }
  0xa1   :  { %1056 = vmatprep.subr.mxu1 %v60_v61  ;;  %986 = vmatpush1.msra.mxu0 %v569_v62  ;;  %v220_v55 = vld [vmem:[%s5755_s1 + $0x558] sm:$0xff]  ;;  %v131_v56 = vld [vmem:[%s5755_s1 + $0x290] sm:$0xff] }
  0xa2   :  { %1057 = vmatpush1.msra.mxu1 %v59_v63  ;;  %987 = vmatprep.subr.mxu0 %v566_v0  ;;  %v219_v57 = vld [vmem:[%s5755_s1 + $0x550] sm:$0xff]  ;;  %v128_v58 = vld [vmem:[%s5755_s1 + $0x278] sm:$0xff] }
  0xa3   :  { %1058 = vmatprep.subr.mxu1 %v56_v1  ;;  %988 = vmatpush1.msra.mxu0 %v565_v2  ;;  %v216_v59 = vld [vmem:[%s5755_s1 + $0x538] sm:$0xff]  ;;  %v127_v60 = vld [vmem:[%s5755_s1 + $0x270] sm:$0xff] }
  0xa4   :  { %1059 = vmatpush1.msra.mxu1 %v55_v3  ;;  %989 = vmatprep.subr.mxu0 %v562_v4  ;;  %v215_v61 = vld [vmem:[%s5755_s1 + $0x530] sm:$0xff]  ;;  %v124_v62 = vld [vmem:[%s5755_s1 + $0x258] sm:$0xff] }
  0xa5   :  { %1060 = vmatprep.subr.mxu1 %v52_v5  ;;  %990 = vmatpush1.msra.mxu0 %v561_v6  ;;  %v212_v63 = vld [vmem:[%s5755_s1 + $0x518] sm:$0xff]  ;;  %v123_v0 = vld [vmem:[%s5755_s1 + $0x250] sm:$0xff] }
  0xa6   :  { %1061 = vmatpush1.msra.mxu1 %v51_v7  ;;  %1011 = vmatprep.subr.mxu0 %v646_v8  ;;  %v211_v1 = vld [vmem:[%s5755_s1 + $0x510] sm:$0xff]  ;;  %v120_v2 = vld [vmem:[%s5755_s1 + $0x238] sm:$0xff] }
  0xa7   :  { %1062 = vmatprep.subr.mxu1 %v176_v9  ;;  %1012 = vmatpush2.msra.mxu0 %v645_v10  ;;  %v208_v3 = vld [vmem:[%s5755_s1 + $0x4f8] sm:$0xff]  ;;  %v119_v4 = vld [vmem:[%s5755_s1 + $0x230] sm:$0xff] }
  0xa8   :  { %1063 = vmatpush2.msra.mxu1 %v175_v11  ;;  %1013 = vmatprep.subr.mxu0 %v642_v12  ;;  %v207_v5 = vld [vmem:[%s5755_s1 + $0x4f0] sm:$0xff]  ;;  %v116_v6 = vld [vmem:[%s5755_s1 + $0x218] sm:$0xff] }
  0xa9   :  { %1064 = vmatprep.subr.mxu1 %v172_v13  ;;  %1014 = vmatpush2.msra.mxu0 %v641_v14  ;;  %v204_v7 = vld [vmem:[%s5755_s1 + $0x4d8] sm:$0xff]  ;;  %v115_v8 = vld [vmem:[%s5755_s1 + $0x210] sm:$0xff]  ;;  %v2629_v14 = vld [vmem:[%s5756_s0 + $0x8] sm:$0xff] }
  0xaa   :  { %1065 = vmatpush2.msra.mxu1 %v171_v15  ;;  %1015 = vmatprep.subr.mxu0 %v638_v16  ;;  %v203_v9 = vld [vmem:[%s5755_s1 + $0x4d0] sm:$0xff]  ;;  %v200_v10 = vld [vmem:[%s5755_s1 + $0x4b8] sm:$0xff] }
  0xab   :  { %1066 = vmatprep.subr.mxu1 %v168_v17  ;;  %1016 = vmatpush2.msra.mxu0 %v637_v18  ;;  %v368_v11 = vld [vmem:[%s5755_s1 + $0x9f8] sm:$0xff]  ;;  %v199_v12 = vld [vmem:[%s5755_s1 + $0x4b0] sm:$0xff]  ;;  %v2630_v17 = vld [vmem:[%s5756_s0] sm:$0xff] }
  0xac   :  { %1067 = vmatpush2.msra.mxu1 %v167_v19  ;;  %1017 = vmatprep.subr.mxu0 %v634_v20  ;;  %v367_v13 = vld [vmem:[%s5755_s1 + $0x9f0] sm:$0xff]  ;;  %v196_v15 = vld [vmem:[%s5755_s1 + $0x498] sm:$0xff] }
  0xad   :  { %1068 = vmatprep.subr.mxu1 %v164_v21  ;;  %1018 = vmatpush2.msra.mxu0 %v633_v22  ;;  %v364_v16 = vld [vmem:[%s5755_s1 + $0x9d8] sm:$0xff]  ;;  %v195_v18 = vld [vmem:[%s5755_s1 + $0x490] sm:$0xff] }
  0xae   :  { %1069 = vmatpush2.msra.mxu1 %v163_v23  ;;  %1019 = vmatprep.subr.mxu0 %v630_v24  ;;  %v363_v19 = vld [vmem:[%s5755_s1 + $0x9d0] sm:$0xff]  ;;  %v192_v20 = vld [vmem:[%s5755_s1 + $0x478] sm:$0xff] }
  0xaf   :  { %1070 = vmatprep.subr.mxu1 %v160_v25  ;;  %1020 = vmatpush2.msra.mxu0 %v629_v26  ;;  %v360_v21 = vld [vmem:[%s5755_s1 + $0x9b8] sm:$0xff]  ;;  %v191_v22 = vld [vmem:[%s5755_s1 + $0x470] sm:$0xff] }
  0xb0   :  { %1071 = vmatpush2.msra.mxu1 %v159_v27  ;;  %1021 = vmatprep.subr.mxu0 %v626_v28  ;;  %v359_v23 = vld [vmem:[%s5755_s1 + $0x9b0] sm:$0xff]  ;;  %v188_v24 = vld [vmem:[%s5755_s1 + $0x458] sm:$0xff] }
  0xb1   :  { %1072 = vmatprep.subr.mxu1 %v156_v29  ;;  %1022 = vmatpush2.msra.mxu0 %v625_v30  ;;  %v356_v25 = vld [vmem:[%s5755_s1 + $0x998] sm:$0xff]  ;;  %v187_v26 = vld [vmem:[%s5755_s1 + $0x450] sm:$0xff] }
  0xb2   :  { %2541 = vmatprep.mubr.msk.f32.mxu0 %vm671_vm0, %v48_v31  ;;  %1073 = vmatpush2.msra.mxu1 %v155_v32  ;;  %v355_v27 = vld [vmem:[%s5755_s1 + $0x990] sm:$0xff]  ;;  %v184_v28 = vld [vmem:[%s5755_s1 + $0x438] sm:$0xff] }
  0xb3   :  { %1024 = vmatmul.mubr.f32.vlgmr.msra.gmra.mxu0 %v47_v33  ;;  %1074 = vmatprep.subr.mxu1 %v152_v34  ;;  %v352_v29 = vld [vmem:[%s5755_s1 + $0x978] sm:$0xff]  ;;  %v183_v30 = vld [vmem:[%s5755_s1 + $0x430] sm:$0xff] }
  0xb4   :  { %1101 = vmatprep.subr.mxu0 %v240_v35  ;;  %1075 = vmatpush2.msra.mxu1 %v151_v36  ;;  %v351_v31 = vld [vmem:[%s5755_s1 + $0x970] sm:$0xff]  ;;  %v180_v32 = vld [vmem:[%s5755_s1 + $0x418] sm:$0xff] }
  0xb5   :  { %1102 = vmatpush1.msra.mxu0 %v239_v37  ;;  %1076 = vmatprep.subr.mxu1 %v148_v38  ;;  %v348_v33 = vld [vmem:[%s5755_s1 + $0x958] sm:$0xff]  ;;  %v179_v34 = vld [vmem:[%s5755_s1 + $0x410] sm:$0xff] }
  0xb6   :  { %1103 = vmatprep.subr.mxu0 %v236_v39  ;;  %1077 = vmatpush2.msra.mxu1 %v147_v40  ;;  %v347_v35 = vld [vmem:[%s5755_s1 + $0x950] sm:$0xff]  ;;  %v304_v36 = vld [vmem:[%s5755_s1 + $0x7f8] sm:$0xff] }
  0xb7   :  { %1104 = vmatpush1.msra.mxu0 %v235_v41  ;;  %1078 = vmatprep.subr.mxu1 %v144_v42  ;;  %v344_v37 = vld [vmem:[%s5755_s1 + $0x938] sm:$0xff]  ;;  %v303_v38 = vld [vmem:[%s5755_s1 + $0x7f0] sm:$0xff] }
  0xb8   :  { %1105 = vmatprep.subr.mxu0 %v232_v43  ;;  %1079 = vmatpush2.msra.mxu1 %v143_v44  ;;  %v343_v39 = vld [vmem:[%s5755_s1 + $0x930] sm:$0xff]  ;;  %v300_v40 = vld [vmem:[%s5755_s1 + $0x7d8] sm:$0xff] }
  0xb9   :  { %1106 = vmatpush1.msra.mxu0 %v231_v45  ;;  %1080 = vmatprep.subr.mxu1 %v140_v46  ;;  %v340_v41 = vld [vmem:[%s5755_s1 + $0x918] sm:$0xff]  ;;  %v299_v42 = vld [vmem:[%s5755_s1 + $0x7d0] sm:$0xff] }
  0xba   :  { %1107 = vmatprep.subr.mxu0 %v228_v47  ;;  %1081 = vmatpush2.msra.mxu1 %v139_v48  ;;  %v339_v43 = vld [vmem:[%s5755_s1 + $0x910] sm:$0xff]  ;;  %v296_v44 = vld [vmem:[%s5755_s1 + $0x7b8] sm:$0xff] }
  0xbb   :  { %1108 = vmatpush1.msra.mxu0 %v227_v49  ;;  %1082 = vmatprep.subr.mxu1 %v136_v50  ;;  %v336_v45 = vld [vmem:[%s5755_s1 + $0x8f8] sm:$0xff]  ;;  %v295_v46 = vld [vmem:[%s5755_s1 + $0x7b0] sm:$0xff] }
  0xbc   :  { %1109 = vmatprep.subr.mxu0 %v224_v51  ;;  %1083 = vmatpush2.msra.mxu1 %v135_v52  ;;  %v335_v47 = vld [vmem:[%s5755_s1 + $0x8f0] sm:$0xff]  ;;  %v292_v48 = vld [vmem:[%s5755_s1 + $0x798] sm:$0xff] }
  0xbd   :  { %1110 = vmatpush1.msra.mxu0 %v223_v53  ;;  %1084 = vmatprep.subr.mxu1 %v132_v54  ;;  %v332_v49 = vld [vmem:[%s5755_s1 + $0x8d8] sm:$0xff]  ;;  %v291_v50 = vld [vmem:[%s5755_s1 + $0x790] sm:$0xff] }
  0xbe   :  { %1111 = vmatprep.subr.mxu0 %v220_v55  ;;  %1085 = vmatpush2.msra.mxu1 %v131_v56  ;;  %v331_v51 = vld [vmem:[%s5755_s1 + $0x8d0] sm:$0xff]  ;;  %v288_v52 = vld [vmem:[%s5755_s1 + $0x778] sm:$0xff] }
  0xbf   :  { %1112 = vmatpush1.msra.mxu0 %v219_v57  ;;  %1086 = vmatprep.subr.mxu1 %v128_v58  ;;  %v328_v53 = vld [vmem:[%s5755_s1 + $0x8b8] sm:$0xff]  ;;  %v287_v54 = vld [vmem:[%s5755_s1 + $0x770] sm:$0xff] }
  0xc0   :  { %1113 = vmatprep.subr.mxu0 %v216_v59  ;;  %1087 = vmatpush2.msra.mxu1 %v127_v60  ;;  %v327_v55 = vld [vmem:[%s5755_s1 + $0x8b0] sm:$0xff]  ;;  %v284_v56 = vld [vmem:[%s5755_s1 + $0x758] sm:$0xff] }
  0xc1   :  { %1114 = vmatpush1.msra.mxu0 %v215_v61  ;;  %1088 = vmatprep.subr.mxu1 %v124_v62  ;;  %v324_v57 = vld [vmem:[%s5755_s1 + $0x898] sm:$0xff]  ;;  %v283_v58 = vld [vmem:[%s5755_s1 + $0x750] sm:$0xff] }
  0xc2   :  { %1115 = vmatprep.subr.mxu0 %v212_v63  ;;  %1089 = vmatpush2.msra.mxu1 %v123_v0  ;;  %v323_v59 = vld [vmem:[%s5755_s1 + $0x890] sm:$0xff]  ;;  %v280_v60 = vld [vmem:[%s5755_s1 + $0x738] sm:$0xff] }
  0xc3   :  { %1116 = vmatpush1.msra.mxu0 %v211_v1  ;;  %1090 = vmatprep.subr.mxu1 %v120_v2  ;;  %v320_v61 = vld [vmem:[%s5755_s1 + $0x878] sm:$0xff]  ;;  %v279_v62 = vld [vmem:[%s5755_s1 + $0x730] sm:$0xff] }
  0xc4   :  { %1117 = vmatprep.subr.mxu0 %v208_v3  ;;  %1091 = vmatpush2.msra.mxu1 %v119_v4  ;;  %v319_v63 = vld [vmem:[%s5755_s1 + $0x870] sm:$0xff]  ;;  %v276_v0 = vld [vmem:[%s5755_s1 + $0x718] sm:$0xff] }
  0xc5   :  { %1118 = vmatpush1.msra.mxu0 %v207_v5  ;;  %1092 = vmatprep.subr.mxu1 %v116_v6  ;;  %v316_v1 = vld [vmem:[%s5755_s1 + $0x858] sm:$0xff]  ;;  %v275_v2 = vld [vmem:[%s5755_s1 + $0x710] sm:$0xff] }
  0xc6   :  { %1119 = vmatprep.subr.mxu0 %v204_v7  ;;  %1093 = vmatpush2.msra.mxu1 %v115_v8  ;;  %v315_v3 = vld [vmem:[%s5755_s1 + $0x850] sm:$0xff]  ;;  %v272_v4 = vld [vmem:[%s5755_s1 + $0x6f8] sm:$0xff] }
  0xc7   :  { %1120 = vmatpush1.msra.mxu0 %v203_v9  ;;  %1094 = vmatprep.mubr.f32.mxu1 %v2629_v14  ;;  %v312_v5 = vld [vmem:[%s5755_s1 + $0x838] sm:$0xff]  ;;  %v271_v6 = vld [vmem:[%s5755_s1 + $0x6f0] sm:$0xff] }
  0xc8   :  { %1121 = vmatprep.subr.mxu0 %v200_v10  ;;  %1172 = vmatprep.subr.mxu1 %v368_v11  ;;  %v311_v7 = vld [vmem:[%s5755_s1 + $0x830] sm:$0xff]  ;;  %v268_v8 = vld [vmem:[%s5755_s1 + $0x6d8] sm:$0xff] }
  0xc9   :  { %1095 = vmatmul.mubr.f32.vlgmr.msra.gmra.mxu1 %v2630_v17  ;;  %1122 = vmatpush1.msra.mxu0 %v199_v12  ;;  %v308_v9 = vld [vmem:[%s5755_s1 + $0x818] sm:$0xff]  ;;  %v267_v10 = vld [vmem:[%s5755_s1 + $0x6d0] sm:$0xff] }
  0xca   :  { %1173 = vmatpush1.msra.mxu1 %v367_v13  ;;  %1123 = vmatprep.subr.mxu0 %v196_v15  ;;  %v307_v11 = vld [vmem:[%s5755_s1 + $0x810] sm:$0xff]  ;;  %v264_v12 = vld [vmem:[%s5755_s1 + $0x6b8] sm:$0xff] }
  0xcb   :  { %1174 = vmatprep.subr.mxu1 %v364_v16  ;;  %1124 = vmatpush1.msra.mxu0 %v195_v18  ;;  %v432_v13 = vld [vmem:[%s5755_s1 + $0xbf8] sm:$0xff]  ;;  %v263_v14 = vld [vmem:[%s5755_s1 + $0x6b0] sm:$0xff] }
  0xcc   :  { %1175 = vmatpush1.msra.mxu1 %v363_v19  ;;  %1125 = vmatprep.subr.mxu0 %v192_v20  ;;  %v431_v15 = vld [vmem:[%s5755_s1 + $0xbf0] sm:$0xff]  ;;  %v260_v16 = vld [vmem:[%s5755_s1 + $0x698] sm:$0xff] }
  0xcd   :  { %1176 = vmatprep.subr.mxu1 %v360_v21  ;;  %1126 = vmatpush1.msra.mxu0 %v191_v22  ;;  %v428_v17 = vld [vmem:[%s5755_s1 + $0xbd8] sm:$0xff]  ;;  %v259_v18 = vld [vmem:[%s5755_s1 + $0x690] sm:$0xff] }
  0xce   :  { %1177 = vmatpush1.msra.mxu1 %v359_v23  ;;  %1127 = vmatprep.subr.mxu0 %v188_v24  ;;  %v427_v19 = vld [vmem:[%s5755_s1 + $0xbd0] sm:$0xff]  ;;  %v256_v20 = vld [vmem:[%s5755_s1 + $0x678] sm:$0xff] }
  0xcf   :  { %1178 = vmatprep.subr.mxu1 %v356_v25  ;;  %1128 = vmatpush1.msra.mxu0 %v187_v26  ;;  %v424_v21 = vld [vmem:[%s5755_s1 + $0xbb8] sm:$0xff]  ;;  %v255_v22 = vld [vmem:[%s5755_s1 + $0x670] sm:$0xff] }
  0xd0   :  { %1179 = vmatpush1.msra.mxu1 %v355_v27  ;;  %1129 = vmatprep.subr.mxu0 %v184_v28  ;;  %v423_v23 = vld [vmem:[%s5755_s1 + $0xbb0] sm:$0xff]  ;;  %v252_v24 = vld [vmem:[%s5755_s1 + $0x658] sm:$0xff] }
  0xd1   :  { %1180 = vmatprep.subr.mxu1 %v352_v29  ;;  %1130 = vmatpush1.msra.mxu0 %v183_v30  ;;  %v420_v25 = vld [vmem:[%s5755_s1 + $0xb98] sm:$0xff]  ;;  %v251_v26 = vld [vmem:[%s5755_s1 + $0x650] sm:$0xff] }
  0xd2   :  { %1181 = vmatpush1.msra.mxu1 %v351_v31  ;;  %1131 = vmatprep.subr.mxu0 %v180_v32  ;;  %v419_v27 = vld [vmem:[%s5755_s1 + $0xb90] sm:$0xff]  ;;  %v248_v28 = vld [vmem:[%s5755_s1 + $0x638] sm:$0xff] }
  0xd3   :  { %1182 = vmatprep.subr.mxu1 %v348_v33  ;;  %1132 = vmatpush1.msra.mxu0 %v179_v34  ;;  %v416_v29 = vld [vmem:[%s5755_s1 + $0xb78] sm:$0xff]  ;;  %v247_v30 = vld [vmem:[%s5755_s1 + $0x630] sm:$0xff] }
  0xd4   :  { %1183 = vmatpush1.msra.mxu1 %v347_v35  ;;  %1133 = vmatprep.subr.mxu0 %v304_v36  ;;  %v415_v31 = vld [vmem:[%s5755_s1 + $0xb70] sm:$0xff]  ;;  %v244_v32 = vld [vmem:[%s5755_s1 + $0x618] sm:$0xff] }
  0xd5   :  { %1184 = vmatprep.subr.mxu1 %v344_v37  ;;  %1134 = vmatpush2.msra.mxu0 %v303_v38  ;;  %v412_v33 = vld [vmem:[%s5755_s1 + $0xb58] sm:$0xff]  ;;  %v243_v34 = vld [vmem:[%s5755_s1 + $0x610] sm:$0xff] }
  0xd6   :  { %1185 = vmatpush1.msra.mxu1 %v343_v39  ;;  %1135 = vmatprep.subr.mxu0 %v300_v40  ;;  %v411_v35 = vld [vmem:[%s5755_s1 + $0xb50] sm:$0xff]  ;;  %v408_v36 = vld [vmem:[%s5755_s1 + $0xb38] sm:$0xff] }
  0xd7   :  { %1186 = vmatprep.subr.mxu1 %v340_v41  ;;  %1136 = vmatpush2.msra.mxu0 %v299_v42  ;;  %v496_v37 = vld [vmem:[%s5755_s1 + $0xdf8] sm:$0xff]  ;;  %v407_v39 = vld [vmem:[%s5755_s1 + $0xb30] sm:$0xff] }
  0xd8   :  { %1187 = vmatpush1.msra.mxu1 %v339_v43  ;;  %1137 = vmatprep.subr.mxu0 %v296_v44  ;;  %v2631_v38 = vld [vmem:[%s5756_s0 + $0x18] sm:$0xff]  ;;  %v495_v40 = vld [vmem:[%s5755_s1 + $0xdf0] sm:$0xff] }
  0xd9   :  { %1188 = vmatprep.subr.mxu1 %v336_v45  ;;  %1138 = vmatpush2.msra.mxu0 %v295_v46  ;;  %v2632_v41 = vld [vmem:[%s5756_s0 + $0x10] sm:$0xff]  ;;  %v404_v42 = vld [vmem:[%s5755_s1 + $0xb18] sm:$0xff] }
  0xda   :  { %1189 = vmatpush1.msra.mxu1 %v335_v47  ;;  %1139 = vmatprep.subr.mxu0 %v292_v48  ;;  %v492_v43 = vld [vmem:[%s5755_s1 + $0xdd8] sm:$0xff]  ;;  %v403_v44 = vld [vmem:[%s5755_s1 + $0xb10] sm:$0xff] }
  0xdb   :  { %1190 = vmatprep.subr.mxu1 %v332_v49  ;;  %1140 = vmatpush2.msra.mxu0 %v291_v50  ;;  %v491_v45 = vld [vmem:[%s5755_s1 + $0xdd0] sm:$0xff]  ;;  %v400_v46 = vld [vmem:[%s5755_s1 + $0xaf8] sm:$0xff] }
  0xdc   :  { %1191 = vmatpush1.msra.mxu1 %v331_v51  ;;  %1141 = vmatprep.subr.mxu0 %v288_v52  ;;  %v488_v47 = vld [vmem:[%s5755_s1 + $0xdb8] sm:$0xff]  ;;  %v399_v48 = vld [vmem:[%s5755_s1 + $0xaf0] sm:$0xff] }
  0xdd   :  { %1192 = vmatprep.subr.mxu1 %v328_v53  ;;  %1142 = vmatpush2.msra.mxu0 %v287_v54  ;;  %v487_v49 = vld [vmem:[%s5755_s1 + $0xdb0] sm:$0xff]  ;;  %v396_v50 = vld [vmem:[%s5755_s1 + $0xad8] sm:$0xff] }
  0xde   :  { %1193 = vmatpush1.msra.mxu1 %v327_v55  ;;  %1143 = vmatprep.subr.mxu0 %v284_v56  ;;  %v484_v51 = vld [vmem:[%s5755_s1 + $0xd98] sm:$0xff]  ;;  %v395_v52 = vld [vmem:[%s5755_s1 + $0xad0] sm:$0xff] }
  0xdf   :  { %1194 = vmatprep.subr.mxu1 %v324_v57  ;;  %1144 = vmatpush2.msra.mxu0 %v283_v58  ;;  %v483_v53 = vld [vmem:[%s5755_s1 + $0xd90] sm:$0xff]  ;;  %v392_v54 = vld [vmem:[%s5755_s1 + $0xab8] sm:$0xff] }
  0xe0   :  { %1195 = vmatpush1.msra.mxu1 %v323_v59  ;;  %1145 = vmatprep.subr.mxu0 %v280_v60  ;;  %v480_v55 = vld [vmem:[%s5755_s1 + $0xd78] sm:$0xff]  ;;  %v391_v56 = vld [vmem:[%s5755_s1 + $0xab0] sm:$0xff] }
  0xe1   :  { %1196 = vmatprep.subr.mxu1 %v320_v61  ;;  %1146 = vmatpush2.msra.mxu0 %v279_v62  ;;  %v479_v57 = vld [vmem:[%s5755_s1 + $0xd70] sm:$0xff]  ;;  %v388_v58 = vld [vmem:[%s5755_s1 + $0xa98] sm:$0xff] }
  0xe2   :  { %1197 = vmatpush1.msra.mxu1 %v319_v63  ;;  %1147 = vmatprep.subr.mxu0 %v276_v0  ;;  %v476_v59 = vld [vmem:[%s5755_s1 + $0xd58] sm:$0xff]  ;;  %v387_v60 = vld [vmem:[%s5755_s1 + $0xa90] sm:$0xff] }
  0xe3   :  { %1198 = vmatprep.subr.mxu1 %v316_v1  ;;  %1148 = vmatpush2.msra.mxu0 %v275_v2  ;;  %v475_v61 = vld [vmem:[%s5755_s1 + $0xd50] sm:$0xff]  ;;  %v384_v62 = vld [vmem:[%s5755_s1 + $0xa78] sm:$0xff] }
  0xe4   :  { %1199 = vmatpush1.msra.mxu1 %v315_v3  ;;  %1149 = vmatprep.subr.mxu0 %v272_v4  ;;  %v472_v63 = vld [vmem:[%s5755_s1 + $0xd38] sm:$0xff]  ;;  %v383_v0 = vld [vmem:[%s5755_s1 + $0xa70] sm:$0xff] }
  0xe5   :  { %1200 = vmatprep.subr.mxu1 %v312_v5  ;;  %1150 = vmatpush2.msra.mxu0 %v271_v6  ;;  %v471_v1 = vld [vmem:[%s5755_s1 + $0xd30] sm:$0xff]  ;;  %v380_v2 = vld [vmem:[%s5755_s1 + $0xa58] sm:$0xff] }
  0xe6   :  { %1201 = vmatpush1.msra.mxu1 %v311_v7  ;;  %1151 = vmatprep.subr.mxu0 %v268_v8  ;;  %v468_v3 = vld [vmem:[%s5755_s1 + $0xd18] sm:$0xff]  ;;  %v379_v4 = vld [vmem:[%s5755_s1 + $0xa50] sm:$0xff] }
  0xe7   :  { %1202 = vmatprep.subr.mxu1 %v308_v9  ;;  %1152 = vmatpush2.msra.mxu0 %v267_v10  ;;  %v467_v5 = vld [vmem:[%s5755_s1 + $0xd10] sm:$0xff]  ;;  %v376_v6 = vld [vmem:[%s5755_s1 + $0xa38] sm:$0xff] }
  0xe8   :  { %1203 = vmatpush1.msra.mxu1 %v307_v11  ;;  %1153 = vmatprep.subr.mxu0 %v264_v12  ;;  %v464_v7 = vld [vmem:[%s5755_s1 + $0xcf8] sm:$0xff]  ;;  %v375_v8 = vld [vmem:[%s5755_s1 + $0xa30] sm:$0xff] }
  0xe9   :  { %1204 = vmatprep.subr.mxu1 %v432_v13  ;;  %1154 = vmatpush2.msra.mxu0 %v263_v14  ;;  %v463_v9 = vld [vmem:[%s5755_s1 + $0xcf0] sm:$0xff]  ;;  %v372_v10 = vld [vmem:[%s5755_s1 + $0xa18] sm:$0xff] }
  0xea   :  { %1205 = vmatpush2.msra.mxu1 %v431_v15  ;;  %1155 = vmatprep.subr.mxu0 %v260_v16  ;;  %v460_v11 = vld [vmem:[%s5755_s1 + $0xcd8] sm:$0xff]  ;;  %v371_v12 = vld [vmem:[%s5755_s1 + $0xa10] sm:$0xff]  ;;  %v2633_v16 = vld [vmem:[%s5756_s0 + $0x28] sm:$0xff] }
  0xeb   :  { %1206 = vmatprep.subr.mxu1 %v428_v17  ;;  %1156 = vmatpush2.msra.mxu0 %v259_v18  ;;  %v459_v13 = vld [vmem:[%s5755_s1 + $0xcd0] sm:$0xff]  ;;  %v456_v14 = vld [vmem:[%s5755_s1 + $0xcb8] sm:$0xff] }
  0xec   :  { %1207 = vmatpush2.msra.mxu1 %v427_v19  ;;  %1157 = vmatprep.subr.mxu0 %v256_v20  ;;  %v624_v15 = vld [vmem:[%s5755_s1 + $0x11f8] sm:$0xff]  ;;  %v455_v17 = vld [vmem:[%s5755_s1 + $0xcb0] sm:$0xff]  ;;  %v2634_v19 = vld [vmem:[%s5756_s0 + $0x20] sm:$0xff] }
  0xed   :  { %1208 = vmatprep.subr.mxu1 %v424_v21  ;;  %1158 = vmatpush2.msra.mxu0 %v255_v22  ;;  %v623_v18 = vld [vmem:[%s5755_s1 + $0x11f0] sm:$0xff]  ;;  %v452_v20 = vld [vmem:[%s5755_s1 + $0xc98] sm:$0xff] }
  0xee   :  { %1209 = vmatpush2.msra.mxu1 %v423_v23  ;;  %1159 = vmatprep.subr.mxu0 %v252_v24  ;;  %v620_v21 = vld [vmem:[%s5755_s1 + $0x11d8] sm:$0xff]  ;;  %v451_v22 = vld [vmem:[%s5755_s1 + $0xc90] sm:$0xff] }
  0xef   :  { %1210 = vmatprep.subr.mxu1 %v420_v25  ;;  %1160 = vmatpush2.msra.mxu0 %v251_v26  ;;  %v619_v23 = vld [vmem:[%s5755_s1 + $0x11d0] sm:$0xff]  ;;  %v448_v24 = vld [vmem:[%s5755_s1 + $0xc78] sm:$0xff] }
  0xf0   :  { %1211 = vmatpush2.msra.mxu1 %v419_v27  ;;  %1161 = vmatprep.subr.mxu0 %v248_v28  ;;  %v616_v25 = vld [vmem:[%s5755_s1 + $0x11b8] sm:$0xff]  ;;  %v447_v26 = vld [vmem:[%s5755_s1 + $0xc70] sm:$0xff] }
  0xf1   :  { %1212 = vmatprep.subr.mxu1 %v416_v29  ;;  %1162 = vmatpush2.msra.mxu0 %v247_v30  ;;  %v615_v27 = vld [vmem:[%s5755_s1 + $0x11b0] sm:$0xff]  ;;  %v444_v28 = vld [vmem:[%s5755_s1 + $0xc58] sm:$0xff] }
  0xf2   :  { %1213 = vmatpush2.msra.mxu1 %v415_v31  ;;  %1163 = vmatprep.subr.mxu0 %v244_v32  ;;  %v612_v29 = vld [vmem:[%s5755_s1 + $0x1198] sm:$0xff]  ;;  %v443_v30 = vld [vmem:[%s5755_s1 + $0xc50] sm:$0xff] }
  0xf3   :  { %1214 = vmatprep.subr.mxu1 %v412_v33  ;;  %1164 = vmatpush2.msra.mxu0 %v243_v34  ;;  %v611_v31 = vld [vmem:[%s5755_s1 + $0x1190] sm:$0xff]  ;;  %v440_v32 = vld [vmem:[%s5755_s1 + $0xc38] sm:$0xff] }
  0xf4   :  { %1165 = vmatprep.mubr.f32.mxu0 %v2631_v38  ;;  %1215 = vmatpush2.msra.mxu1 %v411_v35  ;;  %v608_v33 = vld [vmem:[%s5755_s1 + $0x1178] sm:$0xff]  ;;  %v439_v34 = vld [vmem:[%s5755_s1 + $0xc30] sm:$0xff] }
  0xf5   :  { %1166 = vmatmul.mubr.f32.vlgmr.msra.gmra.mxu0 %v2632_v41  ;;  %1216 = vmatprep.subr.mxu1 %v408_v36  ;;  %v607_v35 = vld [vmem:[%s5755_s1 + $0x1170] sm:$0xff]  ;;  %v436_v36 = vld [vmem:[%s5755_s1 + $0xc18] sm:$0xff] }
  0xf6   :  { %1243 = vmatprep.subr.mxu0 %v496_v37  ;;  %1217 = vmatpush2.msra.mxu1 %v407_v39  ;;  %v604_v37 = vld [vmem:[%s5755_s1 + $0x1158] sm:$0xff]  ;;  %v435_v38 = vld [vmem:[%s5755_s1 + $0xc10] sm:$0xff] }
  0xf7   :  { %1244 = vmatpush1.msra.mxu0 %v495_v40  ;;  %1218 = vmatprep.subr.mxu1 %v404_v42  ;;  %v603_v39 = vld [vmem:[%s5755_s1 + $0x1150] sm:$0xff]  ;;  %v560_v40 = vld [vmem:[%s5755_s1 + $0xff8] sm:$0xff] }
  0xf8   :  { %1245 = vmatprep.subr.mxu0 %v492_v43  ;;  %1219 = vmatpush2.msra.mxu1 %v403_v44  ;;  %v600_v41 = vld [vmem:[%s5755_s1 + $0x1138] sm:$0xff]  ;;  %v559_v42 = vld [vmem:[%s5755_s1 + $0xff0] sm:$0xff] }
  0xf9   :  { %1246 = vmatpush1.msra.mxu0 %v491_v45  ;;  %1220 = vmatprep.subr.mxu1 %v400_v46  ;;  %v599_v43 = vld [vmem:[%s5755_s1 + $0x1130] sm:$0xff]  ;;  %v556_v44 = vld [vmem:[%s5755_s1 + $0xfd8] sm:$0xff] }
  0xfa   :  { %1247 = vmatprep.subr.mxu0 %v488_v47  ;;  %1221 = vmatpush2.msra.mxu1 %v399_v48  ;;  %v596_v45 = vld [vmem:[%s5755_s1 + $0x1118] sm:$0xff]  ;;  %v555_v46 = vld [vmem:[%s5755_s1 + $0xfd0] sm:$0xff] }
  0xfb   :  { %1248 = vmatpush1.msra.mxu0 %v487_v49  ;;  %1222 = vmatprep.subr.mxu1 %v396_v50  ;;  %v595_v47 = vld [vmem:[%s5755_s1 + $0x1110] sm:$0xff]  ;;  %v552_v48 = vld [vmem:[%s5755_s1 + $0xfb8] sm:$0xff] }
  0xfc   :  { %1249 = vmatprep.subr.mxu0 %v484_v51  ;;  %1223 = vmatpush2.msra.mxu1 %v395_v52  ;;  %v592_v49 = vld [vmem:[%s5755_s1 + $0x10f8] sm:$0xff]  ;;  %v551_v50 = vld [vmem:[%s5755_s1 + $0xfb0] sm:$0xff] }
  0xfd   :  { %1250 = vmatpush1.msra.mxu0 %v483_v53  ;;  %1224 = vmatprep.subr.mxu1 %v392_v54  ;;  %v591_v51 = vld [vmem:[%s5755_s1 + $0x10f0] sm:$0xff]  ;;  %v548_v52 = vld [vmem:[%s5755_s1 + $0xf98] sm:$0xff] }
  0xfe   :  { %1251 = vmatprep.subr.mxu0 %v480_v55  ;;  %1225 = vmatpush2.msra.mxu1 %v391_v56  ;;  %v588_v53 = vld [vmem:[%s5755_s1 + $0x10d8] sm:$0xff]  ;;  %v547_v54 = vld [vmem:[%s5755_s1 + $0xf90] sm:$0xff] }
  0xff   :  { %1252 = vmatpush1.msra.mxu0 %v479_v57  ;;  %1226 = vmatprep.subr.mxu1 %v388_v58  ;;  %v587_v55 = vld [vmem:[%s5755_s1 + $0x10d0] sm:$0xff]  ;;  %v544_v56 = vld [vmem:[%s5755_s1 + $0xf78] sm:$0xff] }
 0x100   :  { %1253 = vmatprep.subr.mxu0 %v476_v59  ;;  %1227 = vmatpush2.msra.mxu1 %v387_v60  ;;  %v584_v57 = vld [vmem:[%s5755_s1 + $0x10b8] sm:$0xff]  ;;  %v543_v58 = vld [vmem:[%s5755_s1 + $0xf70] sm:$0xff] }
 0x101   :  { %1254 = vmatpush1.msra.mxu0 %v475_v61  ;;  %1228 = vmatprep.subr.mxu1 %v384_v62  ;;  %v583_v59 = vld [vmem:[%s5755_s1 + $0x10b0] sm:$0xff]  ;;  %v540_v60 = vld [vmem:[%s5755_s1 + $0xf58] sm:$0xff] }
 0x102   :  { %1255 = vmatprep.subr.mxu0 %v472_v63  ;;  %1229 = vmatpush2.msra.mxu1 %v383_v0  ;;  %v580_v61 = vld [vmem:[%s5755_s1 + $0x1098] sm:$0xff]  ;;  %v539_v62 = vld [vmem:[%s5755_s1 + $0xf50] sm:$0xff] }
 0x103   :  { %1256 = vmatpush1.msra.mxu0 %v471_v1  ;;  %1230 = vmatprep.subr.mxu1 %v380_v2  ;;  %v579_v63 = vld [vmem:[%s5755_s1 + $0x1090] sm:$0xff]  ;;  %v536_v0 = vld [vmem:[%s5755_s1 + $0xf38] sm:$0xff] }
 0x104   :  { %1257 = vmatprep.subr.mxu0 %v468_v3  ;;  %1231 = vmatpush2.msra.mxu1 %v379_v4  ;;  %v576_v1 = vld [vmem:[%s5755_s1 + $0x1078] sm:$0xff]  ;;  %v535_v2 = vld [vmem:[%s5755_s1 + $0xf30] sm:$0xff] }
 0x105   :  { %1258 = vmatpush1.msra.mxu0 %v467_v5  ;;  %1232 = vmatprep.subr.mxu1 %v376_v6  ;;  %v575_v3 = vld [vmem:[%s5755_s1 + $0x1070] sm:$0xff]  ;;  %v532_v4 = vld [vmem:[%s5755_s1 + $0xf18] sm:$0xff] }
 0x106   :  { %1259 = vmatprep.subr.mxu0 %v464_v7  ;;  %1233 = vmatpush2.msra.mxu1 %v375_v8  ;;  %v572_v5 = vld [vmem:[%s5755_s1 + $0x1058] sm:$0xff]  ;;  %v531_v6 = vld [vmem:[%s5755_s1 + $0xf10] sm:$0xff] }
 0x107   :  { %1260 = vmatpush1.msra.mxu0 %v463_v9  ;;  %1234 = vmatprep.subr.mxu1 %v372_v10  ;;  %v571_v7 = vld [vmem:[%s5755_s1 + $0x1050] sm:$0xff]  ;;  %v528_v8 = vld [vmem:[%s5755_s1 + $0xef8] sm:$0xff] }
 0x108   :  { %1261 = vmatprep.subr.mxu0 %v460_v11  ;;  %1235 = vmatpush2.msra.mxu1 %v371_v12  ;;  %v568_v9 = vld [vmem:[%s5755_s1 + $0x1038] sm:$0xff]  ;;  %v527_v10 = vld [vmem:[%s5755_s1 + $0xef0] sm:$0xff] }
 0x109   :  { %1236 = vmatprep.mubr.f32.mxu1 %v2633_v16  ;;  %1262 = vmatpush1.msra.mxu0 %v459_v13  ;;  %v567_v11 = vld [vmem:[%s5755_s1 + $0x1030] sm:$0xff]  ;;  %v524_v12 = vld [vmem:[%s5755_s1 + $0xed8] sm:$0xff] }
 0x10a   :  { %1237 = vmatmul.mubr.f32.vlgmr.msra.gmra.mxu1 %v2634_v19  ;;  %1263 = vmatprep.subr.mxu0 %v456_v14  ;;  %v564_v13 = vld [vmem:[%s5755_s1 + $0x1018] sm:$0xff]  ;;  %v523_v14 = vld [vmem:[%s5755_s1 + $0xed0] sm:$0xff] }
 0x10b   :  { %1314 = vmatprep.subr.mxu1 %v624_v15  ;;  %1264 = vmatpush1.msra.mxu0 %v455_v17  ;;  %v563_v15 = vld [vmem:[%s5755_s1 + $0x1010] sm:$0xff]  ;;  %v520_v16 = vld [vmem:[%s5755_s1 + $0xeb8] sm:$0xff] }
 0x10c   :  { %1315 = vmatpush1.msra.mxu1 %v623_v18  ;;  %1265 = vmatprep.subr.mxu0 %v452_v20  ;;  %v648_v17 = vld [vmem:[%s5755_s1 + $0x12b8] sm:$0xff]  ;;  %v519_v18 = vld [vmem:[%s5755_s1 + $0xeb0] sm:$0xff] }
 0x10d   :  { %1316 = vmatprep.subr.mxu1 %v620_v21  ;;  %1266 = vmatpush1.msra.mxu0 %v451_v22  ;;  %v647_v19 = vld [vmem:[%s5755_s1 + $0x12b0] sm:$0xff]  ;;  %v516_v20 = vld [vmem:[%s5755_s1 + $0xe98] sm:$0xff] }
 0x10e   :  { %1317 = vmatpush1.msra.mxu1 %v619_v23  ;;  %1267 = vmatprep.subr.mxu0 %v448_v24  ;;  %v644_v21 = vld [vmem:[%s5755_s1 + $0x1298] sm:$0xff]  ;;  %v515_v22 = vld [vmem:[%s5755_s1 + $0xe90] sm:$0xff] }
 0x10f   :  { %1318 = vmatprep.subr.mxu1 %v616_v25  ;;  %1268 = vmatpush1.msra.mxu0 %v447_v26  ;;  %v643_v23 = vld [vmem:[%s5755_s1 + $0x1290] sm:$0xff]  ;;  %v512_v24 = vld [vmem:[%s5755_s1 + $0xe78] sm:$0xff] }
 0x110   :  { %1319 = vmatpush1.msra.mxu1 %v615_v27  ;;  %1269 = vmatprep.subr.mxu0 %v444_v28  ;;  %v640_v25 = vld [vmem:[%s5755_s1 + $0x1278] sm:$0xff]  ;;  %v511_v26 = vld [vmem:[%s5755_s1 + $0xe70] sm:$0xff] }
 0x111   :  { %1320 = vmatprep.subr.mxu1 %v612_v29  ;;  %1270 = vmatpush1.msra.mxu0 %v443_v30  ;;  %v639_v27 = vld [vmem:[%s5755_s1 + $0x1270] sm:$0xff]  ;;  %v508_v28 = vld [vmem:[%s5755_s1 + $0xe58] sm:$0xff] }
 0x112   :  { %1321 = vmatpush1.msra.mxu1 %v611_v31  ;;  %1271 = vmatprep.subr.mxu0 %v440_v32  ;;  %v636_v29 = vld [vmem:[%s5755_s1 + $0x1258] sm:$0xff]  ;;  %v507_v30 = vld [vmem:[%s5755_s1 + $0xe50] sm:$0xff] }
 0x113   :  { %1322 = vmatprep.subr.mxu1 %v608_v33  ;;  %1272 = vmatpush1.msra.mxu0 %v439_v34  ;;  %v635_v31 = vld [vmem:[%s5755_s1 + $0x1250] sm:$0xff]  ;;  %v504_v32 = vld [vmem:[%s5755_s1 + $0xe38] sm:$0xff] }
 0x114   :  { %1323 = vmatpush1.msra.mxu1 %v607_v35  ;;  %1273 = vmatprep.subr.mxu0 %v436_v36  ;;  %v632_v33 = vld [vmem:[%s5755_s1 + $0x1238] sm:$0xff]  ;;  %v503_v34 = vld [vmem:[%s5755_s1 + $0xe30] sm:$0xff] }
 0x115   :  { %1324 = vmatprep.subr.mxu1 %v604_v37  ;;  %1274 = vmatpush1.msra.mxu0 %v435_v38  ;;  %v631_v35 = vld [vmem:[%s5755_s1 + $0x1230] sm:$0xff]  ;;  %v500_v36 = vld [vmem:[%s5755_s1 + $0xe18] sm:$0xff] }
 0x116   :  { %1325 = vmatpush1.msra.mxu1 %v603_v39  ;;  %1275 = vmatprep.subr.mxu0 %v560_v40  ;;  %v628_v37 = vld [vmem:[%s5755_s1 + $0x1218] sm:$0xff]  ;;  %v499_v38 = vld [vmem:[%s5755_s1 + $0xe10] sm:$0xff] }
 0x117   :  { %1326 = vmatprep.subr.mxu1 %v600_v41  ;;  %1276 = vmatpush2.msra.mxu0 %v559_v42  ;;  %v627_v39 = vld [vmem:[%s5755_s1 + $0x1210] sm:$0xff]  ;;  %v2635_v40 = vld [vmem:[%s5756_s0 + $0x38] sm:$0xff]  ;;  %v1450_v41 = vld [vmem:[%s5757_s3 + $0x1e8] sm:$0xff] }
 0x118   :  { %1327 = vmatpush1.msra.mxu1 %v599_v43  ;;  %1277 = vmatprep.subr.mxu0 %v556_v44  ;;  %v2636_v42 = vld [vmem:[%s5756_s0 + $0x48] sm:$0xff]  ;;  %v1449_v43 = vld [vmem:[%s5757_s3 + $0x1e0] sm:$0xff]  ;;  %v2637_v44 = vld [vmem:[%s5756_s0 + $0x30] sm:$0xff] }
 0x119   :  { %1328 = vmatprep.subr.mxu1 %v596_v45  ;;  %1278 = vmatpush2.msra.mxu0 %v555_v46  ;;  %v2638_v45 = vld [vmem:[%s5756_s0 + $0x40] sm:$0xff]  ;;  %v1446_v46 = vld [vmem:[%s5757_s3 + $0x1c8] sm:$0xff] }
 0x11a   :  { %1329 = vmatpush1.msra.mxu1 %v595_v47  ;;  %1279 = vmatprep.subr.mxu0 %v552_v48  ;;  %v1445_v47 = vld [vmem:[%s5757_s3 + $0x1c0] sm:$0xff]  ;;  %v1578_v48 = vld [vmem:[%s5757_s3 + $0x5e8] sm:$0xff] }
 0x11b   :  { %1330 = vmatprep.subr.mxu1 %v592_v49  ;;  %1280 = vmatpush2.msra.mxu0 %v551_v50  ;;  %v1577_v49 = vld [vmem:[%s5757_s3 + $0x5e0] sm:$0xff]  ;;  %v1574_v50 = vld [vmem:[%s5757_s3 + $0x5c8] sm:$0xff] }
 0x11c   :  { %1331 = vmatpush1.msra.mxu1 %v591_v51  ;;  %1281 = vmatprep.subr.mxu0 %v548_v52  ;;  %v1442_v51 = vld [vmem:[%s5757_s3 + $0x1a8] sm:$0xff]  ;;  %v1573_v52 = vld [vmem:[%s5757_s3 + $0x5c0] sm:$0xff] }
 0x11d   :  { %1332 = vmatprep.subr.mxu1 %v588_v53  ;;  %1282 = vmatpush2.msra.mxu0 %v547_v54  ;;  %v1441_v53 = vld [vmem:[%s5757_s3 + $0x1a0] sm:$0xff]  ;;  %v1570_v54 = vld [vmem:[%s5757_s3 + $0x5a8] sm:$0xff] }
 0x11e   :  { %1333 = vmatpush1.msra.mxu1 %v587_v55  ;;  %1283 = vmatprep.subr.mxu0 %v544_v56  ;;  %v1438_v55 = vld [vmem:[%s5757_s3 + $0x188] sm:$0xff]  ;;  %v1569_v56 = vld [vmem:[%s5757_s3 + $0x5a0] sm:$0xff] }
 0x11f   :  { %1334 = vmatprep.subr.mxu1 %v584_v57  ;;  %1284 = vmatpush2.msra.mxu0 %v543_v58  ;;  %v1437_v57 = vld [vmem:[%s5757_s3 + $0x180] sm:$0xff]  ;;  %v1566_v58 = vld [vmem:[%s5757_s3 + $0x588] sm:$0xff] }
 0x120   :  { %1335 = vmatpush1.msra.mxu1 %v583_v59  ;;  %1285 = vmatprep.subr.mxu0 %v540_v60  ;;  %v1434_v59 = vld [vmem:[%s5757_s3 + $0x168] sm:$0xff]  ;;  %v1565_v60 = vld [vmem:[%s5757_s3 + $0x580] sm:$0xff] }
 0x121   :  { %1336 = vmatprep.subr.mxu1 %v580_v61  ;;  %1286 = vmatpush2.msra.mxu0 %v539_v62  ;;  %v1433_v61 = vld [vmem:[%s5757_s3 + $0x160] sm:$0xff]  ;;  %v1562_v62 = vld [vmem:[%s5757_s3 + $0x568] sm:$0xff] }
 0x122   :  { %1337 = vmatpush1.msra.mxu1 %v579_v63  ;;  %1287 = vmatprep.subr.mxu0 %v536_v0  ;;  %v1430_v63 = vld [vmem:[%s5757_s3 + $0x148] sm:$0xff]  ;;  %v1561_v0 = vld [vmem:[%s5757_s3 + $0x560] sm:$0xff] }
 0x123   :  { %1338 = vmatprep.subr.mxu1 %v576_v1  ;;  %1288 = vmatpush2.msra.mxu0 %v535_v2  ;;  %v1429_v1 = vld [vmem:[%s5757_s3 + $0x140] sm:$0xff]  ;;  %v1558_v2 = vld [vmem:[%s5757_s3 + $0x548] sm:$0xff] }
 0x124   :  { %1339 = vmatpush1.msra.mxu1 %v575_v3  ;;  %1289 = vmatprep.subr.mxu0 %v532_v4  ;;  %v1426_v3 = vld [vmem:[%s5757_s3 + $0x128] sm:$0xff]  ;;  %v1557_v4 = vld [vmem:[%s5757_s3 + $0x540] sm:$0xff] }
 0x125   :  { %1340 = vmatprep.subr.mxu1 %v572_v5  ;;  %1290 = vmatpush2.msra.mxu0 %v531_v6  ;;  %v1425_v5 = vld [vmem:[%s5757_s3 + $0x120] sm:$0xff]  ;;  %v1554_v6 = vld [vmem:[%s5757_s3 + $0x528] sm:$0xff] }
 0x126   :  { %1341 = vmatpush1.msra.mxu1 %v571_v7  ;;  %1291 = vmatprep.subr.mxu0 %v528_v8  ;;  %v1422_v7 = vld [vmem:[%s5757_s3 + $0x108] sm:$0xff]  ;;  %v1421_v8 = vld [vmem:[%s5757_s3 + $0x100] sm:$0xff] }
 0x127   :  { %1342 = vmatprep.subr.mxu1 %v568_v9  ;;  %1292 = vmatpush2.msra.mxu0 %v527_v10  ;;  %v1418_v9 = vld [vmem:[%s5757_s3 + $0xe8] sm:$0xff]  ;;  %v1417_v10 = vld [vmem:[%s5757_s3 + $0xe0] sm:$0xff] }
 0x128   :  { %1343 = vmatpush1.msra.mxu1 %v567_v11  ;;  %1293 = vmatprep.subr.mxu0 %v524_v12  ;;  %v1414_v11 = vld [vmem:[%s5757_s3 + $0xc8] sm:$0xff]  ;;  %v1413_v12 = vld [vmem:[%s5757_s3 + $0xc0] sm:$0xff] }
 0x129   :  { %1344 = vmatprep.subr.mxu1 %v564_v13  ;;  %1294 = vmatpush2.msra.mxu0 %v523_v14  ;;  %v1410_v13 = vld [vmem:[%s5757_s3 + $0xa8] sm:$0xff]  ;;  %v1409_v14 = vld [vmem:[%s5757_s3 + $0xa0] sm:$0xff] }
 0x12a   :  { %1345 = vmatpush1.msra.mxu1 %v563_v15  ;;  %1295 = vmatprep.subr.mxu0 %v520_v16  ;;  %v1553_v15 = vld [vmem:[%s5757_s3 + $0x520] sm:$0xff]  ;;  %v1550_v16 = vld [vmem:[%s5757_s3 + $0x508] sm:$0xff] }
 0x12b   :  { %1366 = vmatprep.subr.mxu1 %v648_v17  ;;  %1296 = vmatpush2.msra.mxu0 %v519_v18  ;;  %v1406_v17 = vld [vmem:[%s5757_s3 + $0x88] sm:$0xff]  ;;  %v1405_v18 = vld [vmem:[%s5757_s3 + $0x80] sm:$0xff] }
 0x12c   :  { %1367 = vmatpush2.msra.mxu1 %v647_v19  ;;  %1297 = vmatprep.subr.mxu0 %v516_v20  ;;  %v1549_v19 = vld [vmem:[%s5757_s3 + $0x500] sm:$0xff]  ;;  %v1546_v20 = vld [vmem:[%s5757_s3 + $0x4e8] sm:$0xff] }
 0x12d   :  { %1368 = vmatprep.subr.mxu1 %v644_v21  ;;  %1298 = vmatpush2.msra.mxu0 %v515_v22  ;;  %v1545_v21 = vld [vmem:[%s5757_s3 + $0x4e0] sm:$0xff]  ;;  %v1402_v22 = vld [vmem:[%s5757_s3 + $0x68] sm:$0xff] }
 0x12e   :  { %1369 = vmatpush2.msra.mxu1 %v643_v23  ;;  %1299 = vmatprep.subr.mxu0 %v512_v24  ;;  %v1542_v23 = vld [vmem:[%s5757_s3 + $0x4c8] sm:$0xff]  ;;  %v1401_v24 = vld [vmem:[%s5757_s3 + $0x60] sm:$0xff] }
 0x12f   :  { %1370 = vmatprep.subr.mxu1 %v640_v25  ;;  %1300 = vmatpush2.msra.mxu0 %v511_v26  ;;  %v1541_v25 = vld [vmem:[%s5757_s3 + $0x4c0] sm:$0xff]  ;;  %v1398_v26 = vld [vmem:[%s5757_s3 + $0x48] sm:$0xff] }
 0x130   :  { %1371 = vmatpush2.msra.mxu1 %v639_v27  ;;  %1301 = vmatprep.subr.mxu0 %v508_v28  ;;  %v1538_v27 = vld [vmem:[%s5757_s3 + $0x4a8] sm:$0xff]  ;;  %v1397_v28 = vld [vmem:[%s5757_s3 + $0x40] sm:$0xff] }
 0x131   :  { %1372 = vmatprep.subr.mxu1 %v636_v29  ;;  %1302 = vmatpush2.msra.mxu0 %v507_v30  ;;  %v1537_v29 = vld [vmem:[%s5757_s3 + $0x4a0] sm:$0xff]  ;;  %v1394_v30 = vld [vmem:[%s5757_s3 + $0x28] sm:$0xff] }
 0x132   :  { %1373 = vmatpush2.msra.mxu1 %v635_v31  ;;  %1303 = vmatprep.subr.mxu0 %v504_v32  ;;  %v1534_v31 = vld [vmem:[%s5757_s3 + $0x488] sm:$0xff]  ;;  %v1393_v32 = vld [vmem:[%s5757_s3 + $0x20] sm:$0xff] }
 0x133   :  { %1374 = vmatprep.subr.mxu1 %v632_v33  ;;  %1304 = vmatpush2.msra.mxu0 %v503_v34  ;;  %v1533_v33 = vld [vmem:[%s5757_s3 + $0x480] sm:$0xff]  ;;  %v1390_v34 = vld [vmem:[%s5757_s3 + $0x8] sm:$0xff] }
 0x134   :  { %1375 = vmatpush2.msra.mxu1 %v631_v35  ;;  %1305 = vmatprep.subr.mxu0 %v500_v36  ;;  %v1530_v35 = vld [vmem:[%s5757_s3 + $0x468] sm:$0xff]  ;;  %v1389_v36 = vld [vmem:[%s5757_s3] sm:$0xff] }
 0x135   :  { %1376 = vmatprep.subr.mxu1 %v628_v37  ;;  %1306 = vmatpush2.msra.mxu0 %v499_v38  ;;  %v1529_v37 = vld [vmem:[%s5757_s3 + $0x460] sm:$0xff]  ;;  %v1514_v38 = vld [vmem:[%s5757_s3 + $0x3e8] sm:$0xff] }
 0x136   :  { %1307 = vmatprep.mubr.f32.mxu0 %v2635_v40  ;;  %1377 = vmatpush2.msra.mxu1 %v627_v39  ;;  %v1526_v39 = vld [vmem:[%s5757_s3 + $0x448] sm:$0xff]  ;;  %v1513_v40 = vld [vmem:[%s5757_s3 + $0x3e0] sm:$0xff] }
 0x137   :  { %2542 = vmatprep.mubr.msk.f32.mxu1 %vm671_vm0, %v2636_v42  ;;  %1308 = vmatmul.mubr.f32.vlgmr.msra.gmra.mxu0 %v2637_v44  ;;  %v651_v42 = vlaneseq  ;;  %v1522_v44 = vld [vmem:[%s5757_s3 + $0x428] sm:$0xff] }
 0x138   :  { %1379 = vmatmul.mubr.f32.vlgmr.msra.gmra.mxu1 %v2638_v45  ;;  %1667 = vmatprep.subr.mxu0 %v1450_v41  ;;  %v1525_v41 = vld [vmem:[%s5757_s3 + $0x440] sm:$0xff] }
 0x139   :  { %1668 = vmatpush1.msra.mxu0 %v1449_v43  ;;  %1738 = vmatprep.subr.mxu1 %v1578_v48  ;;  %v1510_v43 = vld [vmem:[%s5757_s3 + $0x3c8] sm:$0xff]  ;;  %v1509_v45 = vld [vmem:[%s5757_s3 + $0x3c0] sm:$0xff] }
 0x13a   :  { %1669 = vmatprep.subr.mxu0 %v1446_v46  ;;  %1739 = vmatpush1.msra.mxu1 %v1577_v49  ;;  %v1521_v46 = vld [vmem:[%s5757_s3 + $0x420] sm:$0xff]  ;;  %v1518_v48 = vld [vmem:[%s5757_s3 + $0x408] sm:$0xff] }
 0x13b   :  { %1670 = vmatpush1.msra.mxu0 %v1445_v47  ;;  %1740 = vmatprep.subr.mxu1 %v1574_v50  ;;  %v1506_v47 = vld [vmem:[%s5757_s3 + $0x3a8] sm:$0xff]  ;;  %v1505_v49 = vld [vmem:[%s5757_s3 + $0x3a0] sm:$0xff] }
 0x13c   :  { %1671 = vmatprep.subr.mxu0 %v1442_v51  ;;  %1741 = vmatpush1.msra.mxu1 %v1573_v52  ;;  %v1517_v50 = vld [vmem:[%s5757_s3 + $0x400] sm:$0xff]  ;;  %v4783_v51 = vshrl.u32 %v651_v42, 7  ;;  %v1502_v52 = vld [vmem:[%s5757_s3 + $0x388] sm:$0xff] }
 0x13d   :  { %1672 = vmatpush1.msra.mxu0 %v1441_v53  ;;  %1742 = vmatprep.subr.mxu1 %v1570_v54  ;;  %v1642_v53 = vld [vmem:[%s5757_s3 + $0x7e8] sm:$0xff]  ;;  %v1501_v54 = vld [vmem:[%s5757_s3 + $0x380] sm:$0xff] }
 0x13e   :  { %1673 = vmatprep.subr.mxu0 %v1438_v55  ;;  %1743 = vmatpush1.msra.mxu1 %v1569_v56  ;;  %v1641_v55 = vld [vmem:[%s5757_s3 + $0x7e0] sm:$0xff]  ;;  %v1498_v56 = vld [vmem:[%s5757_s3 + $0x368] sm:$0xff] }
 0x13f   :  { %1674 = vmatpush1.msra.mxu0 %v1437_v57  ;;  %1744 = vmatprep.subr.mxu1 %v1566_v58  ;;  %v1638_v57 = vld [vmem:[%s5757_s3 + $0x7c8] sm:$0xff]  ;;  %v1497_v58 = vld [vmem:[%s5757_s3 + $0x360] sm:$0xff] }
 0x140   :  { %1675 = vmatprep.subr.mxu0 %v1434_v59  ;;  %1745 = vmatpush1.msra.mxu1 %v1565_v60  ;;  %v1637_v59 = vld [vmem:[%s5757_s3 + $0x7c0] sm:$0xff]  ;;  %v653_v60 = vsub.s32 0, %v4783_v51  ;;  %v1606_v42 = vld [vmem:[%s5757_s3 + $0x6c8] sm:$0xff] }
 0x141   :  { %1676 = vmatpush1.msra.mxu0 %v1433_v61  ;;  %1746 = vmatprep.subr.mxu1 %v1562_v62  ;;  %v1494_v61 = vld [vmem:[%s5757_s3 + $0x348] sm:$0xff] }
 0x142   :  { %1677 = vmatprep.subr.mxu0 %v1430_v63  ;;  %1747 = vmatpush1.msra.mxu1 %v1561_v0  ;;  %v1634_v62 = vld [vmem:[%s5757_s3 + $0x7a8] sm:$0xff]  ;;  %v4819_v63 = vld [vmem:[%s5758_s2] sm:$0xf] }
 0x143   :  { %1678 = vmatpush1.msra.mxu0 %v1429_v1  ;;  %1748 = vmatprep.subr.mxu1 %v1558_v2  ;;  %v1493_v0 = vld [vmem:[%s5757_s3 + $0x340] sm:$0xff]  ;;  %v657_v2 = vsub.s32 1, %v4783_v51 }
 0x144   :  { %1679 = vmatprep.subr.mxu0 %v1426_v3  ;;  %1749 = vmatpush1.msra.mxu1 %v1557_v4  ;;  %v1633_v1 = vld [vmem:[%s5757_s3 + $0x7a0] sm:$0xff]  ;;  %v1490_v3 = vld [vmem:[%s5757_s3 + $0x328] sm:$0xff] }
 0x145   :  { %1680 = vmatpush1.msra.mxu0 %v1425_v5  ;;  %1750 = vmatprep.subr.mxu1 %v1554_v6  ;;  %v1630_v4 = vld [vmem:[%s5757_s3 + $0x788] sm:$0xff]  ;;  %v741_v5 = vpop.f32.mrf.mxu0  ;;  %v1489_v6 = vld [vmem:[%s5757_s3 + $0x320] sm:$0xff] }
 0x146   :  { %1681 = vmatprep.subr.mxu0 %v1422_v7  ;;  %1751 = vmatpush1.msra.mxu1 %v1553_v15  ;;  %v1629_v7 = vld [vmem:[%s5757_s3 + $0x780] sm:$0xff]  ;;  %v1622_v15 = vld [vmem:[%s5757_s3 + $0x748] sm:$0xff] }
 0x147   :  { %1682 = vmatpush1.msra.mxu0 %v1421_v8  ;;  %1752 = vmatprep.subr.mxu1 %v1550_v16  ;;  %v654_v8 = vrot.slane %v4819_v63, %v653_v60  ;;  %v812_v16 = vpop.f32.mrf.mxu1 }
 0x148   :  { %1683 = vmatprep.subr.mxu0 %v1418_v9  ;;  %1753 = vmatpush1.msra.mxu1 %v1549_v19  ;;  %v1486_v9 = vld [vmem:[%s5757_s3 + $0x308] sm:$0xff]  ;;  %v1621_v19 = vld [vmem:[%s5757_s3 + $0x740] sm:$0xff] }
 0x149   :  { %1684 = vmatpush1.msra.mxu0 %v1417_v10  ;;  %1754 = vmatprep.subr.mxu1 %v1546_v20  ;;  %v1626_v10 = vld [vmem:[%s5757_s3 + $0x768] sm:$0xff]  ;;  %v742_v20 = vadd.f32 %v741_v5, %v654_v8  ;;  %v1451_v5 = vld [vmem:[%s5757_s3 + $0x1f0] sm:$0xff] }
 0x14a   :  { %1685 = vmatprep.subr.mxu0 %v1414_v11  ;;  %1755 = vmatpush1.msra.mxu1 %v1545_v21  ;;  %v1485_v11 = vld [vmem:[%s5757_s3 + $0x300] sm:$0xff]  ;;  %v1478_v21 = vld [vmem:[%s5757_s3 + $0x2c8] sm:$0xff]  ;;  %v1447_v8 = vld [vmem:[%s5757_s3 + $0x1d0] sm:$0xff] }
 0x14b   :  { %1686 = vmatpush1.msra.mxu0 %v1413_v12  ;;  %1756 = vmatprep.subr.mxu1 %v1542_v23  ;;  %v1625_v12 = vld [vmem:[%s5757_s3 + $0x760] sm:$0xff] }
 0x14c   :  { %1687 = vmatprep.subr.mxu0 %v1410_v13  ;;  %1757 = vmatpush1.msra.mxu1 %v1541_v25  ;;  %v658_v13 = vrot.slane %v4819_v63, %v657_v2  ;;  %v1617_v25 = vld [vmem:[%s5757_s3 + $0x720] sm:$0xff] }
 0x14d   :  { %1688 = vmatpush1.msra.mxu0 %v1409_v14  ;;  %1758 = vmatprep.subr.mxu1 %v1538_v27  ;;  %v1482_v14 = vld [vmem:[%s5757_s3 + $0x2e8] sm:$0xff] }
 0x14e   :  { %1689 = vmatprep.subr.mxu0 %v1406_v17  ;;  %1759 = vmatpush1.msra.mxu1 %v1537_v29  ;;  %v743_v17 = vpop.f32.mrf.mxu0  ;;  %v1474_v27 = vld [vmem:[%s5757_s3 + $0x2a8] sm:$0xff]  ;;  %v814_v29 = vpop.f32.mrf.mxu1 }
 0x14f   :  { %1690 = vmatpush1.msra.mxu0 %v1405_v18  ;;  %1760 = vmatprep.subr.mxu1 %v1534_v31  ;;  %v1481_v18 = vld [vmem:[%s5757_s3 + $0x2e0] sm:$0xff] }
 0x150   :  { %1691 = vmatprep.subr.mxu0 %v1402_v22  ;;  %1761 = vmatpush1.msra.mxu1 %v1533_v33  ;;  %v1618_v22 = vld [vmem:[%s5757_s3 + $0x728] sm:$0xff]  ;;  %v883_v23 = vpop.f32.mrf.mxu0  ;;  %v1613_v31 = vld [vmem:[%s5757_s3 + $0x700] sm:$0xff] }
 0x151   :  { %1692 = vmatpush1.msra.mxu0 %v1401_v24  ;;  %1762 = vmatprep.subr.mxu1 %v1530_v35  ;;  %v1477_v24 = vld [vmem:[%s5757_s3 + $0x2c0] sm:$0xff]  ;;  %v1470_v33 = vld [vmem:[%s5757_s3 + $0x288] sm:$0xff]  ;;  %v954_v35 = vpop.f32.mrf.mxu1 }
 0x152   :  { %1693 = vmatprep.subr.mxu0 %v1398_v26  ;;  %1763 = vmatpush1.msra.mxu1 %v1529_v37  ;;  %v744_v26 = vadd.f32 %v743_v17, %v658_v13  ;;  %v1469_v37 = vld [vmem:[%s5757_s3 + $0x280] sm:$0xff]  ;;  %v1586_v13 = vld [vmem:[%s5757_s3 + $0x628] sm:$0xff] }
 0x153   :  { %1694 = vmatpush1.msra.mxu0 %v1397_v28  ;;  %1764 = vmatprep.subr.mxu1 %v1526_v39  ;;  %v1614_v28 = vld [vmem:[%s5757_s3 + $0x708] sm:$0xff] }
 0x154   :  { %1695 = vmatprep.subr.mxu0 %v1394_v30  ;;  %1765 = vmatpush1.msra.mxu1 %v1525_v41  ;;  %v1473_v30 = vld [vmem:[%s5757_s3 + $0x2a0] sm:$0xff]  ;;  %v815_v39 = vadd.f32 %v814_v29, %v744_v26  ;;  %v1466_v41 = vld [vmem:[%s5757_s3 + $0x268] sm:$0xff]  ;;  %v1424_v26 = vld [vmem:[%s5757_s3 + $0x118] sm:$0xff] }
 0x155   :  { %1696 = vmatpush1.msra.mxu0 %v1393_v32  ;;  %1766 = vmatprep.subr.mxu1 %v1522_v44  ;;  %v813_v32 = vadd.f32 %v812_v16, %v742_v20  ;;  %v1605_v44 = vld [vmem:[%s5757_s3 + $0x6c0] sm:$0xff]  ;;  %v1439_v16 = vld [vmem:[%s5757_s3 + $0x190] sm:$0xff]  ;;  %v1582_v17 = vld [vmem:[%s5757_s3 + $0x608] sm:$0xff] }
 0x156   :  { %1697 = vmatprep.subr.mxu0 %v1390_v34  ;;  %1767 = vmatpush1.msra.mxu1 %v1521_v46  ;;  %v1610_v34 = vld [vmem:[%s5757_s3 + $0x6e8] sm:$0xff]  ;;  %v1435_v20 = vld [vmem:[%s5757_s3 + $0x170] sm:$0xff] }
 0x157   :  { %1698 = vmatpush1.msra.mxu0 %v1389_v36  ;;  %1768 = vmatprep.subr.mxu1 %v1518_v48  ;;  %v885_v36 = vpop.f32.mrf.mxu0  ;;  %v1462_v46 = vld [vmem:[%s5757_s3 + $0x248] sm:$0xff]  ;;  %v956_v48 = vpop.f32.mrf.mxu1  ;;  %v1419_v29 = vld [vmem:[%s5757_s3 + $0xf0] sm:$0xff] }
 0x158   :  { %1699 = vmatprep.subr.mxu0 %v1514_v38  ;;  %1769 = vmatpush1.msra.mxu1 %v1517_v50  ;;  %v1609_v38 = vld [vmem:[%s5757_s3 + $0x6e0] sm:$0xff] }
 0x159   :  { %1700 = vmatpush2.msra.mxu0 %v1513_v40  ;;  %1770 = vmatprep.subr.mxu1 %v1642_v53  ;;  %v884_v40 = vadd.f32 %v883_v23, %v813_v32  ;;  %v1601_v50 = vld [vmem:[%s5757_s3 + $0x6a0] sm:$0xff]  ;;  %v1458_v53 = vld [vmem:[%s5757_s3 + $0x228] sm:$0xff]  ;;  %v1431_v23 = vld [vmem:[%s5757_s3 + $0x150] sm:$0xff] }
 0x15a   :  { %1701 = vmatprep.subr.mxu0 %v1510_v43  ;;  %1771 = vmatpush2.msra.mxu1 %v1641_v55  ;;  %v1465_v43 = vld [vmem:[%s5757_s3 + $0x260] sm:$0xff]  ;;  %v1412_v32 = vld [vmem:[%s5757_s3 + $0xb8] sm:$0xff] }
 0x15b   :  { %1702 = vmatpush2.msra.mxu0 %v1509_v45  ;;  %1772 = vmatprep.subr.mxu1 %v1638_v57  ;;  %v886_v45 = vadd.f32 %v885_v36, %v815_v39  ;;  %v1597_v57 = vld [vmem:[%s5757_s3 + $0x680] sm:$0xff]  ;;  %v1404_v36 = vld [vmem:[%s5757_s3 + $0x78] sm:$0xff]  ;;  %v1399_v39 = vld [vmem:[%s5757_s3 + $0x50] sm:$0xff] }
 0x15c   :  { %1703 = vmatprep.subr.mxu0 %v1506_v47  ;;  %1773 = vmatpush2.msra.mxu1 %v1637_v59  ;;  %v1602_v47 = vld [vmem:[%s5757_s3 + $0x6a8] sm:$0xff] }
 0x15d   :  { %1704 = vmatpush2.msra.mxu0 %v1505_v49  ;;  %1774 = vmatprep.subr.mxu1 %v1634_v62  ;;  %v1461_v49 = vld [vmem:[%s5757_s3 + $0x240] sm:$0xff]  ;;  %v1594_v62 = vld [vmem:[%s5757_s3 + $0x668] sm:$0xff] }
 0x15e   :  { %1705 = vmatprep.subr.mxu0 %v1502_v52  ;;  %1775 = vmatpush2.msra.mxu1 %v1633_v1  ;;  %v955_v52 = vadd.f32 %v954_v35, %v884_v40  ;;  %v1453_v1 = vld [vmem:[%s5757_s3 + $0x200] sm:$0xff]  ;;  %v1407_v35 = vld [vmem:[%s5757_s3 + $0x90] sm:$0xff]  ;;  %v1396_v40 = vld [vmem:[%s5757_s3 + $0x38] sm:$0xff] }
 0x15f   :  { %1706 = vmatpush2.msra.mxu0 %v1501_v54  ;;  %1776 = vmatprep.subr.mxu1 %v1630_v4  ;;  %v1598_v54 = vld [vmem:[%s5757_s3 + $0x688] sm:$0xff]  ;;  %v1452_v4 = vld [vmem:[%s5757_s3 + $0x1f8] sm:$0xff] }
 0x160   :  { %1707 = vmatprep.subr.mxu0 %v1498_v56  ;;  %1777 = vmatpush2.msra.mxu1 %v1629_v7  ;;  %v1457_v56 = vld [vmem:[%s5757_s3 + $0x220] sm:$0xff] }
 0x161   :  { %1708 = vmatpush2.msra.mxu0 %v1497_v58  ;;  %1778 = vmatprep.subr.mxu1 %v1626_v10  ;;  %v957_v58 = vadd.f32 %v956_v48, %v886_v45  ;;  %v1593_v7 = vld [vmem:[%s5757_s3 + $0x660] sm:$0xff]  ;;  %v1444_v10 = vld [vmem:[%s5757_s3 + $0x1b8] sm:$0xff]  ;;  %v1515_v45 = vld [vmem:[%s5757_s3 + $0x3f0] sm:$0xff] }
 0x162   :  { %1709 = vmatprep.subr.mxu0 %v1494_v61  ;;  %1779 = vmatpush2.msra.mxu1 %v1625_v12  ;;  %v1454_v61 = vld [vmem:[%s5757_s3 + $0x208] sm:$0xff]  ;;  %v1443_v12 = vld [vmem:[%s5757_s3 + $0x1b0] sm:$0xff]  ;;  %v1508_v48 = vld [vmem:[%s5757_s3 + $0x3b8] sm:$0xff] }
 0x163   :  { %1710 = vmatpush2.msra.mxu0 %v1493_v0  ;;  %1780 = vmatprep.subr.mxu1 %v1622_v15  ;;  %v1585_v15 = vld [vmem:[%s5757_s3 + $0x620] sm:$0xff] }
 0x164   :  { %1711 = vmatprep.subr.mxu0 %v1490_v3  ;;  %1781 = vmatpush2.msra.mxu1 %v1621_v19  ;;  %v1581_v19 = vld [vmem:[%s5757_s3 + $0x600] sm:$0xff] }
 0x165   :  { %1712 = vmatpush2.msra.mxu0 %v1489_v6  ;;  %1782 = vmatprep.subr.mxu1 %v1618_v22  ;;  %v1448_v6 = vld [vmem:[%s5757_s3 + $0x1d8] sm:$0xff] }
 0x166   :  { %1713 = vmatprep.subr.mxu0 %v1486_v9  ;;  %1783 = vmatpush2.msra.mxu1 %v1617_v25  ;;  %v1590_v9 = vld [vmem:[%s5757_s3 + $0x648] sm:$0xff]  ;;  %v1432_v22 = vld [vmem:[%s5757_s3 + $0x158] sm:$0xff]  ;;  %v1427_v25 = vld [vmem:[%s5757_s3 + $0x130] sm:$0xff] }
 0x167   :  { %1714 = vmatpush2.msra.mxu0 %v1485_v11  ;;  %1784 = vmatprep.subr.mxu1 %v1614_v28  ;;  %v1589_v11 = vld [vmem:[%s5757_s3 + $0x640] sm:$0xff]  ;;  %v1420_v28 = vld [vmem:[%s5757_s3 + $0xf8] sm:$0xff] }
 0x168   :  { %1715 = vmatprep.subr.mxu0 %v1482_v14  ;;  %1785 = vmatpush2.msra.mxu1 %v1613_v31  ;;  %v1440_v14 = vld [vmem:[%s5757_s3 + $0x198] sm:$0xff]  ;;  %v1415_v31 = vld [vmem:[%s5757_s3 + $0xd0] sm:$0xff] }
 0x169   :  { %1716 = vmatpush2.msra.mxu0 %v1481_v18  ;;  %1786 = vmatprep.subr.mxu1 %v1610_v34  ;;  %v1436_v18 = vld [vmem:[%s5757_s3 + $0x178] sm:$0xff] }
 0x16a   :  { %1717 = vmatprep.subr.mxu0 %v1478_v21  ;;  %1787 = vmatpush2.msra.mxu1 %v1609_v38  ;;  %v1580_v21 = vld [vmem:[%s5757_s3 + $0x5f8] sm:$0xff] }
 0x16b   :  { %1718 = vmatpush2.msra.mxu0 %v1477_v24  ;;  %1788 = vmatprep.subr.mxu1 %v1606_v42  ;;  %v1428_v24 = vld [vmem:[%s5757_s3 + $0x138] sm:$0xff] }
 0x16c   :  { %1719 = vmatprep.subr.mxu0 %v1474_v27  ;;  %1789 = vmatpush2.msra.mxu1 %v1605_v44  ;;  %v1423_v27 = vld [vmem:[%s5757_s3 + $0x110] sm:$0xff]  ;;  %v1408_v34 = vld [vmem:[%s5757_s3 + $0x98] sm:$0xff] }
 0x16d   :  { %1720 = vmatpush2.msra.mxu0 %v1473_v30  ;;  %1790 = vmatprep.subr.mxu1 %v1602_v47  ;;  %v1416_v30 = vld [vmem:[%s5757_s3 + $0xd8] sm:$0xff]  ;;  %v1511_v47 = vld [vmem:[%s5757_s3 + $0x3d0] sm:$0xff] }
 0x16e   :  { %1721 = vmatprep.subr.mxu0 %v1470_v33  ;;  %1791 = vmatpush2.msra.mxu1 %v1601_v50  ;;  %v1411_v33 = vld [vmem:[%s5757_s3 + $0xb0] sm:$0xff]  ;;  %v1400_v38 = vld [vmem:[%s5757_s3 + $0x58] sm:$0xff] }
 0x16f   :  { %1722 = vmatpush2.msra.mxu0 %v1469_v37  ;;  %1792 = vmatprep.subr.mxu1 %v1598_v54  ;;  %v1403_v37 = vld [vmem:[%s5757_s3 + $0x70] sm:$0xff]  ;;  %v1392_v42 = vld [vmem:[%s5757_s3 + $0x18] sm:$0xff] }
 0x170   :  { %1723 = vmatprep.subr.mxu0 %v1466_v41  ;;  %1793 = vmatpush2.msra.mxu1 %v1597_v57  ;;  %v1395_v41 = vld [vmem:[%s5757_s3 + $0x30] sm:$0xff]  ;;  %v1516_v44 = vld [vmem:[%s5757_s3 + $0x3f8] sm:$0xff] }
 0x171   :  { %1724 = vmatpush2.msra.mxu0 %v1465_v43  ;;  %1794 = vmatprep.subr.mxu1 %v1594_v62  ;;  %v1391_v43 = vld [vmem:[%s5757_s3 + $0x10] sm:$0xff]  ;;  %v1504_v50 = vld [vmem:[%s5757_s3 + $0x398] sm:$0xff] }
 0x172   :  { %1725 = vmatprep.subr.mxu0 %v1462_v46  ;;  %1795 = vmatpush2.msra.mxu1 %v1593_v7  ;;  %v1512_v46 = vld [vmem:[%s5757_s3 + $0x3d8] sm:$0xff]  ;;  %v1499_v54 = vld [vmem:[%s5757_s3 + $0x370] sm:$0xff] }
 0x173   :  { %v1025_v55 = vpop.f32.mrf.mxu0  ;;  %1726 = vmatpush2.msra.mxu0 %v1461_v49  ;;  %1796 = vmatprep.subr.mxu1 %v1590_v9  ;;  %v1507_v49 = vld [vmem:[%s5757_s3 + $0x3b0] sm:$0xff]  ;;  %v1492_v57 = vld [vmem:[%s5757_s3 + $0x338] sm:$0xff] }
 0x174   :  { %v4942_v59 = vadd.f32 %v1025_v55, %v955_v52  ;;  %1727 = vmatprep.subr.mxu0 %v1458_v53  ;;  %1797 = vmatpush2.msra.mxu1 %v1589_v11  ;;  %v1503_v52 = vld [vmem:[%s5757_s3 + $0x390] sm:$0xff]  ;;  %v1500_v53 = vld [vmem:[%s5757_s3 + $0x378] sm:$0xff] }
 0x175   :  { %v1027_v0 = vpop.f32.mrf.mxu0  ;;  %1728 = vmatpush2.msra.mxu0 %v1457_v56  ;;  %1798 = vmatprep.subr.mxu1 %v1586_v13  ;;  %v1496_v55 = vld [vmem:[%s5757_s3 + $0x358] sm:$0xff]  ;;  %v1495_v56 = vld [vmem:[%s5757_s3 + $0x350] sm:$0xff] }
 0x176   :  { %1385 = vst [vmem:[%s5759_s10] sm:$0xff] %v4942_v59  ;;  %v1028_v3 = vadd.f32 %v1027_v0, %v957_v58  ;;  %1729 = vmatprep.subr.mxu0 %v1454_v61  ;;  %1799 = vmatpush2.msra.mxu1 %v1585_v15  ;;  %v1491_v58 = vld [vmem:[%s5757_s3 + $0x330] sm:$0xff]  ;;  %v1488_v61 = vld [vmem:[%s5757_s3 + $0x318] sm:$0xff] }
 0x177   :  { %1730 = vmatpush2.msra.mxu0 %v1453_v1  ;;  %1800 = vmatprep.subr.mxu1 %v1582_v17  ;;  %v1487_v62 = vld [vmem:[%s5757_s3 + $0x310] sm:$0xff]  ;;  %v1484_v0 = vld [vmem:[%s5757_s3 + $0x2f8] sm:$0xff]  ;;  %v5180_v17 = vld [vmem:[%s5760_s4 + $0x1e8] sm:$0xff] }
 0x178   :  { %1386 = vst [vmem:[%s5759_s10 + $0x8] sm:$0xff] %v1028_v3  ;;  %1731 = vmatprep.mubr.f32.mxu0 %v1028_v3  ;;  %1809 = vmatprep.subr.mxu0 %v1452_v4  ;;  %v1483_v1 = vld [vmem:[%s5757_s3 + $0x2f0] sm:$0xff]  ;;  %v1472_v7 = vld [vmem:[%s5757_s3 + $0x298] sm:$0xff] }
 0x179   :  { %1732 = vmatmul.mubr.f32.vlgmr.msra.gmra.mxu0 %v4942_v59  ;;  %1801 = vmatpush2.msra.mxu1 %v1581_v19  ;;  %v1479_v4 = vld [vmem:[%s5757_s3 + $0x2d0] sm:$0xff]  ;;  %v1468_v9 = vld [vmem:[%s5757_s3 + $0x278] sm:$0xff]  ;;  %v5190_v19 = vld [vmem:[%s5760_s4 + $0x1c8] sm:$0xff] }
 0x17a   :  { %1810 = vmatpush1.msra.mxu0 %v1451_v5  ;;  %1873 = vmatprep.mubr.f32.mxu0 %v1028_v3  ;;  %v1480_v3 = vld [vmem:[%s5757_s3 + $0x2d8] sm:$0xff] }
 0x17b   :  { %1811 = vmatprep.subr.mxu0 %v1448_v6  ;;  %1880 = vmatprep.subr.mxu1 %v1580_v21  ;;  %v1476_v5 = vld [vmem:[%s5757_s3 + $0x2b8] sm:$0xff]  ;;  %v1475_v6 = vld [vmem:[%s5757_s3 + $0x2b0] sm:$0xff]  ;;  %v5203_v21 = vld [vmem:[%s5760_s4 + $0x1a8] sm:$0xff] }
 0x17c   :  { %1812 = vmatpush1.msra.mxu0 %v1447_v8  ;;  %v1471_v8 = vld [vmem:[%s5757_s3 + $0x290] sm:$0xff]  ;;  %v1464_v11 = vld [vmem:[%s5757_s3 + $0x258] sm:$0xff] }
 0x17d   :  { %1813 = vmatprep.subr.mxu0 %v1444_v10  ;;  %v1467_v10 = vld [vmem:[%s5757_s3 + $0x270] sm:$0xff]  ;;  %v1460_v13 = vld [vmem:[%s5757_s3 + $0x238] sm:$0xff] }
 0x17e   :  { %1814 = vmatpush1.msra.mxu0 %v1443_v12  ;;  %v1463_v12 = vld [vmem:[%s5757_s3 + $0x250] sm:$0xff]  ;;  %v1456_v15 = vld [vmem:[%s5757_s3 + $0x218] sm:$0xff] }
 0x17f   :  { %1815 = vmatprep.subr.mxu0 %v1440_v14  ;;  %v1459_v14 = vld [vmem:[%s5757_s3 + $0x230] sm:$0xff] }
 0x180   :  { %1816 = vmatpush1.msra.mxu0 %v1439_v16  ;;  %v1455_v16 = vld [vmem:[%s5757_s3 + $0x210] sm:$0xff] }
 0x181   :  { %1817 = vmatprep.subr.mxu0 %v1436_v18  ;;  %v5185_v18 = vld [vmem:[%s5760_s4 + $0x1e0] sm:$0xff] }
 0x182   :  { %1818 = vmatpush1.msra.mxu0 %v1435_v20  ;;  %v5197_v20 = vld [vmem:[%s5760_s4 + $0x1c0] sm:$0xff] }
 0x183   :  { %1819 = vmatprep.subr.mxu0 %v1432_v22  ;;  %v2639_v22 = vmov 0.0  }
 0x184   :  { %1820 = vmatpush1.msra.mxu0 %v1431_v23  ;;  %v5216_v23 = vld [vmem:[%s5760_s4 + $0x188] sm:$0xff]  ;;  %1951 = vst [vmem:[%s5762_s11] sm:$0xff] %v2639_v22 }
 0x185   :  { %1821 = vmatprep.subr.mxu0 %v1428_v24  ;;  %v2002_v24 = vld [vmem:[%s5760_s4 + $0x180] sm:$0xff] }
 0x186   :  { %1822 = vmatpush1.msra.mxu0 %v1427_v25  ;;  %v1999_v25 = vld [vmem:[%s5760_s4 + $0x168] sm:$0xff] }
 0x187   :  { %1823 = vmatprep.subr.mxu0 %v1424_v26  ;;  %v1998_v26 = vld [vmem:[%s5760_s4 + $0x160] sm:$0xff] }
 0x188   :  { %1824 = vmatpush1.msra.mxu0 %v1423_v27  ;;  %v1995_v27 = vld [vmem:[%s5760_s4 + $0x148] sm:$0xff] }
 0x189   :  { %1825 = vmatprep.subr.mxu0 %v1420_v28  ;;  %v1994_v28 = vld [vmem:[%s5760_s4 + $0x140] sm:$0xff] }
 0x18a   :  { %1826 = vmatpush1.msra.mxu0 %v1419_v29  ;;  %v1991_v29 = vld [vmem:[%s5760_s4 + $0x128] sm:$0xff] }
 0x18b   :  { %1827 = vmatprep.subr.mxu0 %v1416_v30  ;;  %v1990_v30 = vld [vmem:[%s5760_s4 + $0x120] sm:$0xff] }
 0x18c   :  { %1828 = vmatpush1.msra.mxu0 %v1415_v31  ;;  %v1987_v31 = vld [vmem:[%s5760_s4 + $0x108] sm:$0xff] }
 0x18d   :  { %1829 = vmatprep.subr.mxu0 %v1412_v32  ;;  %v1986_v32 = vld [vmem:[%s5760_s4 + $0x100] sm:$0xff] }
 0x18e   :  { %1830 = vmatpush1.msra.mxu0 %v1411_v33  ;;  %v1983_v33 = vld [vmem:[%s5760_s4 + $0xe8] sm:$0xff] }
 0x18f   :  { %1831 = vmatprep.subr.mxu0 %v1408_v34  ;;  %v1982_v34 = vld [vmem:[%s5760_s4 + $0xe0] sm:$0xff] }
 0x190   :  { %1832 = vmatpush1.msra.mxu0 %v1407_v35  ;;  %v1979_v35 = vld [vmem:[%s5760_s4 + $0xc8] sm:$0xff] }
 0x191   :  { %1833 = vmatprep.subr.mxu0 %v1404_v36  ;;  %v1978_v36 = vld [vmem:[%s5760_s4 + $0xc0] sm:$0xff] }
 0x192   :  { %1834 = vmatpush1.msra.mxu0 %v1403_v37  ;;  %v1975_v37 = vld [vmem:[%s5760_s4 + $0xa8] sm:$0xff] }
 0x193   :  { %1835 = vmatprep.subr.mxu0 %v1400_v38  ;;  %v1974_v38 = vld [vmem:[%s5760_s4 + $0xa0] sm:$0xff] }
 0x194   :  { %1836 = vmatpush1.msra.mxu0 %v1399_v39  ;;  %v1971_v39 = vld [vmem:[%s5760_s4 + $0x88] sm:$0xff] }
 0x195   :  { %1837 = vmatprep.subr.mxu0 %v1396_v40  ;;  %v1970_v40 = vld [vmem:[%s5760_s4 + $0x80] sm:$0xff] }
 0x196   :  { %1838 = vmatpush1.msra.mxu0 %v1395_v41  ;;  %v1967_v41 = vld [vmem:[%s5760_s4 + $0x68] sm:$0xff] }
 0x197   :  { %1839 = vmatprep.subr.mxu0 %v1392_v42  ;;  %v1966_v42 = vld [vmem:[%s5760_s4 + $0x60] sm:$0xff] }
 0x198   :  { %1840 = vmatpush1.msra.mxu0 %v1391_v43  ;;  %v1963_v43 = vld [vmem:[%s5760_s4 + $0x48] sm:$0xff] }
 0x199   :  { %1841 = vmatprep.subr.mxu0 %v1516_v44  ;;  %v1962_v44 = vld [vmem:[%s5760_s4 + $0x40] sm:$0xff] }
 0x19a   :  { %1842 = vmatpush2.msra.mxu0 %v1515_v45  ;;  %v1959_v45 = vld [vmem:[%s5760_s4 + $0x28] sm:$0xff] }
 0x19b   :  { %1843 = vmatprep.subr.mxu0 %v1512_v46  ;;  %v1958_v46 = vld [vmem:[%s5760_s4 + $0x20] sm:$0xff] }
 0x19c   :  { %1844 = vmatpush2.msra.mxu0 %v1511_v47  ;;  %v1955_v47 = vld [vmem:[%s5760_s4 + $0x8] sm:$0xff] }
 0x19d   :  { %1845 = vmatprep.subr.mxu0 %v1508_v48  ;;  %v1954_v48 = vld [vmem:[%s5760_s4] sm:$0xff] }
 0x19e   :  { %1846 = vmatpush2.msra.mxu0 %v1507_v49  ;;  %v5299_v49 = vld [vmem:[%s5761_s6] sm:$0x1] }
 0x19f   :  { %1847 = vmatprep.subr.mxu0 %v1504_v50  ;;  %v661_v50 = vsub.s32 2, %v4783_v51 }
 0x1a0   :  { %1848 = vmatpush2.msra.mxu0 %v1503_v52  ;;  %v1096_v52 = vpop.f32.mrf.mxu1 }
 0x1a1   :  { %1849 = vmatprep.subr.mxu0 %v1500_v53  ;;  %v665_v53 = vsub.s32 3, %v4783_v51 }
 0x1a2   :  { %1850 = vmatpush2.msra.mxu0 %v1499_v54  ;;  %v662_v54 = vrot.slane %v4819_v63, %v661_v50 }
 0x1a3   :  { %1851 = vmatprep.subr.mxu0 %v1496_v55  ;;  %v1098_v55 = vpop.f32.mrf.mxu1 }
 0x1a4   :  { %1852 = vmatpush2.msra.mxu0 %v1495_v56 }
 0x1a5   :  { %1853 = vmatprep.subr.mxu0 %v1492_v57  ;;  %v666_v57 = vrot.slane %v4819_v63, %v665_v53 }
 0x1a6   :  { %1854 = vmatpush2.msra.mxu0 %v1491_v58 }
 0x1a7   :  { %1855 = vmatprep.subr.mxu0 %v1488_v61  ;;  %v1097_v61 = vadd.f32 %v1096_v52, %v662_v54  ;;  %v1636_v52 = vld [vmem:[%s5757_s3 + $0x7b8] sm:$0xff]  ;;  %v1635_v54 = vld [vmem:[%s5757_s3 + $0x7b0] sm:$0xff] }
 0x1a8   :  { %1856 = vmatpush2.msra.mxu0 %v1487_v62 }
 0x1a9   :  { %1857 = vmatprep.subr.mxu0 %v1484_v0  ;;  %v1099_v0 = vadd.f32 %v1098_v55, %v666_v57  ;;  %v1632_v55 = vld [vmem:[%s5757_s3 + $0x798] sm:$0xff] }
 0x1aa   :  { %1858 = vmatpush2.msra.mxu0 %v1483_v1  ;;  %v1628_v57 = vld [vmem:[%s5757_s3 + $0x778] sm:$0xff] }
 0x1ab   :  { %1859 = vmatprep.subr.mxu0 %v1480_v3 }
 0x1ac   :  { %1860 = vmatpush2.msra.mxu0 %v1479_v4 }
 0x1ad   :  { %1861 = vmatprep.subr.mxu0 %v1476_v5 }
 0x1ae   :  { %1862 = vmatpush2.msra.mxu0 %v1475_v6 }
 0x1af   :  { %1863 = vmatprep.subr.mxu0 %v1472_v7 }
 0x1b0   :  { %1864 = vmatpush2.msra.mxu0 %v1471_v8 }
 0x1b1   :  { %1865 = vmatprep.subr.mxu0 %v1468_v9 }
 0x1b2   :  { %1866 = vmatpush2.msra.mxu0 %v1467_v10 }
 0x1b3   :  { %1867 = vmatprep.subr.mxu0 %v1464_v11 }
 0x1b4   :  { %1868 = vmatpush2.msra.mxu0 %v1463_v12 }
 0x1b5   :  { %1869 = vmatprep.subr.mxu0 %v1460_v13  ;;  %v1167_v56 = vpop.f32.mrf.mxu0 }
 0x1b6   :  { %1870 = vmatpush2.msra.mxu0 %v1459_v14  ;;  %v1168_v1 = vadd.f32 %v1167_v56, %v1097_v61  ;;  %v1579_v14 = vld [vmem:[%s5757_s3 + $0x5f0] sm:$0xff]  ;;  %v1624_v61 = vld [vmem:[%s5757_s3 + $0x758] sm:$0xff] }
 0x1b7   :  { %1871 = vmatprep.subr.mxu0 %v1456_v15  ;;  %v1169_v62 = vpop.f32.mrf.mxu0  ;;  %v1576_v15 = vld [vmem:[%s5757_s3 + $0x5d8] sm:$0xff]  ;;  %v1631_v56 = vld [vmem:[%s5757_s3 + $0x790] sm:$0xff] }
 0x1b8   :  { %1872 = vmatpush2.msra.mxu0 %v1455_v16  ;;  %v1170_v4 = vadd.f32 %v1169_v62, %v1099_v0  ;;  %v1575_v16 = vld [vmem:[%s5757_s3 + $0x5d0] sm:$0xff]  ;;  %v1620_v0 = vld [vmem:[%s5757_s3 + $0x738] sm:$0xff] }
 0x1b9   :  { %1874 = vmatmul.mubr.f32.vlgmr.msra.gmra.mxu0 %v4942_v59  ;;  %2018 = vmatprep.subr.mxu0 %v5180_v17  ;;  %v5210_v59 = vld [vmem:[%s5760_s4 + $0x1a0] sm:$0xff]  ;;  %v1623_v62 = vld [vmem:[%s5757_s3 + $0x750] sm:$0xff] }
 0x1ba   :  { %2019 = vmatpush1.msra.mxu0 %v5185_v18  ;;  %2082 = vmatprep.mubr.f32.mxu0 %v2639_v22 }
 0x1bb   :  { %2020 = vmatprep.subr.mxu0 %v5190_v19 }
 0x1bc   :  { %2021 = vmatpush1.msra.mxu0 %v5197_v20 }
 0x1bd   :  { %2022 = vmatprep.subr.mxu0 %v5203_v21 }
 0x1be   :  { %2023 = vmatpush1.msra.mxu0 %v5210_v59 }
 0x1bf   :  { %2024 = vmatprep.subr.mxu0 %v5216_v23 }
 0x1c0   :  { %2025 = vmatpush1.msra.mxu0 %v2002_v24 }
 0x1c1   :  { %2026 = vmatprep.subr.mxu0 %v1999_v25 }
 0x1c2   :  { %2027 = vmatpush1.msra.mxu0 %v1998_v26 }
 0x1c3   :  { %2028 = vmatprep.subr.mxu0 %v1995_v27 }
 0x1c4   :  { %2029 = vmatpush1.msra.mxu0 %v1994_v28 }
 0x1c5   :  { %2030 = vmatprep.subr.mxu0 %v1991_v29 }
 0x1c6   :  { %2031 = vmatpush1.msra.mxu0 %v1990_v30 }
 0x1c7   :  { %2032 = vmatprep.subr.mxu0 %v1987_v31 }
 0x1c8   :  { %2033 = vmatpush1.msra.mxu0 %v1986_v32 }
 0x1c9   :  { %2034 = vmatprep.subr.mxu0 %v1983_v33 }
 0x1ca   :  { %2035 = vmatpush1.msra.mxu0 %v1982_v34  ;;  %v1238_v58 = vpop.f32.mrf.mxu1 }
 0x1cb   :  { %2036 = vmatprep.subr.mxu0 %v1979_v35  ;;  %v1239_v5 = vadd.f32 %v1238_v58, %v1168_v1  ;;  %v1627_v58 = vld [vmem:[%s5757_s3 + $0x770] sm:$0xff] }
 0x1cc   :  { %2037 = vmatpush1.msra.mxu0 %v1978_v36  ;;  %v1240_v3 = vpop.f32.mrf.mxu1  ;;  %v1619_v1 = vld [vmem:[%s5757_s3 + $0x730] sm:$0xff] }
 0x1cd   :  { %2038 = vmatprep.subr.mxu0 %v1975_v37  ;;  %v1241_v8 = vadd.f32 %v1240_v3, %v1170_v4  ;;  %v1616_v3 = vld [vmem:[%s5757_s3 + $0x718] sm:$0xff]  ;;  %v1615_v4 = vld [vmem:[%s5757_s3 + $0x710] sm:$0xff] }
 0x1ce   :  { %2039 = vmatpush1.msra.mxu0 %v1974_v38 }
 0x1cf   :  { %2040 = vmatprep.subr.mxu0 %v1971_v39 }
 0x1d0   :  { %2041 = vmatpush1.msra.mxu0 %v1970_v40 }
 0x1d1   :  { %2042 = vmatprep.subr.mxu0 %v1967_v41 }
 0x1d2   :  { %2043 = vmatpush1.msra.mxu0 %v1966_v42 }
 0x1d3   :  { %2044 = vmatprep.subr.mxu0 %v1963_v43 }
 0x1d4   :  { %2045 = vmatpush1.msra.mxu0 %v1962_v44 }
 0x1d5   :  { %2046 = vmatprep.subr.mxu0 %v1959_v45 }
 0x1d6   :  { %2047 = vmatpush1.msra.mxu0 %v1958_v46 }
 0x1d7   :  { %2048 = vmatprep.subr.mxu0 %v1955_v47 }
 0x1d8   :  { %2049 = vmatpush1.msra.mxu0 %v1954_v48 }
 0x1d9   :  { %2083 = vmatmul.mubr.f32.vlgmr.msra.gmra.mxu0 %v5299_v49  ;;  %2250 = vmatprep.subr.mxu0 %v5180_v17  ;;  %v1572_v17 = vld [vmem:[%s5757_s3 + $0x5b8] sm:$0xff] }
 0x1da   :  { %2251 = vmatpush1.msra.mxu0 %v5185_v18  ;;  %2314 = vmatprep.mubr.f32.mxu0 %v2639_v22  ;;  %v1571_v18 = vld [vmem:[%s5757_s3 + $0x5b0] sm:$0xff] }
 0x1db   :  { %2252 = vmatprep.subr.mxu0 %v5190_v19  ;;  %v1568_v19 = vld [vmem:[%s5757_s3 + $0x598] sm:$0xff] }
 0x1dc   :  { %2253 = vmatpush1.msra.mxu0 %v5197_v20  ;;  %v1567_v20 = vld [vmem:[%s5757_s3 + $0x590] sm:$0xff] }
 0x1dd   :  { %2254 = vmatprep.subr.mxu0 %v5203_v21  ;;  %v1564_v21 = vld [vmem:[%s5757_s3 + $0x578] sm:$0xff] }
 0x1de   :  { %2255 = vmatpush1.msra.mxu0 %v5210_v59  ;;  %v1563_v59 = vld [vmem:[%s5757_s3 + $0x570] sm:$0xff] }
 0x1df   :  { %2256 = vmatprep.subr.mxu0 %v5216_v23  ;;  %v1560_v23 = vld [vmem:[%s5757_s3 + $0x558] sm:$0xff] }
 0x1e0   :  { %2257 = vmatpush1.msra.mxu0 %v2002_v24  ;;  %v1559_v24 = vld [vmem:[%s5757_s3 + $0x550] sm:$0xff] }
 0x1e1   :  { %2258 = vmatprep.subr.mxu0 %v1999_v25  ;;  %v1556_v25 = vld [vmem:[%s5757_s3 + $0x538] sm:$0xff] }
 0x1e2   :  { %2259 = vmatpush1.msra.mxu0 %v1998_v26  ;;  %v1555_v26 = vld [vmem:[%s5757_s3 + $0x530] sm:$0xff] }
 0x1e3   :  { %2260 = vmatprep.subr.mxu0 %v1995_v27  ;;  %v1552_v27 = vld [vmem:[%s5757_s3 + $0x518] sm:$0xff] }
 0x1e4   :  { %2261 = vmatpush1.msra.mxu0 %v1994_v28  ;;  %v1551_v28 = vld [vmem:[%s5757_s3 + $0x510] sm:$0xff] }
 0x1e5   :  { %2262 = vmatprep.subr.mxu0 %v1991_v29  ;;  %v1548_v29 = vld [vmem:[%s5757_s3 + $0x4f8] sm:$0xff] }
 0x1e6   :  { %2263 = vmatpush1.msra.mxu0 %v1990_v30  ;;  %v1547_v30 = vld [vmem:[%s5757_s3 + $0x4f0] sm:$0xff] }
 0x1e7   :  { %2264 = vmatprep.subr.mxu0 %v1987_v31  ;;  %v1544_v31 = vld [vmem:[%s5757_s3 + $0x4d8] sm:$0xff] }
 0x1e8   :  { %2265 = vmatpush1.msra.mxu0 %v1986_v32  ;;  %v1543_v32 = vld [vmem:[%s5757_s3 + $0x4d0] sm:$0xff] }
 0x1e9   :  { %2266 = vmatprep.subr.mxu0 %v1983_v33  ;;  %v1540_v33 = vld [vmem:[%s5757_s3 + $0x4b8] sm:$0xff] }
 0x1ea   :  { %2267 = vmatpush1.msra.mxu0 %v1982_v34  ;;  %v1539_v34 = vld [vmem:[%s5757_s3 + $0x4b0] sm:$0xff] }
 0x1eb   :  { %2268 = vmatprep.subr.mxu0 %v1979_v35  ;;  %v1536_v35 = vld [vmem:[%s5757_s3 + $0x498] sm:$0xff] }
 0x1ec   :  { %2269 = vmatpush1.msra.mxu0 %v1978_v36  ;;  %v1535_v36 = vld [vmem:[%s5757_s3 + $0x490] sm:$0xff] }
 0x1ed   :  { %2270 = vmatprep.subr.mxu0 %v1975_v37  ;;  %v1532_v37 = vld [vmem:[%s5757_s3 + $0x478] sm:$0xff] }
 0x1ee   :  { %2271 = vmatpush1.msra.mxu0 %v1974_v38  ;;  %v1531_v38 = vld [vmem:[%s5757_s3 + $0x470] sm:$0xff] }
 0x1ef   :  { %2272 = vmatprep.subr.mxu0 %v1971_v39  ;;  %v1528_v39 = vld [vmem:[%s5757_s3 + $0x458] sm:$0xff] }
 0x1f0   :  { %2273 = vmatpush1.msra.mxu0 %v1970_v40  ;;  %v1527_v40 = vld [vmem:[%s5757_s3 + $0x450] sm:$0xff] }
 0x1f1   :  { %2274 = vmatprep.subr.mxu0 %v1967_v41  ;;  %v1524_v41 = vld [vmem:[%s5757_s3 + $0x438] sm:$0xff] }
 0x1f2   :  { %2275 = vmatpush1.msra.mxu0 %v1966_v42  ;;  %v1523_v42 = vld [vmem:[%s5757_s3 + $0x430] sm:$0xff] }
 0x1f3   :  { %2276 = vmatprep.subr.mxu0 %v1963_v43  ;;  %v1520_v43 = vld [vmem:[%s5757_s3 + $0x418] sm:$0xff] }
 0x1f4   :  { %2277 = vmatpush1.msra.mxu0 %v1962_v44  ;;  %v1519_v44 = vld [vmem:[%s5757_s3 + $0x410] sm:$0xff] }
 0x1f5   :  { %2278 = vmatprep.subr.mxu0 %v1959_v45  ;;  %v1644_v45 = vld [vmem:[%s5757_s3 + $0x7f8] sm:$0xff] }
 0x1f6   :  { %2279 = vmatpush1.msra.mxu0 %v1958_v46  ;;  %v1643_v46 = vld [vmem:[%s5757_s3 + $0x7f0] sm:$0xff] }
 0x1f7   :  { %2280 = vmatprep.subr.mxu0 %v1955_v47  ;;  %v1309_v6 = vpop.f32.mrf.mxu0  ;;  %v1640_v47 = vld [vmem:[%s5757_s3 + $0x7d8] sm:$0xff] }
 0x1f8   :  { %v1380_v7 = vpop.f32.mrf.mxu1  ;;  %2281 = vmatpush1.msra.mxu0 %v1954_v48  ;;  %v1310_v63 = vadd.f32 %v1309_v6, %v1239_v5  ;;  %v1639_v48 = vld [vmem:[%s5757_s3 + $0x7d0] sm:$0xff]  ;;  %v1612_v5 = vld [vmem:[%s5757_s3 + $0x6f8] sm:$0xff] }
 0x1f9   :  { %2560 = vmatprep.subr.mxu0 %v2639_v22  ;;  %v1311_v9 = vpop.f32.mrf.mxu0  ;;  %v1611_v6 = vld [vmem:[%s5757_s3 + $0x6f0] sm:$0xff] }
 0x1fa   :  { %v5319_v10 = vadd.f32 %v1380_v7, %v1310_v63  ;;  %v1312_v11 = vadd.f32 %v1311_v9, %v1241_v8  ;;  %v1382_v12 = vpop.f32.mrf.mxu1  ;;  %v1608_v7 = vld [vmem:[%s5757_s3 + $0x6d8] sm:$0xff]  ;;  %v1607_v8 = vld [vmem:[%s5757_s3 + $0x6d0] sm:$0xff] }
 0x1fb   :  { %v1604_v63 = vld [vmem:[%s5757_s3 + $0x6b8] sm:$0xff]  ;;  %v1603_v9 = vld [vmem:[%s5757_s3 + $0x6b0] sm:$0xff] }
 0x1fc   :  { %1387 = vst [vmem:[%s5759_s10 + $0x10] sm:$0xff] %v5319_v10  ;;  %v1383_v13 = vadd.f32 %v1382_v12, %v1312_v11  ;;  %v1600_v11 = vld [vmem:[%s5757_s3 + $0x698] sm:$0xff]  ;;  %v1599_v12 = vld [vmem:[%s5757_s3 + $0x690] sm:$0xff] }
 0x1fe   :  { %1388 = vst [vmem:[%s5759_s10 + $0x18] sm:$0xff] %v1383_v13  ;;  %1802 = vmatprep.mubr.f32.mxu1 %v1383_v13 }
 0x1ff   :  { %1803 = vmatmul.mubr.f32.vlgmr.msra.gmra.mxu1 %v5319_v10 }
 0x200   :  { %1881 = vmatpush1.msra.mxu1 %v1579_v14  ;;  %1944 = vmatprep.mubr.f32.mxu1 %v1383_v13  ;;  %v1596_v13 = vld [vmem:[%s5757_s3 + $0x678] sm:$0xff]  ;;  %v1595_v14 = vld [vmem:[%s5757_s3 + $0x670] sm:$0xff] }
 0x201   :  { %1882 = vmatprep.subr.mxu1 %v1576_v15  ;;  %v1592_v15 = vld [vmem:[%s5757_s3 + $0x658] sm:$0xff] }
 0x202   :  { %1883 = vmatpush1.msra.mxu1 %v1575_v16  ;;  %v1591_v16 = vld [vmem:[%s5757_s3 + $0x650] sm:$0xff] }
 0x203   :  { %1884 = vmatprep.subr.mxu1 %v1572_v17  ;;  %v1588_v17 = vld [vmem:[%s5757_s3 + $0x638] sm:$0xff] }
 0x204   :  { %1885 = vmatpush1.msra.mxu1 %v1571_v18  ;;  %v1587_v18 = vld [vmem:[%s5757_s3 + $0x630] sm:$0xff] }
 0x205   :  { %1886 = vmatprep.subr.mxu1 %v1568_v19  ;;  %v1584_v19 = vld [vmem:[%s5757_s3 + $0x618] sm:$0xff] }
 0x206   :  { %1887 = vmatpush1.msra.mxu1 %v1567_v20  ;;  %v1583_v20 = vld [vmem:[%s5757_s3 + $0x610] sm:$0xff] }
 0x207   :  { %1888 = vmatprep.subr.mxu1 %v1564_v21  ;;  %v5521_v21 = vld [vmem:[%s5760_s4 + $0x1f8] sm:$0xff] }
 0x208   :  { %1889 = vmatpush1.msra.mxu1 %v1563_v59  ;;  %v5526_v59 = vld [vmem:[%s5760_s4 + $0x1f0] sm:$0xff] }
 0x209   :  { %1890 = vmatprep.subr.mxu1 %v1560_v23  ;;  %v5531_v23 = vld [vmem:[%s5760_s4 + $0x1d8] sm:$0xff] }
 0x20a   :  { %1891 = vmatpush1.msra.mxu1 %v1559_v24  ;;  %v5538_v24 = vld [vmem:[%s5760_s4 + $0x1d0] sm:$0xff] }
 0x20b   :  { %1892 = vmatprep.subr.mxu1 %v1556_v25  ;;  %v5544_v25 = vld [vmem:[%s5760_s4 + $0x1b8] sm:$0xff] }
 0x20c   :  { %1893 = vmatpush1.msra.mxu1 %v1555_v26  ;;  %v2005_v26 = vld [vmem:[%s5760_s4 + $0x198] sm:$0xff] }
 0x20d   :  { %1894 = vmatprep.subr.mxu1 %v1552_v27  ;;  %v2004_v27 = vld [vmem:[%s5760_s4 + $0x190] sm:$0xff] }
 0x20e   :  { %1895 = vmatpush1.msra.mxu1 %v1551_v28  ;;  %v2001_v28 = vld [vmem:[%s5760_s4 + $0x178] sm:$0xff] }
 0x20f   :  { %1896 = vmatprep.subr.mxu1 %v1548_v29  ;;  %v2000_v29 = vld [vmem:[%s5760_s4 + $0x170] sm:$0xff] }
 0x210   :  { %1897 = vmatpush1.msra.mxu1 %v1547_v30  ;;  %v1997_v30 = vld [vmem:[%s5760_s4 + $0x158] sm:$0xff] }
 0x211   :  { %1898 = vmatprep.subr.mxu1 %v1544_v31  ;;  %v1996_v31 = vld [vmem:[%s5760_s4 + $0x150] sm:$0xff] }
 0x212   :  { %1899 = vmatpush1.msra.mxu1 %v1543_v32  ;;  %v1993_v32 = vld [vmem:[%s5760_s4 + $0x138] sm:$0xff] }
 0x213   :  { %1900 = vmatprep.subr.mxu1 %v1540_v33  ;;  %v1992_v33 = vld [vmem:[%s5760_s4 + $0x130] sm:$0xff] }
 0x214   :  { %1901 = vmatpush1.msra.mxu1 %v1539_v34  ;;  %v1989_v34 = vld [vmem:[%s5760_s4 + $0x118] sm:$0xff] }
 0x215   :  { %1902 = vmatprep.subr.mxu1 %v1536_v35  ;;  %v1988_v35 = vld [vmem:[%s5760_s4 + $0x110] sm:$0xff] }
 0x216   :  { %1903 = vmatpush1.msra.mxu1 %v1535_v36  ;;  %v1985_v36 = vld [vmem:[%s5760_s4 + $0xf8] sm:$0xff] }
 0x217   :  { %1904 = vmatprep.subr.mxu1 %v1532_v37  ;;  %v1984_v37 = vld [vmem:[%s5760_s4 + $0xf0] sm:$0xff] }
 0x218   :  { %1905 = vmatpush1.msra.mxu1 %v1531_v38  ;;  %v1981_v38 = vld [vmem:[%s5760_s4 + $0xd8] sm:$0xff] }
 0x219   :  { %1906 = vmatprep.subr.mxu1 %v1528_v39  ;;  %v1980_v39 = vld [vmem:[%s5760_s4 + $0xd0] sm:$0xff] }
 0x21a   :  { %1907 = vmatpush1.msra.mxu1 %v1527_v40  ;;  %v1977_v40 = vld [vmem:[%s5760_s4 + $0xb8] sm:$0xff] }
 0x21b   :  { %1908 = vmatprep.subr.mxu1 %v1524_v41  ;;  %v1976_v41 = vld [vmem:[%s5760_s4 + $0xb0] sm:$0xff] }
 0x21c   :  { %1909 = vmatpush1.msra.mxu1 %v1523_v42  ;;  %v1973_v42 = vld [vmem:[%s5760_s4 + $0x98] sm:$0xff] }
 0x21d   :  { %1910 = vmatprep.subr.mxu1 %v1520_v43  ;;  %v1972_v43 = vld [vmem:[%s5760_s4 + $0x90] sm:$0xff] }
 0x21e   :  { %1911 = vmatpush1.msra.mxu1 %v1519_v44  ;;  %v1969_v44 = vld [vmem:[%s5760_s4 + $0x78] sm:$0xff] }
 0x21f   :  { %1912 = vmatprep.subr.mxu1 %v1644_v45  ;;  %v1968_v45 = vld [vmem:[%s5760_s4 + $0x70] sm:$0xff] }
 0x220   :  { %1913 = vmatpush2.msra.mxu1 %v1643_v46  ;;  %v1965_v46 = vld [vmem:[%s5760_s4 + $0x58] sm:$0xff] }
 0x221   :  { %1914 = vmatprep.subr.mxu1 %v1640_v47  ;;  %v1964_v47 = vld [vmem:[%s5760_s4 + $0x50] sm:$0xff] }
 0x222   :  { %1915 = vmatpush2.msra.mxu1 %v1639_v48  ;;  %v1961_v48 = vld [vmem:[%s5760_s4 + $0x38] sm:$0xff] }
 0x223   :  { %1916 = vmatprep.subr.mxu1 %v1636_v52  ;;  %v1960_v52 = vld [vmem:[%s5760_s4 + $0x30] sm:$0xff] }
 0x224   :  { %1917 = vmatpush2.msra.mxu1 %v1635_v54  ;;  %v1957_v54 = vld [vmem:[%s5760_s4 + $0x18] sm:$0xff] }
 0x225   :  { %1918 = vmatprep.subr.mxu1 %v1632_v55  ;;  %v1956_v55 = vld [vmem:[%s5760_s4 + $0x10] sm:$0xff] }
 0x226   :  { %1919 = vmatpush2.msra.mxu1 %v1631_v56 }
 0x227   :  { %1920 = vmatprep.subr.mxu1 %v1628_v57  ;;  %v1645_v57 = vld [vmem:[%s5763_s5] sm:$0xf] }
 0x228   :  { %1921 = vmatpush2.msra.mxu1 %v1627_v58 }
 0x229   :  { %1922 = vmatprep.subr.mxu1 %v1624_v61  ;;  %v1650_v61 = vrot.slane %v1645_v57, %v653_v60 }
 0x22a   :  { %1923 = vmatpush2.msra.mxu1 %v1623_v62 }
 0x22b   :  { %1924 = vmatprep.subr.mxu1 %v1620_v0  ;;  %v1654_v0 = vrot.slane %v1645_v57, %v657_v2  ;;  %v1658_v2 = vrot.slane %v1645_v57, %v661_v50 }
 0x22c   :  { %1925 = vmatpush2.msra.mxu1 %v1619_v1 }
 0x22d   :  { %1926 = vmatprep.subr.mxu1 %v1616_v3 }
 0x22e   :  { %1927 = vmatpush2.msra.mxu1 %v1615_v4 }
 0x22f   :  { %1928 = vmatprep.subr.mxu1 %v1612_v5 }
 0x230   :  { %1929 = vmatpush2.msra.mxu1 %v1611_v6 }
 0x231   :  { %1930 = vmatprep.subr.mxu1 %v1608_v7 }
 0x232   :  { %1931 = vmatpush2.msra.mxu1 %v1607_v8 }
 0x233   :  { %1932 = vmatprep.subr.mxu1 %v1604_v63 }
 0x234   :  { %1933 = vmatpush2.msra.mxu1 %v1603_v9 }
 0x235   :  { %1934 = vmatprep.subr.mxu1 %v1600_v11 }
 0x236   :  { %1935 = vmatpush2.msra.mxu1 %v1599_v12 }
 0x237   :  { %1936 = vmatprep.subr.mxu1 %v1596_v13 }
 0x238   :  { %1937 = vmatpush2.msra.mxu1 %v1595_v14 }
 0x239   :  { %1938 = vmatprep.subr.mxu1 %v1592_v15 }
 0x23a   :  { %1939 = vmatpush2.msra.mxu1 %v1591_v16 }
 0x23b   :  { %1940 = vmatprep.subr.mxu1 %v1588_v17 }
 0x23c   :  { %1941 = vmatpush2.msra.mxu1 %v1587_v18  ;;  %v1662_v18 = vrot.slane %v1645_v57, %v665_v53  ;;  %v2435_v57 = vld [vmem:[%s5765_s8 + $0x8] sm:$0xff] }
 0x23d   :  { %1942 = vmatprep.subr.mxu1 %v1584_v19 }
 0x23e   :  { %1943 = vmatpush2.msra.mxu1 %v1583_v20 }
 0x23f   :  { %1945 = vmatmul.mubr.f32.vlgmr.msra.gmra.mxu1 %v5319_v10  ;;  %2089 = vmatprep.subr.mxu1 %v5521_v21  ;;  %v2008_v10 = vld [vmem:[%s5760_s4 + $0x1b0] sm:$0xff] }
 0x240   :  { %2090 = vmatpush1.msra.mxu1 %v5526_v59  ;;  %2153 = vmatprep.mubr.f32.mxu1 %v2639_v22 }
 0x241   :  { %2091 = vmatprep.subr.mxu1 %v5531_v23 }
 0x242   :  { %2092 = vmatpush1.msra.mxu1 %v5538_v24 }
 0x243   :  { %2093 = vmatprep.subr.mxu1 %v5544_v25 }
 0x244   :  { %2094 = vmatpush1.msra.mxu1 %v2008_v10 }
 0x245   :  { %2095 = vmatprep.subr.mxu1 %v2005_v26 }
 0x246   :  { %2096 = vmatpush1.msra.mxu1 %v2004_v27 }
 0x247   :  { %2097 = vmatprep.subr.mxu1 %v2001_v28 }
 0x248   :  { %2098 = vmatpush1.msra.mxu1 %v2000_v29 }
 0x249   :  { %2099 = vmatprep.subr.mxu1 %v1997_v30 }
 0x24a   :  { %2100 = vmatpush1.msra.mxu1 %v1996_v31 }
 0x24b   :  { %2101 = vmatprep.subr.mxu1 %v1993_v32 }
 0x24c   :  { %2102 = vmatpush1.msra.mxu1 %v1992_v33 }
 0x24d   :  { %2103 = vmatprep.subr.mxu1 %v1989_v34 }
 0x24e   :  { %2104 = vmatpush1.msra.mxu1 %v1988_v35 }
 0x24f   :  { %2105 = vmatprep.subr.mxu1 %v1985_v36 }
 0x250   :  { %2106 = vmatpush1.msra.mxu1 %v1984_v37 }
 0x251   :  { %2107 = vmatprep.subr.mxu1 %v1981_v38 }
 0x252   :  { %2108 = vmatpush1.msra.mxu1 %v1980_v39 }
 0x253   :  { %2109 = vmatprep.subr.mxu1 %v1977_v40 }
 0x254   :  { %2110 = vmatpush1.msra.mxu1 %v1976_v41 }
 0x255   :  { %2111 = vmatprep.subr.mxu1 %v1973_v42 }
 0x256   :  { %2112 = vmatpush1.msra.mxu1 %v1972_v43 }
 0x257   :  { %2113 = vmatprep.subr.mxu1 %v1969_v44 }
 0x258   :  { %2114 = vmatpush1.msra.mxu1 %v1968_v45 }
 0x259   :  { %2115 = vmatprep.subr.mxu1 %v1965_v46 }
 0x25a   :  { %2116 = vmatpush1.msra.mxu1 %v1964_v47 }
 0x25b   :  { %2117 = vmatprep.subr.mxu1 %v1961_v48 }
 0x25c   :  { %2118 = vmatpush1.msra.mxu1 %v1960_v52 }
 0x25d   :  { %2119 = vmatprep.subr.mxu1 %v1957_v54 }
 0x25e   :  { %2120 = vmatpush1.msra.mxu1 %v1956_v55 }
 0x25f   :  { %2154 = vmatmul.mubr.f32.vlgmr.msra.gmra.mxu1 %v5299_v49  ;;  %2321 = vmatprep.subr.mxu1 %v5521_v21  ;;  %v1733_v49 = vpop.f32.mrf.mxu0 }
 0x260   :  { %2322 = vmatpush1.msra.mxu1 %v5526_v59  ;;  %2385 = vmatprep.mubr.f32.mxu1 %v2639_v22  ;;  %v1734_v3 = vadd.f32 %v1733_v49, %v1650_v61  ;;  %v2437_v49 = vld [vmem:[%s5765_s8 + $0x18] sm:$0xff] }
 0x261   :  { %2323 = vmatprep.subr.mxu1 %v5531_v23  ;;  %v1735_v56 = vpop.f32.mrf.mxu0 }
 0x262   :  { %2324 = vmatpush1.msra.mxu1 %v5538_v24  ;;  %v1736_v6 = vadd.f32 %v1735_v56, %v1654_v0  ;;  %v2436_v56 = vld [vmem:[%s5765_s8 + $0x10] sm:$0xff] }
 0x263   :  { %2325 = vmatprep.subr.mxu1 %v5544_v25 }
 0x264   :  { %2326 = vmatpush1.msra.mxu1 %v2008_v10 }
 0x265   :  { %2327 = vmatprep.subr.mxu1 %v2005_v26 }
 0x266   :  { %2328 = vmatpush1.msra.mxu1 %v2004_v27 }
 0x267   :  { %2329 = vmatprep.subr.mxu1 %v2001_v28 }
 0x268   :  { %2330 = vmatpush1.msra.mxu1 %v2000_v29 }
 0x269   :  { %2331 = vmatprep.subr.mxu1 %v1997_v30  ;;  %v1953_v30 = vld [vmem:[%s5764_s7] sm:$0x1] }
 0x26a   :  { %2332 = vmatpush1.msra.mxu1 %v1996_v31 }
 0x26b   :  { %2333 = vmatprep.subr.mxu1 %v1993_v32 }
 0x26c   :  { %2334 = vmatpush1.msra.mxu1 %v1992_v33 }
 0x26d   :  { %2335 = vmatprep.subr.mxu1 %v1989_v34 }
 0x26e   :  { %2336 = vmatpush1.msra.mxu1 %v1988_v35 }
 0x26f   :  { %2337 = vmatprep.subr.mxu1 %v1985_v36 }
 0x270   :  { %2338 = vmatpush1.msra.mxu1 %v1984_v37 }
 0x271   :  { %2339 = vmatprep.subr.mxu1 %v1981_v38 }
 0x272   :  { %2340 = vmatpush1.msra.mxu1 %v1980_v39 }
 0x273   :  { %2341 = vmatprep.subr.mxu1 %v1977_v40  ;;  %v2449_v40 = vld [vmem:[%s5765_s8 + $0x78] sm:$0xff] }
 0x274   :  { %2342 = vmatpush1.msra.mxu1 %v1976_v41  ;;  %v2448_v41 = vld [vmem:[%s5765_s8 + $0x70] sm:$0xff] }
 0x275   :  { %2343 = vmatprep.subr.mxu1 %v1973_v42  ;;  %v2447_v42 = vld [vmem:[%s5765_s8 + $0x68] sm:$0xff] }
 0x276   :  { %2344 = vmatpush1.msra.mxu1 %v1972_v43  ;;  %v2446_v43 = vld [vmem:[%s5765_s8 + $0x60] sm:$0xff] }
 0x277   :  { %2345 = vmatprep.subr.mxu1 %v1969_v44  ;;  %v2445_v44 = vld [vmem:[%s5765_s8 + $0x58] sm:$0xff] }
 0x278   :  { %2346 = vmatpush1.msra.mxu1 %v1968_v45  ;;  %v2444_v45 = vld [vmem:[%s5765_s8 + $0x50] sm:$0xff] }
 0x279   :  { %2347 = vmatprep.subr.mxu1 %v1965_v46  ;;  %v1875_v58 = vpop.f32.mrf.mxu0  ;;  %v2443_v46 = vld [vmem:[%s5765_s8 + $0x48] sm:$0xff] }
 0x27a   :  { %2348 = vmatpush1.msra.mxu1 %v1964_v47  ;;  %v1876_v19 = vadd.f32 %v1875_v58, %v1658_v2  ;;  %v2442_v47 = vld [vmem:[%s5765_s8 + $0x40] sm:$0xff] }
 0x27b   :  { %2349 = vmatprep.subr.mxu1 %v1961_v48  ;;  %v1877_v1 = vpop.f32.mrf.mxu0  ;;  %v2441_v48 = vld [vmem:[%s5765_s8 + $0x38] sm:$0xff]  ;;  %v2434_v58 = vld [vmem:[%s5765_s8] sm:$0xff] }
 0x27c   :  { %2350 = vmatpush1.msra.mxu1 %v1960_v52  ;;  %v1878_v23 = vadd.f32 %v1877_v1, %v1662_v18  ;;  %v2440_v52 = vld [vmem:[%s5765_s8 + $0x30] sm:$0xff] }
 0x27d   :  { %2351 = vmatprep.subr.mxu1 %v1957_v54  ;;  %v2439_v54 = vld [vmem:[%s5765_s8 + $0x28] sm:$0xff] }
 0x27e   :  { %2352 = vmatpush1.msra.mxu1 %v1956_v55  ;;  %v2438_v55 = vld [vmem:[%s5765_s8 + $0x20] sm:$0xff] }
 0x299   :  { %v2084_v5 = vpop.f32.mrf.mxu0 }
 0x29b   :  { %v2086_v63 = vpop.f32.mrf.mxu0 }
 0x2bf   :  { %v1804_v62 = vpop.f32.mrf.mxu1 }
 0x2c0   :  { %v5649_v7 = vadd.f32 %v1804_v62, %v1734_v3 }
 0x2c1   :  { %v1806_v4 = vpop.f32.mrf.mxu1 }
 0x2c2   :  { %v5651_v8 = vadd.f32 %v1806_v4, %v1736_v6  ;;  %v2160_v9 = vadd.f32 %v2084_v5, %v5649_v7 }
 0x2c4   :  { %v2161_v11 = vadd.f32 %v2086_v63, %v5651_v8  ;;  %v2164_v12 = vsub.f32 0.0, %v2160_v9 }
 0x2c6   :  { %v2169_v60 = vsub.f32 0.0, %v2161_v11  ;;  %v2165_v13 = vmul.f32 1.442695, %v2164_v12 }
 0x2c8   :  { %v2170_v14 = vmul.f32 1.442695, %v2169_v60  ;;  %2597 = vpow2.f32 %v2165_v13 }
 0x2ca   :  { %2599 = vpow2.f32 %v2170_v14 }
 0x2d5   :  { %v2598_v15 = vpop.eup %2597 }
 0x2d6   :  { %v2167_v20 = vadd.f32 1.0, %v2598_v15 }
 0x2d7   :  { %v2600_v17 = vpop.eup %2599 }
 0x2d8   :  { %v2172_v21 = vadd.f32 1.0, %v2600_v17  ;;  %2601 = vrcp.f32 %v2167_v20 }
 0x2da   :  { %2603 = vrcp.f32 %v2172_v21 }
 0x2e5   :  { %v2602_v28 = vpop.eup %2601 }
 0x2e7   :  { %v2604_v29 = vpop.eup %2603 }
 0x2e8   :  { %v2180_v33 = vmul.f32 %v2604_v29, %v1953_v30 }
 0x2ff   :  { %v1946_v16 = vpop.f32.mrf.mxu1 }
 0x300   :  { %v5659_v24 = vadd.f32 %v1946_v16, %v1876_v19 }
 0x301   :  { %v1948_v59 = vpop.f32.mrf.mxu1 }
 0x302   :  { %v5661_v10 = vadd.f32 %v1948_v59, %v1878_v23 }
 0x31f   :  { %v2155_v25 = vpop.f32.mrf.mxu1 }
 0x320   :  { %v2162_v26 = vadd.f32 %v2155_v25, %v5659_v24 }
 0x321   :  { %v2157_v50 = vpop.f32.mrf.mxu1 }
 0x322   :  { %2605 = vtanh.f32 %v2162_v26  ;;  %v2163_v27 = vadd.f32 %v2157_v50, %v5661_v10 }
 0x324   :  { %v2175_v51 = vsub.f32 0.0, %v2163_v27 }
 0x326   :  { %v2176_v53 = vmul.f32 1.442695, %v2175_v51 }
 0x328   :  { %2607 = vpow2.f32 %v2176_v53  ;;  %v2450_v53 = vld [vmem:[%s5767_s9] sm:$0x1] }
 0x32f   :  { %v2606_v31 = vpop.eup %2605 }
 0x330   :  { %v2181_v32 = vmul.f32 %v2606_v31, %v2602_v28 }
 0x332   :  { %v5668_v34 = vadd.f32 %v2181_v32, %v2180_v33 }
 0x334   :  { %2609 = vtanh.f32 %v5668_v34  ;;  %v2425_v21 = vrot.slane %v5668_v34, 7 }
 0x335   :  { %v2608_v35 = vpop.eup %2607 }
 0x336   :  { %v2178_v36 = vadd.f32 1.0, %v2608_v35 }
 0x338   :  { %2611 = vrcp.f32 %v2178_v36 }
 0x341   :  { %v2610_v37 = vpop.eup %2609 }
 0x345   :  { %v2612_v38 = vpop.eup %2611 }
 0x346   :  { %v2184_v39 = vmul.f32 %v2612_v38, %v2610_v37 }
 0x348   :  { %2185 = vst [vmem:[%s5762_s11] sm:$0x1] %v2184_v39  ;;  %2315 = vmatmul.mubr.f32.vlgmr.msra.gmra.mxu0 %v2184_v39  ;;  %2386 = vmatmul.mubr.f32.vlgmr.msra.gmra.mxu1 %v2184_v39 }
 0x349   :  { %2561 = vmatpush3.msra.mxu0 %v2449_v40  ;;  %2592 = vmatprep.mubr.msk.f32.mxu0 %vm2640_vm1, %v2639_v22 }
 0x34a   :  { %2562 = vmatprep.subr.mxu0 %v2639_v22 }
 0x34b   :  { %2563 = vmatpush3.msra.mxu0 %v2448_v41 }
 0x34c   :  { %2564 = vmatprep.subr.mxu0 %v2639_v22 }
 0x34d   :  { %2565 = vmatpush3.msra.mxu0 %v2447_v42 }
 0x34e   :  { %2566 = vmatprep.subr.mxu0 %v2639_v22 }
 0x34f   :  { %2567 = vmatpush3.msra.mxu0 %v2446_v43 }
 0x350   :  { %2568 = vmatprep.subr.mxu0 %v2639_v22 }
 0x351   :  { %2569 = vmatpush3.msra.mxu0 %v2445_v44 }
 0x352   :  { %2570 = vmatprep.subr.mxu0 %v2639_v22 }
 0x353   :  { %2571 = vmatpush3.msra.mxu0 %v2444_v45 }
 0x354   :  { %2572 = vmatprep.subr.mxu0 %v2639_v22 }
 0x355   :  { %2573 = vmatpush3.msra.mxu0 %v2443_v46 }
 0x356   :  { %2574 = vmatprep.subr.mxu0 %v2639_v22 }
 0x357   :  { %2575 = vmatpush3.msra.mxu0 %v2442_v47 }
 0x358   :  { %2576 = vmatprep.subr.mxu0 %v2639_v22 }
 0x359   :  { %2577 = vmatpush3.msra.mxu0 %v2441_v48 }
 0x35a   :  { %2578 = vmatprep.subr.mxu0 %v2639_v22 }
 0x35b   :  { %2579 = vmatpush3.msra.mxu0 %v2440_v52 }
 0x35c   :  { %2580 = vmatprep.subr.mxu0 %v2639_v22 }
 0x35d   :  { %2581 = vmatpush3.msra.mxu0 %v2439_v54 }
 0x35e   :  { %2582 = vmatprep.subr.mxu0 %v2639_v22 }
 0x35f   :  { %2583 = vmatpush3.msra.mxu0 %v2438_v55 }
 0x360   :  { %2584 = vmatprep.subr.mxu0 %v2639_v22 }
 0x361   :  { %2585 = vmatpush3.msra.mxu0 %v2437_v49 }
 0x362   :  { %2586 = vmatprep.subr.mxu0 %v2639_v22 }
 0x363   :  { %2587 = vmatpush3.msra.mxu0 %v2436_v56 }
 0x364   :  { %2588 = vmatprep.subr.mxu0 %v2639_v22 }
 0x365   :  { %2589 = vmatpush3.msra.mxu0 %v2435_v57 }
 0x366   :  { %2590 = vmatprep.subr.mxu0 %v2639_v22 }
 0x367   :  { %2591 = vmatpush3.msra.mxu0 %v2434_v58 }
 0x408   :  { %v2316_v61 = vpop.f32.mrf.mxu0  ;;  %v2387_v0 = vpop.f32.mrf.mxu1 }
 0x409   :  { %v2396_v62 = vrot.slane %v2316_v61, 7  ;;  %v2398_v14 = vrot.slane %v2387_v0, 7 }
 0x40a   :  { %v2318_v1 = vpop.f32.mrf.mxu0  ;;  %v2389_v63 = vpop.f32.mrf.mxu1 }
 0x40b   :  { %v2404_v3 = vadd.f32 %v2396_v62, %v5649_v7  ;;  %v2397_v4 = vrot.slane %v2318_v1, 7  ;;  %v2399_v12 = vrot.slane %v2389_v63, 7  ;;  %v2406_v16 = vadd.f32 %v2398_v14, %v5659_v24 }
 0x40d   :  { %v2408_v5 = vsub.f32 0.0, %v2404_v3  ;;  %v2405_v6 = vadd.f32 %v2397_v4, %v5651_v8  ;;  %v2407_v22 = vadd.f32 %v2399_v12, %v5661_v10 }
 0x40f   :  { %v2409_v9 = vmul.f32 1.442695, %v2408_v5  ;;  %v2413_v11 = vsub.f32 0.0, %v2405_v6  ;;  %v2419_v13 = vsub.f32 0.0, %v2407_v22 }
 0x411   :  { %2613 = vpow2.f32 %v2409_v9  ;;  %v2414_v60 = vmul.f32 1.442695, %v2413_v11  ;;  %v2420_v2 = vmul.f32 1.442695, %v2419_v13 }
 0x413   :  { %2615 = vpow2.f32 %v2414_v60 }
 0x414   :  { %2617 = vpow2.f32 %v2420_v2 }
 0x41e   :  { %v2614_v15 = vpop.eup %2613 }
 0x41f   :  { %v2411_v7 = vadd.f32 1.0, %v2614_v15 }
 0x420   :  { %v2616_v17 = vpop.eup %2615 }
 0x421   :  { %2619 = vrcp.f32 %v2411_v7  ;;  %v2416_v8 = vadd.f32 1.0, %v2616_v17  ;;  %v2618_v18 = vpop.eup %2617 }
 0x422   :  { %2621 = vtanh.f32 %v2406_v16  ;;  %v2422_v23 = vadd.f32 1.0, %v2618_v18 }
 0x423   :  { %2623 = vrcp.f32 %v2416_v8 }
 0x424   :  { %2625 = vrcp.f32 %v2422_v23 }
 0x42e   :  { %v2620_v19 = vpop.eup %2619 }
 0x42f   :  { %v2622_v20 = vpop.eup %2621 }
 0x430   :  { %v2624_v59 = vpop.eup %2623  ;;  %v2428_v25 = vmul.f32 %v2622_v20, %v2620_v19 }
 0x431   :  { %v2427_v10 = vmul.f32 %v2624_v59, %v2425_v21  ;;  %v2626_v24 = vpop.eup %2625 }
 0x433   :  { %v2429_v26 = vadd.f32 %v2428_v25, %v2427_v10 }
 0x435   :  { %2433 = vst [vmem:[%s5766_s13 - $0x1] sm:$0x2] %v2429_v26  ;;  %2627 = vtanh.f32 %v2429_v26 }
 0x442   :  { %v2628_v50 = vpop.eup %2627 }
 0x443   :  { %v2431_v27 = vmul.f32 %v2628_v50, %v2626_v24 }
 0x445   :  { %2432 = vst [vmem:[%s5762_s11] sm:$0x2] %v2431_v27  ;;  %v2452_v51 = vrot.slane %v2431_v27, 1 }
 0x447   :  { %2593 = vmatmul.mubr.f32.vlgmr.msra.gmra.mxu0 %v2452_v51 }
 0x507   :  { %v2520_v28 = vpop.f32.mrf.mxu0 }
 0x508   :  { %v2521_v29 = vadd.f32 %v2520_v28, %v2450_v53 }
 0x509   :  { %v2594_v30 = vpop.f32.mrf.mxu0 }
 0x50a   :  { %2524 = vst [vmem:[%s5768_s12] sm:$0x1] %v2521_v29 }

</bundles_post_ra>
